<compile_context>
chip_gen: v7x
topology: tpu7x:2x2x1
jax: 0.10.0
libtpu: 0.0.40
codegen_flags: <defaults>
</compile_context>

<pallas_src>
import math

import jax
import jax.numpy as jnp
from jax.experimental import pallas as pl
from jax.experimental.pallas import tpu as pltpu  # noqa: F401  (kept per template)

# ---------------- small synthetic config ----------------
B = 2          # batch
R = 4          # msa_depth (rows)
L = 8          # max_sequence_len (columns)
SEQ_DIM = 16   # config.model.seq_dim
POS_DIM = 8    # config.model.decoder_pos_emb_dim
D = 32         # config.model.decoder_msa_dim
FFN = 64       # config.model.decoder_ffn_hidden
H = 4          # config.model.decoder_num_heads
HD = D // H
DEPTH = 2      # config.model.decoder_depth
ALPHABET = 24  # config.data.alphabet_size
T = B * R * L  # flat token count, token order (b, r, c)


# ---------------- shared math helpers (plain jnp, used in-kernel & in ref) ----
def _gelu(x):
    # TODO(synk): PyTorch nn.GELU() / ESM gelu use the exact erf form; the tanh
    # approximation is used because erf lowering inside Mosaic is not guaranteed.
    c = math.sqrt(2.0 / math.pi)
    return 0.5 * x * (1.0 + jnp.tanh(c * (x + 0.044715 * x * x * x)))


def _ln(x, g, b, eps):
    mu = jnp.mean(x, axis=-1, keepdims=True)
    xc = x - mu
    var = jnp.mean(xc * xc, axis=-1, keepdims=True)
    return xc * jax.lax.rsqrt(var + eps) * g + b


def sinusoidal_pos_table(length, dim):
    pos = jnp.arange(length, dtype=jnp.float32)[:, None]
    i = jnp.arange(0, dim, 2, dtype=jnp.float32)
    div = jnp.exp(-math.log(10000.0) * i / dim)
    pe = jnp.zeros((length, dim), jnp.float32)
    pe = pe.at[:, 0::2].set(jnp.sin(pos * div))
    pe = pe.at[:, 1::2].set(jnp.cos(pos * div))
    return pe


def _column_bias():
    # additive mask selecting same-column token pairs (token n -> column n % L)
    idx = jnp.arange(R * L, dtype=jnp.int32)
    same = (idx[:, None] % L) == (idx[None, :] % L)
    return jnp.where(same, 0.0, -1e30).astype(jnp.float32)          # (RL, RL)


def _row_broadcast_selector():
    # one-hot matrix mapping token t=(b,r,c) -> source row (b*R + r)
    tid = jnp.arange(T, dtype=jnp.int32)
    src = jnp.arange(B * R, dtype=jnp.int32)
    return ((tid[:, None] // L) == src[None, :]).astype(jnp.float32)  # (T, B*R)


# ---------------- the fused decoder kernel ----------------
def _decoder_kernel(
    z_ref, perm_ref, pe_ref, sel_ref, colmask_ref,
    dzw_ref, dzb_ref,
    bng_ref, bnb_ref, ang_ref, anb_ref,
    lw_ref, lb_ref,
    r_lng_ref, r_lnb_ref, r_wqkv_ref, r_bqkv_ref, r_wo_ref, r_bo_ref,
    c_lng_ref, c_lnb_ref, c_wqkv_ref, c_bqkv_ref, c_wo_ref, c_bo_ref,
    f_lng_ref, f_lnb_ref, f_w1_ref, f_b1_ref, f_w2_ref, f_b2_ref,
    out_ref,
):
    f32 = jnp.float32

    def softmax(s):
        s = s - jnp.max(s, axis=-1, keepdims=True)
        e = jnp.exp(s)
        return e * pl.reciprocal(jnp.sum(e, axis=-1, keepdims=True), approx=True)

    # ---- init_message_matrix: decode_z(concat(z_expand, perm @ pos_emb)) ----
    # concat(z, pos) @ W  ==  z @ W[:SEQ]  +  pos @ W[SEQ:]
    wz = dzw_ref[0:SEQ_DIM, :]                                       # (SEQ, D)
    wp = dzw_ref[SEQ_DIM:SEQ_DIM + POS_DIM, :]                       # (POS, D)
    zw = jnp.dot(z_ref[...].reshape(B * L, SEQ_DIM), wz,
                 preferred_element_type=f32)                         # (B*L, D)
    pos = jnp.dot(perm_ref[...].reshape(B * R, R), pe_ref[...],
                  preferred_element_type=f32)                        # (B*R, POS)
    pw = jnp.dot(pos, wp, preferred_element_type=f32)                # (B*R, D)

    # Broadcast zw over rows (tile-aligned reshape) and pw over columns via a
    # one-hot selection matmul -> lane layout stays (tokens, D) throughout.
    z_full = jnp.broadcast_to(zw.reshape(B, 1, L, D), (B, R, L, D)).reshape(T, D)
    p_full = jnp.dot(sel_ref[...], pw, preferred_element_type=f32)   # (T, D)
    x = z_full + p_full + dzb_ref[...]                               # (T, D)

    x = _ln(x, bng_ref[...], bnb_ref[...], 1e-5)                     # before_norm

    col_bias = colmask_ref[...]                                      # (RL, RL)

    def attention(h_in, wqkv, bqkv, wo, bo, tied_rows):
        # fused QKV projection: one (T, 3D) matmul, 96-lane output
        qkv = jnp.dot(h_in, wqkv, preferred_element_type=f32) + bqkv  # (T, 3D)
        if tied_rows:
            scale = (HD ** -0.5) / math.sqrt(R)   # ESM align_scaling
        else:
            scale = HD ** -0.5
        # scale applied once to the whole Q block (single VPU multiply)
        q_all = qkv[:, 0:D] * scale
        k_all = qkv[:, D:2 * D]
        v_all = qkv[:, 2 * D:3 * D]
        if tied_rows:
            q3 = q_all.reshape(B * R, L, D)
            k3 = k_all.reshape(B * R, L, D)
            v3 = v_all.reshape(B * R, L, D)
        else:
            q3 = q_all.reshape(B, R * L, D)
            k3 = k_all.reshape(B, R * L, D)
            v3 = v_all.reshape(B, R * L, D)
        ctx_heads = []
        for h in range(H):
            q = q3[..., h * HD:(h + 1) * HD]
            k = k3[..., h * HD:(h + 1) * HD]
            v = v3[..., h * HD:(h + 1) * HD]
            if tied_rows:
                # tied-row attention: logits summed over rows, softmax over cols
                s = jnp.einsum("nid,njd->nij", q, k,
                               preferred_element_type=f32)            # (B*R, L, L)
                s = s.reshape(B, R, L, L)
                w = s[:, 0]
                for r in range(1, R):
                    w = w + s[:, r]                                   # (B, L, L)
                p = softmax(w)
                p = jnp.broadcast_to(p[:, None], (B, R, L, L)).reshape(B * R, L, L)
                ctx = jnp.einsum("nij,njd->nid", p, v,
                                 preferred_element_type=f32)          # (B*R, L, HD)
            else:
                # column attention over rows: full token x token scores masked
                # down to same-column pairs (no transposes needed)
                s = jnp.einsum("bnd,bmd->bnm", q, k,
                               preferred_element_type=f32)            # (B, RL, RL)
                p = softmax(s + col_bias)
                ctx = jnp.einsum("bnm,bmd->bnd", p, v,
                                 preferred_element_type=f32)          # (B, RL, HD)
            ctx_heads.append(ctx.reshape(T, HD))
        # single fused output projection: lane-concat heads -> one (T,D)x(D,D)
        ctx_all = jnp.concatenate(ctx_heads, axis=-1)                 # (T, D)
        return jnp.dot(ctx_all, wo, preferred_element_type=f32) + bo  # (T, D)

    # ---- axial transformer layers (NormalizedResidualBlock, dropout=identity) ----
    for l in range(DEPTH):
        h_in = _ln(x, r_lng_ref[l], r_lnb_ref[l], 1e-12)
        x = x + attention(h_in, r_wqkv_ref[l], r_bqkv_ref[l],
                          r_wo_ref[l], r_bo_ref[l], tied_rows=True)
        h_in = _ln(x, c_lng_ref[l], c_lnb_ref[l], 1e-12)
        x = x + attention(h_in, c_wqkv_ref[l], c_bqkv_ref[l],
                          c_wo_ref[l], c_bo_ref[l], tied_rows=False)
        h_in = _ln(x, f_lng_ref[l], f_lnb_ref[l], 1e-12)
        h_in = _gelu(jnp.dot(h_in, f_w1_ref[l], preferred_element_type=f32)
                     + f_b1_ref[l])
        x = x + jnp.dot(h_in, f_w2_ref[l], preferred_element_type=f32) + f_b2_ref[l]

    # ---- after_norm -> GELU -> to_logits ----
    x = _ln(x, ang_ref[...], anb_ref[...], 1e-5)
    logits = jnp.dot(_gelu(x), lw_ref[...], preferred_element_type=f32) + lb_ref[...]
    out_ref[...] = logits.reshape(B, R, L, ALPHABET)


def msa_decoder_forward(params, z, perm):
    pe = sinusoidal_pos_table(R, POS_DIM)
    sel = _row_broadcast_selector()      # hoisted invariants (constant-folded)
    colmask = _column_bias()
    args = (
        z, perm, pe, sel, colmask,
        params["decode_z_w"], params["decode_z_b"],
        params["before_g"], params["before_b"],
        params["after_g"], params["after_b"],
        params["logits_w"], params["logits_b"],
        params["row_ln_g"], params["row_ln_b"], params["row_wqkv"],
        params["row_bqkv"], params["row_wo"], params["row_bo"],
        params["col_ln_g"], params["col_ln_b"], params["col_wqkv"],
        params["col_bqkv"], params["col_wo"], params["col_bo"],
        params["ffn_ln_g"], params["ffn_ln_b"], params["ffn_w1"],
        params["ffn_b1"], params["ffn_w2"], params["ffn_b2"],
    )
    return pl.pallas_call(
        _decoder_kernel,
        out_shape=jax.ShapeDtypeStruct((B, R, L, ALPHABET), jnp.float32),
    )(*args)


# ---------------- pure-JAX reference (for a sanity check) ----------------
@jax.jit
def reference_forward(params, z, perm):
    pe = sinusoidal_pos_table(R, POS_DIM)
    pos = jnp.einsum("brs,sd->brd", perm, pe)
    x = jnp.concatenate([
        jnp.broadcast_to(z[:, None, :, :], (B, R, L, SEQ_DIM)),
        jnp.broadcast_to(pos[:, :, None, :], (B, R, L, POS_DIM)),
    ], axis=-1)
    x = x @ params["decode_z_w"] + params["decode_z_b"]
    x = _ln(x, params["before_g"], params["before_b"], 1e-5)

    def attn(h, wqkv, bqkv, wo, bo, tied):
        qkv = h @ wqkv + bqkv
        q, k, v = jnp.split(qkv, 3, axis=-1)
        q = q.reshape(B, R, L, H, HD)
        k = k.reshape(B, R, L, H, HD)
        v = v.reshape(B, R, L, H, HD)
        if tied:
            q = q * ((HD ** -0.5) / math.sqrt(R))
            w = jnp.einsum("brihd,brjhd->bhij", q, k)
            ctx = jnp.einsum("bhij,brjhd->brihd", jax.nn.softmax(w, -1), v)
        else:
            q = q * (HD ** -0.5)
            w = jnp.einsum("bichd,bjchd->bhcij", q, k)
            ctx = jnp.einsum("bhcij,bjchd->bichd", jax.nn.softmax(w, -1), v)
        return ctx.reshape(B, R, L, D) @ wo + bo

    for l in range(DEPTH):
        x = x + attn(_ln(x, params["row_ln_g"][l], params["row_ln_b"][l], 1e-12),
                     params["row_wqkv"][l], params["row_bqkv"][l],
                     params["row_wo"][l], params["row_bo"][l], True)
        x = x + attn(_ln(x, params["col_ln_g"][l], params["col_ln_b"][l], 1e-12),
                     params["col_wqkv"][l], params["col_bqkv"][l],
                     params["col_wo"][l], params["col_bo"][l], False)
        h = _ln(x, params["ffn_ln_g"][l], params["ffn_ln_b"][l], 1e-12)
        h = _gelu(h @ params["ffn_w1"][l] + params["ffn_b1"][l])
        x = x + h @ params["ffn_w2"][l] + params["ffn_b2"][l]

    x = _ln(x, params["after_g"], params["after_b"], 1e-5)
    return _gelu(x) @ params["logits_w"] + params["logits_b"]


# ---------------- deterministic parameter init ----------------
def init_params(key):
    def dense(k, din, dout):
        kw, kb = jax.random.split(k)
        return (jax.random.normal(kw, (din, dout), jnp.float32) * 0.02,
                jax.random.normal(kb, (1, dout), jnp.float32) * 0.02)

    keys = jax.random.split(key, 2 + DEPTH)
    p = {
        "before_g": jnp.ones((1, D), jnp.float32),
        "before_b": jnp.zeros((1, D), jnp.float32),
        "after_g": jnp.ones((1, D), jnp.float32),
        "after_b": jnp.zeros((1, D), jnp.float32),
    }
    p["decode_z_w"], p["decode_z_b"] = dense(keys[0], SEQ_DIM + POS_DIM, D)
    p["logits_w"], p["logits_b"] = dense(keys[1], D, ALPHABET)

    def attn_block(k):
        ks = jax.random.split(k, 4)
        wq, bq = dense(ks[0], D, D)
        wk, bk = dense(ks[1], D, D)
        wv, bv = dense(ks[2], D, D)
        wo, bo = dense(ks[3], D, D)
        # fused QKV weights: concat along the output axis
        return (jnp.concatenate([wq, wk, wv], axis=1),
                jnp.concatenate([bq, bk, bv], axis=1), wo, bo)

    row, col, ffn = [], [], []
    for l in range(DEPTH):
        lk = jax.random.split(keys[2 + l], 4)
        row.append(attn_block(lk[0]))
        col.append(attn_block(lk[1]))
        ffn.append(dense(lk[2], D, FFN) + dense(lk[3], FFN, D))

    st = lambda xs: jnp.stack(xs, axis=0)
    for name, blocks in (("row", row), ("col", col)):
        p[f"{name}_ln_g"] = jnp.ones((DEPTH, 1, D), jnp.float32)
        p[f"{name}_ln_b"] = jnp.zeros((DEPTH, 1, D), jnp.float32)
        p[f"{name}_wqkv"] = st([t[0] for t in blocks])
        p[f"{name}_bqkv"] = st([t[1] for t in blocks])
        p[f"{name}_wo"] = st([t[2] for t in blocks])
        p[f"{name}_bo"] = st([t[3] for t in blocks])
    p["ffn_ln_g"] = jnp.ones((DEPTH, 1, D), jnp.float32)
    p["ffn_ln_b"] = jnp.zeros((DEPTH, 1, D), jnp.float32)
    p["ffn_w1"] = st([t[0] for t in ffn])
    p["ffn_b1"] = st([t[1] for t in ffn])
    p["ffn_w2"] = st([t[2] for t in ffn])
    p["ffn_b2"] = st([t[3] for t in ffn])
    return p
    # NOTE: LearnedPositionalEmbedding / embed_positions is unused in forward().


# ---------------- run ----------------
if __name__ == "__main__":
    key = jax.random.PRNGKey(0)
    kp, kz, kperm = jax.random.split(key, 3)
    params = init_params(kp)

    z = jax.random.normal(kz, (B, L, SEQ_DIM), jnp.float32)
    # per-batch permutation matrices over the MSA depth
    perm = jnp.stack([
        jnp.eye(R, dtype=jnp.float32)[
            jax.random.permutation(jax.random.fold_in(kperm, i), R)]
        for i in range(B)
    ])

    out = jax.jit(msa_decoder_forward)(params, z, perm)
    out = jax.block_until_ready(out)
    assert out.shape == (B, R, L, ALPHABET), out.shape
    assert bool(jnp.all(jnp.isfinite(out)))

    ref = reference_forward(params, z, perm)
    assert float(jnp.max(jnp.abs(out - ref))) < 2e-2
    print("KERNEL_OK")
</pallas_src>

<mosaic_0001>
module attributes {stable_mosaic.version = 11 : i64} {
  func.func @_decoder_kernel(%arg0: memref<2x8x16xf32, #tpu.memory_space<vmem>>, %arg1: memref<2x4x4xf32, #tpu.memory_space<vmem>>, %arg2: memref<4x8xf32, #tpu.memory_space<vmem>>, %arg3: memref<64x8xf32, #tpu.memory_space<vmem>>, %arg4: memref<32x32xf32, #tpu.memory_space<vmem>>, %arg5: memref<24x32xf32, #tpu.memory_space<vmem>>, %arg6: memref<1x32xf32, #tpu.memory_space<vmem>>, %arg7: memref<1x32xf32, #tpu.memory_space<vmem>>, %arg8: memref<1x32xf32, #tpu.memory_space<vmem>>, %arg9: memref<1x32xf32, #tpu.memory_space<vmem>>, %arg10: memref<1x32xf32, #tpu.memory_space<vmem>>, %arg11: memref<32x24xf32, #tpu.memory_space<vmem>>, %arg12: memref<1x24xf32, #tpu.memory_space<vmem>>, %arg13: memref<2x1x32xf32, #tpu.memory_space<vmem>>, %arg14: memref<2x1x32xf32, #tpu.memory_space<vmem>>, %arg15: memref<2x32x96xf32, #tpu.memory_space<vmem>>, %arg16: memref<2x1x96xf32, #tpu.memory_space<vmem>>, %arg17: memref<2x32x32xf32, #tpu.memory_space<vmem>>, %arg18: memref<2x1x32xf32, #tpu.memory_space<vmem>>, %arg19: memref<2x1x32xf32, #tpu.memory_space<vmem>>, %arg20: memref<2x1x32xf32, #tpu.memory_space<vmem>>, %arg21: memref<2x32x96xf32, #tpu.memory_space<vmem>>, %arg22: memref<2x1x96xf32, #tpu.memory_space<vmem>>, %arg23: memref<2x32x32xf32, #tpu.memory_space<vmem>>, %arg24: memref<2x1x32xf32, #tpu.memory_space<vmem>>, %arg25: memref<2x1x32xf32, #tpu.memory_space<vmem>>, %arg26: memref<2x1x32xf32, #tpu.memory_space<vmem>>, %arg27: memref<2x32x64xf32, #tpu.memory_space<vmem>>, %arg28: memref<2x1x64xf32, #tpu.memory_space<vmem>>, %arg29: memref<2x64x32xf32, #tpu.memory_space<vmem>>, %arg30: memref<2x1x32xf32, #tpu.memory_space<vmem>>, %arg31: memref<2x4x8x24xf32, #tpu.memory_space<vmem>>) attributes {dimension_semantics = [], scalar_prefetch = 0 : i64, scratch_operands = 0 : i64, tpu.core_type = #tpu.core_type<tc>} {
    %c0 = arith.constant 0 : index
    %c0_0 = arith.constant 0 : index
    %0 = vector.load %arg5[%c0, %c0_0] : memref<24x32xf32, #tpu.memory_space<vmem>>, vector<16x32xf32>
    %c16 = arith.constant 16 : index
    %c0_1 = arith.constant 0 : index
    %1 = vector.load %arg5[%c16, %c0_1] : memref<24x32xf32, #tpu.memory_space<vmem>>, vector<8x32xf32>
    %c0_2 = arith.constant 0 : index
    %c0_3 = arith.constant 0 : index
    %c0_4 = arith.constant 0 : index
    %2 = vector.load %arg0[%c0_2, %c0_3, %c0_4] : memref<2x8x16xf32, #tpu.memory_space<vmem>>, vector<2x8x16xf32>
    %3 = vector.shape_cast %2 : vector<2x8x16xf32> to vector<16x16xf32>
    %cst = arith.constant dense<0.000000e+00> : vector<16x32xf32>
    %4 = tpu.matmul %3, %0, %cst {dimension_numbers = #tpu.dot_dimension_numbers<[1], [0], [0], [1], [0, 0, 1, 1], [], []>} : vector<16x16xf32>, vector<16x32xf32>, vector<16x32xf32> -> vector<16x32xf32>
    %c0_5 = arith.constant 0 : index
    %c0_6 = arith.constant 0 : index
    %c0_7 = arith.constant 0 : index
    %5 = vector.load %arg1[%c0_5, %c0_6, %c0_7] : memref<2x4x4xf32, #tpu.memory_space<vmem>>, vector<2x4x4xf32>
    %6 = vector.shape_cast %5 : vector<2x4x4xf32> to vector<8x4xf32>
    %c0_8 = arith.constant 0 : index
    %c0_9 = arith.constant 0 : index
    %7 = vector.load %arg2[%c0_8, %c0_9] : memref<4x8xf32, #tpu.memory_space<vmem>>, vector<4x8xf32>
    %cst_10 = arith.constant dense<0.000000e+00> : vector<8x8xf32>
    %8 = tpu.matmul %6, %7, %cst_10 {dimension_numbers = #tpu.dot_dimension_numbers<[1], [0], [0], [1], [0, 0, 1, 1], [], []>} : vector<8x4xf32>, vector<4x8xf32>, vector<8x8xf32> -> vector<8x8xf32>
    %cst_11 = arith.constant dense<0.000000e+00> : vector<8x32xf32>
    %9 = tpu.matmul %8, %1, %cst_11 {dimension_numbers = #tpu.dot_dimension_numbers<[1], [0], [0], [1], [0, 0, 1, 1], [], []>} : vector<8x8xf32>, vector<8x32xf32>, vector<8x32xf32> -> vector<8x32xf32>
    %10 = vector.shape_cast %4 : vector<16x32xf32> to vector<2x1x8x32xf32>
    %11 = vector.shape_cast %10 : vector<2x1x8x32xf32> to vector<2x1x8x32xf32>
    %12 = vector.broadcast %11 : vector<2x1x8x32xf32> to vector<2x4x8x32xf32>
    %13 = vector.shape_cast %12 : vector<2x4x8x32xf32> to vector<64x32xf32>
    %c0_12 = arith.constant 0 : index
    %c0_13 = arith.constant 0 : index
    %14 = vector.load %arg3[%c0_12, %c0_13] : memref<64x8xf32, #tpu.memory_space<vmem>>, vector<64x8xf32>
    %cst_14 = arith.constant dense<0.000000e+00> : vector<64x32xf32>
    %15 = tpu.matmul %14, %9, %cst_14 {dimension_numbers = #tpu.dot_dimension_numbers<[1], [0], [0], [1], [0, 0, 1, 1], [], []>} : vector<64x8xf32>, vector<8x32xf32>, vector<64x32xf32> -> vector<64x32xf32>
    %16 = arith.addf %13, %15 : vector<64x32xf32>
    %c0_15 = arith.constant 0 : index
    %c0_16 = arith.constant 0 : index
    %17 = vector.load %arg6[%c0_15, %c0_16] : memref<1x32xf32, #tpu.memory_space<vmem>>, vector<1x32xf32>
    %18 = vector.broadcast %17 : vector<1x32xf32> to vector<64x32xf32>
    %19 = arith.addf %16, %18 : vector<64x32xf32>
    %c0_17 = arith.constant 0 : index
    %c0_18 = arith.constant 0 : index
    %20 = vector.load %arg7[%c0_17, %c0_18] : memref<1x32xf32, #tpu.memory_space<vmem>>, vector<1x32xf32>
    %c0_19 = arith.constant 0 : index
    %c0_20 = arith.constant 0 : index
    %21 = vector.load %arg8[%c0_19, %c0_20] : memref<1x32xf32, #tpu.memory_space<vmem>>, vector<1x32xf32>
    %cst_21 = arith.constant dense<0.000000e+00> : vector<64xf32>
    %22 = vector.multi_reduction <add>, %19, %cst_21 [1] : vector<64x32xf32> to vector<64xf32>
    %23 = vector.shape_cast %22 : vector<64xf32> to vector<64x1xf32>
    %cst_22 = arith.constant 3.200000e+01 : f32
    %24 = vector.broadcast %cst_22 : f32 to vector<64x1xf32>
    %25 = arith.divf %23, %24 : vector<64x1xf32>
    %26 = vector.broadcast %25 : vector<64x1xf32> to vector<64x32xf32>
    %27 = arith.subf %19, %26 : vector<64x32xf32>
    %28 = arith.mulf %27, %27 : vector<64x32xf32>
    %cst_23 = arith.constant dense<0.000000e+00> : vector<64xf32>
    %29 = vector.multi_reduction <add>, %28, %cst_23 [1] : vector<64x32xf32> to vector<64xf32>
    %30 = vector.shape_cast %29 : vector<64xf32> to vector<64x1xf32>
    %cst_24 = arith.constant 3.200000e+01 : f32
    %31 = vector.broadcast %cst_24 : f32 to vector<64x1xf32>
    %32 = arith.divf %30, %31 : vector<64x1xf32>
    %cst_25 = arith.constant 9.99999974E-6 : f32
    %33 = vector.broadcast %cst_25 : f32 to vector<64x1xf32>
    %34 = arith.addf %32, %33 : vector<64x1xf32>
    %35 = math.rsqrt %34 : vector<64x1xf32>
    %36 = vector.broadcast %35 : vector<64x1xf32> to vector<64x32xf32>
    %37 = arith.mulf %27, %36 : vector<64x32xf32>
    %38 = vector.broadcast %20 : vector<1x32xf32> to vector<64x32xf32>
    %39 = arith.mulf %37, %38 : vector<64x32xf32>
    %40 = vector.broadcast %21 : vector<1x32xf32> to vector<64x32xf32>
    %41 = arith.addf %39, %40 : vector<64x32xf32>
    %c0_26 = arith.constant 0 : index
    %c0_27 = arith.constant 0 : index
    %42 = vector.load %arg4[%c0_26, %c0_27] : memref<32x32xf32, #tpu.memory_space<vmem>>, vector<32x32xf32>
    %c0_28 = arith.constant 0 : index
    %c0_29 = arith.constant 0 : index
    %c0_30 = arith.constant 0 : index
    %43 = vector.load %arg13[%c0_28, %c0_29, %c0_30] : memref<2x1x32xf32, #tpu.memory_space<vmem>>, vector<1x1x32xf32>
    %44 = vector.shape_cast %43 : vector<1x1x32xf32> to vector<1x32xf32>
    %c0_31 = arith.constant 0 : index
    %c0_32 = arith.constant 0 : index
    %c0_33 = arith.constant 0 : index
    %45 = vector.load %arg14[%c0_31, %c0_32, %c0_33] : memref<2x1x32xf32, #tpu.memory_space<vmem>>, vector<1x1x32xf32>
    %46 = vector.shape_cast %45 : vector<1x1x32xf32> to vector<1x32xf32>
    %cst_34 = arith.constant dense<0.000000e+00> : vector<64xf32>
    %47 = vector.multi_reduction <add>, %41, %cst_34 [1] : vector<64x32xf32> to vector<64xf32>
    %48 = vector.shape_cast %47 : vector<64xf32> to vector<64x1xf32>
    %cst_35 = arith.constant 3.200000e+01 : f32
    %49 = vector.broadcast %cst_35 : f32 to vector<64x1xf32>
    %50 = arith.divf %48, %49 : vector<64x1xf32>
    %51 = vector.broadcast %50 : vector<64x1xf32> to vector<64x32xf32>
    %52 = arith.subf %41, %51 : vector<64x32xf32>
    %53 = arith.mulf %52, %52 : vector<64x32xf32>
    %cst_36 = arith.constant dense<0.000000e+00> : vector<64xf32>
    %54 = vector.multi_reduction <add>, %53, %cst_36 [1] : vector<64x32xf32> to vector<64xf32>
    %55 = vector.shape_cast %54 : vector<64xf32> to vector<64x1xf32>
    %cst_37 = arith.constant 3.200000e+01 : f32
    %56 = vector.broadcast %cst_37 : f32 to vector<64x1xf32>
    %57 = arith.divf %55, %56 : vector<64x1xf32>
    %cst_38 = arith.constant 9.99999996E-13 : f32
    %58 = vector.broadcast %cst_38 : f32 to vector<64x1xf32>
    %59 = arith.addf %57, %58 : vector<64x1xf32>
    %60 = math.rsqrt %59 : vector<64x1xf32>
    %61 = vector.broadcast %60 : vector<64x1xf32> to vector<64x32xf32>
    %62 = arith.mulf %52, %61 : vector<64x32xf32>
    %63 = vector.broadcast %44 : vector<1x32xf32> to vector<64x32xf32>
    %64 = arith.mulf %62, %63 : vector<64x32xf32>
    %65 = vector.broadcast %46 : vector<1x32xf32> to vector<64x32xf32>
    %66 = arith.addf %64, %65 : vector<64x32xf32>
    %c0_39 = arith.constant 0 : index
    %c0_40 = arith.constant 0 : index
    %c0_41 = arith.constant 0 : index
    %67 = vector.load %arg15[%c0_39, %c0_40, %c0_41] : memref<2x32x96xf32, #tpu.memory_space<vmem>>, vector<1x32x96xf32>
    %68 = vector.shape_cast %67 : vector<1x32x96xf32> to vector<32x96xf32>
    %c0_42 = arith.constant 0 : index
    %c0_43 = arith.constant 0 : index
    %c0_44 = arith.constant 0 : index
    %69 = vector.load %arg16[%c0_42, %c0_43, %c0_44] : memref<2x1x96xf32, #tpu.memory_space<vmem>>, vector<1x1x96xf32>
    %70 = vector.shape_cast %69 : vector<1x1x96xf32> to vector<1x96xf32>
    %c0_45 = arith.constant 0 : index
    %c0_46 = arith.constant 0 : index
    %c0_47 = arith.constant 0 : index
    %71 = vector.load %arg17[%c0_45, %c0_46, %c0_47] : memref<2x32x32xf32, #tpu.memory_space<vmem>>, vector<1x32x32xf32>
    %72 = vector.shape_cast %71 : vector<1x32x32xf32> to vector<32x32xf32>
    %c0_48 = arith.constant 0 : index
    %c0_49 = arith.constant 0 : index
    %c0_50 = arith.constant 0 : index
    %73 = vector.load %arg18[%c0_48, %c0_49, %c0_50] : memref<2x1x32xf32, #tpu.memory_space<vmem>>, vector<1x1x32xf32>
    %74 = vector.shape_cast %73 : vector<1x1x32xf32> to vector<1x32xf32>
    %cst_51 = arith.constant dense<0.000000e+00> : vector<64x96xf32>
    %75 = tpu.matmul %66, %68, %cst_51 {dimension_numbers = #tpu.dot_dimension_numbers<[1], [0], [0], [1], [0, 0, 1, 1], [], []>} : vector<64x32xf32>, vector<32x96xf32>, vector<64x96xf32> -> vector<64x96xf32>
    %76 = vector.broadcast %70 : vector<1x96xf32> to vector<64x96xf32>
    %77 = arith.addf %75, %76 : vector<64x96xf32>
    %78 = vector.extract_strided_slice %77 {offsets = [0, 0], sizes = [64, 32], strides = [1, 1]} : vector<64x96xf32> to vector<64x32xf32>
    %cst_52 = arith.constant 0.176776692 : f32
    %79 = vector.broadcast %cst_52 : f32 to vector<64x32xf32>
    %80 = arith.mulf %78, %79 : vector<64x32xf32>
    %81 = vector.extract_strided_slice %77 {offsets = [0, 32], sizes = [64, 32], strides = [1, 1]} : vector<64x96xf32> to vector<64x32xf32>
    %82 = vector.extract_strided_slice %77 {offsets = [0, 64], sizes = [64, 32], strides = [1, 1]} : vector<64x96xf32> to vector<64x32xf32>
    %83 = vector.shape_cast %80 : vector<64x32xf32> to vector<8x8x32xf32>
    %84 = vector.shape_cast %81 : vector<64x32xf32> to vector<8x8x32xf32>
    %85 = vector.shape_cast %82 : vector<64x32xf32> to vector<8x8x32xf32>
    %86 = vector.extract_strided_slice %83 {offsets = [0, 0, 0], sizes = [8, 8, 8], strides = [1, 1, 1]} : vector<8x8x32xf32> to vector<8x8x8xf32>
    %87 = vector.extract_strided_slice %84 {offsets = [0, 0, 0], sizes = [8, 8, 8], strides = [1, 1, 1]} : vector<8x8x32xf32> to vector<8x8x8xf32>
    %88 = vector.extract_strided_slice %85 {offsets = [0, 0, 0], sizes = [8, 8, 8], strides = [1, 1, 1]} : vector<8x8x32xf32> to vector<8x8x8xf32>
    "tpu.trace_start"() <{level = 10 : i32, message = "nid,njd->nij"}> : () -> ()
    %cst_53 = arith.constant dense<0.000000e+00> : vector<8x8x8xf32>
    %89 = tpu.matmul %86, %87, %cst_53 {dimension_numbers = #tpu.dot_dimension_numbers<[2], [2], [1], [1], [0, 0, 0, 1, 1, 1], [0], [0]>} : vector<8x8x8xf32>, vector<8x8x8xf32>, vector<8x8x8xf32> -> vector<8x8x8xf32>
    "tpu.trace_stop"() : () -> ()
    %90 = vector.shape_cast %89 : vector<8x8x8xf32> to vector<2x4x8x8xf32>
    %91 = vector.extract_strided_slice %90 {offsets = [0, 0, 0, 0], sizes = [2, 1, 8, 8], strides = [1, 1, 1, 1]} : vector<2x4x8x8xf32> to vector<2x1x8x8xf32>
    %92 = vector.shape_cast %91 : vector<2x1x8x8xf32> to vector<2x8x8xf32>
    %93 = vector.extract_strided_slice %90 {offsets = [0, 1, 0, 0], sizes = [2, 1, 8, 8], strides = [1, 1, 1, 1]} : vector<2x4x8x8xf32> to vector<2x1x8x8xf32>
    %94 = vector.shape_cast %93 : vector<2x1x8x8xf32> to vector<2x8x8xf32>
    %95 = arith.addf %92, %94 : vector<2x8x8xf32>
    %96 = vector.extract_strided_slice %90 {offsets = [0, 2, 0, 0], sizes = [2, 1, 8, 8], strides = [1, 1, 1, 1]} : vector<2x4x8x8xf32> to vector<2x1x8x8xf32>
    %97 = vector.shape_cast %96 : vector<2x1x8x8xf32> to vector<2x8x8xf32>
    %98 = arith.addf %95, %97 : vector<2x8x8xf32>
    %99 = vector.extract_strided_slice %90 {offsets = [0, 3, 0, 0], sizes = [2, 1, 8, 8], strides = [1, 1, 1, 1]} : vector<2x4x8x8xf32> to vector<2x1x8x8xf32>
    %100 = vector.shape_cast %99 : vector<2x1x8x8xf32> to vector<2x8x8xf32>
    %101 = arith.addf %98, %100 : vector<2x8x8xf32>
    %cst_54 = arith.constant dense<0xFF800000> : vector<2x8xf32>
    %102 = vector.multi_reduction <maximumf>, %101, %cst_54 [2] : vector<2x8x8xf32> to vector<2x8xf32>
    %103 = vector.shape_cast %102 : vector<2x8xf32> to vector<2x8x1xf32>
    %104 = vector.broadcast %103 : vector<2x8x1xf32> to vector<2x8x8xf32>
    %105 = arith.subf %101, %104 : vector<2x8x8xf32>
    %106 = math.exp %105 : vector<2x8x8xf32>
    %cst_55 = arith.constant dense<0.000000e+00> : vector<2x8xf32>
    %107 = vector.multi_reduction <add>, %106, %cst_55 [2] : vector<2x8x8xf32> to vector<2x8xf32>
    %108 = vector.shape_cast %107 : vector<2x8xf32> to vector<2x8x1xf32>
    %109 = tpu.reciprocal %108 {approx = true} : vector<2x8x1xf32> -> vector<2x8x1xf32>
    %110 = vector.broadcast %109 : vector<2x8x1xf32> to vector<2x8x8xf32>
    %111 = arith.mulf %106, %110 : vector<2x8x8xf32>
    %112 = vector.shape_cast %111 : vector<2x8x8xf32> to vector<2x1x8x8xf32>
    %113 = vector.shape_cast %112 : vector<2x1x8x8xf32> to vector<2x1x8x8xf32>
    %114 = vector.broadcast %113 : vector<2x1x8x8xf32> to vector<2x4x8x8xf32>
    %115 = vector.shape_cast %114 : vector<2x4x8x8xf32> to vector<8x8x8xf32>
    "tpu.trace_start"() <{level = 10 : i32, message = "nij,njd->nid"}> : () -> ()
    %cst_56 = arith.constant dense<0.000000e+00> : vector<8x8x8xf32>
    %116 = tpu.matmul %115, %88, %cst_56 {dimension_numbers = #tpu.dot_dimension_numbers<[2], [1], [1], [2], [0, 0, 0, 1, 1, 2], [0], [0]>} : vector<8x8x8xf32>, vector<8x8x8xf32>, vector<8x8x8xf32> -> vector<8x8x8xf32>
    "tpu.trace_stop"() : () -> ()
    %117 = vector.shape_cast %116 : vector<8x8x8xf32> to vector<64x8xf32>
    %118 = vector.extract_strided_slice %83 {offsets = [0, 0, 8], sizes = [8, 8, 8], strides = [1, 1, 1]} : vector<8x8x32xf32> to vector<8x8x8xf32>
    %119 = vector.extract_strided_slice %84 {offsets = [0, 0, 8], sizes = [8, 8, 8], strides = [1, 1, 1]} : vector<8x8x32xf32> to vector<8x8x8xf32>
    %120 = vector.extract_strided_slice %85 {offsets = [0, 0, 8], sizes = [8, 8, 8], strides = [1, 1, 1]} : vector<8x8x32xf32> to vector<8x8x8xf32>
    "tpu.trace_start"() <{level = 10 : i32, message = "nid,njd->nij"}> : () -> ()
    %cst_57 = arith.constant dense<0.000000e+00> : vector<8x8x8xf32>
    %121 = tpu.matmul %118, %119, %cst_57 {dimension_numbers = #tpu.dot_dimension_numbers<[2], [2], [1], [1], [0, 0, 0, 1, 1, 1], [0], [0]>} : vector<8x8x8xf32>, vector<8x8x8xf32>, vector<8x8x8xf32> -> vector<8x8x8xf32>
    "tpu.trace_stop"() : () -> ()
    %122 = vector.shape_cast %121 : vector<8x8x8xf32> to vector<2x4x8x8xf32>
    %123 = vector.extract_strided_slice %122 {offsets = [0, 0, 0, 0], sizes = [2, 1, 8, 8], strides = [1, 1, 1, 1]} : vector<2x4x8x8xf32> to vector<2x1x8x8xf32>
    %124 = vector.shape_cast %123 : vector<2x1x8x8xf32> to vector<2x8x8xf32>
    %125 = vector.extract_strided_slice %122 {offsets = [0, 1, 0, 0], sizes = [2, 1, 8, 8], strides = [1, 1, 1, 1]} : vector<2x4x8x8xf32> to vector<2x1x8x8xf32>
    %126 = vector.shape_cast %125 : vector<2x1x8x8xf32> to vector<2x8x8xf32>
    %127 = arith.addf %124, %126 : vector<2x8x8xf32>
    %128 = vector.extract_strided_slice %122 {offsets = [0, 2, 0, 0], sizes = [2, 1, 8, 8], strides = [1, 1, 1, 1]} : vector<2x4x8x8xf32> to vector<2x1x8x8xf32>
    %129 = vector.shape_cast %128 : vector<2x1x8x8xf32> to vector<2x8x8xf32>
    %130 = arith.addf %127, %129 : vector<2x8x8xf32>
    %131 = vector.extract_strided_slice %122 {offsets = [0, 3, 0, 0], sizes = [2, 1, 8, 8], strides = [1, 1, 1, 1]} : vector<2x4x8x8xf32> to vector<2x1x8x8xf32>
    %132 = vector.shape_cast %131 : vector<2x1x8x8xf32> to vector<2x8x8xf32>
    %133 = arith.addf %130, %132 : vector<2x8x8xf32>
    %cst_58 = arith.constant dense<0xFF800000> : vector<2x8xf32>
    %134 = vector.multi_reduction <maximumf>, %133, %cst_58 [2] : vector<2x8x8xf32> to vector<2x8xf32>
    %135 = vector.shape_cast %134 : vector<2x8xf32> to vector<2x8x1xf32>
    %136 = vector.broadcast %135 : vector<2x8x1xf32> to vector<2x8x8xf32>
    %137 = arith.subf %133, %136 : vector<2x8x8xf32>
    %138 = math.exp %137 : vector<2x8x8xf32>
    %cst_59 = arith.constant dense<0.000000e+00> : vector<2x8xf32>
    %139 = vector.multi_reduction <add>, %138, %cst_59 [2] : vector<2x8x8xf32> to vector<2x8xf32>
    %140 = vector.shape_cast %139 : vector<2x8xf32> to vector<2x8x1xf32>
    %141 = tpu.reciprocal %140 {approx = true} : vector<2x8x1xf32> -> vector<2x8x1xf32>
    %142 = vector.broadcast %141 : vector<2x8x1xf32> to vector<2x8x8xf32>
    %143 = arith.mulf %138, %142 : vector<2x8x8xf32>
    %144 = vector.shape_cast %143 : vector<2x8x8xf32> to vector<2x1x8x8xf32>
    %145 = vector.shape_cast %144 : vector<2x1x8x8xf32> to vector<2x1x8x8xf32>
    %146 = vector.broadcast %145 : vector<2x1x8x8xf32> to vector<2x4x8x8xf32>
    %147 = vector.shape_cast %146 : vector<2x4x8x8xf32> to vector<8x8x8xf32>
    "tpu.trace_start"() <{level = 10 : i32, message = "nij,njd->nid"}> : () -> ()
    %cst_60 = arith.constant dense<0.000000e+00> : vector<8x8x8xf32>
    %148 = tpu.matmul %147, %120, %cst_60 {dimension_numbers = #tpu.dot_dimension_numbers<[2], [1], [1], [2], [0, 0, 0, 1, 1, 2], [0], [0]>} : vector<8x8x8xf32>, vector<8x8x8xf32>, vector<8x8x8xf32> -> vector<8x8x8xf32>
    "tpu.trace_stop"() : () -> ()
    %149 = vector.shape_cast %148 : vector<8x8x8xf32> to vector<64x8xf32>
    %150 = vector.extract_strided_slice %83 {offsets = [0, 0, 16], sizes = [8, 8, 8], strides = [1, 1, 1]} : vector<8x8x32xf32> to vector<8x8x8xf32>
    %151 = vector.extract_strided_slice %84 {offsets = [0, 0, 16], sizes = [8, 8, 8], strides = [1, 1, 1]} : vector<8x8x32xf32> to vector<8x8x8xf32>
    %152 = vector.extract_strided_slice %85 {offsets = [0, 0, 16], sizes = [8, 8, 8], strides = [1, 1, 1]} : vector<8x8x32xf32> to vector<8x8x8xf32>
    "tpu.trace_start"() <{level = 10 : i32, message = "nid,njd->nij"}> : () -> ()
    %cst_61 = arith.constant dense<0.000000e+00> : vector<8x8x8xf32>
    %153 = tpu.matmul %150, %151, %cst_61 {dimension_numbers = #tpu.dot_dimension_numbers<[2], [2], [1], [1], [0, 0, 0, 1, 1, 1], [0], [0]>} : vector<8x8x8xf32>, vector<8x8x8xf32>, vector<8x8x8xf32> -> vector<8x8x8xf32>
    "tpu.trace_stop"() : () -> ()
    %154 = vector.shape_cast %153 : vector<8x8x8xf32> to vector<2x4x8x8xf32>
    %155 = vector.extract_strided_slice %154 {offsets = [0, 0, 0, 0], sizes = [2, 1, 8, 8], strides = [1, 1, 1, 1]} : vector<2x4x8x8xf32> to vector<2x1x8x8xf32>
    %156 = vector.shape_cast %155 : vector<2x1x8x8xf32> to vector<2x8x8xf32>
    %157 = vector.extract_strided_slice %154 {offsets = [0, 1, 0, 0], sizes = [2, 1, 8, 8], strides = [1, 1, 1, 1]} : vector<2x4x8x8xf32> to vector<2x1x8x8xf32>
    %158 = vector.shape_cast %157 : vector<2x1x8x8xf32> to vector<2x8x8xf32>
    %159 = arith.addf %156, %158 : vector<2x8x8xf32>
    %160 = vector.extract_strided_slice %154 {offsets = [0, 2, 0, 0], sizes = [2, 1, 8, 8], strides = [1, 1, 1, 1]} : vector<2x4x8x8xf32> to vector<2x1x8x8xf32>
    %161 = vector.shape_cast %160 : vector<2x1x8x8xf32> to vector<2x8x8xf32>
    %162 = arith.addf %159, %161 : vector<2x8x8xf32>
    %163 = vector.extract_strided_slice %154 {offsets = [0, 3, 0, 0], sizes = [2, 1, 8, 8], strides = [1, 1, 1, 1]} : vector<2x4x8x8xf32> to vector<2x1x8x8xf32>
    %164 = vector.shape_cast %163 : vector<2x1x8x8xf32> to vector<2x8x8xf32>
    %165 = arith.addf %162, %164 : vector<2x8x8xf32>
    %cst_62 = arith.constant dense<0xFF800000> : vector<2x8xf32>
    %166 = vector.multi_reduction <maximumf>, %165, %cst_62 [2] : vector<2x8x8xf32> to vector<2x8xf32>
    %167 = vector.shape_cast %166 : vector<2x8xf32> to vector<2x8x1xf32>
    %168 = vector.broadcast %167 : vector<2x8x1xf32> to vector<2x8x8xf32>
    %169 = arith.subf %165, %168 : vector<2x8x8xf32>
    %170 = math.exp %169 : vector<2x8x8xf32>
    %cst_63 = arith.constant dense<0.000000e+00> : vector<2x8xf32>
    %171 = vector.multi_reduction <add>, %170, %cst_63 [2] : vector<2x8x8xf32> to vector<2x8xf32>
    %172 = vector.shape_cast %171 : vector<2x8xf32> to vector<2x8x1xf32>
    %173 = tpu.reciprocal %172 {approx = true} : vector<2x8x1xf32> -> vector<2x8x1xf32>
    %174 = vector.broadcast %173 : vector<2x8x1xf32> to vector<2x8x8xf32>
    %175 = arith.mulf %170, %174 : vector<2x8x8xf32>
    %176 = vector.shape_cast %175 : vector<2x8x8xf32> to vector<2x1x8x8xf32>
    %177 = vector.shape_cast %176 : vector<2x1x8x8xf32> to vector<2x1x8x8xf32>
    %178 = vector.broadcast %177 : vector<2x1x8x8xf32> to vector<2x4x8x8xf32>
    %179 = vector.shape_cast %178 : vector<2x4x8x8xf32> to vector<8x8x8xf32>
    "tpu.trace_start"() <{level = 10 : i32, message = "nij,njd->nid"}> : () -> ()
    %cst_64 = arith.constant dense<0.000000e+00> : vector<8x8x8xf32>
    %180 = tpu.matmul %179, %152, %cst_64 {dimension_numbers = #tpu.dot_dimension_numbers<[2], [1], [1], [2], [0, 0, 0, 1, 1, 2], [0], [0]>} : vector<8x8x8xf32>, vector<8x8x8xf32>, vector<8x8x8xf32> -> vector<8x8x8xf32>
    "tpu.trace_stop"() : () -> ()
    %181 = vector.shape_cast %180 : vector<8x8x8xf32> to vector<64x8xf32>
    %182 = vector.extract_strided_slice %83 {offsets = [0, 0, 24], sizes = [8, 8, 8], strides = [1, 1, 1]} : vector<8x8x32xf32> to vector<8x8x8xf32>
    %183 = vector.extract_strided_slice %84 {offsets = [0, 0, 24], sizes = [8, 8, 8], strides = [1, 1, 1]} : vector<8x8x32xf32> to vector<8x8x8xf32>
    %184 = vector.extract_strided_slice %85 {offsets = [0, 0, 24], sizes = [8, 8, 8], strides = [1, 1, 1]} : vector<8x8x32xf32> to vector<8x8x8xf32>
    "tpu.trace_start"() <{level = 10 : i32, message = "nid,njd->nij"}> : () -> ()
    %cst_65 = arith.constant dense<0.000000e+00> : vector<8x8x8xf32>
    %185 = tpu.matmul %182, %183, %cst_65 {dimension_numbers = #tpu.dot_dimension_numbers<[2], [2], [1], [1], [0, 0, 0, 1, 1, 1], [0], [0]>} : vector<8x8x8xf32>, vector<8x8x8xf32>, vector<8x8x8xf32> -> vector<8x8x8xf32>
    "tpu.trace_stop"() : () -> ()
    %186 = vector.shape_cast %185 : vector<8x8x8xf32> to vector<2x4x8x8xf32>
    %187 = vector.extract_strided_slice %186 {offsets = [0, 0, 0, 0], sizes = [2, 1, 8, 8], strides = [1, 1, 1, 1]} : vector<2x4x8x8xf32> to vector<2x1x8x8xf32>
    %188 = vector.shape_cast %187 : vector<2x1x8x8xf32> to vector<2x8x8xf32>
    %189 = vector.extract_strided_slice %186 {offsets = [0, 1, 0, 0], sizes = [2, 1, 8, 8], strides = [1, 1, 1, 1]} : vector<2x4x8x8xf32> to vector<2x1x8x8xf32>
    %190 = vector.shape_cast %189 : vector<2x1x8x8xf32> to vector<2x8x8xf32>
    %191 = arith.addf %188, %190 : vector<2x8x8xf32>
    %192 = vector.extract_strided_slice %186 {offsets = [0, 2, 0, 0], sizes = [2, 1, 8, 8], strides = [1, 1, 1, 1]} : vector<2x4x8x8xf32> to vector<2x1x8x8xf32>
    %193 = vector.shape_cast %192 : vector<2x1x8x8xf32> to vector<2x8x8xf32>
    %194 = arith.addf %191, %193 : vector<2x8x8xf32>
    %195 = vector.extract_strided_slice %186 {offsets = [0, 3, 0, 0], sizes = [2, 1, 8, 8], strides = [1, 1, 1, 1]} : vector<2x4x8x8xf32> to vector<2x1x8x8xf32>
    %196 = vector.shape_cast %195 : vector<2x1x8x8xf32> to vector<2x8x8xf32>
    %197 = arith.addf %194, %196 : vector<2x8x8xf32>
    %cst_66 = arith.constant dense<0xFF800000> : vector<2x8xf32>
    %198 = vector.multi_reduction <maximumf>, %197, %cst_66 [2] : vector<2x8x8xf32> to vector<2x8xf32>
    %199 = vector.shape_cast %198 : vector<2x8xf32> to vector<2x8x1xf32>
    %200 = vector.broadcast %199 : vector<2x8x1xf32> to vector<2x8x8xf32>
    %201 = arith.subf %197, %200 : vector<2x8x8xf32>
    %202 = math.exp %201 : vector<2x8x8xf32>
    %cst_67 = arith.constant dense<0.000000e+00> : vector<2x8xf32>
    %203 = vector.multi_reduction <add>, %202, %cst_67 [2] : vector<2x8x8xf32> to vector<2x8xf32>
    %204 = vector.shape_cast %203 : vector<2x8xf32> to vector<2x8x1xf32>
    %205 = tpu.reciprocal %204 {approx = true} : vector<2x8x1xf32> -> vector<2x8x1xf32>
    %206 = vector.broadcast %205 : vector<2x8x1xf32> to vector<2x8x8xf32>
    %207 = arith.mulf %202, %206 : vector<2x8x8xf32>
    %208 = vector.shape_cast %207 : vector<2x8x8xf32> to vector<2x1x8x8xf32>
    %209 = vector.shape_cast %208 : vector<2x1x8x8xf32> to vector<2x1x8x8xf32>
    %210 = vector.broadcast %209 : vector<2x1x8x8xf32> to vector<2x4x8x8xf32>
    %211 = vector.shape_cast %210 : vector<2x4x8x8xf32> to vector<8x8x8xf32>
    "tpu.trace_start"() <{level = 10 : i32, message = "nij,njd->nid"}> : () -> ()
    %cst_68 = arith.constant dense<0.000000e+00> : vector<8x8x8xf32>
    %212 = tpu.matmul %211, %184, %cst_68 {dimension_numbers = #tpu.dot_dimension_numbers<[2], [1], [1], [2], [0, 0, 0, 1, 1, 2], [0], [0]>} : vector<8x8x8xf32>, vector<8x8x8xf32>, vector<8x8x8xf32> -> vector<8x8x8xf32>
    "tpu.trace_stop"() : () -> ()
    %213 = vector.shape_cast %212 : vector<8x8x8xf32> to vector<64x8xf32>
    %214 = tpu.concatenate %117, %149, %181, %213 in 1 : vector<64x8xf32>, vector<64x8xf32>, vector<64x8xf32>, vector<64x8xf32> -> vector<64x32xf32>
    %cst_69 = arith.constant dense<0.000000e+00> : vector<64x32xf32>
    %215 = tpu.matmul %214, %72, %cst_69 {dimension_numbers = #tpu.dot_dimension_numbers<[1], [0], [0], [1], [0, 0, 1, 1], [], []>} : vector<64x32xf32>, vector<32x32xf32>, vector<64x32xf32> -> vector<64x32xf32>
    %216 = vector.broadcast %74 : vector<1x32xf32> to vector<64x32xf32>
    %217 = arith.addf %215, %216 : vector<64x32xf32>
    %218 = arith.addf %41, %217 : vector<64x32xf32>
    %c0_70 = arith.constant 0 : index
    %c0_71 = arith.constant 0 : index
    %c0_72 = arith.constant 0 : index
    %219 = vector.load %arg19[%c0_70, %c0_71, %c0_72] : memref<2x1x32xf32, #tpu.memory_space<vmem>>, vector<1x1x32xf32>
    %220 = vector.shape_cast %219 : vector<1x1x32xf32> to vector<1x32xf32>
    %c0_73 = arith.constant 0 : index
    %c0_74 = arith.constant 0 : index
    %c0_75 = arith.constant 0 : index
    %221 = vector.load %arg20[%c0_73, %c0_74, %c0_75] : memref<2x1x32xf32, #tpu.memory_space<vmem>>, vector<1x1x32xf32>
    %222 = vector.shape_cast %221 : vector<1x1x32xf32> to vector<1x32xf32>
    %cst_76 = arith.constant dense<0.000000e+00> : vector<64xf32>
    %223 = vector.multi_reduction <add>, %218, %cst_76 [1] : vector<64x32xf32> to vector<64xf32>
    %224 = vector.shape_cast %223 : vector<64xf32> to vector<64x1xf32>
    %cst_77 = arith.constant 3.200000e+01 : f32
    %225 = vector.broadcast %cst_77 : f32 to vector<64x1xf32>
    %226 = arith.divf %224, %225 : vector<64x1xf32>
    %227 = vector.broadcast %226 : vector<64x1xf32> to vector<64x32xf32>
    %228 = arith.subf %218, %227 : vector<64x32xf32>
    %229 = arith.mulf %228, %228 : vector<64x32xf32>
    %cst_78 = arith.constant dense<0.000000e+00> : vector<64xf32>
    %230 = vector.multi_reduction <add>, %229, %cst_78 [1] : vector<64x32xf32> to vector<64xf32>
    %231 = vector.shape_cast %230 : vector<64xf32> to vector<64x1xf32>
    %cst_79 = arith.constant 3.200000e+01 : f32
    %232 = vector.broadcast %cst_79 : f32 to vector<64x1xf32>
    %233 = arith.divf %231, %232 : vector<64x1xf32>
    %cst_80 = arith.constant 9.99999996E-13 : f32
    %234 = vector.broadcast %cst_80 : f32 to vector<64x1xf32>
    %235 = arith.addf %233, %234 : vector<64x1xf32>
    %236 = math.rsqrt %235 : vector<64x1xf32>
    %237 = vector.broadcast %236 : vector<64x1xf32> to vector<64x32xf32>
    %238 = arith.mulf %228, %237 : vector<64x32xf32>
    %239 = vector.broadcast %220 : vector<1x32xf32> to vector<64x32xf32>
    %240 = arith.mulf %238, %239 : vector<64x32xf32>
    %241 = vector.broadcast %222 : vector<1x32xf32> to vector<64x32xf32>
    %242 = arith.addf %240, %241 : vector<64x32xf32>
    %c0_81 = arith.constant 0 : index
    %c0_82 = arith.constant 0 : index
    %c0_83 = arith.constant 0 : index
    %243 = vector.load %arg21[%c0_81, %c0_82, %c0_83] : memref<2x32x96xf32, #tpu.memory_space<vmem>>, vector<1x32x96xf32>
    %244 = vector.shape_cast %243 : vector<1x32x96xf32> to vector<32x96xf32>
    %c0_84 = arith.constant 0 : index
    %c0_85 = arith.constant 0 : index
    %c0_86 = arith.constant 0 : index
    %245 = vector.load %arg22[%c0_84, %c0_85, %c0_86] : memref<2x1x96xf32, #tpu.memory_space<vmem>>, vector<1x1x96xf32>
    %246 = vector.shape_cast %245 : vector<1x1x96xf32> to vector<1x96xf32>
    %c0_87 = arith.constant 0 : index
    %c0_88 = arith.constant 0 : index
    %c0_89 = arith.constant 0 : index
    %247 = vector.load %arg23[%c0_87, %c0_88, %c0_89] : memref<2x32x32xf32, #tpu.memory_space<vmem>>, vector<1x32x32xf32>
    %248 = vector.shape_cast %247 : vector<1x32x32xf32> to vector<32x32xf32>
    %c0_90 = arith.constant 0 : index
    %c0_91 = arith.constant 0 : index
    %c0_92 = arith.constant 0 : index
    %249 = vector.load %arg24[%c0_90, %c0_91, %c0_92] : memref<2x1x32xf32, #tpu.memory_space<vmem>>, vector<1x1x32xf32>
    %250 = vector.shape_cast %249 : vector<1x1x32xf32> to vector<1x32xf32>
    %cst_93 = arith.constant dense<0.000000e+00> : vector<64x96xf32>
    %251 = tpu.matmul %242, %244, %cst_93 {dimension_numbers = #tpu.dot_dimension_numbers<[1], [0], [0], [1], [0, 0, 1, 1], [], []>} : vector<64x32xf32>, vector<32x96xf32>, vector<64x96xf32> -> vector<64x96xf32>
    %252 = vector.broadcast %246 : vector<1x96xf32> to vector<64x96xf32>
    %253 = arith.addf %251, %252 : vector<64x96xf32>
    %254 = vector.extract_strided_slice %253 {offsets = [0, 0], sizes = [64, 32], strides = [1, 1]} : vector<64x96xf32> to vector<64x32xf32>
    %cst_94 = arith.constant 0.353553385 : f32
    %255 = vector.broadcast %cst_94 : f32 to vector<64x32xf32>
    %256 = arith.mulf %254, %255 : vector<64x32xf32>
    %257 = vector.extract_strided_slice %253 {offsets = [0, 32], sizes = [64, 32], strides = [1, 1]} : vector<64x96xf32> to vector<64x32xf32>
    %258 = vector.extract_strided_slice %253 {offsets = [0, 64], sizes = [64, 32], strides = [1, 1]} : vector<64x96xf32> to vector<64x32xf32>
    %259 = vector.shape_cast %256 : vector<64x32xf32> to vector<2x32x32xf32>
    %260 = vector.shape_cast %257 : vector<64x32xf32> to vector<2x32x32xf32>
    %261 = vector.shape_cast %258 : vector<64x32xf32> to vector<2x32x32xf32>
    %262 = vector.extract_strided_slice %259 {offsets = [0, 0, 0], sizes = [2, 32, 8], strides = [1, 1, 1]} : vector<2x32x32xf32> to vector<2x32x8xf32>
    %263 = vector.extract_strided_slice %260 {offsets = [0, 0, 0], sizes = [2, 32, 8], strides = [1, 1, 1]} : vector<2x32x32xf32> to vector<2x32x8xf32>
    %264 = vector.extract_strided_slice %261 {offsets = [0, 0, 0], sizes = [2, 32, 8], strides = [1, 1, 1]} : vector<2x32x32xf32> to vector<2x32x8xf32>
    "tpu.trace_start"() <{level = 10 : i32, message = "bnd,bmd->bnm"}> : () -> ()
    %cst_95 = arith.constant dense<0.000000e+00> : vector<2x32x32xf32>
    %265 = tpu.matmul %262, %263, %cst_95 {dimension_numbers = #tpu.dot_dimension_numbers<[2], [2], [1], [1], [0, 0, 0, 1, 1, 1], [0], [0]>} : vector<2x32x8xf32>, vector<2x32x8xf32>, vector<2x32x32xf32> -> vector<2x32x32xf32>
    "tpu.trace_stop"() : () -> ()
    %266 = vector.shape_cast %42 : vector<32x32xf32> to vector<1x32x32xf32>
    %267 = vector.broadcast %266 : vector<1x32x32xf32> to vector<2x32x32xf32>
    %268 = arith.addf %265, %267 : vector<2x32x32xf32>
    %cst_96 = arith.constant dense<0xFF800000> : vector<2x32xf32>
    %269 = vector.multi_reduction <maximumf>, %268, %cst_96 [2] : vector<2x32x32xf32> to vector<2x32xf32>
    %270 = vector.shape_cast %269 : vector<2x32xf32> to vector<2x32x1xf32>
    %271 = vector.broadcast %270 : vector<2x32x1xf32> to vector<2x32x32xf32>
    %272 = arith.subf %268, %271 : vector<2x32x32xf32>
    %273 = math.exp %272 : vector<2x32x32xf32>
    %cst_97 = arith.constant dense<0.000000e+00> : vector<2x32xf32>
    %274 = vector.multi_reduction <add>, %273, %cst_97 [2] : vector<2x32x32xf32> to vector<2x32xf32>
    %275 = vector.shape_cast %274 : vector<2x32xf32> to vector<2x32x1xf32>
    %276 = tpu.reciprocal %275 {approx = true} : vector<2x32x1xf32> -> vector<2x32x1xf32>
    %277 = vector.broadcast %276 : vector<2x32x1xf32> to vector<2x32x32xf32>
    %278 = arith.mulf %273, %277 : vector<2x32x32xf32>
    "tpu.trace_start"() <{level = 10 : i32, message = "bnm,bmd->bnd"}> : () -> ()
    %cst_98 = arith.constant dense<0.000000e+00> : vector<2x32x8xf32>
    %279 = tpu.matmul %278, %264, %cst_98 {dimension_numbers = #tpu.dot_dimension_numbers<[2], [1], [1], [2], [0, 0, 0, 1, 1, 2], [0], [0]>} : vector<2x32x32xf32>, vector<2x32x8xf32>, vector<2x32x8xf32> -> vector<2x32x8xf32>
    "tpu.trace_stop"() : () -> ()
    %280 = vector.shape_cast %279 : vector<2x32x8xf32> to vector<64x8xf32>
    %281 = vector.extract_strided_slice %259 {offsets = [0, 0, 8], sizes = [2, 32, 8], strides = [1, 1, 1]} : vector<2x32x32xf32> to vector<2x32x8xf32>
    %282 = vector.extract_strided_slice %260 {offsets = [0, 0, 8], sizes = [2, 32, 8], strides = [1, 1, 1]} : vector<2x32x32xf32> to vector<2x32x8xf32>
    %283 = vector.extract_strided_slice %261 {offsets = [0, 0, 8], sizes = [2, 32, 8], strides = [1, 1, 1]} : vector<2x32x32xf32> to vector<2x32x8xf32>
    "tpu.trace_start"() <{level = 10 : i32, message = "bnd,bmd->bnm"}> : () -> ()
    %cst_99 = arith.constant dense<0.000000e+00> : vector<2x32x32xf32>
    %284 = tpu.matmul %281, %282, %cst_99 {dimension_numbers = #tpu.dot_dimension_numbers<[2], [2], [1], [1], [0, 0, 0, 1, 1, 1], [0], [0]>} : vector<2x32x8xf32>, vector<2x32x8xf32>, vector<2x32x32xf32> -> vector<2x32x32xf32>
    "tpu.trace_stop"() : () -> ()
    %285 = vector.shape_cast %42 : vector<32x32xf32> to vector<1x32x32xf32>
    %286 = vector.broadcast %285 : vector<1x32x32xf32> to vector<2x32x32xf32>
    %287 = arith.addf %284, %286 : vector<2x32x32xf32>
    %cst_100 = arith.constant dense<0xFF800000> : vector<2x32xf32>
    %288 = vector.multi_reduction <maximumf>, %287, %cst_100 [2] : vector<2x32x32xf32> to vector<2x32xf32>
    %289 = vector.shape_cast %288 : vector<2x32xf32> to vector<2x32x1xf32>
    %290 = vector.broadcast %289 : vector<2x32x1xf32> to vector<2x32x32xf32>
    %291 = arith.subf %287, %290 : vector<2x32x32xf32>
    %292 = math.exp %291 : vector<2x32x32xf32>
    %cst_101 = arith.constant dense<0.000000e+00> : vector<2x32xf32>
    %293 = vector.multi_reduction <add>, %292, %cst_101 [2] : vector<2x32x32xf32> to vector<2x32xf32>
    %294 = vector.shape_cast %293 : vector<2x32xf32> to vector<2x32x1xf32>
    %295 = tpu.reciprocal %294 {approx = true} : vector<2x32x1xf32> -> vector<2x32x1xf32>
    %296 = vector.broadcast %295 : vector<2x32x1xf32> to vector<2x32x32xf32>
    %297 = arith.mulf %292, %296 : vector<2x32x32xf32>
    "tpu.trace_start"() <{level = 10 : i32, message = "bnm,bmd->bnd"}> : () -> ()
    %cst_102 = arith.constant dense<0.000000e+00> : vector<2x32x8xf32>
    %298 = tpu.matmul %297, %283, %cst_102 {dimension_numbers = #tpu.dot_dimension_numbers<[2], [1], [1], [2], [0, 0, 0, 1, 1, 2], [0], [0]>} : vector<2x32x32xf32>, vector<2x32x8xf32>, vector<2x32x8xf32> -> vector<2x32x8xf32>
    "tpu.trace_stop"() : () -> ()
    %299 = vector.shape_cast %298 : vector<2x32x8xf32> to vector<64x8xf32>
    %300 = vector.extract_strided_slice %259 {offsets = [0, 0, 16], sizes = [2, 32, 8], strides = [1, 1, 1]} : vector<2x32x32xf32> to vector<2x32x8xf32>
    %301 = vector.extract_strided_slice %260 {offsets = [0, 0, 16], sizes = [2, 32, 8], strides = [1, 1, 1]} : vector<2x32x32xf32> to vector<2x32x8xf32>
    %302 = vector.extract_strided_slice %261 {offsets = [0, 0, 16], sizes = [2, 32, 8], strides = [1, 1, 1]} : vector<2x32x32xf32> to vector<2x32x8xf32>
    "tpu.trace_start"() <{level = 10 : i32, message = "bnd,bmd->bnm"}> : () -> ()
    %cst_103 = arith.constant dense<0.000000e+00> : vector<2x32x32xf32>
    %303 = tpu.matmul %300, %301, %cst_103 {dimension_numbers = #tpu.dot_dimension_numbers<[2], [2], [1], [1], [0, 0, 0, 1, 1, 1], [0], [0]>} : vector<2x32x8xf32>, vector<2x32x8xf32>, vector<2x32x32xf32> -> vector<2x32x32xf32>
    "tpu.trace_stop"() : () -> ()
    %304 = vector.shape_cast %42 : vector<32x32xf32> to vector<1x32x32xf32>
    %305 = vector.broadcast %304 : vector<1x32x32xf32> to vector<2x32x32xf32>
    %306 = arith.addf %303, %305 : vector<2x32x32xf32>
    %cst_104 = arith.constant dense<0xFF800000> : vector<2x32xf32>
    %307 = vector.multi_reduction <maximumf>, %306, %cst_104 [2] : vector<2x32x32xf32> to vector<2x32xf32>
    %308 = vector.shape_cast %307 : vector<2x32xf32> to vector<2x32x1xf32>
    %309 = vector.broadcast %308 : vector<2x32x1xf32> to vector<2x32x32xf32>
    %310 = arith.subf %306, %309 : vector<2x32x32xf32>
    %311 = math.exp %310 : vector<2x32x32xf32>
    %cst_105 = arith.constant dense<0.000000e+00> : vector<2x32xf32>
    %312 = vector.multi_reduction <add>, %311, %cst_105 [2] : vector<2x32x32xf32> to vector<2x32xf32>
    %313 = vector.shape_cast %312 : vector<2x32xf32> to vector<2x32x1xf32>
    %314 = tpu.reciprocal %313 {approx = true} : vector<2x32x1xf32> -> vector<2x32x1xf32>
    %315 = vector.broadcast %314 : vector<2x32x1xf32> to vector<2x32x32xf32>
    %316 = arith.mulf %311, %315 : vector<2x32x32xf32>
    "tpu.trace_start"() <{level = 10 : i32, message = "bnm,bmd->bnd"}> : () -> ()
    %cst_106 = arith.constant dense<0.000000e+00> : vector<2x32x8xf32>
    %317 = tpu.matmul %316, %302, %cst_106 {dimension_numbers = #tpu.dot_dimension_numbers<[2], [1], [1], [2], [0, 0, 0, 1, 1, 2], [0], [0]>} : vector<2x32x32xf32>, vector<2x32x8xf32>, vector<2x32x8xf32> -> vector<2x32x8xf32>
    "tpu.trace_stop"() : () -> ()
    %318 = vector.shape_cast %317 : vector<2x32x8xf32> to vector<64x8xf32>
    %319 = vector.extract_strided_slice %259 {offsets = [0, 0, 24], sizes = [2, 32, 8], strides = [1, 1, 1]} : vector<2x32x32xf32> to vector<2x32x8xf32>
    %320 = vector.extract_strided_slice %260 {offsets = [0, 0, 24], sizes = [2, 32, 8], strides = [1, 1, 1]} : vector<2x32x32xf32> to vector<2x32x8xf32>
    %321 = vector.extract_strided_slice %261 {offsets = [0, 0, 24], sizes = [2, 32, 8], strides = [1, 1, 1]} : vector<2x32x32xf32> to vector<2x32x8xf32>
    "tpu.trace_start"() <{level = 10 : i32, message = "bnd,bmd->bnm"}> : () -> ()
    %cst_107 = arith.constant dense<0.000000e+00> : vector<2x32x32xf32>
    %322 = tpu.matmul %319, %320, %cst_107 {dimension_numbers = #tpu.dot_dimension_numbers<[2], [2], [1], [1], [0, 0, 0, 1, 1, 1], [0], [0]>} : vector<2x32x8xf32>, vector<2x32x8xf32>, vector<2x32x32xf32> -> vector<2x32x32xf32>
    "tpu.trace_stop"() : () -> ()
    %323 = vector.shape_cast %42 : vector<32x32xf32> to vector<1x32x32xf32>
    %324 = vector.broadcast %323 : vector<1x32x32xf32> to vector<2x32x32xf32>
    %325 = arith.addf %322, %324 : vector<2x32x32xf32>
    %cst_108 = arith.constant dense<0xFF800000> : vector<2x32xf32>
    %326 = vector.multi_reduction <maximumf>, %325, %cst_108 [2] : vector<2x32x32xf32> to vector<2x32xf32>
    %327 = vector.shape_cast %326 : vector<2x32xf32> to vector<2x32x1xf32>
    %328 = vector.broadcast %327 : vector<2x32x1xf32> to vector<2x32x32xf32>
    %329 = arith.subf %325, %328 : vector<2x32x32xf32>
    %330 = math.exp %329 : vector<2x32x32xf32>
    %cst_109 = arith.constant dense<0.000000e+00> : vector<2x32xf32>
    %331 = vector.multi_reduction <add>, %330, %cst_109 [2] : vector<2x32x32xf32> to vector<2x32xf32>
    %332 = vector.shape_cast %331 : vector<2x32xf32> to vector<2x32x1xf32>
    %333 = tpu.reciprocal %332 {approx = true} : vector<2x32x1xf32> -> vector<2x32x1xf32>
    %334 = vector.broadcast %333 : vector<2x32x1xf32> to vector<2x32x32xf32>
    %335 = arith.mulf %330, %334 : vector<2x32x32xf32>
    "tpu.trace_start"() <{level = 10 : i32, message = "bnm,bmd->bnd"}> : () -> ()
    %cst_110 = arith.constant dense<0.000000e+00> : vector<2x32x8xf32>
    %336 = tpu.matmul %335, %321, %cst_110 {dimension_numbers = #tpu.dot_dimension_numbers<[2], [1], [1], [2], [0, 0, 0, 1, 1, 2], [0], [0]>} : vector<2x32x32xf32>, vector<2x32x8xf32>, vector<2x32x8xf32> -> vector<2x32x8xf32>
    "tpu.trace_stop"() : () -> ()
    %337 = vector.shape_cast %336 : vector<2x32x8xf32> to vector<64x8xf32>
    %338 = tpu.concatenate %280, %299, %318, %337 in 1 : vector<64x8xf32>, vector<64x8xf32>, vector<64x8xf32>, vector<64x8xf32> -> vector<64x32xf32>
    %cst_111 = arith.constant dense<0.000000e+00> : vector<64x32xf32>
    %339 = tpu.matmul %338, %248, %cst_111 {dimension_numbers = #tpu.dot_dimension_numbers<[1], [0], [0], [1], [0, 0, 1, 1], [], []>} : vector<64x32xf32>, vector<32x32xf32>, vector<64x32xf32> -> vector<64x32xf32>
    %340 = vector.broadcast %250 : vector<1x32xf32> to vector<64x32xf32>
    %341 = arith.addf %339, %340 : vector<64x32xf32>
    %342 = arith.addf %218, %341 : vector<64x32xf32>
    %c0_112 = arith.constant 0 : index
    %c0_113 = arith.constant 0 : index
    %c0_114 = arith.constant 0 : index
    %343 = vector.load %arg25[%c0_112, %c0_113, %c0_114] : memref<2x1x32xf32, #tpu.memory_space<vmem>>, vector<1x1x32xf32>
    %344 = vector.shape_cast %343 : vector<1x1x32xf32> to vector<1x32xf32>
    %c0_115 = arith.constant 0 : index
    %c0_116 = arith.constant 0 : index
    %c0_117 = arith.constant 0 : index
    %345 = vector.load %arg26[%c0_115, %c0_116, %c0_117] : memref<2x1x32xf32, #tpu.memory_space<vmem>>, vector<1x1x32xf32>
    %346 = vector.shape_cast %345 : vector<1x1x32xf32> to vector<1x32xf32>
    %cst_118 = arith.constant dense<0.000000e+00> : vector<64xf32>
    %347 = vector.multi_reduction <add>, %342, %cst_118 [1] : vector<64x32xf32> to vector<64xf32>
    %348 = vector.shape_cast %347 : vector<64xf32> to vector<64x1xf32>
    %cst_119 = arith.constant 3.200000e+01 : f32
    %349 = vector.broadcast %cst_119 : f32 to vector<64x1xf32>
    %350 = arith.divf %348, %349 : vector<64x1xf32>
    %351 = vector.broadcast %350 : vector<64x1xf32> to vector<64x32xf32>
    %352 = arith.subf %342, %351 : vector<64x32xf32>
    %353 = arith.mulf %352, %352 : vector<64x32xf32>
    %cst_120 = arith.constant dense<0.000000e+00> : vector<64xf32>
    %354 = vector.multi_reduction <add>, %353, %cst_120 [1] : vector<64x32xf32> to vector<64xf32>
    %355 = vector.shape_cast %354 : vector<64xf32> to vector<64x1xf32>
    %cst_121 = arith.constant 3.200000e+01 : f32
    %356 = vector.broadcast %cst_121 : f32 to vector<64x1xf32>
    %357 = arith.divf %355, %356 : vector<64x1xf32>
    %cst_122 = arith.constant 9.99999996E-13 : f32
    %358 = vector.broadcast %cst_122 : f32 to vector<64x1xf32>
    %359 = arith.addf %357, %358 : vector<64x1xf32>
    %360 = math.rsqrt %359 : vector<64x1xf32>
    %361 = vector.broadcast %360 : vector<64x1xf32> to vector<64x32xf32>
    %362 = arith.mulf %352, %361 : vector<64x32xf32>
    %363 = vector.broadcast %344 : vector<1x32xf32> to vector<64x32xf32>
    %364 = arith.mulf %362, %363 : vector<64x32xf32>
    %365 = vector.broadcast %346 : vector<1x32xf32> to vector<64x32xf32>
    %366 = arith.addf %364, %365 : vector<64x32xf32>
    %c0_123 = arith.constant 0 : index
    %c0_124 = arith.constant 0 : index
    %c0_125 = arith.constant 0 : index
    %367 = vector.load %arg27[%c0_123, %c0_124, %c0_125] : memref<2x32x64xf32, #tpu.memory_space<vmem>>, vector<1x32x64xf32>
    %368 = vector.shape_cast %367 : vector<1x32x64xf32> to vector<32x64xf32>
    %cst_126 = arith.constant dense<0.000000e+00> : vector<64x64xf32>
    %369 = tpu.matmul %366, %368, %cst_126 {dimension_numbers = #tpu.dot_dimension_numbers<[1], [0], [0], [1], [0, 0, 1, 1], [], []>} : vector<64x32xf32>, vector<32x64xf32>, vector<64x64xf32> -> vector<64x64xf32>
    %c0_127 = arith.constant 0 : index
    %c0_128 = arith.constant 0 : index
    %c0_129 = arith.constant 0 : index
    %370 = vector.load %arg28[%c0_127, %c0_128, %c0_129] : memref<2x1x64xf32, #tpu.memory_space<vmem>>, vector<1x1x64xf32>
    %371 = vector.shape_cast %370 : vector<1x1x64xf32> to vector<1x64xf32>
    %372 = vector.broadcast %371 : vector<1x64xf32> to vector<64x64xf32>
    %373 = arith.addf %369, %372 : vector<64x64xf32>
    %cst_130 = arith.constant 5.000000e-01 : f32
    %374 = vector.broadcast %cst_130 : f32 to vector<64x64xf32>
    %375 = arith.mulf %374, %373 : vector<64x64xf32>
    %cst_131 = arith.constant 4.471500e-02 : f32
    %376 = vector.broadcast %cst_131 : f32 to vector<64x64xf32>
    %377 = arith.mulf %376, %373 : vector<64x64xf32>
    %378 = arith.mulf %377, %373 : vector<64x64xf32>
    %379 = arith.mulf %378, %373 : vector<64x64xf32>
    %380 = arith.addf %373, %379 : vector<64x64xf32>
    %cst_132 = arith.constant 0.797884583 : f32
    %381 = vector.broadcast %cst_132 : f32 to vector<64x64xf32>
    %382 = arith.mulf %381, %380 : vector<64x64xf32>
    %383 = math.tanh %382 : vector<64x64xf32>
    %cst_133 = arith.constant 1.000000e+00 : f32
    %384 = vector.broadcast %cst_133 : f32 to vector<64x64xf32>
    %385 = arith.addf %384, %383 : vector<64x64xf32>
    %386 = arith.mulf %375, %385 : vector<64x64xf32>
    %c0_134 = arith.constant 0 : index
    %c0_135 = arith.constant 0 : index
    %c0_136 = arith.constant 0 : index
    %387 = vector.load %arg29[%c0_134, %c0_135, %c0_136] : memref<2x64x32xf32, #tpu.memory_space<vmem>>, vector<1x64x32xf32>
    %388 = vector.shape_cast %387 : vector<1x64x32xf32> to vector<64x32xf32>
    %cst_137 = arith.constant dense<0.000000e+00> : vector<64x32xf32>
    %389 = tpu.matmul %386, %388, %cst_137 {dimension_numbers = #tpu.dot_dimension_numbers<[1], [0], [0], [1], [0, 0, 1, 1], [], []>} : vector<64x64xf32>, vector<64x32xf32>, vector<64x32xf32> -> vector<64x32xf32>
    %390 = arith.addf %342, %389 : vector<64x32xf32>
    %c0_138 = arith.constant 0 : index
    %c0_139 = arith.constant 0 : index
    %c0_140 = arith.constant 0 : index
    %391 = vector.load %arg30[%c0_138, %c0_139, %c0_140] : memref<2x1x32xf32, #tpu.memory_space<vmem>>, vector<1x1x32xf32>
    %392 = vector.shape_cast %391 : vector<1x1x32xf32> to vector<1x32xf32>
    %393 = vector.broadcast %392 : vector<1x32xf32> to vector<64x32xf32>
    %394 = arith.addf %390, %393 : vector<64x32xf32>
    %c1 = arith.constant 1 : index
    %c0_141 = arith.constant 0 : index
    %c0_142 = arith.constant 0 : index
    %395 = vector.load %arg13[%c1, %c0_141, %c0_142] : memref<2x1x32xf32, #tpu.memory_space<vmem>>, vector<1x1x32xf32>
    %396 = vector.shape_cast %395 : vector<1x1x32xf32> to vector<1x32xf32>
    %c1_143 = arith.constant 1 : index
    %c0_144 = arith.constant 0 : index
    %c0_145 = arith.constant 0 : index
    %397 = vector.load %arg14[%c1_143, %c0_144, %c0_145] : memref<2x1x32xf32, #tpu.memory_space<vmem>>, vector<1x1x32xf32>
    %398 = vector.shape_cast %397 : vector<1x1x32xf32> to vector<1x32xf32>
    %cst_146 = arith.constant dense<0.000000e+00> : vector<64xf32>
    %399 = vector.multi_reduction <add>, %394, %cst_146 [1] : vector<64x32xf32> to vector<64xf32>
    %400 = vector.shape_cast %399 : vector<64xf32> to vector<64x1xf32>
    %cst_147 = arith.constant 3.200000e+01 : f32
    %401 = vector.broadcast %cst_147 : f32 to vector<64x1xf32>
    %402 = arith.divf %400, %401 : vector<64x1xf32>
    %403 = vector.broadcast %402 : vector<64x1xf32> to vector<64x32xf32>
    %404 = arith.subf %394, %403 : vector<64x32xf32>
    %405 = arith.mulf %404, %404 : vector<64x32xf32>
    %cst_148 = arith.constant dense<0.000000e+00> : vector<64xf32>
    %406 = vector.multi_reduction <add>, %405, %cst_148 [1] : vector<64x32xf32> to vector<64xf32>
    %407 = vector.shape_cast %406 : vector<64xf32> to vector<64x1xf32>
    %cst_149 = arith.constant 3.200000e+01 : f32
    %408 = vector.broadcast %cst_149 : f32 to vector<64x1xf32>
    %409 = arith.divf %407, %408 : vector<64x1xf32>
    %cst_150 = arith.constant 9.99999996E-13 : f32
    %410 = vector.broadcast %cst_150 : f32 to vector<64x1xf32>
    %411 = arith.addf %409, %410 : vector<64x1xf32>
    %412 = math.rsqrt %411 : vector<64x1xf32>
    %413 = vector.broadcast %412 : vector<64x1xf32> to vector<64x32xf32>
    %414 = arith.mulf %404, %413 : vector<64x32xf32>
    %415 = vector.broadcast %396 : vector<1x32xf32> to vector<64x32xf32>
    %416 = arith.mulf %414, %415 : vector<64x32xf32>
    %417 = vector.broadcast %398 : vector<1x32xf32> to vector<64x32xf32>
    %418 = arith.addf %416, %417 : vector<64x32xf32>
    %c1_151 = arith.constant 1 : index
    %c0_152 = arith.constant 0 : index
    %c0_153 = arith.constant 0 : index
    %419 = vector.load %arg15[%c1_151, %c0_152, %c0_153] : memref<2x32x96xf32, #tpu.memory_space<vmem>>, vector<1x32x96xf32>
    %420 = vector.shape_cast %419 : vector<1x32x96xf32> to vector<32x96xf32>
    %c1_154 = arith.constant 1 : index
    %c0_155 = arith.constant 0 : index
    %c0_156 = arith.constant 0 : index
    %421 = vector.load %arg16[%c1_154, %c0_155, %c0_156] : memref<2x1x96xf32, #tpu.memory_space<vmem>>, vector<1x1x96xf32>
    %422 = vector.shape_cast %421 : vector<1x1x96xf32> to vector<1x96xf32>
    %c1_157 = arith.constant 1 : index
    %c0_158 = arith.constant 0 : index
    %c0_159 = arith.constant 0 : index
    %423 = vector.load %arg17[%c1_157, %c0_158, %c0_159] : memref<2x32x32xf32, #tpu.memory_space<vmem>>, vector<1x32x32xf32>
    %424 = vector.shape_cast %423 : vector<1x32x32xf32> to vector<32x32xf32>
    %c1_160 = arith.constant 1 : index
    %c0_161 = arith.constant 0 : index
    %c0_162 = arith.constant 0 : index
    %425 = vector.load %arg18[%c1_160, %c0_161, %c0_162] : memref<2x1x32xf32, #tpu.memory_space<vmem>>, vector<1x1x32xf32>
    %426 = vector.shape_cast %425 : vector<1x1x32xf32> to vector<1x32xf32>
    %cst_163 = arith.constant dense<0.000000e+00> : vector<64x96xf32>
    %427 = tpu.matmul %418, %420, %cst_163 {dimension_numbers = #tpu.dot_dimension_numbers<[1], [0], [0], [1], [0, 0, 1, 1], [], []>} : vector<64x32xf32>, vector<32x96xf32>, vector<64x96xf32> -> vector<64x96xf32>
    %428 = vector.broadcast %422 : vector<1x96xf32> to vector<64x96xf32>
    %429 = arith.addf %427, %428 : vector<64x96xf32>
    %430 = vector.extract_strided_slice %429 {offsets = [0, 0], sizes = [64, 32], strides = [1, 1]} : vector<64x96xf32> to vector<64x32xf32>
    %cst_164 = arith.constant 0.176776692 : f32
    %431 = vector.broadcast %cst_164 : f32 to vector<64x32xf32>
    %432 = arith.mulf %430, %431 : vector<64x32xf32>
    %433 = vector.extract_strided_slice %429 {offsets = [0, 32], sizes = [64, 32], strides = [1, 1]} : vector<64x96xf32> to vector<64x32xf32>
    %434 = vector.extract_strided_slice %429 {offsets = [0, 64], sizes = [64, 32], strides = [1, 1]} : vector<64x96xf32> to vector<64x32xf32>
    %435 = vector.shape_cast %432 : vector<64x32xf32> to vector<8x8x32xf32>
    %436 = vector.shape_cast %433 : vector<64x32xf32> to vector<8x8x32xf32>
    %437 = vector.shape_cast %434 : vector<64x32xf32> to vector<8x8x32xf32>
    %438 = vector.extract_strided_slice %435 {offsets = [0, 0, 0], sizes = [8, 8, 8], strides = [1, 1, 1]} : vector<8x8x32xf32> to vector<8x8x8xf32>
    %439 = vector.extract_strided_slice %436 {offsets = [0, 0, 0], sizes = [8, 8, 8], strides = [1, 1, 1]} : vector<8x8x32xf32> to vector<8x8x8xf32>
    %440 = vector.extract_strided_slice %437 {offsets = [0, 0, 0], sizes = [8, 8, 8], strides = [1, 1, 1]} : vector<8x8x32xf32> to vector<8x8x8xf32>
    "tpu.trace_start"() <{level = 10 : i32, message = "nid,njd->nij"}> : () -> ()
    %cst_165 = arith.constant dense<0.000000e+00> : vector<8x8x8xf32>
    %441 = tpu.matmul %438, %439, %cst_165 {dimension_numbers = #tpu.dot_dimension_numbers<[2], [2], [1], [1], [0, 0, 0, 1, 1, 1], [0], [0]>} : vector<8x8x8xf32>, vector<8x8x8xf32>, vector<8x8x8xf32> -> vector<8x8x8xf32>
    "tpu.trace_stop"() : () -> ()
    %442 = vector.shape_cast %441 : vector<8x8x8xf32> to vector<2x4x8x8xf32>
    %443 = vector.extract_strided_slice %442 {offsets = [0, 0, 0, 0], sizes = [2, 1, 8, 8], strides = [1, 1, 1, 1]} : vector<2x4x8x8xf32> to vector<2x1x8x8xf32>
    %444 = vector.shape_cast %443 : vector<2x1x8x8xf32> to vector<2x8x8xf32>
    %445 = vector.extract_strided_slice %442 {offsets = [0, 1, 0, 0], sizes = [2, 1, 8, 8], strides = [1, 1, 1, 1]} : vector<2x4x8x8xf32> to vector<2x1x8x8xf32>
    %446 = vector.shape_cast %445 : vector<2x1x8x8xf32> to vector<2x8x8xf32>
    %447 = arith.addf %444, %446 : vector<2x8x8xf32>
    %448 = vector.extract_strided_slice %442 {offsets = [0, 2, 0, 0], sizes = [2, 1, 8, 8], strides = [1, 1, 1, 1]} : vector<2x4x8x8xf32> to vector<2x1x8x8xf32>
    %449 = vector.shape_cast %448 : vector<2x1x8x8xf32> to vector<2x8x8xf32>
    %450 = arith.addf %447, %449 : vector<2x8x8xf32>
    %451 = vector.extract_strided_slice %442 {offsets = [0, 3, 0, 0], sizes = [2, 1, 8, 8], strides = [1, 1, 1, 1]} : vector<2x4x8x8xf32> to vector<2x1x8x8xf32>
    %452 = vector.shape_cast %451 : vector<2x1x8x8xf32> to vector<2x8x8xf32>
    %453 = arith.addf %450, %452 : vector<2x8x8xf32>
    %cst_166 = arith.constant dense<0xFF800000> : vector<2x8xf32>
    %454 = vector.multi_reduction <maximumf>, %453, %cst_166 [2] : vector<2x8x8xf32> to vector<2x8xf32>
    %455 = vector.shape_cast %454 : vector<2x8xf32> to vector<2x8x1xf32>
    %456 = vector.broadcast %455 : vector<2x8x1xf32> to vector<2x8x8xf32>
    %457 = arith.subf %453, %456 : vector<2x8x8xf32>
    %458 = math.exp %457 : vector<2x8x8xf32>
    %cst_167 = arith.constant dense<0.000000e+00> : vector<2x8xf32>
    %459 = vector.multi_reduction <add>, %458, %cst_167 [2] : vector<2x8x8xf32> to vector<2x8xf32>
    %460 = vector.shape_cast %459 : vector<2x8xf32> to vector<2x8x1xf32>
    %461 = tpu.reciprocal %460 {approx = true} : vector<2x8x1xf32> -> vector<2x8x1xf32>
    %462 = vector.broadcast %461 : vector<2x8x1xf32> to vector<2x8x8xf32>
    %463 = arith.mulf %458, %462 : vector<2x8x8xf32>
    %464 = vector.shape_cast %463 : vector<2x8x8xf32> to vector<2x1x8x8xf32>
    %465 = vector.shape_cast %464 : vector<2x1x8x8xf32> to vector<2x1x8x8xf32>
    %466 = vector.broadcast %465 : vector<2x1x8x8xf32> to vector<2x4x8x8xf32>
    %467 = vector.shape_cast %466 : vector<2x4x8x8xf32> to vector<8x8x8xf32>
    "tpu.trace_start"() <{level = 10 : i32, message = "nij,njd->nid"}> : () -> ()
    %cst_168 = arith.constant dense<0.000000e+00> : vector<8x8x8xf32>
    %468 = tpu.matmul %467, %440, %cst_168 {dimension_numbers = #tpu.dot_dimension_numbers<[2], [1], [1], [2], [0, 0, 0, 1, 1, 2], [0], [0]>} : vector<8x8x8xf32>, vector<8x8x8xf32>, vector<8x8x8xf32> -> vector<8x8x8xf32>
    "tpu.trace_stop"() : () -> ()
    %469 = vector.shape_cast %468 : vector<8x8x8xf32> to vector<64x8xf32>
    %470 = vector.extract_strided_slice %435 {offsets = [0, 0, 8], sizes = [8, 8, 8], strides = [1, 1, 1]} : vector<8x8x32xf32> to vector<8x8x8xf32>
    %471 = vector.extract_strided_slice %436 {offsets = [0, 0, 8], sizes = [8, 8, 8], strides = [1, 1, 1]} : vector<8x8x32xf32> to vector<8x8x8xf32>
    %472 = vector.extract_strided_slice %437 {offsets = [0, 0, 8], sizes = [8, 8, 8], strides = [1, 1, 1]} : vector<8x8x32xf32> to vector<8x8x8xf32>
    "tpu.trace_start"() <{level = 10 : i32, message = "nid,njd->nij"}> : () -> ()
    %cst_169 = arith.constant dense<0.000000e+00> : vector<8x8x8xf32>
    %473 = tpu.matmul %470, %471, %cst_169 {dimension_numbers = #tpu.dot_dimension_numbers<[2], [2], [1], [1], [0, 0, 0, 1, 1, 1], [0], [0]>} : vector<8x8x8xf32>, vector<8x8x8xf32>, vector<8x8x8xf32> -> vector<8x8x8xf32>
    "tpu.trace_stop"() : () -> ()
    %474 = vector.shape_cast %473 : vector<8x8x8xf32> to vector<2x4x8x8xf32>
    %475 = vector.extract_strided_slice %474 {offsets = [0, 0, 0, 0], sizes = [2, 1, 8, 8], strides = [1, 1, 1, 1]} : vector<2x4x8x8xf32> to vector<2x1x8x8xf32>
    %476 = vector.shape_cast %475 : vector<2x1x8x8xf32> to vector<2x8x8xf32>
    %477 = vector.extract_strided_slice %474 {offsets = [0, 1, 0, 0], sizes = [2, 1, 8, 8], strides = [1, 1, 1, 1]} : vector<2x4x8x8xf32> to vector<2x1x8x8xf32>
    %478 = vector.shape_cast %477 : vector<2x1x8x8xf32> to vector<2x8x8xf32>
    %479 = arith.addf %476, %478 : vector<2x8x8xf32>
    %480 = vector.extract_strided_slice %474 {offsets = [0, 2, 0, 0], sizes = [2, 1, 8, 8], strides = [1, 1, 1, 1]} : vector<2x4x8x8xf32> to vector<2x1x8x8xf32>
    %481 = vector.shape_cast %480 : vector<2x1x8x8xf32> to vector<2x8x8xf32>
    %482 = arith.addf %479, %481 : vector<2x8x8xf32>
    %483 = vector.extract_strided_slice %474 {offsets = [0, 3, 0, 0], sizes = [2, 1, 8, 8], strides = [1, 1, 1, 1]} : vector<2x4x8x8xf32> to vector<2x1x8x8xf32>
    %484 = vector.shape_cast %483 : vector<2x1x8x8xf32> to vector<2x8x8xf32>
    %485 = arith.addf %482, %484 : vector<2x8x8xf32>
    %cst_170 = arith.constant dense<0xFF800000> : vector<2x8xf32>
    %486 = vector.multi_reduction <maximumf>, %485, %cst_170 [2] : vector<2x8x8xf32> to vector<2x8xf32>
    %487 = vector.shape_cast %486 : vector<2x8xf32> to vector<2x8x1xf32>
    %488 = vector.broadcast %487 : vector<2x8x1xf32> to vector<2x8x8xf32>
    %489 = arith.subf %485, %488 : vector<2x8x8xf32>
    %490 = math.exp %489 : vector<2x8x8xf32>
    %cst_171 = arith.constant dense<0.000000e+00> : vector<2x8xf32>
    %491 = vector.multi_reduction <add>, %490, %cst_171 [2] : vector<2x8x8xf32> to vector<2x8xf32>
    %492 = vector.shape_cast %491 : vector<2x8xf32> to vector<2x8x1xf32>
    %493 = tpu.reciprocal %492 {approx = true} : vector<2x8x1xf32> -> vector<2x8x1xf32>
    %494 = vector.broadcast %493 : vector<2x8x1xf32> to vector<2x8x8xf32>
    %495 = arith.mulf %490, %494 : vector<2x8x8xf32>
    %496 = vector.shape_cast %495 : vector<2x8x8xf32> to vector<2x1x8x8xf32>
    %497 = vector.shape_cast %496 : vector<2x1x8x8xf32> to vector<2x1x8x8xf32>
    %498 = vector.broadcast %497 : vector<2x1x8x8xf32> to vector<2x4x8x8xf32>
    %499 = vector.shape_cast %498 : vector<2x4x8x8xf32> to vector<8x8x8xf32>
    "tpu.trace_start"() <{level = 10 : i32, message = "nij,njd->nid"}> : () -> ()
    %cst_172 = arith.constant dense<0.000000e+00> : vector<8x8x8xf32>
    %500 = tpu.matmul %499, %472, %cst_172 {dimension_numbers = #tpu.dot_dimension_numbers<[2], [1], [1], [2], [0, 0, 0, 1, 1, 2], [0], [0]>} : vector<8x8x8xf32>, vector<8x8x8xf32>, vector<8x8x8xf32> -> vector<8x8x8xf32>
    "tpu.trace_stop"() : () -> ()
    %501 = vector.shape_cast %500 : vector<8x8x8xf32> to vector<64x8xf32>
    %502 = vector.extract_strided_slice %435 {offsets = [0, 0, 16], sizes = [8, 8, 8], strides = [1, 1, 1]} : vector<8x8x32xf32> to vector<8x8x8xf32>
    %503 = vector.extract_strided_slice %436 {offsets = [0, 0, 16], sizes = [8, 8, 8], strides = [1, 1, 1]} : vector<8x8x32xf32> to vector<8x8x8xf32>
    %504 = vector.extract_strided_slice %437 {offsets = [0, 0, 16], sizes = [8, 8, 8], strides = [1, 1, 1]} : vector<8x8x32xf32> to vector<8x8x8xf32>
    "tpu.trace_start"() <{level = 10 : i32, message = "nid,njd->nij"}> : () -> ()
    %cst_173 = arith.constant dense<0.000000e+00> : vector<8x8x8xf32>
    %505 = tpu.matmul %502, %503, %cst_173 {dimension_numbers = #tpu.dot_dimension_numbers<[2], [2], [1], [1], [0, 0, 0, 1, 1, 1], [0], [0]>} : vector<8x8x8xf32>, vector<8x8x8xf32>, vector<8x8x8xf32> -> vector<8x8x8xf32>
    "tpu.trace_stop"() : () -> ()
    %506 = vector.shape_cast %505 : vector<8x8x8xf32> to vector<2x4x8x8xf32>
    %507 = vector.extract_strided_slice %506 {offsets = [0, 0, 0, 0], sizes = [2, 1, 8, 8], strides = [1, 1, 1, 1]} : vector<2x4x8x8xf32> to vector<2x1x8x8xf32>
    %508 = vector.shape_cast %507 : vector<2x1x8x8xf32> to vector<2x8x8xf32>
    %509 = vector.extract_strided_slice %506 {offsets = [0, 1, 0, 0], sizes = [2, 1, 8, 8], strides = [1, 1, 1, 1]} : vector<2x4x8x8xf32> to vector<2x1x8x8xf32>
    %510 = vector.shape_cast %509 : vector<2x1x8x8xf32> to vector<2x8x8xf32>
    %511 = arith.addf %508, %510 : vector<2x8x8xf32>
    %512 = vector.extract_strided_slice %506 {offsets = [0, 2, 0, 0], sizes = [2, 1, 8, 8], strides = [1, 1, 1, 1]} : vector<2x4x8x8xf32> to vector<2x1x8x8xf32>
    %513 = vector.shape_cast %512 : vector<2x1x8x8xf32> to vector<2x8x8xf32>
    %514 = arith.addf %511, %513 : vector<2x8x8xf32>
    %515 = vector.extract_strided_slice %506 {offsets = [0, 3, 0, 0], sizes = [2, 1, 8, 8], strides = [1, 1, 1, 1]} : vector<2x4x8x8xf32> to vector<2x1x8x8xf32>
    %516 = vector.shape_cast %515 : vector<2x1x8x8xf32> to vector<2x8x8xf32>
    %517 = arith.addf %514, %516 : vector<2x8x8xf32>
    %cst_174 = arith.constant dense<0xFF800000> : vector<2x8xf32>
    %518 = vector.multi_reduction <maximumf>, %517, %cst_174 [2] : vector<2x8x8xf32> to vector<2x8xf32>
    %519 = vector.shape_cast %518 : vector<2x8xf32> to vector<2x8x1xf32>
    %520 = vector.broadcast %519 : vector<2x8x1xf32> to vector<2x8x8xf32>
    %521 = arith.subf %517, %520 : vector<2x8x8xf32>
    %522 = math.exp %521 : vector<2x8x8xf32>
    %cst_175 = arith.constant dense<0.000000e+00> : vector<2x8xf32>
    %523 = vector.multi_reduction <add>, %522, %cst_175 [2] : vector<2x8x8xf32> to vector<2x8xf32>
    %524 = vector.shape_cast %523 : vector<2x8xf32> to vector<2x8x1xf32>
    %525 = tpu.reciprocal %524 {approx = true} : vector<2x8x1xf32> -> vector<2x8x1xf32>
    %526 = vector.broadcast %525 : vector<2x8x1xf32> to vector<2x8x8xf32>
    %527 = arith.mulf %522, %526 : vector<2x8x8xf32>
    %528 = vector.shape_cast %527 : vector<2x8x8xf32> to vector<2x1x8x8xf32>
    %529 = vector.shape_cast %528 : vector<2x1x8x8xf32> to vector<2x1x8x8xf32>
    %530 = vector.broadcast %529 : vector<2x1x8x8xf32> to vector<2x4x8x8xf32>
    %531 = vector.shape_cast %530 : vector<2x4x8x8xf32> to vector<8x8x8xf32>
    "tpu.trace_start"() <{level = 10 : i32, message = "nij,njd->nid"}> : () -> ()
    %cst_176 = arith.constant dense<0.000000e+00> : vector<8x8x8xf32>
    %532 = tpu.matmul %531, %504, %cst_176 {dimension_numbers = #tpu.dot_dimension_numbers<[2], [1], [1], [2], [0, 0, 0, 1, 1, 2], [0], [0]>} : vector<8x8x8xf32>, vector<8x8x8xf32>, vector<8x8x8xf32> -> vector<8x8x8xf32>
    "tpu.trace_stop"() : () -> ()
    %533 = vector.shape_cast %532 : vector<8x8x8xf32> to vector<64x8xf32>
    %534 = vector.extract_strided_slice %435 {offsets = [0, 0, 24], sizes = [8, 8, 8], strides = [1, 1, 1]} : vector<8x8x32xf32> to vector<8x8x8xf32>
    %535 = vector.extract_strided_slice %436 {offsets = [0, 0, 24], sizes = [8, 8, 8], strides = [1, 1, 1]} : vector<8x8x32xf32> to vector<8x8x8xf32>
    %536 = vector.extract_strided_slice %437 {offsets = [0, 0, 24], sizes = [8, 8, 8], strides = [1, 1, 1]} : vector<8x8x32xf32> to vector<8x8x8xf32>
    "tpu.trace_start"() <{level = 10 : i32, message = "nid,njd->nij"}> : () -> ()
    %cst_177 = arith.constant dense<0.000000e+00> : vector<8x8x8xf32>
    %537 = tpu.matmul %534, %535, %cst_177 {dimension_numbers = #tpu.dot_dimension_numbers<[2], [2], [1], [1], [0, 0, 0, 1, 1, 1], [0], [0]>} : vector<8x8x8xf32>, vector<8x8x8xf32>, vector<8x8x8xf32> -> vector<8x8x8xf32>
    "tpu.trace_stop"() : () -> ()
    %538 = vector.shape_cast %537 : vector<8x8x8xf32> to vector<2x4x8x8xf32>
    %539 = vector.extract_strided_slice %538 {offsets = [0, 0, 0, 0], sizes = [2, 1, 8, 8], strides = [1, 1, 1, 1]} : vector<2x4x8x8xf32> to vector<2x1x8x8xf32>
    %540 = vector.shape_cast %539 : vector<2x1x8x8xf32> to vector<2x8x8xf32>
    %541 = vector.extract_strided_slice %538 {offsets = [0, 1, 0, 0], sizes = [2, 1, 8, 8], strides = [1, 1, 1, 1]} : vector<2x4x8x8xf32> to vector<2x1x8x8xf32>
    %542 = vector.shape_cast %541 : vector<2x1x8x8xf32> to vector<2x8x8xf32>
    %543 = arith.addf %540, %542 : vector<2x8x8xf32>
    %544 = vector.extract_strided_slice %538 {offsets = [0, 2, 0, 0], sizes = [2, 1, 8, 8], strides = [1, 1, 1, 1]} : vector<2x4x8x8xf32> to vector<2x1x8x8xf32>
    %545 = vector.shape_cast %544 : vector<2x1x8x8xf32> to vector<2x8x8xf32>
    %546 = arith.addf %543, %545 : vector<2x8x8xf32>
    %547 = vector.extract_strided_slice %538 {offsets = [0, 3, 0, 0], sizes = [2, 1, 8, 8], strides = [1, 1, 1, 1]} : vector<2x4x8x8xf32> to vector<2x1x8x8xf32>
    %548 = vector.shape_cast %547 : vector<2x1x8x8xf32> to vector<2x8x8xf32>
    %549 = arith.addf %546, %548 : vector<2x8x8xf32>
    %cst_178 = arith.constant dense<0xFF800000> : vector<2x8xf32>
    %550 = vector.multi_reduction <maximumf>, %549, %cst_178 [2] : vector<2x8x8xf32> to vector<2x8xf32>
    %551 = vector.shape_cast %550 : vector<2x8xf32> to vector<2x8x1xf32>
    %552 = vector.broadcast %551 : vector<2x8x1xf32> to vector<2x8x8xf32>
    %553 = arith.subf %549, %552 : vector<2x8x8xf32>
    %554 = math.exp %553 : vector<2x8x8xf32>
    %cst_179 = arith.constant dense<0.000000e+00> : vector<2x8xf32>
    %555 = vector.multi_reduction <add>, %554, %cst_179 [2] : vector<2x8x8xf32> to vector<2x8xf32>
    %556 = vector.shape_cast %555 : vector<2x8xf32> to vector<2x8x1xf32>
    %557 = tpu.reciprocal %556 {approx = true} : vector<2x8x1xf32> -> vector<2x8x1xf32>
    %558 = vector.broadcast %557 : vector<2x8x1xf32> to vector<2x8x8xf32>
    %559 = arith.mulf %554, %558 : vector<2x8x8xf32>
    %560 = vector.shape_cast %559 : vector<2x8x8xf32> to vector<2x1x8x8xf32>
    %561 = vector.shape_cast %560 : vector<2x1x8x8xf32> to vector<2x1x8x8xf32>
    %562 = vector.broadcast %561 : vector<2x1x8x8xf32> to vector<2x4x8x8xf32>
    %563 = vector.shape_cast %562 : vector<2x4x8x8xf32> to vector<8x8x8xf32>
    "tpu.trace_start"() <{level = 10 : i32, message = "nij,njd->nid"}> : () -> ()
    %cst_180 = arith.constant dense<0.000000e+00> : vector<8x8x8xf32>
    %564 = tpu.matmul %563, %536, %cst_180 {dimension_numbers = #tpu.dot_dimension_numbers<[2], [1], [1], [2], [0, 0, 0, 1, 1, 2], [0], [0]>} : vector<8x8x8xf32>, vector<8x8x8xf32>, vector<8x8x8xf32> -> vector<8x8x8xf32>
    "tpu.trace_stop"() : () -> ()
    %565 = vector.shape_cast %564 : vector<8x8x8xf32> to vector<64x8xf32>
    %566 = tpu.concatenate %469, %501, %533, %565 in 1 : vector<64x8xf32>, vector<64x8xf32>, vector<64x8xf32>, vector<64x8xf32> -> vector<64x32xf32>
    %cst_181 = arith.constant dense<0.000000e+00> : vector<64x32xf32>
    %567 = tpu.matmul %566, %424, %cst_181 {dimension_numbers = #tpu.dot_dimension_numbers<[1], [0], [0], [1], [0, 0, 1, 1], [], []>} : vector<64x32xf32>, vector<32x32xf32>, vector<64x32xf32> -> vector<64x32xf32>
    %568 = vector.broadcast %426 : vector<1x32xf32> to vector<64x32xf32>
    %569 = arith.addf %567, %568 : vector<64x32xf32>
    %570 = arith.addf %394, %569 : vector<64x32xf32>
    %c1_182 = arith.constant 1 : index
    %c0_183 = arith.constant 0 : index
    %c0_184 = arith.constant 0 : index
    %571 = vector.load %arg19[%c1_182, %c0_183, %c0_184] : memref<2x1x32xf32, #tpu.memory_space<vmem>>, vector<1x1x32xf32>
    %572 = vector.shape_cast %571 : vector<1x1x32xf32> to vector<1x32xf32>
    %c1_185 = arith.constant 1 : index
    %c0_186 = arith.constant 0 : index
    %c0_187 = arith.constant 0 : index
    %573 = vector.load %arg20[%c1_185, %c0_186, %c0_187] : memref<2x1x32xf32, #tpu.memory_space<vmem>>, vector<1x1x32xf32>
    %574 = vector.shape_cast %573 : vector<1x1x32xf32> to vector<1x32xf32>
    %cst_188 = arith.constant dense<0.000000e+00> : vector<64xf32>
    %575 = vector.multi_reduction <add>, %570, %cst_188 [1] : vector<64x32xf32> to vector<64xf32>
    %576 = vector.shape_cast %575 : vector<64xf32> to vector<64x1xf32>
    %cst_189 = arith.constant 3.200000e+01 : f32
    %577 = vector.broadcast %cst_189 : f32 to vector<64x1xf32>
    %578 = arith.divf %576, %577 : vector<64x1xf32>
    %579 = vector.broadcast %578 : vector<64x1xf32> to vector<64x32xf32>
    %580 = arith.subf %570, %579 : vector<64x32xf32>
    %581 = arith.mulf %580, %580 : vector<64x32xf32>
    %cst_190 = arith.constant dense<0.000000e+00> : vector<64xf32>
    %582 = vector.multi_reduction <add>, %581, %cst_190 [1] : vector<64x32xf32> to vector<64xf32>
    %583 = vector.shape_cast %582 : vector<64xf32> to vector<64x1xf32>
    %cst_191 = arith.constant 3.200000e+01 : f32
    %584 = vector.broadcast %cst_191 : f32 to vector<64x1xf32>
    %585 = arith.divf %583, %584 : vector<64x1xf32>
    %cst_192 = arith.constant 9.99999996E-13 : f32
    %586 = vector.broadcast %cst_192 : f32 to vector<64x1xf32>
    %587 = arith.addf %585, %586 : vector<64x1xf32>
    %588 = math.rsqrt %587 : vector<64x1xf32>
    %589 = vector.broadcast %588 : vector<64x1xf32> to vector<64x32xf32>
    %590 = arith.mulf %580, %589 : vector<64x32xf32>
    %591 = vector.broadcast %572 : vector<1x32xf32> to vector<64x32xf32>
    %592 = arith.mulf %590, %591 : vector<64x32xf32>
    %593 = vector.broadcast %574 : vector<1x32xf32> to vector<64x32xf32>
    %594 = arith.addf %592, %593 : vector<64x32xf32>
    %c1_193 = arith.constant 1 : index
    %c0_194 = arith.constant 0 : index
    %c0_195 = arith.constant 0 : index
    %595 = vector.load %arg21[%c1_193, %c0_194, %c0_195] : memref<2x32x96xf32, #tpu.memory_space<vmem>>, vector<1x32x96xf32>
    %596 = vector.shape_cast %595 : vector<1x32x96xf32> to vector<32x96xf32>
    %c1_196 = arith.constant 1 : index
    %c0_197 = arith.constant 0 : index
    %c0_198 = arith.constant 0 : index
    %597 = vector.load %arg22[%c1_196, %c0_197, %c0_198] : memref<2x1x96xf32, #tpu.memory_space<vmem>>, vector<1x1x96xf32>
    %598 = vector.shape_cast %597 : vector<1x1x96xf32> to vector<1x96xf32>
    %c1_199 = arith.constant 1 : index
    %c0_200 = arith.constant 0 : index
    %c0_201 = arith.constant 0 : index
    %599 = vector.load %arg23[%c1_199, %c0_200, %c0_201] : memref<2x32x32xf32, #tpu.memory_space<vmem>>, vector<1x32x32xf32>
    %600 = vector.shape_cast %599 : vector<1x32x32xf32> to vector<32x32xf32>
    %c1_202 = arith.constant 1 : index
    %c0_203 = arith.constant 0 : index
    %c0_204 = arith.constant 0 : index
    %601 = vector.load %arg24[%c1_202, %c0_203, %c0_204] : memref<2x1x32xf32, #tpu.memory_space<vmem>>, vector<1x1x32xf32>
    %602 = vector.shape_cast %601 : vector<1x1x32xf32> to vector<1x32xf32>
    %cst_205 = arith.constant dense<0.000000e+00> : vector<64x96xf32>
    %603 = tpu.matmul %594, %596, %cst_205 {dimension_numbers = #tpu.dot_dimension_numbers<[1], [0], [0], [1], [0, 0, 1, 1], [], []>} : vector<64x32xf32>, vector<32x96xf32>, vector<64x96xf32> -> vector<64x96xf32>
    %604 = vector.broadcast %598 : vector<1x96xf32> to vector<64x96xf32>
    %605 = arith.addf %603, %604 : vector<64x96xf32>
    %606 = vector.extract_strided_slice %605 {offsets = [0, 0], sizes = [64, 32], strides = [1, 1]} : vector<64x96xf32> to vector<64x32xf32>
    %cst_206 = arith.constant 0.353553385 : f32
    %607 = vector.broadcast %cst_206 : f32 to vector<64x32xf32>
    %608 = arith.mulf %606, %607 : vector<64x32xf32>
    %609 = vector.extract_strided_slice %605 {offsets = [0, 32], sizes = [64, 32], strides = [1, 1]} : vector<64x96xf32> to vector<64x32xf32>
    %610 = vector.extract_strided_slice %605 {offsets = [0, 64], sizes = [64, 32], strides = [1, 1]} : vector<64x96xf32> to vector<64x32xf32>
    %611 = vector.shape_cast %608 : vector<64x32xf32> to vector<2x32x32xf32>
    %612 = vector.shape_cast %609 : vector<64x32xf32> to vector<2x32x32xf32>
    %613 = vector.shape_cast %610 : vector<64x32xf32> to vector<2x32x32xf32>
    %614 = vector.extract_strided_slice %611 {offsets = [0, 0, 0], sizes = [2, 32, 8], strides = [1, 1, 1]} : vector<2x32x32xf32> to vector<2x32x8xf32>
    %615 = vector.extract_strided_slice %612 {offsets = [0, 0, 0], sizes = [2, 32, 8], strides = [1, 1, 1]} : vector<2x32x32xf32> to vector<2x32x8xf32>
    %616 = vector.extract_strided_slice %613 {offsets = [0, 0, 0], sizes = [2, 32, 8], strides = [1, 1, 1]} : vector<2x32x32xf32> to vector<2x32x8xf32>
    "tpu.trace_start"() <{level = 10 : i32, message = "bnd,bmd->bnm"}> : () -> ()
    %cst_207 = arith.constant dense<0.000000e+00> : vector<2x32x32xf32>
    %617 = tpu.matmul %614, %615, %cst_207 {dimension_numbers = #tpu.dot_dimension_numbers<[2], [2], [1], [1], [0, 0, 0, 1, 1, 1], [0], [0]>} : vector<2x32x8xf32>, vector<2x32x8xf32>, vector<2x32x32xf32> -> vector<2x32x32xf32>
    "tpu.trace_stop"() : () -> ()
    %618 = vector.shape_cast %42 : vector<32x32xf32> to vector<1x32x32xf32>
    %619 = vector.broadcast %618 : vector<1x32x32xf32> to vector<2x32x32xf32>
    %620 = arith.addf %617, %619 : vector<2x32x32xf32>
    %cst_208 = arith.constant dense<0xFF800000> : vector<2x32xf32>
    %621 = vector.multi_reduction <maximumf>, %620, %cst_208 [2] : vector<2x32x32xf32> to vector<2x32xf32>
    %622 = vector.shape_cast %621 : vector<2x32xf32> to vector<2x32x1xf32>
    %623 = vector.broadcast %622 : vector<2x32x1xf32> to vector<2x32x32xf32>
    %624 = arith.subf %620, %623 : vector<2x32x32xf32>
    %625 = math.exp %624 : vector<2x32x32xf32>
    %cst_209 = arith.constant dense<0.000000e+00> : vector<2x32xf32>
    %626 = vector.multi_reduction <add>, %625, %cst_209 [2] : vector<2x32x32xf32> to vector<2x32xf32>
    %627 = vector.shape_cast %626 : vector<2x32xf32> to vector<2x32x1xf32>
    %628 = tpu.reciprocal %627 {approx = true} : vector<2x32x1xf32> -> vector<2x32x1xf32>
    %629 = vector.broadcast %628 : vector<2x32x1xf32> to vector<2x32x32xf32>
    %630 = arith.mulf %625, %629 : vector<2x32x32xf32>
    "tpu.trace_start"() <{level = 10 : i32, message = "bnm,bmd->bnd"}> : () -> ()
    %cst_210 = arith.constant dense<0.000000e+00> : vector<2x32x8xf32>
    %631 = tpu.matmul %630, %616, %cst_210 {dimension_numbers = #tpu.dot_dimension_numbers<[2], [1], [1], [2], [0, 0, 0, 1, 1, 2], [0], [0]>} : vector<2x32x32xf32>, vector<2x32x8xf32>, vector<2x32x8xf32> -> vector<2x32x8xf32>
    "tpu.trace_stop"() : () -> ()
    %632 = vector.shape_cast %631 : vector<2x32x8xf32> to vector<64x8xf32>
    %633 = vector.extract_strided_slice %611 {offsets = [0, 0, 8], sizes = [2, 32, 8], strides = [1, 1, 1]} : vector<2x32x32xf32> to vector<2x32x8xf32>
    %634 = vector.extract_strided_slice %612 {offsets = [0, 0, 8], sizes = [2, 32, 8], strides = [1, 1, 1]} : vector<2x32x32xf32> to vector<2x32x8xf32>
    %635 = vector.extract_strided_slice %613 {offsets = [0, 0, 8], sizes = [2, 32, 8], strides = [1, 1, 1]} : vector<2x32x32xf32> to vector<2x32x8xf32>
    "tpu.trace_start"() <{level = 10 : i32, message = "bnd,bmd->bnm"}> : () -> ()
    %cst_211 = arith.constant dense<0.000000e+00> : vector<2x32x32xf32>
    %636 = tpu.matmul %633, %634, %cst_211 {dimension_numbers = #tpu.dot_dimension_numbers<[2], [2], [1], [1], [0, 0, 0, 1, 1, 1], [0], [0]>} : vector<2x32x8xf32>, vector<2x32x8xf32>, vector<2x32x32xf32> -> vector<2x32x32xf32>
    "tpu.trace_stop"() : () -> ()
    %637 = vector.shape_cast %42 : vector<32x32xf32> to vector<1x32x32xf32>
    %638 = vector.broadcast %637 : vector<1x32x32xf32> to vector<2x32x32xf32>
    %639 = arith.addf %636, %638 : vector<2x32x32xf32>
    %cst_212 = arith.constant dense<0xFF800000> : vector<2x32xf32>
    %640 = vector.multi_reduction <maximumf>, %639, %cst_212 [2] : vector<2x32x32xf32> to vector<2x32xf32>
    %641 = vector.shape_cast %640 : vector<2x32xf32> to vector<2x32x1xf32>
    %642 = vector.broadcast %641 : vector<2x32x1xf32> to vector<2x32x32xf32>
    %643 = arith.subf %639, %642 : vector<2x32x32xf32>
    %644 = math.exp %643 : vector<2x32x32xf32>
    %cst_213 = arith.constant dense<0.000000e+00> : vector<2x32xf32>
    %645 = vector.multi_reduction <add>, %644, %cst_213 [2] : vector<2x32x32xf32> to vector<2x32xf32>
    %646 = vector.shape_cast %645 : vector<2x32xf32> to vector<2x32x1xf32>
    %647 = tpu.reciprocal %646 {approx = true} : vector<2x32x1xf32> -> vector<2x32x1xf32>
    %648 = vector.broadcast %647 : vector<2x32x1xf32> to vector<2x32x32xf32>
    %649 = arith.mulf %644, %648 : vector<2x32x32xf32>
    "tpu.trace_start"() <{level = 10 : i32, message = "bnm,bmd->bnd"}> : () -> ()
    %cst_214 = arith.constant dense<0.000000e+00> : vector<2x32x8xf32>
    %650 = tpu.matmul %649, %635, %cst_214 {dimension_numbers = #tpu.dot_dimension_numbers<[2], [1], [1], [2], [0, 0, 0, 1, 1, 2], [0], [0]>} : vector<2x32x32xf32>, vector<2x32x8xf32>, vector<2x32x8xf32> -> vector<2x32x8xf32>
    "tpu.trace_stop"() : () -> ()
    %651 = vector.shape_cast %650 : vector<2x32x8xf32> to vector<64x8xf32>
    %652 = vector.extract_strided_slice %611 {offsets = [0, 0, 16], sizes = [2, 32, 8], strides = [1, 1, 1]} : vector<2x32x32xf32> to vector<2x32x8xf32>
    %653 = vector.extract_strided_slice %612 {offsets = [0, 0, 16], sizes = [2, 32, 8], strides = [1, 1, 1]} : vector<2x32x32xf32> to vector<2x32x8xf32>
    %654 = vector.extract_strided_slice %613 {offsets = [0, 0, 16], sizes = [2, 32, 8], strides = [1, 1, 1]} : vector<2x32x32xf32> to vector<2x32x8xf32>
    "tpu.trace_start"() <{level = 10 : i32, message = "bnd,bmd->bnm"}> : () -> ()
    %cst_215 = arith.constant dense<0.000000e+00> : vector<2x32x32xf32>
    %655 = tpu.matmul %652, %653, %cst_215 {dimension_numbers = #tpu.dot_dimension_numbers<[2], [2], [1], [1], [0, 0, 0, 1, 1, 1], [0], [0]>} : vector<2x32x8xf32>, vector<2x32x8xf32>, vector<2x32x32xf32> -> vector<2x32x32xf32>
    "tpu.trace_stop"() : () -> ()
    %656 = vector.shape_cast %42 : vector<32x32xf32> to vector<1x32x32xf32>
    %657 = vector.broadcast %656 : vector<1x32x32xf32> to vector<2x32x32xf32>
    %658 = arith.addf %655, %657 : vector<2x32x32xf32>
    %cst_216 = arith.constant dense<0xFF800000> : vector<2x32xf32>
    %659 = vector.multi_reduction <maximumf>, %658, %cst_216 [2] : vector<2x32x32xf32> to vector<2x32xf32>
    %660 = vector.shape_cast %659 : vector<2x32xf32> to vector<2x32x1xf32>
    %661 = vector.broadcast %660 : vector<2x32x1xf32> to vector<2x32x32xf32>
    %662 = arith.subf %658, %661 : vector<2x32x32xf32>
    %663 = math.exp %662 : vector<2x32x32xf32>
    %cst_217 = arith.constant dense<0.000000e+00> : vector<2x32xf32>
    %664 = vector.multi_reduction <add>, %663, %cst_217 [2] : vector<2x32x32xf32> to vector<2x32xf32>
    %665 = vector.shape_cast %664 : vector<2x32xf32> to vector<2x32x1xf32>
    %666 = tpu.reciprocal %665 {approx = true} : vector<2x32x1xf32> -> vector<2x32x1xf32>
    %667 = vector.broadcast %666 : vector<2x32x1xf32> to vector<2x32x32xf32>
    %668 = arith.mulf %663, %667 : vector<2x32x32xf32>
    "tpu.trace_start"() <{level = 10 : i32, message = "bnm,bmd->bnd"}> : () -> ()
    %cst_218 = arith.constant dense<0.000000e+00> : vector<2x32x8xf32>
    %669 = tpu.matmul %668, %654, %cst_218 {dimension_numbers = #tpu.dot_dimension_numbers<[2], [1], [1], [2], [0, 0, 0, 1, 1, 2], [0], [0]>} : vector<2x32x32xf32>, vector<2x32x8xf32>, vector<2x32x8xf32> -> vector<2x32x8xf32>
    "tpu.trace_stop"() : () -> ()
    %670 = vector.shape_cast %669 : vector<2x32x8xf32> to vector<64x8xf32>
    %671 = vector.extract_strided_slice %611 {offsets = [0, 0, 24], sizes = [2, 32, 8], strides = [1, 1, 1]} : vector<2x32x32xf32> to vector<2x32x8xf32>
    %672 = vector.extract_strided_slice %612 {offsets = [0, 0, 24], sizes = [2, 32, 8], strides = [1, 1, 1]} : vector<2x32x32xf32> to vector<2x32x8xf32>
    %673 = vector.extract_strided_slice %613 {offsets = [0, 0, 24], sizes = [2, 32, 8], strides = [1, 1, 1]} : vector<2x32x32xf32> to vector<2x32x8xf32>
    "tpu.trace_start"() <{level = 10 : i32, message = "bnd,bmd->bnm"}> : () -> ()
    %cst_219 = arith.constant dense<0.000000e+00> : vector<2x32x32xf32>
    %674 = tpu.matmul %671, %672, %cst_219 {dimension_numbers = #tpu.dot_dimension_numbers<[2], [2], [1], [1], [0, 0, 0, 1, 1, 1], [0], [0]>} : vector<2x32x8xf32>, vector<2x32x8xf32>, vector<2x32x32xf32> -> vector<2x32x32xf32>
    "tpu.trace_stop"() : () -> ()
    %675 = vector.shape_cast %42 : vector<32x32xf32> to vector<1x32x32xf32>
    %676 = vector.broadcast %675 : vector<1x32x32xf32> to vector<2x32x32xf32>
    %677 = arith.addf %674, %676 : vector<2x32x32xf32>
    %cst_220 = arith.constant dense<0xFF800000> : vector<2x32xf32>
    %678 = vector.multi_reduction <maximumf>, %677, %cst_220 [2] : vector<2x32x32xf32> to vector<2x32xf32>
    %679 = vector.shape_cast %678 : vector<2x32xf32> to vector<2x32x1xf32>
    %680 = vector.broadcast %679 : vector<2x32x1xf32> to vector<2x32x32xf32>
    %681 = arith.subf %677, %680 : vector<2x32x32xf32>
    %682 = math.exp %681 : vector<2x32x32xf32>
    %cst_221 = arith.constant dense<0.000000e+00> : vector<2x32xf32>
    %683 = vector.multi_reduction <add>, %682, %cst_221 [2] : vector<2x32x32xf32> to vector<2x32xf32>
    %684 = vector.shape_cast %683 : vector<2x32xf32> to vector<2x32x1xf32>
    %685 = tpu.reciprocal %684 {approx = true} : vector<2x32x1xf32> -> vector<2x32x1xf32>
    %686 = vector.broadcast %685 : vector<2x32x1xf32> to vector<2x32x32xf32>
    %687 = arith.mulf %682, %686 : vector<2x32x32xf32>
    "tpu.trace_start"() <{level = 10 : i32, message = "bnm,bmd->bnd"}> : () -> ()
    %cst_222 = arith.constant dense<0.000000e+00> : vector<2x32x8xf32>
    %688 = tpu.matmul %687, %673, %cst_222 {dimension_numbers = #tpu.dot_dimension_numbers<[2], [1], [1], [2], [0, 0, 0, 1, 1, 2], [0], [0]>} : vector<2x32x32xf32>, vector<2x32x8xf32>, vector<2x32x8xf32> -> vector<2x32x8xf32>
    "tpu.trace_stop"() : () -> ()
    %689 = vector.shape_cast %688 : vector<2x32x8xf32> to vector<64x8xf32>
    %690 = tpu.concatenate %632, %651, %670, %689 in 1 : vector<64x8xf32>, vector<64x8xf32>, vector<64x8xf32>, vector<64x8xf32> -> vector<64x32xf32>
    %cst_223 = arith.constant dense<0.000000e+00> : vector<64x32xf32>
    %691 = tpu.matmul %690, %600, %cst_223 {dimension_numbers = #tpu.dot_dimension_numbers<[1], [0], [0], [1], [0, 0, 1, 1], [], []>} : vector<64x32xf32>, vector<32x32xf32>, vector<64x32xf32> -> vector<64x32xf32>
    %692 = vector.broadcast %602 : vector<1x32xf32> to vector<64x32xf32>
    %693 = arith.addf %691, %692 : vector<64x32xf32>
    %694 = arith.addf %570, %693 : vector<64x32xf32>
    %c1_224 = arith.constant 1 : index
    %c0_225 = arith.constant 0 : index
    %c0_226 = arith.constant 0 : index
    %695 = vector.load %arg25[%c1_224, %c0_225, %c0_226] : memref<2x1x32xf32, #tpu.memory_space<vmem>>, vector<1x1x32xf32>
    %696 = vector.shape_cast %695 : vector<1x1x32xf32> to vector<1x32xf32>
    %c1_227 = arith.constant 1 : index
    %c0_228 = arith.constant 0 : index
    %c0_229 = arith.constant 0 : index
    %697 = vector.load %arg26[%c1_227, %c0_228, %c0_229] : memref<2x1x32xf32, #tpu.memory_space<vmem>>, vector<1x1x32xf32>
    %698 = vector.shape_cast %697 : vector<1x1x32xf32> to vector<1x32xf32>
    %cst_230 = arith.constant dense<0.000000e+00> : vector<64xf32>
    %699 = vector.multi_reduction <add>, %694, %cst_230 [1] : vector<64x32xf32> to vector<64xf32>
    %700 = vector.shape_cast %699 : vector<64xf32> to vector<64x1xf32>
    %cst_231 = arith.constant 3.200000e+01 : f32
    %701 = vector.broadcast %cst_231 : f32 to vector<64x1xf32>
    %702 = arith.divf %700, %701 : vector<64x1xf32>
    %703 = vector.broadcast %702 : vector<64x1xf32> to vector<64x32xf32>
    %704 = arith.subf %694, %703 : vector<64x32xf32>
    %705 = arith.mulf %704, %704 : vector<64x32xf32>
    %cst_232 = arith.constant dense<0.000000e+00> : vector<64xf32>
    %706 = vector.multi_reduction <add>, %705, %cst_232 [1] : vector<64x32xf32> to vector<64xf32>
    %707 = vector.shape_cast %706 : vector<64xf32> to vector<64x1xf32>
    %cst_233 = arith.constant 3.200000e+01 : f32
    %708 = vector.broadcast %cst_233 : f32 to vector<64x1xf32>
    %709 = arith.divf %707, %708 : vector<64x1xf32>
    %cst_234 = arith.constant 9.99999996E-13 : f32
    %710 = vector.broadcast %cst_234 : f32 to vector<64x1xf32>
    %711 = arith.addf %709, %710 : vector<64x1xf32>
    %712 = math.rsqrt %711 : vector<64x1xf32>
    %713 = vector.broadcast %712 : vector<64x1xf32> to vector<64x32xf32>
    %714 = arith.mulf %704, %713 : vector<64x32xf32>
    %715 = vector.broadcast %696 : vector<1x32xf32> to vector<64x32xf32>
    %716 = arith.mulf %714, %715 : vector<64x32xf32>
    %717 = vector.broadcast %698 : vector<1x32xf32> to vector<64x32xf32>
    %718 = arith.addf %716, %717 : vector<64x32xf32>
    %c1_235 = arith.constant 1 : index
    %c0_236 = arith.constant 0 : index
    %c0_237 = arith.constant 0 : index
    %719 = vector.load %arg27[%c1_235, %c0_236, %c0_237] : memref<2x32x64xf32, #tpu.memory_space<vmem>>, vector<1x32x64xf32>
    %720 = vector.shape_cast %719 : vector<1x32x64xf32> to vector<32x64xf32>
    %cst_238 = arith.constant dense<0.000000e+00> : vector<64x64xf32>
    %721 = tpu.matmul %718, %720, %cst_238 {dimension_numbers = #tpu.dot_dimension_numbers<[1], [0], [0], [1], [0, 0, 1, 1], [], []>} : vector<64x32xf32>, vector<32x64xf32>, vector<64x64xf32> -> vector<64x64xf32>
    %c1_239 = arith.constant 1 : index
    %c0_240 = arith.constant 0 : index
    %c0_241 = arith.constant 0 : index
    %722 = vector.load %arg28[%c1_239, %c0_240, %c0_241] : memref<2x1x64xf32, #tpu.memory_space<vmem>>, vector<1x1x64xf32>
    %723 = vector.shape_cast %722 : vector<1x1x64xf32> to vector<1x64xf32>
    %724 = vector.broadcast %723 : vector<1x64xf32> to vector<64x64xf32>
    %725 = arith.addf %721, %724 : vector<64x64xf32>
    %cst_242 = arith.constant 5.000000e-01 : f32
    %726 = vector.broadcast %cst_242 : f32 to vector<64x64xf32>
    %727 = arith.mulf %726, %725 : vector<64x64xf32>
    %cst_243 = arith.constant 4.471500e-02 : f32
    %728 = vector.broadcast %cst_243 : f32 to vector<64x64xf32>
    %729 = arith.mulf %728, %725 : vector<64x64xf32>
    %730 = arith.mulf %729, %725 : vector<64x64xf32>
    %731 = arith.mulf %730, %725 : vector<64x64xf32>
    %732 = arith.addf %725, %731 : vector<64x64xf32>
    %cst_244 = arith.constant 0.797884583 : f32
    %733 = vector.broadcast %cst_244 : f32 to vector<64x64xf32>
    %734 = arith.mulf %733, %732 : vector<64x64xf32>
    %735 = math.tanh %734 : vector<64x64xf32>
    %cst_245 = arith.constant 1.000000e+00 : f32
    %736 = vector.broadcast %cst_245 : f32 to vector<64x64xf32>
    %737 = arith.addf %736, %735 : vector<64x64xf32>
    %738 = arith.mulf %727, %737 : vector<64x64xf32>
    %c1_246 = arith.constant 1 : index
    %c0_247 = arith.constant 0 : index
    %c0_248 = arith.constant 0 : index
    %739 = vector.load %arg29[%c1_246, %c0_247, %c0_248] : memref<2x64x32xf32, #tpu.memory_space<vmem>>, vector<1x64x32xf32>
    %740 = vector.shape_cast %739 : vector<1x64x32xf32> to vector<64x32xf32>
    %cst_249 = arith.constant dense<0.000000e+00> : vector<64x32xf32>
    %741 = tpu.matmul %738, %740, %cst_249 {dimension_numbers = #tpu.dot_dimension_numbers<[1], [0], [0], [1], [0, 0, 1, 1], [], []>} : vector<64x64xf32>, vector<64x32xf32>, vector<64x32xf32> -> vector<64x32xf32>
    %742 = arith.addf %694, %741 : vector<64x32xf32>
    %c1_250 = arith.constant 1 : index
    %c0_251 = arith.constant 0 : index
    %c0_252 = arith.constant 0 : index
    %743 = vector.load %arg30[%c1_250, %c0_251, %c0_252] : memref<2x1x32xf32, #tpu.memory_space<vmem>>, vector<1x1x32xf32>
    %744 = vector.shape_cast %743 : vector<1x1x32xf32> to vector<1x32xf32>
    %745 = vector.broadcast %744 : vector<1x32xf32> to vector<64x32xf32>
    %746 = arith.addf %742, %745 : vector<64x32xf32>
    %c0_253 = arith.constant 0 : index
    %c0_254 = arith.constant 0 : index
    %747 = vector.load %arg9[%c0_253, %c0_254] : memref<1x32xf32, #tpu.memory_space<vmem>>, vector<1x32xf32>
    %c0_255 = arith.constant 0 : index
    %c0_256 = arith.constant 0 : index
    %748 = vector.load %arg10[%c0_255, %c0_256] : memref<1x32xf32, #tpu.memory_space<vmem>>, vector<1x32xf32>
    %cst_257 = arith.constant dense<0.000000e+00> : vector<64xf32>
    %749 = vector.multi_reduction <add>, %746, %cst_257 [1] : vector<64x32xf32> to vector<64xf32>
    %750 = vector.shape_cast %749 : vector<64xf32> to vector<64x1xf32>
    %cst_258 = arith.constant 3.200000e+01 : f32
    %751 = vector.broadcast %cst_258 : f32 to vector<64x1xf32>
    %752 = arith.divf %750, %751 : vector<64x1xf32>
    %753 = vector.broadcast %752 : vector<64x1xf32> to vector<64x32xf32>
    %754 = arith.subf %746, %753 : vector<64x32xf32>
    %755 = arith.mulf %754, %754 : vector<64x32xf32>
    %cst_259 = arith.constant dense<0.000000e+00> : vector<64xf32>
    %756 = vector.multi_reduction <add>, %755, %cst_259 [1] : vector<64x32xf32> to vector<64xf32>
    %757 = vector.shape_cast %756 : vector<64xf32> to vector<64x1xf32>
    %cst_260 = arith.constant 3.200000e+01 : f32
    %758 = vector.broadcast %cst_260 : f32 to vector<64x1xf32>
    %759 = arith.divf %757, %758 : vector<64x1xf32>
    %cst_261 = arith.constant 9.99999974E-6 : f32
    %760 = vector.broadcast %cst_261 : f32 to vector<64x1xf32>
    %761 = arith.addf %759, %760 : vector<64x1xf32>
    %762 = math.rsqrt %761 : vector<64x1xf32>
    %763 = vector.broadcast %762 : vector<64x1xf32> to vector<64x32xf32>
    %764 = arith.mulf %754, %763 : vector<64x32xf32>
    %765 = vector.broadcast %747 : vector<1x32xf32> to vector<64x32xf32>
    %766 = arith.mulf %764, %765 : vector<64x32xf32>
    %767 = vector.broadcast %748 : vector<1x32xf32> to vector<64x32xf32>
    %768 = arith.addf %766, %767 : vector<64x32xf32>
    %cst_262 = arith.constant 5.000000e-01 : f32
    %769 = vector.broadcast %cst_262 : f32 to vector<64x32xf32>
    %770 = arith.mulf %769, %768 : vector<64x32xf32>
    %cst_263 = arith.constant 4.471500e-02 : f32
    %771 = vector.broadcast %cst_263 : f32 to vector<64x32xf32>
    %772 = arith.mulf %771, %768 : vector<64x32xf32>
    %773 = arith.mulf %772, %768 : vector<64x32xf32>
    %774 = arith.mulf %773, %768 : vector<64x32xf32>
    %775 = arith.addf %768, %774 : vector<64x32xf32>
    %cst_264 = arith.constant 0.797884583 : f32
    %776 = vector.broadcast %cst_264 : f32 to vector<64x32xf32>
    %777 = arith.mulf %776, %775 : vector<64x32xf32>
    %778 = math.tanh %777 : vector<64x32xf32>
    %cst_265 = arith.constant 1.000000e+00 : f32
    %779 = vector.broadcast %cst_265 : f32 to vector<64x32xf32>
    %780 = arith.addf %779, %778 : vector<64x32xf32>
    %781 = arith.mulf %770, %780 : vector<64x32xf32>
    %c0_266 = arith.constant 0 : index
    %c0_267 = arith.constant 0 : index
    %782 = vector.load %arg11[%c0_266, %c0_267] : memref<32x24xf32, #tpu.memory_space<vmem>>, vector<32x24xf32>
    %cst_268 = arith.constant dense<0.000000e+00> : vector<64x24xf32>
    %783 = tpu.matmul %781, %782, %cst_268 {dimension_numbers = #tpu.dot_dimension_numbers<[1], [0], [0], [1], [0, 0, 1, 1], [], []>} : vector<64x32xf32>, vector<32x24xf32>, vector<64x24xf32> -> vector<64x24xf32>
    %c0_269 = arith.constant 0 : index
    %c0_270 = arith.constant 0 : index
    %784 = vector.load %arg12[%c0_269, %c0_270] : memref<1x24xf32, #tpu.memory_space<vmem>>, vector<1x24xf32>
    %785 = vector.broadcast %784 : vector<1x24xf32> to vector<64x24xf32>
    %786 = arith.addf %783, %785 : vector<64x24xf32>
    %787 = vector.shape_cast %786 : vector<64x24xf32> to vector<2x4x8x24xf32>
    %c0_271 = arith.constant 0 : index
    %c0_272 = arith.constant 0 : index
    %c0_273 = arith.constant 0 : index
    %c0_274 = arith.constant 0 : index
    %788 = vector.load %arg31[%c0_271, %c0_272, %c0_273, %c0_274] : memref<2x4x8x24xf32, #tpu.memory_space<vmem>>, vector<2x4x8x24xf32>
    tpu.vector_store %arg31[%c0_271, %c0_272, %c0_273, %c0_274], %787 {strides = array<i32>} : memref<2x4x8x24xf32, #tpu.memory_space<vmem>>, vector<2x4x8x24xf32>,
    return
  }
}

</mosaic_0001>

<bundles_post_ra>
// kernel: msa_decoder_forward.1
= control target key start
LH: loop header
LB: loop body
LE: loop exit
PB: predicated region body
PF: predicated region fallthrough
CT: control target
= control target key end

     0   :  { %s23144_s6 = smov 1   ;;  %s23145_s10 = smov 2   ;;  %s27077_s0 = inlined_call_operand.smem [shape: u32[32], index: -1, kind: input, shape index: {}] }
   0x1   :  { %s23215_s5 = sld [smem:[%s27077_s0]]   ;;  %s23146_s14 = smov 3  }
   0x2   :  { %s23220_s9 = sld [smem:[%s27077_s0 + %s23144_s6]]   ;;  %s23147_s18 = smov 4  }
   0x3   :  { %s23225_s13 = sld [smem:[%s27077_s0 + %s23145_s10]]   ;;  %s23148_s22 = smov 5  }
   0x4   :  { %s23230_s17 = sld [smem:[%s27077_s0 + %s23146_s14]]   ;;  %s23149_s26 = smov 6  }
   0x5   :  { %s23235_s21 = sld [smem:[%s27077_s0 + %s23147_s18]]   ;;  %s23150_s30 = smov 7  }
   0x6   :  { %s23240_s25 = sld [smem:[%s27077_s0 + %s23148_s22]]   ;;  %s23151_s4 = smov 8  }
   0x7   :  { %27091 = sst [smem:[#allocation32_spill]] %s23215_s5  ;;  %s23152_s10 = smov 9  }
   0x8   :  { %s23245_s29 = sld [smem:[%s27077_s0 + %s23149_s26]]   ;;  %s23153_s15 = smov 10  }
   0x9   :  { %s23250_s3 = sld [smem:[%s27077_s0 + %s23150_s30]]   ;;  %s23154_s20 = smov 11  }
   0xa   :  { %27092 = sst [smem:[#allocation33_spill]] %s23230_s17  ;;  %s23155_s26 = smov 12  }
   0xb   :  { %27093 = sst [smem:[#allocation34_spill]] %s23235_s21  ;;  %s23156_s1 = smov 13  }
   0xc   :  { %s23255_s8 = sld [smem:[%s27077_s0 + %s23151_s4]]   ;;  %s23157_s7 = smov 14  }
   0xd   :  { %s23260_s14 = sld [smem:[%s27077_s0 + %s23152_s10]]   ;;  %s23159_s22 = smov 16  }
   0xe   :  { %s23265_s19 = sld [smem:[%s27077_s0 + %s23153_s15]]   ;;  %s23158_s15 = smov 15  }
   0xf   :  { %s23270_s24 = sld [smem:[%s27077_s0 + %s23154_s20]]   ;;  %s23160_s28 = smov 17  }
  0x10   :  { %s23275_s30 = sld [smem:[%s27077_s0 + %s23155_s26]]  }
  0x11   :  { %s23280_s6 = sld [smem:[%s27077_s0 + %s23156_s1]]  }
  0x12   :  { %s23285_s12 = sld [smem:[%s27077_s0 + %s23157_s7]]   ;;  %s23161_s7 = smov 18  }
  0x13   :  { %s23290_s20 = sld [smem:[%s27077_s0 + %s23158_s15]]   ;;  %s23162_s15 = smov 19  }
  0x14   :  { %s23295_s27 = sld [smem:[%s27077_s0 + %s23159_s22]]   ;;  %s23163_s22 = smov 20  }
  0x15   :  { %27094 = sst [smem:[#allocation35_spill]] %s23270_s24 }
  0x16   :  { %27095 = sst [smem:[#allocation36_spill]] %s23275_s30 }
  0x17   :  { %27096 = sst [smem:[#allocation37_spill]] %s23280_s6 }
  0x18   :  { %27097 = sst [smem:[#allocation38_spill]] %s23285_s12 }
  0x19   :  { %27098 = sst [smem:[#allocation39_spill]] %s23290_s20 }
  0x1a   :  { %27099 = sst [smem:[#allocation40_spill]] %s23295_s27 }
  0x1b   :  { %s23300_s4 = sld [smem:[%s27077_s0 + %s23160_s28]]   ;;  %s23164_s28 = smov 21  }
  0x1c   :  { %s23305_s30 = sld [smem:[%s27077_s0 + %s23161_s7]]   ;;  %s23165_s7 = smov 22  }
  0x1d   :  { %s23310_s24 = sld [smem:[%s27077_s0 + %s23162_s15]]   ;;  %s23166_s15 = smov 23  }
  0x1e   :  { %s23315_s21 = sld [smem:[%s27077_s0 + %s23163_s22]]   ;;  %s23167_s22 = smov 24  }
  0x1f   :  { %s23330_s27 = sld [smem:[%s27077_s0 + %s23166_s15]]   ;;  %s23170_s15 = smov 27  }
  0x20   :  { %s23335_s12 = sld [smem:[%s27077_s0 + %s23167_s22]]   ;;  %s23171_s22 = smov 28  }
  0x21   :  { %27100 = sst [smem:[#allocation41_spill]] %s23300_s4 }
  0x22   :  { %27101 = sst [smem:[#allocation42_spill]] %s23305_s30 }
  0x23   :  { %s23320_s4 = sld [smem:[%s27077_s0 + %s23164_s28]]   ;;  %s23168_s28 = smov 25  }
  0x24   :  { %s23325_s30 = sld [smem:[%s27077_s0 + %s23165_s7]]   ;;  %s23169_s7 = smov 26  }
  0x25   :  { %27103 = sst [smem:[#allocation44_spill]] %s23330_s27 }
  0x26   :  { %s23345_s6 = sld [smem:[%s27077_s0 + %s23169_s7]]   ;;  %s23173_s7 = smov 30  }
  0x27   :  { %s23350_s27 = sld [smem:[%s27077_s0 + %s23170_s15]]   ;;  %s23174_s15 = smov 31  }
  0x28   :  { %s23355_s20 = sld [smem:[%s27077_s0 + %s23171_s22]]  }
  0x29   :  { %27102 = sst [smem:[#allocation43_spill]] %s23320_s4 }
  0x2a   :  { %s23340_s4 = sld [smem:[%s27077_s0 + %s23168_s28]]   ;;  %s23172_s28 = smov 29  }
  0x2b   :  { %s23360_s17 = sld [smem:[%s27077_s0 + %s23172_s28]]  }
  0x2c   :  { %s23365_s5 = sld [smem:[%s27077_s0 + %s23173_s7]]  }
  0x2d   :  { %27104 = sst [smem:[#allocation45_spill]] %s23350_s27 }
  0x2e   :  { %s23370_s27 = sld [smem:[%s27077_s0 + %s23174_s15]]  }
  0x2f   :  { %68 = vsyncpa [#allocation3], 0 }
  0x30   :  { %69 = vsyncpa [#allocation6], 0 }
  0x31   :  { %70 = vsyncpa [#allocation9], 0 }
  0x32   :  { %71 = vsyncpa [#allocation12], 0 }
  0x33   :  { %72 = vsyncpa [#allocation15], 0 }
  0x34   :  { %73 = vsyncpa [#allocation18], 0 }
  0x35   :  { %74 = vsyncpa [#allocation21], 0 }
  0x36   :  { %75 = vsyncpa [#allocation4], 0  ;;  %s23175_s22 = smov [#allocation5]   ;;  %s23176_s26 = smov [#allocation8]  }
  0x37   :  { %s104_s23 = sshll.u32 %s23175_s22, 4  ;;  %s124_s28 = sshll.u32 %s23176_s26, 4  ;;  %s105_s23 = int_to_ptr.vmem [resolvable:$true] %s104_s23  ;;  %s125_s28 = int_to_ptr.vmem [resolvable:$true] %s124_s28 }
  0x38   :  { %s22820_s1 = scalar_lea.hbm %s23250_s3, 16 }
  0x39   :  { %p22821_p0 = scmp.ne.s32.totalorder %s23250_s3, %s22820_s1  ;;  %p22824_p1 = scmp.lt.u32.totalorder %s22820_s1, %s23250_s3 }
  0x3b   :  { %p22826_p2 = pnand %p22824_p1, %p22821_p0 }
  0x3d   :  { %22829 = shalt.err (!%p22826_p2)
}
  0x3e   :  { %s22830_s0 = scalar_lea.vmem %s105_s23, 16  ;;  %s22834_s2 = scalar_lea.vmem %s105_s23, 32 }
  0x3f   :  { %p22831_p3 = scmp.ne.s32.totalorder %s105_s23, %s22830_s0  ;;  %p22835_p4 = scmp.lt.s32.totalorder %s105_s23, %s105_s23 }
  0x40   :  { %p22836_p5 = scmp.lt.s32.totalorder %s22834_s2, %s22830_s0 }
  0x42   :  { %p22837_p6 = por %p22836_p5, %p22835_p4 }
  0x44   :  { %p22838_p7 = pnand %p22837_p6, %p22831_p3 }
  0x46   :  { %22841 = shalt.err (!%p22838_p7)
}
  0x47   :  { %107 = dma.hbm_to_vmem [thread:$0]  %s23250_s3, 16, %s105_s23, [#allocation6]  }
  0x48   :  { %s22842_s7 = scalar_lea.hbm %s23260_s14, 16 }
  0x49   :  { %p22843_p8 = scmp.ne.s32.totalorder %s23260_s14, %s22842_s7  ;;  %p22846_p9 = scmp.lt.u32.totalorder %s22842_s7, %s23260_s14 }
  0x4b   :  { %p22848_p10 = pnand %p22846_p9, %p22843_p8 }
  0x4d   :  { %22851 = shalt.err (!%p22848_p10)
}
  0x4e   :  { %s22852_s10 = scalar_lea.vmem %s125_s28, 16  ;;  %s22856_s11 = scalar_lea.vmem %s125_s28, 32 }
  0x4f   :  { %p22853_p11 = scmp.ne.s32.totalorder %s125_s28, %s22852_s10  ;;  %p22857_p12 = scmp.lt.s32.totalorder %s125_s28, %s125_s28 }
  0x50   :  { %p22858_p13 = scmp.lt.s32.totalorder %s22856_s11, %s22852_s10 }
  0x52   :  { %p22859_p0 = por %p22858_p13, %p22857_p12 }
  0x54   :  { %p22860_p1 = pnand %p22859_p0, %p22853_p11 }
  0x56   :  { %22863 = shalt.err (!%p22860_p1)
}
  0x57   :  { %127 = dma.hbm_to_vmem [thread:$0]  %s23260_s14, 16, %s125_s28, [#allocation9]  }
  0x58   :  { %s23177_s15 = smov [#allocation11]   ;;  %s22864_s16 = scalar_lea.hbm %s23310_s24, 32 }
  0x59   :  { %s159_s3 = sshll.u32 %s23177_s15, 4  ;;  %p22865_p2 = scmp.ne.s32.totalorder %s23310_s24, %s22864_s16  ;;  %s160_s3 = int_to_ptr.vmem [resolvable:$true] %s159_s3 }
  0x5a   :  { %p22868_p3 = scmp.lt.u32.totalorder %s22864_s16, %s23310_s24 }
  0x5c   :  { %p22870_p4 = pnand %p22868_p3, %p22865_p2 }
  0x5e   :  { %22873 = shalt.err (!%p22870_p4)
}
  0x5f   :  { %s22874_s18 = scalar_lea.vmem %s160_s3, 32  ;;  %p22879_p6 = scmp.lt.s32.totalorder %s160_s3, %s160_s3 }
  0x60   :  { %p22875_p5 = scmp.ne.s32.totalorder %s160_s3, %s22874_s18  ;;  %p22880_p7 = scmp.lt.s32.totalorder %s22874_s18, %s22874_s18 }
  0x62   :  { %p22881_p8 = por %p22880_p7, %p22879_p6 }
  0x64   :  { %p22882_p9 = pnand %p22881_p8, %p22875_p5 }
  0x66   :  { %22885 = shalt.err (!%p22882_p9)
}
  0x67   :  { %s23178_s22 = smov 16   ;;  %s23179_s14 = smov 1  }
  0x68   :  { %165 = dma.hbm_to_vmem [thread:$0]  %s23310_s24, 32, %s160_s3, [#allocation12], %s23178_s22, %s23178_s22, %s23179_s14  }
  0x69   :  { %s23180_s23 = smov [#allocation14]   ;;  %s23181_s28 = smov [#allocation17]  }
  0x6a   :  { %s185_s26 = sshll.u32 %s23180_s23, 4  ;;  %s211_s1 = sshll.u32 %s23181_s28, 4  ;;  %s186_s26 = int_to_ptr.vmem [resolvable:$true] %s185_s26  ;;  %s212_s1 = int_to_ptr.vmem [resolvable:$true] %s211_s1 }
  0x6b   :  { %s22886_s0 = scalar_lea.hbm %s23325_s30, 32 }
  0x6c   :  { %p22887_p10 = scmp.ne.s32.totalorder %s23325_s30, %s22886_s0  ;;  %p22890_p11 = scmp.lt.u32.totalorder %s22886_s0, %s23325_s30 }
  0x6e   :  { %p22892_p12 = pnand %p22890_p11, %p22887_p10 }
  0x70   :  { %22895 = shalt.err (!%p22892_p12)
}
  0x71   :  { %s22896_s2 = scalar_lea.vmem %s186_s26, 32  ;;  %p22901_p0 = scmp.lt.s32.totalorder %s186_s26, %s186_s26 }
  0x72   :  { %p22897_p13 = scmp.ne.s32.totalorder %s186_s26, %s22896_s2  ;;  %p22902_p1 = scmp.lt.s32.totalorder %s22896_s2, %s22896_s2 }
  0x74   :  { %p22903_p2 = por %p22902_p1, %p22901_p0 }
  0x76   :  { %p22904_p3 = pnand %p22903_p2, %p22897_p13 }
  0x78   :  { %22907 = shalt.err (!%p22904_p3)
}
  0x79   :  { %191 = dma.hbm_to_vmem [thread:$0]  %s23325_s30, 32, %s186_s26, [#allocation15], %s23178_s22, %s23178_s22, %s23179_s14  }
  0x7a   :  { %s22908_s24 = scalar_lea.hbm %s23340_s4, 32 }
  0x7b   :  { %p22909_p4 = scmp.ne.s32.totalorder %s23340_s4, %s22908_s24  ;;  %p22912_p5 = scmp.lt.u32.totalorder %s22908_s24, %s23340_s4 }
  0x7d   :  { %p22914_p6 = pnand %p22912_p5, %p22909_p4 }
  0x7f   :  { %22917 = shalt.err (!%p22914_p6)
}
  0x80   :  { %s22918_s7 = scalar_lea.vmem %s212_s1, 32  ;;  %p22923_p8 = scmp.lt.s32.totalorder %s212_s1, %s212_s1 }
  0x81   :  { %p22919_p7 = scmp.ne.s32.totalorder %s212_s1, %s22918_s7  ;;  %p22924_p9 = scmp.lt.s32.totalorder %s22918_s7, %s22918_s7 }
  0x83   :  { %p22925_p10 = por %p22924_p9, %p22923_p8 }
  0x85   :  { %p22926_p11 = pnand %p22925_p10, %p22919_p7 }
  0x87   :  { %22929 = shalt.err (!%p22926_p11)
}
  0x88   :  { %217 = dma.hbm_to_vmem [thread:$0]  %s23340_s4, 32, %s212_s1, [#allocation18], %s23178_s22, %s23178_s22, %s23179_s14  }
  0x89   :  { %s23182_s30 = smov [#allocation20]   ;;  %s23183_s11 = smov [#allocation2]  }
  0x8a   :  { %s237_s10 = sshll.u32 %s23182_s30, 4  ;;  %s94_s15 = sshll.u32 %s23183_s11, 4  ;;  %s238_s10 = int_to_ptr.vmem [resolvable:$true] %s237_s10  ;;  %s95_s15 = int_to_ptr.vmem [resolvable:$true] %s94_s15 }
  0x8b   :  { %s22930_s3 = scalar_lea.hbm %s23355_s20, 32 }
  0x8c   :  { %p22931_p12 = scmp.ne.s32.totalorder %s23355_s20, %s22930_s3  ;;  %p22934_p13 = scmp.lt.u32.totalorder %s22930_s3, %s23355_s20 }
  0x8e   :  { %p22936_p0 = pnand %p22934_p13, %p22931_p12 }
  0x90   :  { %22939 = shalt.err (!%p22936_p0)
}
  0x91   :  { %s22940_s16 = scalar_lea.vmem %s238_s10, 32  ;;  %p22945_p2 = scmp.lt.s32.totalorder %s238_s10, %s238_s10 }
  0x92   :  { %p22941_p1 = scmp.ne.s32.totalorder %s238_s10, %s22940_s16  ;;  %p22946_p3 = scmp.lt.s32.totalorder %s22940_s16, %s22940_s16 }
  0x94   :  { %p22947_p4 = por %p22946_p3, %p22945_p2 }
  0x96   :  { %p22948_p5 = pnand %p22947_p4, %p22941_p1 }
  0x98   :  { %22951 = shalt.err (!%p22948_p5)
}
  0x99   :  { %243 = dma.hbm_to_vmem [thread:$0]  %s23355_s20, 32, %s238_s10, [#allocation21], %s23178_s22, %s23178_s22, %s23179_s14  }
  0x9a   :  { %s22952_s4 = scalar_lea.hbm %s23245_s29, 16 }
  0x9b   :  { %p22953_p6 = scmp.ne.s32.totalorder %s23245_s29, %s22952_s4  ;;  %p22956_p7 = scmp.lt.u32.totalorder %s22952_s4, %s23245_s29 }
  0x9d   :  { %p22958_p8 = pnand %p22956_p7, %p22953_p6 }
  0x9f   :  { %22961 = shalt.err (!%p22958_p8)
}
  0xa0   :  { %s22962_s18 = scalar_lea.vmem %s95_s15, 16  ;;  %s22966_s23 = scalar_lea.vmem %s95_s15, 32 }
  0xa1   :  { %p22963_p9 = scmp.ne.s32.totalorder %s95_s15, %s22962_s18  ;;  %p22967_p10 = scmp.lt.s32.totalorder %s95_s15, %s95_s15 }
  0xa2   :  { %p22968_p11 = scmp.lt.s32.totalorder %s22966_s23, %s22962_s18 }
  0xa4   :  { %p22969_p12 = por %p22968_p11, %p22967_p10 }
  0xa6   :  { %p22970_p13 = pnand %p22969_p12, %p22963_p9 }
  0xa8   :  { %22973 = shalt.err (!%p22970_p13)
}
  0xa9   :  { %97 = dma.hbm_to_vmem [thread:$0]  %s23245_s29, 16, %s95_s15, [#allocation3]  }
  0xaa   :  { %s23184_s20 = smov [#allocation7]   ;;  %s23185_s28 = smov [#allocation10]  }
  0xab   :  { %s114_s26 = sshll.u32 %s23184_s20, 4  ;;  %s134_s1 = sshll.u32 %s23185_s28, 4  ;;  %s115_s26 = int_to_ptr.vmem [resolvable:$true] %s114_s26  ;;  %s135_s1 = int_to_ptr.vmem [resolvable:$true] %s134_s1 }
  0xac   :  { %s22974_s0 = scalar_lea.hbm %s23255_s8, 16 }
  0xad   :  { %p22975_p0 = scmp.ne.s32.totalorder %s23255_s8, %s22974_s0  ;;  %p22978_p1 = scmp.lt.u32.totalorder %s22974_s0, %s23255_s8 }
  0xaf   :  { %p22980_p2 = pnand %p22978_p1, %p22975_p0 }
  0xb1   :  { %22983 = shalt.err (!%p22980_p2)
}
  0xb2   :  { %s22984_s2 = scalar_lea.vmem %s115_s26, 16  ;;  %s22988_s24 = scalar_lea.vmem %s115_s26, 32 }
  0xb3   :  { %p22985_p3 = scmp.ne.s32.totalorder %s115_s26, %s22984_s2  ;;  %p22989_p4 = scmp.lt.s32.totalorder %s115_s26, %s115_s26 }
  0xb4   :  { %p22990_p5 = scmp.lt.s32.totalorder %s22988_s24, %s22984_s2 }
  0xb6   :  { %p22991_p6 = por %p22990_p5, %p22989_p4 }
  0xb8   :  { %p22992_p7 = pnand %p22991_p6, %p22985_p3 }
  0xba   :  { %22995 = shalt.err (!%p22992_p7)
}
  0xbb   :  { %117 = dma.hbm_to_vmem [thread:$0]  %s23255_s8, 16, %s115_s26, [#allocation6]  }
  0xbc   :  { %s22996_s29 = scalar_lea.hbm %s23265_s19, 16 }
  0xbd   :  { %p22997_p8 = scmp.ne.s32.totalorder %s23265_s19, %s22996_s29  ;;  %p23000_p9 = scmp.lt.u32.totalorder %s22996_s29, %s23265_s19 }
  0xbf   :  { %p23002_p10 = pnand %p23000_p9, %p22997_p8 }
  0xc1   :  { %23005 = shalt.err (!%p23002_p10)
}
  0xc2   :  { %s23006_s7 = scalar_lea.vmem %s135_s1, 16  ;;  %s23010_s30 = scalar_lea.vmem %s135_s1, 32 }
  0xc3   :  { %p23007_p11 = scmp.ne.s32.totalorder %s135_s1, %s23006_s7  ;;  %p23011_p12 = scmp.lt.s32.totalorder %s135_s1, %s135_s1 }
  0xc4   :  { %p23012_p13 = scmp.lt.s32.totalorder %s23010_s30, %s23006_s7 }
  0xc6   :  { %p23013_p0 = por %p23012_p13, %p23011_p12 }
  0xc8   :  { %p23014_p1 = pnand %p23013_p0, %p23007_p11 }
  0xca   :  { %23017 = shalt.err (!%p23014_p1)
}
  0xcb   :  { %137 = dma.hbm_to_vmem [thread:$0]  %s23265_s19, 16, %s135_s1, [#allocation9]  }
  0xcc   :  { %s23186_s8 = smov [#allocation13]   ;;  %s23187_s11 = smov [#allocation16]  }
  0xcd   :  { %s171_s10 = sshll.u32 %s23186_s8, 4  ;;  %s199_s15 = sshll.u32 %s23187_s11, 4  ;;  %s172_s10 = int_to_ptr.vmem [resolvable:$true] %s171_s10  ;;  %s200_s15 = int_to_ptr.vmem [resolvable:$true] %s199_s15 }
  0xce   :  { %s23018_s3 = scalar_lea.hbm %s23315_s21, 32 }
  0xcf   :  { %p23019_p2 = scmp.ne.s32.totalorder %s23315_s21, %s23018_s3  ;;  %p23022_p3 = scmp.lt.u32.totalorder %s23018_s3, %s23315_s21 }
  0xd1   :  { %p23024_p4 = pnand %p23022_p3, %p23019_p2 }
  0xd3   :  { %23027 = shalt.err (!%p23024_p4)
}
  0xd4   :  { %s23028_s16 = scalar_lea.vmem %s172_s10, 32  ;;  %p23033_p6 = scmp.lt.s32.totalorder %s172_s10, %s172_s10 }
  0xd5   :  { %p23029_p5 = scmp.ne.s32.totalorder %s172_s10, %s23028_s16  ;;  %p23034_p7 = scmp.lt.s32.totalorder %s23028_s16, %s23028_s16 }
  0xd7   :  { %p23035_p8 = por %p23034_p7, %p23033_p6 }
  0xd9   :  { %p23036_p9 = pnand %p23035_p8, %p23029_p5 }
  0xdb   :  { %23039 = shalt.err (!%p23036_p9)
}
  0xdc   :  { %177 = dma.hbm_to_vmem [thread:$0]  %s23315_s21, 32, %s172_s10, [#allocation12], %s23178_s22, %s23178_s22, %s23179_s14  }
  0xdd   :  { %s23040_s19 = scalar_lea.hbm %s23335_s12, 32 }
  0xde   :  { %p23041_p10 = scmp.ne.s32.totalorder %s23335_s12, %s23040_s19  ;;  %p23044_p11 = scmp.lt.u32.totalorder %s23040_s19, %s23335_s12 }
  0xe0   :  { %p23046_p12 = pnand %p23044_p11, %p23041_p10 }
  0xe2   :  { %23049 = shalt.err (!%p23046_p12)
}
  0xe3   :  { %s23050_s4 = scalar_lea.vmem %s200_s15, 32  ;;  %p23055_p0 = scmp.lt.s32.totalorder %s200_s15, %s200_s15 }
  0xe4   :  { %p23051_p13 = scmp.ne.s32.totalorder %s200_s15, %s23050_s4  ;;  %p23056_p1 = scmp.lt.s32.totalorder %s23050_s4, %s23050_s4 }
  0xe6   :  { %p23057_p2 = por %p23056_p1, %p23055_p0 }
  0xe8   :  { %p23058_p3 = pnand %p23057_p2, %p23051_p13 }
  0xea   :  { %23061 = shalt.err (!%p23058_p3)
}
  0xeb   :  { %205 = dma.hbm_to_vmem [thread:$0]  %s23335_s12, 32, %s200_s15, [#allocation15], %s23178_s22, %s23178_s22, %s23179_s14  }
  0xec   :  { %s23188_s21 = smov [#allocation19]   ;;  %s23189_s23 = smov [#allocation22]  }
  0xed   :  { %s223_s18 = sshll.u32 %s23188_s21, 4  ;;  %s251_s20 = sshll.u32 %s23189_s23, 4  ;;  %s224_s18 = int_to_ptr.vmem [resolvable:$true] %s223_s18  ;;  %s252_s20 = int_to_ptr.vmem [resolvable:$true] %s251_s20 }
  0xee   :  { %s23062_s26 = scalar_lea.hbm %s23345_s6, 32 }
  0xef   :  { %p23063_p4 = scmp.ne.s32.totalorder %s23345_s6, %s23062_s26  ;;  %p23066_p5 = scmp.lt.u32.totalorder %s23062_s26, %s23345_s6 }
  0xf1   :  { %p23068_p6 = pnand %p23066_p5, %p23063_p4 }
  0xf3   :  { %23071 = shalt.err (!%p23068_p6)
}
  0xf4   :  { %s23072_s28 = scalar_lea.vmem %s224_s18, 32  ;;  %p23077_p8 = scmp.lt.s32.totalorder %s224_s18, %s224_s18 }
  0xf5   :  { %p23073_p7 = scmp.ne.s32.totalorder %s224_s18, %s23072_s28  ;;  %p23078_p9 = scmp.lt.s32.totalorder %s23072_s28, %s23072_s28 }
  0xf7   :  { %p23079_p10 = por %p23078_p9, %p23077_p8 }
  0xf9   :  { %p23080_p11 = pnand %p23079_p10, %p23073_p7 }
  0xfb   :  { %23083 = shalt.err (!%p23080_p11)
}
  0xfc   :  { %229 = dma.hbm_to_vmem [thread:$0]  %s23345_s6, 32, %s224_s18, [#allocation18], %s23178_s22, %s23178_s22, %s23179_s14  }
  0xfd   :  { %s23084_s12 = scalar_lea.hbm %s23365_s5, 32 }
  0xfe   :  { %p23085_p12 = scmp.ne.s32.totalorder %s23365_s5, %s23084_s12  ;;  %p23088_p13 = scmp.lt.u32.totalorder %s23084_s12, %s23365_s5 }
 0x100   :  { %p23090_p0 = pnand %p23088_p13, %p23085_p12 }
 0x102   :  { %23093 = shalt.err (!%p23090_p0)
}
 0x103   :  { %s23094_s1 = scalar_lea.vmem %s252_s20, 32  ;;  %p23099_p2 = scmp.lt.s32.totalorder %s252_s20, %s252_s20 }
 0x104   :  { %p23095_p1 = scmp.ne.s32.totalorder %s252_s20, %s23094_s1  ;;  %p23100_p3 = scmp.lt.s32.totalorder %s23094_s1, %s23094_s1 }
 0x106   :  { %p23101_p4 = por %p23100_p3, %p23099_p2 }
 0x108   :  { %p23102_p5 = pnand %p23101_p4, %p23095_p1 }
 0x10a   :  { %23105 = shalt.err (!%p23102_p5)
}
 0x10b   :  { %257 = dma.hbm_to_vmem [thread:$0]  %s23365_s5, 32, %s252_s20, [#allocation21], %s23178_s22, %s23178_s22, %s23179_s14  }
 0x10c   :  { %23128 = dma.done.wait [#allocation3], 16  }
 0x10d   :  { %23129 = vsyncadd [#allocation3], 4294967280 }
 0x10e   :  { %23130 = dma.done.wait [#allocation6], 32  }
 0x10f   :  { %23131 = vsyncadd [#allocation6], 4294967264 }
 0x110   :  { %23132 = dma.done.wait [#allocation9], 32  }
 0x111   :  { %23133 = vsyncadd [#allocation9], 4294967264 }
 0x112   :  { %23134 = dma.done.wait [#allocation12], 64  }
 0x113   :  { %23135 = vsyncadd [#allocation12], 4294967232 }
 0x114   :  { %23136 = dma.done.wait [#allocation15], 64  }
 0x115   :  { %23137 = vsyncadd [#allocation15], 4294967232 }
 0x116   :  { %23138 = dma.done.wait [#allocation18], 64  }
 0x117   :  { %23139 = vsyncadd [#allocation18], 4294967232 }
 0x118   :  { %23140 = dma.done.wait [#allocation21], 64  }
 0x119   :  { %23141 = vsyncadd [#allocation21], 4294967232  ;;  %v23190_v0 = vmov 0.0   ;;  %s27105_s5 = sld [smem:[#allocation32_spill]]  ;;  %vm23191_vm0 = vmmov 0   ;;  %vm393_vm1 = vcmask 1043456  }
 0x11a   :  { %20000 = vmatprep.subr.mxu1 %v23190_v0  ;;  %20002 = vmatprep.mubr.msk.f32.mxu1 %vm23191_vm0, %v23190_v0  ;;  %vm390_vm2 = vcmask 31744   ;;  %v386_v1 = vld [vmem:[%s23225_s13] sm:$0xf]  ;;  %v299_v3 = vld [vmem:[%s23240_s25 + $0x10] sm:$0xff]  ;;  %s27106_s6 = sld [smem:[#allocation33_spill]]  ;;  %v298_v5 = vld [vmem:[%s23240_s25 + $0x8] sm:$0xff] }
 0x11b   :  { %20001 = vmatpush3.msk.msra.mxu1 %vm393_vm1, %v386_v1  ;;  %v22311_v2 = vld [vmem:[%s23220_s9] sm:$0xff]   ;;  %vm302_vm3 = vcmask 130048   ;;  %vm467_vm4 = vcmask 64512   ;;  %vm703_vm5 = vcmask 261120   ;;  %s27107_s9 = sld [smem:[#allocation39_spill]]  ;;  %s27108_s13 = sld [smem:[#allocation37_spill]] }
 0x11c   :  { %20005 = vmatprep.subr.mxu1 %v23190_v0  ;;  %20003 = vmatmul.mubr.msk.f32.vlgmr.msra.gmra.mrb[0].mxu1 %vm390_vm2, %v22311_v2  ;;  %v297_v4 = vld [vmem:[%s23240_s25] sm:$0xff]  ;;  %s27109_s25 = sld [smem:[#allocation38_spill]]  ;;  %s27110_s14 = sld [smem:[#allocation40_spill]]  ;;  %vm6208_vm6 = vcmask 195584   ;;  %vm24440_vm7 = vmpackc.low %vm467_vm4, %vm467_vm4  ;;  %vm9424_vm8 = vcmask 523264  }
 0x11d   :  { %20007 = vmatprep.mubr.msk.f32.mxu1 %vm23191_vm0, %v23190_v0  ;;  %20006 = vmatpush3.msra.mxu1 %v299_v3  ;;  %v21388_v7 = vpack.c.bf16 %v298_v5, %v297_v4  ;;  %v18750_v26 = vld [vmem:[#allocation2] ss:$0 sm:$0xff]  ;;  %s23192_s0 = smov 96   ;;  %s23193_s2 = smov 64  }
 0x11e   :  { %s23194_s24 = smov 88   ;;  %s23195_s29 = smov 120  }
 0x11f   :  { %v300_v6 = vld [vmem:[%s27105_s5] sm:$0xff]  ;;  %21389 = vmatprep.subr.bf16.mxu0 %v21388_v7  ;;  %v301_v8 = vld [vmem:[%s27105_s5 + $0x8] sm:$0xff]  ;;  %s23196_s7 = smov 56   ;;  %s23197_s30 = smov 80  }
 0x120   :  { %19997 = vmatprep.mubr.msk.f32.mxu0 %vm302_vm3, %v300_v6  ;;  %21391 = vmatpush3.bf16.msra.mxu0 %v21388_v7  ;;  %v541_v11 = vld [vmem:[%s27106_s6] sm:$0xff]  ;;  %v542_v15 = vld [vmem:[%s27106_s6 + $0x8] sm:$0xff]  ;;  %v543_v17 = vld [vmem:[%s27106_s6 + $0x10] sm:$0xff]  ;;  %s23198_s8 = smov 112   ;;  %s23199_s10 = smov 48  }
 0x121   :  { %v544_v18 = vld [vmem:[%s27106_s6 + $0x18] sm:$0xff]  ;;  %v545_v19 = vld [vmem:[%s27106_s6 + $0x20] sm:$0xff]  ;;  %v546_v20 = vld [vmem:[%s27106_s6 + $0x28] sm:$0xff]  ;;  %s23200_s11 = smov 72   ;;  %s23201_s15 = smov 104  }
 0x122   :  { %v547_v21 = vld [vmem:[%s27106_s6 + $0x30] sm:$0xff]  ;;  %v548_v22 = vld [vmem:[%s27106_s6 + $0x38] sm:$0xff]  ;;  %s23202_s3 = smov 40   ;;  %s23203_s16 = smov 8  }
 0x123   :  { %19998 = vmatmul.mubr.msk.f32.vlgmr.msra.gmra.mrb[0].mxu0 %vm302_vm3, %v301_v8  ;;  %s27111_s19 = sld [smem:[#allocation41_spill]]  ;;  %s23204_s4 = smov 24  }
 0x124   :  { %20012 = vmatprep.mubr.msk.f32.mxu0 %vm467_vm4, %v541_v11  ;;  %s27112_s21 = sld [smem:[#allocation42_spill]]  ;;  %s27113_s18 = sld [smem:[#allocation43_spill]] }
 0x125   :  { %s27116_s23 = sld [smem:[#allocation34_spill]]  ;;  %s27117_s20 = sld [smem:[#allocation44_spill]] }
 0x126   :  { %s27118_s26 = sld [smem:[#allocation45_spill]]  ;;  %s23205_s28 = smov [#allocation23]  }
 0x127   :  { %s18688_s12 = sshll.u32 %s23205_s28, 4  ;;  %s18689_s12 = int_to_ptr.vmem [resolvable:$true] %s18688_s12 }
 0x128   :  { %s23106_s1 = scalar_lea.vmem %s18689_s12, 1024  ;;  %p23111_p7 = scmp.lt.s32.totalorder %s18689_s12, %s18689_s12 }
 0x129   :  { %p23107_p6 = scmp.ne.s32.totalorder %s18689_s12, %s23106_s1  ;;  %p23112_p8 = scmp.lt.s32.totalorder %s23106_s1, %s23106_s1 }
 0x12b   :  { %p23113_p9 = por %p23112_p8, %p23111_p7 }
 0x12d   :  { %p23114_p10 = pnand %p23113_p9, %p23107_p6 }
 0x1ef   :  { %v463_v9 = vpop.f32.mrb[0].mxu1 }
 0x1f0   :  { %v20004_v10 = vpop.f32.mrb[1].mxu1  ;;  %20008 = vmatmul.mubr.msk.f32.vlgmr.msra.gmra.mrb[2].mxu1 %vm467_vm4, %v463_v9 }
 0x1f6   :  { %v19999_v12 = vpop.f32.mrb[0].mxu0 }
 0x1f7   :  { %v375_v13 = vpop.f32.mrb[1].mxu0 }
 0x2c3   :  { %v537_v14 = vpop.f32.mrb[2].mxu1 }
 0x2c4   :  { %v20009_v16 = vpop.f32.mrb[3].mxu1  ;;  %20010 = vmatprep.subr.mxu0 %v537_v14 }
 0x2c5   :  { %20011 = vmatpush3.msra.mxu0 %v537_v14 }
 0x2c6   :  { %20013 = vmatmul.mubr.msk.f32.vlgmr.msra.gmra.mrb[2].mxu0 %vm467_vm4, %v542_v15  ;;  %20044 = vmatprep.subr.mxu0 %v23190_v0 }
 0x2c7   :  { %20015 = vmatprep.mubr.msk.f32.mxu0 %vm467_vm4, %v543_v17 }
 0x2ca   :  { %20016 = vmatmul.mubr.msk.f32.gmra.mrb[4].mxu0 %vm467_vm4, %v544_v18 }
 0x2cb   :  { %20018 = vmatprep.mubr.msk.f32.mxu0 %vm467_vm4, %v545_v19 }
 0x2ce   :  { %20019 = vmatmul.mubr.msk.f32.gmra.mrb[6].mxu0 %vm467_vm4, %v546_v20 }
 0x2cf   :  { %20021 = vmatprep.mubr.msk.f32.mxu0 %vm467_vm4, %v547_v21 }
 0x2d2   :  { %20022 = vmatmul.mubr.msk.f32.gmra.mrb[8].mxu0 %vm467_vm4, %v548_v22 }
 0x2d3   :  { %20046 = vmatprep.mubr.msk.f32.mxu0 %vm23191_vm0, %v23190_v0 }
 0x399   :  { %v20014_v23 = vpop.f32.mrb[2].mxu0 }
 0x39a   :  { %v679_v24 = vadd.f32 %v20014_v23, %v375_v13  ;;  %v639_v25 = vpop.f32.mrb[3].mxu0 }
 0x39b   :  { %v678_v27 = vadd.f32 %v639_v25, %v375_v13 }
 0x39c   :  { %v694_v34 = vadd.f32 %v18750_v26, %v679_v24 }
 0x39d   :  { %v20017_v28 = vpop.f32.mrb[4].mxu0  ;;  %v693_v29 = vadd.f32 %v18750_v26, %v678_v27 }
 0x39e   :  { %v681_v30 = vadd.f32 %v20017_v28, %v375_v13  ;;  %v649_v31 = vpop.f32.mrb[5].mxu0  ;;  %v707_v40 = vsel %vm703_vm5, %v694_v34, 0.0 }
 0x39f   :  { %v680_v32 = vadd.f32 %v649_v31, %v375_v13  ;;  %v704_v33 = vsel %vm703_vm5, %v693_v29, 0.0 }
 0x3a0   :  { %705 = vadd.xlane.f32.xlu0 %v704_v33  ;;  %v696_v42 = vadd.f32 %v18750_v26, %v681_v30 }
 0x3a1   :  { %v20020_v35 = vpop.f32.mrb[6].mxu0  ;;  %v695_v36 = vadd.f32 %v18750_v26, %v680_v32 }
 0x3a2   :  { %v683_v37 = vadd.f32 %v20020_v35, %v19999_v12  ;;  %v659_v38 = vpop.f32.mrb[7].mxu0  ;;  %v713_v48 = vsel %vm703_vm5, %v696_v42, 0.0 }
 0x3a3   :  { %v682_v39 = vadd.f32 %v19999_v12, %v659_v38  ;;  %v710_v41 = vsel %vm703_vm5, %v695_v36, 0.0 }
 0x3a4   :  { %708 = vadd.xlane.f32.xlu0 %v707_v40  ;;  %711 = vadd.xlane.f32.xlu1 %v710_v41  ;;  %v698_v50 = vadd.f32 %v18750_v26, %v683_v37 }
 0x3a5   :  { %v20023_v43 = vpop.f32.mrb[8].mxu0  ;;  %v697_v44 = vadd.f32 %v18750_v26, %v682_v39 }
 0x3a6   :  { %v685_v45 = vadd.f32 %v20023_v43, %v19999_v12  ;;  %v669_v46 = vpop.f32.mrb[9].mxu0  ;;  %v719_v52 = vsel %vm703_vm5, %v698_v50, 0.0 }
 0x3a7   :  { %v684_v47 = vadd.f32 %v19999_v12, %v669_v46  ;;  %v716_v49 = vsel %vm703_vm5, %v697_v44, 0.0 }
 0x3a8   :  { %714 = vadd.xlane.f32.xlu1 %v713_v48  ;;  %717 = vadd.xlane.f32.xlu0 %v716_v49  ;;  %v700_v54 = vadd.f32 %v18750_v26, %v685_v45 }
 0x3a9   :  { %v699_v51 = vadd.f32 %v18750_v26, %v684_v47 }
 0x3aa   :  { %v725_v55 = vsel %vm703_vm5, %v700_v54, 0.0 }
 0x3ab   :  { %v722_v53 = vsel %vm703_vm5, %v699_v51, 0.0 }
 0x3ac   :  { %720 = vadd.xlane.f32.xlu1 %v719_v52  ;;  %723 = vadd.xlane.f32.xlu0 %v722_v53 }
 0x3b0   :  { %726 = vadd.xlane.f32.xlu1 %v725_v55  ;;  %v18751_v55 = vld [vmem:[#allocation5] ss:$0 sm:$0xff] }
 0x42d   :  { %v706_v56 = vpop.xlane.xlu0 %705 }
 0x42e   :  { %v729_v57 = vmul.f32 0.03125, %v706_v56 }
 0x430   :  { %v23491_v58 = vsub.f32 %v693_v29, %v729_v57 }
 0x431   :  { %v709_v59 = vpop.xlane.xlu0 %708  ;;  %v712_v60 = vpop.xlane.xlu1 %711 }
 0x432   :  { %v730_v61 = vmul.f32 0.03125, %v709_v59  ;;  %v731_v62 = vmul.f32 0.03125, %v712_v60  ;;  %v745_v63 = vmul.f32 %v23491_v58, %v23491_v58  ;;  %v18752_v60 = vld [vmem:[#allocation7] ss:$0 sm:$0xff] }
 0x434   :  { %v23495_v1 = vsub.f32 %v694_v34, %v730_v61  ;;  %v23497_v2 = vsub.f32 %v695_v36, %v731_v62  ;;  %v753_v3 = vsel %vm703_vm5, %v745_v63, 0.0 }
 0x435   :  { %v715_v4 = vpop.xlane.xlu1 %714  ;;  %v718_v5 = vpop.xlane.xlu0 %717  ;;  %754 = vadd.xlane.f32.xlu0 %v753_v3 }
 0x436   :  { %v732_v6 = vmul.f32 0.03125, %v715_v4  ;;  %v733_v7 = vmul.f32 0.03125, %v718_v5  ;;  %v746_v8 = vmul.f32 %v23495_v1, %v23495_v1  ;;  %v747_v9 = vmul.f32 %v23497_v2, %v23497_v2 }
 0x438   :  { %v23504_v10 = vsub.f32 %v696_v42, %v732_v6  ;;  %v23506_v11 = vsub.f32 %v697_v44, %v733_v7  ;;  %v756_v12 = vsel %vm703_vm5, %v746_v8, 0.0  ;;  %v759_v13 = vsel %vm703_vm5, %v747_v9, 0.0 }
 0x439   :  { %v721_v14 = vpop.xlane.xlu1 %720  ;;  %757 = vadd.xlane.f32.xlu1 %v756_v12  ;;  %760 = vadd.xlane.f32.xlu0 %v759_v13  ;;  %v724_v15 = vpop.xlane.xlu0 %723 }
 0x43a   :  { %v734_v16 = vmul.f32 0.03125, %v721_v14  ;;  %v735_v17 = vmul.f32 0.03125, %v724_v15  ;;  %v748_v18 = vmul.f32 %v23504_v10, %v23504_v10  ;;  %v749_v19 = vmul.f32 %v23506_v11, %v23506_v11 }
 0x43c   :  { %v23514_v20 = vsub.f32 %v698_v50, %v734_v16  ;;  %v23516_v21 = vsub.f32 %v699_v51, %v735_v17  ;;  %v762_v22 = vsel %vm703_vm5, %v748_v18, 0.0  ;;  %v765_v23 = vsel %vm703_vm5, %v749_v19, 0.0 }
 0x43d   :  { %763 = vadd.xlane.f32.xlu1 %v762_v22  ;;  %v727_v24 = vpop.xlane.xlu1 %726  ;;  %766 = vadd.xlane.f32.xlu0 %v765_v23 }
 0x43e   :  { %v736_v25 = vmul.f32 0.03125, %v727_v24  ;;  %v750_v26 = vmul.f32 %v23514_v20, %v23514_v20  ;;  %v751_v27 = vmul.f32 %v23516_v21, %v23516_v21 }
 0x440   :  { %v23524_v28 = vsub.f32 %v700_v54, %v736_v25  ;;  %v768_v29 = vsel %vm703_vm5, %v750_v26, 0.0  ;;  %v771_v30 = vsel %vm703_vm5, %v751_v27, 0.0 }
 0x441   :  { %769 = vadd.xlane.f32.xlu1 %v768_v29  ;;  %772 = vadd.xlane.f32.xlu0 %v771_v30 }
 0x442   :  { %v752_v31 = vmul.f32 %v23524_v28, %v23524_v28 }
 0x444   :  { %v774_v32 = vsel %vm703_vm5, %v752_v31, 0.0 }
 0x445   :  { %775 = vadd.xlane.f32.xlu1 %v774_v32 }
 0x4c2   :  { %v755_v33 = vpop.xlane.xlu0 %754 }
 0x4c3   :  { %v777_v34 = vmul.f32 0.03125, %v755_v33 }
 0x4c5   :  { %v785_v35 = vadd.f32 1e-05, %v777_v34 }
 0x4c6   :  { %v758_v36 = vpop.xlane.xlu1 %757  ;;  %v761_v37 = vpop.xlane.xlu0 %760 }
 0x4c7   :  { %22312 = vrsqrt.f32 %v785_v35  ;;  %v778_v38 = vmul.f32 0.03125, %v758_v36  ;;  %v779_v39 = vmul.f32 0.03125, %v761_v37 }
 0x4c9   :  { %v786_v40 = vadd.f32 1e-05, %v778_v38  ;;  %v787_v41 = vadd.f32 1e-05, %v779_v39 }
 0x4ca   :  { %v764_v42 = vpop.xlane.xlu1 %763  ;;  %v767_v43 = vpop.xlane.xlu0 %766 }
 0x4cb   :  { %22314 = vrsqrt.f32 %v786_v40  ;;  %v780_v44 = vmul.f32 0.03125, %v764_v42  ;;  %v781_v45 = vmul.f32 0.03125, %v767_v43 }
 0x4cc   :  { %22316 = vrsqrt.f32 %v787_v41 }
 0x4cd   :  { %v788_v46 = vadd.f32 1e-05, %v780_v44  ;;  %v789_v47 = vadd.f32 1e-05, %v781_v45 }
 0x4ce   :  { %v770_v48 = vpop.xlane.xlu1 %769  ;;  %v773_v49 = vpop.xlane.xlu0 %772 }
 0x4cf   :  { %22318 = vrsqrt.f32 %v788_v46  ;;  %v782_v50 = vmul.f32 0.03125, %v770_v48  ;;  %v783_v51 = vmul.f32 0.03125, %v773_v49 }
 0x4d0   :  { %22320 = vrsqrt.f32 %v789_v47 }
 0x4d1   :  { %v22313_v52 = vpop.eup %22312  ;;  %v790_v53 = vadd.f32 1e-05, %v782_v50  ;;  %v791_v54 = vadd.f32 1e-05, %v783_v51 }
 0x4d2   :  { %v776_v56 = vpop.xlane.xlu1 %775  ;;  %v801_v57 = vmul.f32 %v22313_v52, %v23491_v58 }
 0x4d3   :  { %22322 = vrsqrt.f32 %v790_v53  ;;  %v784_v59 = vmul.f32 0.03125, %v776_v56 }
 0x4d4   :  { %22324 = vrsqrt.f32 %v791_v54  ;;  %v815_v61 = vmul.f32 %v18751_v55, %v801_v57 }
 0x4d5   :  { %v22315_v62 = vpop.eup %22314  ;;  %v792_v63 = vadd.f32 1e-05, %v784_v59 }
 0x4d6   :  { %v22317_v3 = vpop.eup %22316  ;;  %v23532_v4 = vadd.f32 %v18752_v60, %v815_v61  ;;  %v802_v5 = vmul.f32 %v22315_v62, %v23495_v1 }
 0x4d7   :  { %22326 = vrsqrt.f32 %v792_v63  ;;  %v803_v6 = vmul.f32 %v22317_v3, %v23497_v2 }
 0x4d8   :  { %v843_v7 = vsel %vm703_vm5, %v23532_v4, 0.0  ;;  %v816_v8 = vmul.f32 %v18751_v55, %v802_v5 }
 0x4d9   :  { %v22319_v58 = vpop.eup %22318  ;;  %844 = vadd.xlane.f32.xlu0 %v843_v7  ;;  %v817_v9 = vmul.f32 %v18751_v55, %v803_v6 }
 0x4da   :  { %v22321_v12 = vpop.eup %22320  ;;  %v23538_v13 = vadd.f32 %v18752_v60, %v816_v8  ;;  %v804_v14 = vmul.f32 %v22319_v58, %v23504_v10 }
 0x4db   :  { %v23541_v15 = vadd.f32 %v18752_v60, %v817_v9  ;;  %v805_v16 = vmul.f32 %v22321_v12, %v23506_v11 }
 0x4dc   :  { %v846_v1 = vsel %vm703_vm5, %v23538_v13, 0.0  ;;  %v818_v2 = vmul.f32 %v18751_v55, %v804_v14 }
 0x4dd   :  { %v22323_v17 = vpop.eup %22322  ;;  %847 = vadd.xlane.f32.xlu1 %v846_v1  ;;  %v849_v18 = vsel %vm703_vm5, %v23541_v15, 0.0  ;;  %v819_v19 = vmul.f32 %v18751_v55, %v805_v16 }
 0x4de   :  { %v22325_v22 = vpop.eup %22324  ;;  %850 = vadd.xlane.f32.xlu0 %v849_v18  ;;  %v23548_v23 = vadd.f32 %v18752_v60, %v818_v2  ;;  %v806_v10 = vmul.f32 %v22323_v17, %v23514_v20  ;;  %v975_v18 = vld [vmem:[%s27107_s9] sm:$0xff] }
 0x4df   :  { %v23551_v24 = vadd.f32 %v18752_v60, %v819_v19  ;;  %v807_v11 = vmul.f32 %v22325_v22, %v23516_v21  ;;  %v976_v19 = vld [vmem:[%s27107_s9 + $0x8] sm:$0xff] }
 0x4e0   :  { %v852_v25 = vsel %vm703_vm5, %v23548_v23, 0.0  ;;  %v820_v26 = vmul.f32 %v18751_v55, %v806_v10  ;;  %v21392_v22 = vpack.c.bf16 %v976_v19, %v975_v18  ;;  %v977_v10 = vld [vmem:[%s27107_s9 + $0x10] sm:$0xff] }
 0x4e1   :  { %v22327_v27 = vpop.eup %22326  ;;  %853 = vadd.xlane.f32.xlu1 %v852_v25  ;;  %v855_v29 = vsel %vm703_vm5, %v23551_v24, 0.0  ;;  %v821_v30 = vmul.f32 %v18751_v55, %v807_v11  ;;  %v978_v11 = vld [vmem:[%s27107_s9 + $0x18] sm:$0xff] }
 0x4e2   :  { %856 = vadd.xlane.f32.xlu0 %v855_v29  ;;  %v23558_v31 = vadd.f32 %v18752_v60, %v820_v26  ;;  %v808_v32 = vmul.f32 %v22327_v27, %v23524_v28  ;;  %21393 = vmatprep.subr.bf16.mxu1 %v21392_v22  ;;  %v21396_v25 = vpack.c.bf16 %v978_v11, %v977_v10 }
 0x4e3   :  { %v23561_v20 = vadd.f32 %v18752_v60, %v821_v30  ;;  %21395 = vmatpush3.bf16.msra.mxu1 %v21392_v22 }
 0x4e4   :  { %v858_v21 = vsel %vm703_vm5, %v23558_v31, 0.0  ;;  %v822_v33 = vmul.f32 %v18751_v55, %v808_v32  ;;  %21397 = vmatprep.subr.bf16.mxu1 %v21396_v25 }
 0x4e5   :  { %859 = vadd.xlane.f32.xlu1 %v858_v21  ;;  %v861_v34 = vsel %vm703_vm5, %v23561_v20, 0.0 }
 0x4e6   :  { %862 = vadd.xlane.f32.xlu0 %v861_v34  ;;  %v23567_v35 = vadd.f32 %v18752_v60, %v822_v33 }
 0x4e7   :  { %21399 = vmatpush3.bf16.msra.mxu1 %v21396_v25 }
 0x4e8   :  { %v864_v36 = vsel %vm703_vm5, %v23567_v35, 0.0  ;;  %20064 = vmatprep.subr.mxu1 %v23190_v0 }
 0x4e9   :  { %865 = vadd.xlane.f32.xlu1 %v864_v36 }
 0x566   :  { %v845_v37 = vpop.xlane.xlu0 %844 }
 0x567   :  { %v867_v38 = vmul.f32 0.03125, %v845_v37 }
 0x569   :  { %v23572_v28 = vsub.f32 %v23532_v4, %v867_v38 }
 0x56a   :  { %v848_v39 = vpop.xlane.xlu1 %847 }
 0x56b   :  { %v868_v40 = vmul.f32 0.03125, %v848_v39  ;;  %v851_v41 = vpop.xlane.xlu0 %850  ;;  %v883_v42 = vmul.f32 %v23572_v28, %v23572_v28 }
 0x56c   :  { %v869_v43 = vmul.f32 0.03125, %v851_v41 }
 0x56d   :  { %v23577_v44 = vsub.f32 %v23538_v13, %v868_v40  ;;  %v891_v45 = vsel %vm703_vm5, %v883_v42, 0.0 }
 0x56e   :  { %v23581_v46 = vsub.f32 %v23541_v15, %v869_v43  ;;  %v854_v47 = vpop.xlane.xlu1 %853  ;;  %892 = vadd.xlane.f32.xlu0 %v891_v45 }
 0x56f   :  { %v870_v48 = vmul.f32 0.03125, %v854_v47  ;;  %v857_v49 = vpop.xlane.xlu0 %856  ;;  %v884_v50 = vmul.f32 %v23577_v44, %v23577_v44 }
 0x570   :  { %v871_v51 = vmul.f32 0.03125, %v857_v49  ;;  %v885_v52 = vmul.f32 %v23581_v46, %v23581_v46 }
 0x571   :  { %v23588_v53 = vsub.f32 %v23548_v23, %v870_v48  ;;  %v894_v54 = vsel %vm703_vm5, %v884_v50, 0.0 }
 0x572   :  { %v23592_v55 = vsub.f32 %v23551_v24, %v871_v51  ;;  %895 = vadd.xlane.f32.xlu1 %v894_v54  ;;  %v860_v56 = vpop.xlane.xlu1 %859  ;;  %v897_v57 = vsel %vm703_vm5, %v885_v52, 0.0  ;;  %v18753_v51 = vld [vmem:[%s27108_s13] ss:$0 sm:$0xff] }
 0x573   :  { %v872_v59 = vmul.f32 0.03125, %v860_v56  ;;  %898 = vadd.xlane.f32.xlu0 %v897_v57  ;;  %v863_v60 = vpop.xlane.xlu0 %862  ;;  %v886_v61 = vmul.f32 %v23588_v53, %v23588_v53 }
 0x574   :  { %v873_v62 = vmul.f32 0.03125, %v863_v60  ;;  %v887_v63 = vmul.f32 %v23592_v55, %v23592_v55 }
 0x575   :  { %v23600_v3 = vsub.f32 %v23558_v31, %v872_v59  ;;  %v900_v5 = vsel %vm703_vm5, %v886_v61, 0.0  ;;  %v18754_v59 = vld [vmem:[%s27109_s25] ss:$0 sm:$0xff] }
 0x576   :  { %v23604_v6 = vsub.f32 %v23561_v20, %v873_v62  ;;  %901 = vadd.xlane.f32.xlu1 %v900_v5  ;;  %v866_v7 = vpop.xlane.xlu1 %865  ;;  %v903_v8 = vsel %vm703_vm5, %v887_v63, 0.0 }
 0x577   :  { %v874_v58 = vmul.f32 0.03125, %v866_v7  ;;  %904 = vadd.xlane.f32.xlu0 %v903_v8  ;;  %v888_v9 = vmul.f32 %v23600_v3, %v23600_v3 }
 0x578   :  { %v889_v12 = vmul.f32 %v23604_v6, %v23604_v6 }
 0x579   :  { %v23612_v14 = vsub.f32 %v23567_v35, %v874_v58  ;;  %v906_v16 = vsel %vm703_vm5, %v888_v9, 0.0 }
 0x57a   :  { %907 = vadd.xlane.f32.xlu1 %v906_v16  ;;  %v909_v1 = vsel %vm703_vm5, %v889_v12, 0.0 }
 0x57b   :  { %910 = vadd.xlane.f32.xlu0 %v909_v1  ;;  %v890_v2 = vmul.f32 %v23612_v14, %v23612_v14 }
 0x57d   :  { %v912_v17 = vsel %vm703_vm5, %v890_v2, 0.0 }
 0x57e   :  { %913 = vadd.xlane.f32.xlu1 %v912_v17 }
 0x5fb   :  { %v893_v26 = vpop.xlane.xlu0 %892 }
 0x5fc   :  { %v915_v27 = vmul.f32 0.03125, %v893_v26 }
 0x5fe   :  { %v923_v29 = vadd.f32 1e-12, %v915_v27 }
 0x5ff   :  { %v896_v30 = vpop.xlane.xlu1 %895 }
 0x600   :  { %22328 = vrsqrt.f32 %v923_v29  ;;  %v916_v32 = vmul.f32 0.03125, %v896_v30  ;;  %v899_v21 = vpop.xlane.xlu0 %898 }
 0x601   :  { %v917_v33 = vmul.f32 0.03125, %v899_v21 }
 0x602   :  { %v924_v34 = vadd.f32 1e-12, %v916_v32 }
 0x603   :  { %v925_v36 = vadd.f32 1e-12, %v917_v33  ;;  %v902_v37 = vpop.xlane.xlu1 %901 }
 0x604   :  { %22330 = vrsqrt.f32 %v924_v34  ;;  %v918_v38 = vmul.f32 0.03125, %v902_v37  ;;  %v905_v39 = vpop.xlane.xlu0 %904 }
 0x605   :  { %22332 = vrsqrt.f32 %v925_v36  ;;  %v919_v40 = vmul.f32 0.03125, %v905_v39 }
 0x606   :  { %v926_v41 = vadd.f32 1e-12, %v918_v38 }
 0x607   :  { %v927_v42 = vadd.f32 1e-12, %v919_v40  ;;  %v908_v43 = vpop.xlane.xlu1 %907 }
 0x608   :  { %22334 = vrsqrt.f32 %v926_v41  ;;  %v920_v45 = vmul.f32 0.03125, %v908_v43  ;;  %v911_v47 = vpop.xlane.xlu0 %910 }
 0x609   :  { %22336 = vrsqrt.f32 %v927_v42  ;;  %v921_v48 = vmul.f32 0.03125, %v911_v47 }
 0x60a   :  { %v22329_v49 = vpop.eup %22328  ;;  %v928_v50 = vadd.f32 1e-12, %v920_v45 }
 0x60b   :  { %v929_v52 = vadd.f32 1e-12, %v921_v48  ;;  %v914_v54 = vpop.xlane.xlu1 %913  ;;  %v939_v56 = vmul.f32 %v22329_v49, %v23572_v28 }
 0x60c   :  { %22338 = vrsqrt.f32 %v928_v50  ;;  %v922_v57 = vmul.f32 0.03125, %v914_v54 }
 0x60d   :  { %22340 = vrsqrt.f32 %v929_v52  ;;  %v953_v60 = vmul.f32 %v18753_v51, %v939_v56 }
 0x60e   :  { %v22331_v61 = vpop.eup %22330  ;;  %v930_v62 = vadd.f32 1e-12, %v922_v57 }
 0x60f   :  { %v22333_v63 = vpop.eup %22332  ;;  %v940_v5 = vmul.f32 %v22331_v61, %v23577_v44  ;;  %v967_v7 = vadd.f32 %v18754_v59, %v953_v60 }
 0x610   :  { %22342 = vrsqrt.f32 %v930_v62  ;;  %v941_v8 = vmul.f32 %v22333_v63, %v23581_v46 }
 0x611   :  { %20032 = vmatprep.mubr.msk.f32.mxu1 %vm703_vm5, %v967_v7  ;;  %v954_v58 = vmul.f32 %v18753_v51, %v940_v5 }
 0x612   :  { %v22335_v9 = vpop.eup %22334  ;;  %v955_v12 = vmul.f32 %v18753_v51, %v941_v8 }
 0x613   :  { %v22337_v28 = vpop.eup %22336  ;;  %v968_v16 = vadd.f32 %v18754_v59, %v954_v58  ;;  %v942_v1 = vmul.f32 %v22335_v9, %v23588_v53 }
 0x614   :  { %v969_v2 = vadd.f32 %v18754_v59, %v955_v12  ;;  %v943_v17 = vmul.f32 %v22337_v28, %v23592_v55 }
 0x615   :  { %20033 = vmatmul.mubr.msk.f32.vlgmr.msra.gmra.mrb[4].mxu1 %vm703_vm5, %v968_v16  ;;  %v956_v18 = vmul.f32 %v18753_v51, %v942_v1 }
 0x616   :  { %v22339_v44 = vpop.eup %22338  ;;  %20035 = vmatprep.mubr.msk.f32.mxu1 %vm703_vm5, %v969_v2  ;;  %v957_v19 = vmul.f32 %v18753_v51, %v943_v17 }
 0x617   :  { %v22341_v46 = vpop.eup %22340  ;;  %v970_v22 = vadd.f32 %v18754_v59, %v956_v18  ;;  %v944_v10 = vmul.f32 %v22339_v44, %v23600_v3 }
 0x618   :  { %v971_v11 = vadd.f32 %v18754_v59, %v957_v19  ;;  %v945_v25 = vmul.f32 %v22341_v46, %v23604_v6  ;;  %v18755_v6 = vld [vmem:[%s27110_s14] ss:$0 sm:$0xff] }
 0x619   :  { %20036 = vmatmul.mubr.msk.f32.gmra.mrb[6].mxu1 %vm703_vm5, %v970_v22  ;;  %v958_v53 = vmul.f32 %v18753_v51, %v944_v10 }
 0x61a   :  { %v22343_v26 = vpop.eup %22342  ;;  %20038 = vmatprep.mubr.msk.f32.mxu1 %vm703_vm5, %v971_v11  ;;  %v959_v55 = vmul.f32 %v18753_v51, %v945_v25 }
 0x61b   :  { %v972_v27 = vadd.f32 %v18754_v59, %v958_v53  ;;  %v946_v29 = vmul.f32 %v22343_v26, %v23612_v14 }
 0x61c   :  { %v973_v30 = vadd.f32 %v18754_v59, %v959_v55 }
 0x61d   :  { %20039 = vmatmul.mubr.msk.f32.gmra.mrb[8].mxu1 %vm703_vm5, %v972_v27  ;;  %v960_v32 = vmul.f32 %v18753_v51, %v946_v29 }
 0x61e   :  { %20041 = vmatprep.mubr.msk.f32.mxu1 %vm703_vm5, %v973_v30 }
 0x61f   :  { %v974_v3 = vadd.f32 %v18754_v59, %v960_v32 }
 0x621   :  { %20042 = vmatmul.mubr.msk.f32.gmra.mrb[10].mxu1 %vm703_vm5, %v974_v3 }
 0x622   :  { %20066 = vmatprep.mubr.msk.f32.mxu1 %vm23191_vm0, %v23190_v0 }
 0x6e8   :  { %v20034_v21 = vpop.f32.mrb[4].mxu1 }
 0x6e9   :  { %v1081_v33 = vpop.f32.mrb[5].mxu1  ;;  %v23661_v45 = vadd.f32 %v20034_v21, %v18755_v6 }
 0x6ea   :  { %v23645_v34 = vadd.f32 %v18755_v6, %v1081_v33 }
 0x6eb   :  { %v23697_v57 = vmul.f32 0.17677669, %v23661_v45 }
 0x6ec   :  { %1129 = vrot.lane.b32.xlu0 %v23645_v34, %s23192_s0  ;;  %v20037_v14 = vpop.f32.mrb[6].mxu1  ;;  %v23679_v51 = vmul.f32 0.17677669, %v23645_v34 }
 0x6ed   :  { %v1091_v36 = vpop.f32.mrb[7].mxu1  ;;  %v23653_v40 = vadd.f32 %v20037_v14, %v18755_v6 }
 0x6ee   :  { %v23649_v37 = vadd.f32 %v18755_v6, %v1091_v36 }
 0x6ef   :  { %v23735_v58 = vmul.f32 0.17677669, %v23653_v40 }
 0x6f0   :  { %1285 = vrot.lane.b32.xlu0 %v23649_v37, %s23192_s0  ;;  %v20040_v38 = vpop.f32.mrb[8].mxu1  ;;  %v23717_v63 = vmul.f32 0.17677669, %v23649_v37 }
 0x6f1   :  { %v1101_v39 = vpop.f32.mrb[9].mxu1  ;;  %v23665_v47 = vadd.f32 %v20040_v38, %v18755_v6 }
 0x6f2   :  { %v23655_v41 = vadd.f32 %v18755_v6, %v1101_v39 }
 0x6f3   :  { %v23705_v61 = vmul.f32 0.17677669, %v23665_v47 }
 0x6f4   :  { %1363 = vrot.lane.b32.xlu0 %v23653_v40, %s23192_s0  ;;  %1441 = vrot.lane.b32.xlu1 %v23655_v41, %s23192_s0  ;;  %v20043_v42 = vpop.f32.mrb[10].mxu1  ;;  %v23688_v54 = vmul.f32 0.17677669, %v23655_v41 }
 0x6f5   :  { %v1111_v43 = vpop.f32.mrb[11].mxu1  ;;  %v23673_v49 = vadd.f32 %v20043_v42, %v18755_v6 }
 0x6f6   :  { %v23669_v48 = vadd.f32 %v18755_v6, %v1111_v43 }
 0x6f7   :  { %v23743_v9 = vmul.f32 0.17677669, %v23673_v49 }
 0x6f8   :  { %1207 = vrot.lane.b32.xlu1 %v23661_v45, %s23192_s0  ;;  %v23726_v7 = vmul.f32 0.17677669, %v23669_v48 }
 0x6fc   :  { %1519 = vrot.lane.b32.xlu1 %v23665_v47, %s23192_s0 }
 0x700   :  { %1597 = vrot.lane.b32.xlu1 %v23669_v48, %s23192_s0 }
 0x704   :  { %1675 = vrot.lane.b32.xlu1 %v23673_v49, %s23192_s0 }
 0x75e   :  { %v1130_v50 = vpop.permute.xlu0 %1129 }
 0x75f   :  { %20045 = vmatpush3.xpose.msk.msra.mxu0 %vm467_vm4, %v1130_v50 }
 0x760   :  { %20049 = vmatprep.subr.mxu0 %v23190_v0 }
 0x762   :  { %20047 = vmatmul.mubr.msk.f32.vlgmr.msra.gmra.mrb[10].mxu0 %vm467_vm4, %v23679_v51  ;;  %v1286_v59 = vpop.permute.xlu0 %1285 }
 0x763   :  { %20051 = vmatprep.mubr.msk.f32.mxu0 %vm23191_vm0, %v23190_v0 }
 0x766   :  { %v1442_v52 = vpop.permute.xlu1 %1441  ;;  %v1364_v5 = vpop.permute.xlu0 %1363 }
 0x767   :  { %20065 = vmatpush3.xpose.msk.msra.mxu1 %vm467_vm4, %v1442_v52 }
 0x768   :  { %20069 = vmatprep.subr.mxu1 %v23190_v0 }
 0x76a   :  { %v1208_v56 = vpop.permute.xlu1 %1207  ;;  %20067 = vmatmul.mubr.msk.f32.vlgmr.msra.gmra.mrb[12].mxu1 %vm467_vm4, %v23688_v54 }
 0x76b   :  { %20050 = vmatpush3.xpose.msk.msra.mxu0 %vm467_vm4, %v1208_v56  ;;  %20071 = vmatprep.mubr.msk.f32.mxu1 %vm23191_vm0, %v23190_v0 }
 0x76c   :  { %20054 = vmatprep.subr.mxu0 %v23190_v0 }
 0x76e   :  { %v1520_v60 = vpop.permute.xlu1 %1519  ;;  %20052 = vmatmul.mubr.msk.f32.vlgmr.msra.gmra.mrb[10].mxu0 %vm467_vm4, %v23697_v57 }
 0x76f   :  { %20055 = vmatpush3.xpose.msk.msra.mxu0 %vm467_vm4, %v1286_v59  ;;  %20070 = vmatpush3.xpose.msk.msra.mxu1 %vm467_vm4, %v1520_v60 }
 0x770   :  { %20074 = vmatprep.subr.mxu1 %v23190_v0  ;;  %20056 = vmatprep.mubr.msk.f32.mxu0 %vm23191_vm0, %v23190_v0 }
 0x771   :  { %20059 = vmatprep.subr.mxu0 %v23190_v0 }
 0x772   :  { %20072 = vmatmul.mubr.msk.f32.vlgmr.msra.gmra.mrb[12].mxu1 %vm467_vm4, %v23705_v61  ;;  %v1598_v62 = vpop.permute.xlu1 %1597 }
 0x773   :  { %20075 = vmatpush3.xpose.msk.msra.mxu1 %vm467_vm4, %v1598_v62  ;;  %20076 = vmatprep.mubr.msk.f32.mxu1 %vm23191_vm0, %v23190_v0 }
 0x774   :  { %20079 = vmatprep.subr.mxu1 %v23190_v0 }
 0x776   :  { %20057 = vmatmul.mubr.msk.f32.vlgmr.msra.gmra.mrb[10].mxu0 %vm467_vm4, %v23717_v63  ;;  %v1676_v8 = vpop.permute.xlu1 %1675 }
 0x777   :  { %20060 = vmatpush3.xpose.msk.msra.mxu0 %vm467_vm4, %v1364_v5  ;;  %20061 = vmatprep.mubr.msk.f32.mxu0 %vm23191_vm0, %v23190_v0 }
 0x778   :  { %20084 = vmatprep.subr.mxu0 %v23190_v0 }
 0x77a   :  { %20077 = vmatmul.mubr.msk.f32.vlgmr.msra.gmra.mrb[12].mxu1 %vm467_vm4, %v23726_v7 }
 0x77b   :  { %20080 = vmatpush3.xpose.msk.msra.mxu1 %vm467_vm4, %v1676_v8  ;;  %20081 = vmatprep.mubr.msk.f32.mxu1 %vm23191_vm0, %v23190_v0 }
 0x77c   :  { %20094 = vmatprep.subr.mxu1 %v23190_v0 }
 0x77e   :  { %20062 = vmatmul.mubr.msk.f32.vlgmr.msra.gmra.mrb[10].mxu0 %vm467_vm4, %v23735_v58 }
 0x77f   :  { %20086 = vmatprep.mubr.msk.f32.mxu0 %vm23191_vm0, %v23190_v0 }
 0x782   :  { %20082 = vmatmul.mubr.msk.f32.vlgmr.msra.gmra.mrb[12].mxu1 %vm467_vm4, %v23743_v9 }
 0x783   :  { %20096 = vmatprep.mubr.msk.f32.mxu1 %vm23191_vm0, %v23190_v0 }
 0x851   :  { %v1436_v12 = vpop.f32.mrb[10].mxu0 }
 0x852   :  { %v20063_v28 = vpop.f32.mrb[11].mxu0  ;;  %v1758_v16 = vsel %vm467_vm4, %v1436_v12, -inf }
 0x853   :  { %1759 = vmax.xlane.f32.xlu0 %v1758_v16 }
 0x855   :  { %v1748_v1 = vpop.f32.mrb[12].mxu1 }
 0x856   :  { %v20083_v2 = vpop.f32.mrb[13].mxu1  ;;  %v1761_v17 = vsel %vm467_vm4, %v1748_v1, -inf }
 0x857   :  { %1762 = vmax.xlane.f32.xlu1 %v1761_v17 }
 0x868   :  { %1929 = vrot.lane.b32.xlu1 %v23649_v37, %s23193_s2 }
 0x869   :  { %1780 = vrot.lane.b32.xlu0 %v23645_v34, %s23193_s2 }
 0x86c   :  { %2075 = vrot.lane.b32.xlu1 %v23655_v41, %s23193_s2 }
 0x86d   :  { %2224 = vrot.lane.b32.xlu0 %v23669_v48, %s23193_s2 }
 0x870   :  { %1856 = vrot.lane.b32.xlu1 %v23661_v45, %s23193_s2 }
 0x874   :  { %2002 = vrot.lane.b32.xlu1 %v23653_v40, %s23193_s2 }
 0x878   :  { %2372 = vrot.lane.b32.xlu1 %v23645_v34, %s23194_s24 }
 0x87c   :  { %2370 = vrot.lane.b32.xlu1 %v23679_v51, %s23195_s29 }
 0x880   :  { %2684 = vrot.lane.b32.xlu1 %v23655_v41, %s23194_s24 }
 0x884   :  { %2682 = vrot.lane.b32.xlu1 %v23688_v54, %s23195_s29 }
 0x888   :  { %2762 = vrot.lane.b32.xlu1 %v23665_v47, %s23194_s24 }
 0x88c   :  { %2760 = vrot.lane.b32.xlu1 %v23705_v61, %s23195_s29 }
 0x890   :  { %2840 = vrot.lane.b32.xlu1 %v23669_v48, %s23194_s24 }
 0x894   :  { %2838 = vrot.lane.b32.xlu1 %v23726_v7, %s23195_s29 }
 0x898   :  { %2916 = vrot.lane.b32.xlu1 %v23743_v9, %s23195_s29 }
 0x8e0   :  { %v1760_v18 = vpop.xlane.xlu0 %1759 }
 0x8e1   :  { %v1764_v44 = vsub.f32 %v1436_v12, %v1760_v18 }
 0x8e3   :  { %v1766_v19 = vmul.f32 1.442695, %v1764_v44 }
 0x8e4   :  { %v1763_v46 = vpop.xlane.xlu1 %1762  ;;  %v1781_v22 = vpop.permute.xlu0 %1780 }
 0x8e5   :  { %22344 = vpow2.f32 %v1766_v19  ;;  %v1765_v10 = vsub.f32 %v1748_v1, %v1763_v46  ;;  %20085 = vmatpush3.msra.mxu0 %v1781_v22 }
 0x8e6   :  { %20089 = vmatprep.subr.mxu0 %v23190_v0 }
 0x8e7   :  { %v1768_v11 = vmul.f32 1.442695, %v1765_v10 }
 0x8e8   :  { %v1930_v25 = vpop.permute.xlu1 %1929  ;;  %v2225_v30 = vpop.permute.xlu0 %2224 }
 0x8e9   :  { %22346 = vpow2.f32 %v1768_v11  ;;  %20095 = vmatpush3.msra.mxu1 %v1930_v25 }
 0x8ea   :  { %20104 = vmatprep.subr.mxu1 %v23190_v0 }
 0x8ec   :  { %v2076_v29 = vpop.permute.xlu1 %2075 }
 0x8ef   :  { %v22345_v53 = vpop.eup %22344 }
 0x8f0   :  { %v1770_v26 = vsel %vm467_vm4, %v22345_v53, 0.0  ;;  %v1857_v32 = vpop.permute.xlu1 %1856 }
 0x8f1   :  { %1771 = vadd.xlane.f32.xlu0 %v1770_v26 }
 0x8f3   :  { %v22347_v55 = vpop.eup %22346 }
 0x8f4   :  { %v1773_v27 = vsel %vm467_vm4, %v22347_v55, 0.0  ;;  %v2003_v6 = vpop.permute.xlu1 %2002 }
 0x8f5   :  { %1774 = vadd.xlane.f32.xlu0 %v1773_v27 }
 0x8f8   :  { %v2373_v14 = vpop.permute.xlu1 %2372 }
 0x8fc   :  { %v2371_v43 = vpop.permute.xlu1 %2370 }
 0x900   :  { %v2685_v56 = vpop.permute.xlu1 %2684 }
 0x904   :  { %v2683_v60 = vpop.permute.xlu1 %2682 }
 0x908   :  { %v2763_v5 = vpop.permute.xlu1 %2762 }
 0x90b   :  { %2151 = vrot.lane.b32.xlu0 %v23665_v47, %s23193_s2 }
 0x90c   :  { %v2761_v12 = vpop.permute.xlu1 %2760 }
 0x90f   :  { %2297 = vrot.lane.b32.xlu0 %v23673_v49, %s23193_s2 }
 0x910   :  { %v2841_v16 = vpop.permute.xlu1 %2840 }
 0x913   :  { %2450 = vrot.lane.b32.xlu0 %v23661_v45, %s23194_s24 }
 0x914   :  { %v2839_v2 = vpop.permute.xlu1 %2838 }
 0x917   :  { %2448 = vrot.lane.b32.xlu0 %v23697_v57, %s23195_s29 }
 0x918   :  { %v2917_v18 = vpop.permute.xlu1 %2916 }
 0x91b   :  { %2528 = vrot.lane.b32.xlu0 %v23649_v37, %s23194_s24 }
 0x91f   :  { %2526 = vrot.lane.b32.xlu0 %v23717_v63, %s23195_s29 }
 0x923   :  { %2606 = vrot.lane.b32.xlu0 %v23653_v40, %s23194_s24 }
 0x927   :  { %2604 = vrot.lane.b32.xlu0 %v23735_v58, %s23195_s29 }
 0x92b   :  { %2918 = vrot.lane.b32.xlu0 %v23673_v49, %s23194_s24 }
 0x97e   :  { %v1772_v3 = vpop.xlane.xlu0 %1771 }
 0x97f   :  { %22348 = vrcp.f32 %v1772_v3 }
 0x982   :  { %v1775_v21 = vpop.xlane.xlu0 %1774 }
 0x983   :  { %22350 = vrcp.f32 %v1775_v21 }
 0x986   :  { %v2152_v33 = vpop.permute.xlu0 %2151 }
 0x989   :  { %v22349_v36 = vpop.eup %22348 }
 0x98a   :  { %v2298_v38 = vpop.permute.xlu0 %2297  ;;  %v1778_v39 = vmul.f32 %v22349_v36, %v22345_v53 }
 0x98c   :  { %20087 = vmatmul.mubr.msk.f32.vlgmr.msra.gmra.mrb[12].mxu0 %vm467_vm4, %v1778_v39  ;;  %20097 = vmatmul.mubr.msk.f32.vlgmr.msra.gmra.mrb[14].mxu1 %vm467_vm4, %v1778_v39 }
 0x98d   :  { %v22351_v42 = vpop.eup %22350  ;;  %20090 = vmatpush3.msra.mxu0 %v1857_v32  ;;  %20105 = vmatpush3.msra.mxu1 %v2076_v29 }
 0x98e   :  { %20091 = vmatprep.mubr.msk.f32.mxu0 %vm23191_vm0, %v23190_v0  ;;  %20099 = vmatprep.subr.mxu0 %v23190_v0  ;;  %v1779_v50 = vmul.f32 %v22351_v42, %v22347_v55  ;;  %v2451_v52 = vpop.permute.xlu0 %2450 }
 0x98f   :  { %20106 = vmatprep.mubr.msk.f32.mxu1 %vm23191_vm0, %v23190_v0  ;;  %20114 = vmatprep.subr.mxu1 %v23190_v0 }
 0x990   :  { %20092 = vmatmul.mubr.msk.f32.vlgmr.msra.gmra.mrb[14].mxu0 %vm467_vm4, %v1778_v39  ;;  %20107 = vmatmul.mubr.msk.f32.vlgmr.msra.gmra.mrb[16].mxu1 %vm467_vm4, %v1779_v50 }
 0x991   :  { %20100 = vmatpush3.msra.mxu0 %v2003_v6  ;;  %20115 = vmatpush3.msra.mxu1 %v2225_v30 }
 0x992   :  { %20101 = vmatprep.mubr.msk.f32.mxu0 %vm23191_vm0, %v23190_v0  ;;  %20109 = vmatprep.subr.mxu0 %v23190_v0  ;;  %v2449_v59 = vpop.permute.xlu0 %2448 }
 0x993   :  { %20116 = vmatprep.mubr.msk.f32.mxu1 %vm23191_vm0, %v23190_v0  ;;  %20124 = vmatprep.subr.mxu1 %v23190_v0 }
 0x994   :  { %20102 = vmatmul.mubr.msk.f32.vlgmr.msra.gmra.mrb[16].mxu0 %vm467_vm4, %v1778_v39  ;;  %20117 = vmatmul.mubr.msk.f32.vlgmr.msra.gmra.mrb[18].mxu1 %vm467_vm4, %v1779_v50 }
 0x995   :  { %20110 = vmatpush3.msra.mxu0 %v2152_v33  ;;  %20111 = vmatprep.mubr.msk.f32.mxu0 %vm23191_vm0, %v23190_v0 }
 0x996   :  { %20119 = vmatprep.subr.mxu0 %v23190_v0  ;;  %20126 = vmatprep.mubr.msk.f32.mxu1 %vm23191_vm0, %v23190_v0  ;;  %v2529_v62 = vpop.permute.xlu0 %2528 }
 0x998   :  { %20125 = vmatpush3.xpose.msk.msra.mxu1 %vm467_vm4, %v2373_v14  ;;  %20112 = vmatmul.mubr.msk.f32.vlgmr.msra.gmra.mrb[18].mxu0 %vm467_vm4, %v1779_v50 }
 0x999   :  { %20120 = vmatpush3.msra.mxu0 %v2298_v38  ;;  %20129 = vmatprep.subr.mxu1 %v23190_v0 }
 0x99a   :  { %20121 = vmatprep.mubr.msk.f32.mxu0 %vm23191_vm0, %v23190_v0  ;;  %20144 = vmatprep.subr.mxu0 %v23190_v0  ;;  %v2527_v8 = vpop.permute.xlu0 %2526 }
 0x99b   :  { %20127 = vmatmul.mubr.msk.f32.vlgmr.msra.gmra.mrb[20].mxu1 %vm467_vm4, %v2371_v43 }
 0x99c   :  { %20130 = vmatpush3.xpose.msk.msra.mxu1 %vm467_vm4, %v2451_v52  ;;  %20122 = vmatmul.mubr.msk.f32.vlgmr.msra.gmra.mrb[20].mxu0 %vm467_vm4, %v1779_v50 }
 0x99d   :  { %20131 = vmatprep.mubr.msk.f32.mxu1 %vm23191_vm0, %v23190_v0  ;;  %20134 = vmatprep.subr.mxu1 %v23190_v0 }
 0x99e   :  { %20146 = vmatprep.mubr.msk.f32.mxu0 %vm23191_vm0, %v23190_v0  ;;  %v2607_v28 = vpop.permute.xlu0 %2606 }
 0x9a0   :  { %20145 = vmatpush3.xpose.msk.msra.mxu0 %vm467_vm4, %v2685_v56 }
 0x9a1   :  { %20149 = vmatprep.subr.mxu0 %v23190_v0 }
 0x9a2   :  { %v2605_v1 = vpop.permute.xlu0 %2604 }
 0x9a3   :  { %20132 = vmatmul.mubr.msk.f32.vlgmr.msra.gmra.mrb[20].mxu1 %vm467_vm4, %v2449_v59  ;;  %20147 = vmatmul.mubr.msk.f32.vlgmr.msra.gmra.mrb[22].mxu0 %vm467_vm4, %v2683_v60 }
 0x9a4   :  { %20135 = vmatpush3.xpose.msk.msra.mxu1 %vm467_vm4, %v2529_v62  ;;  %20150 = vmatpush3.xpose.msk.msra.mxu0 %vm467_vm4, %v2763_v5 }
 0x9a5   :  { %20136 = vmatprep.mubr.msk.f32.mxu1 %vm23191_vm0, %v23190_v0  ;;  %20139 = vmatprep.subr.mxu1 %v23190_v0 }
 0x9a6   :  { %20151 = vmatprep.mubr.msk.f32.mxu0 %vm23191_vm0, %v23190_v0  ;;  %20154 = vmatprep.subr.mxu0 %v23190_v0  ;;  %v2919_v17 = vpop.permute.xlu0 %2918 }
 0x9ab   :  { %20137 = vmatmul.mubr.msk.f32.vlgmr.msra.gmra.mrb[20].mxu1 %vm467_vm4, %v2527_v8  ;;  %20152 = vmatmul.mubr.msk.f32.vlgmr.msra.gmra.mrb[22].mxu0 %vm467_vm4, %v2761_v12 }
 0x9ac   :  { %20140 = vmatpush3.xpose.msk.msra.mxu1 %vm467_vm4, %v2607_v28  ;;  %20155 = vmatpush3.xpose.msk.msra.mxu0 %vm467_vm4, %v2841_v16 }
 0x9ad   :  { %20141 = vmatprep.mubr.msk.f32.mxu1 %vm23191_vm0, %v23190_v0  ;;  %20156 = vmatprep.mubr.msk.f32.mxu0 %vm23191_vm0, %v23190_v0 }
 0x9ae   :  { %20159 = vmatprep.subr.mxu0 %v23190_v0  ;;  %20164 = vmatprep.subr.mxu1 %v23190_v0 }
 0x9b3   :  { %20142 = vmatmul.mubr.msk.f32.vlgmr.msra.gmra.mrb[20].mxu1 %vm467_vm4, %v2605_v1  ;;  %20157 = vmatmul.mubr.msk.f32.vlgmr.msra.gmra.mrb[22].mxu0 %vm467_vm4, %v2839_v2 }
 0x9b4   :  { %20160 = vmatpush3.xpose.msk.msra.mxu0 %vm467_vm4, %v2919_v17  ;;  %20161 = vmatprep.mubr.msk.f32.mxu0 %vm23191_vm0, %v23190_v0 }
 0x9b5   :  { %20169 = vmatprep.subr.mxu0 %v23190_v0  ;;  %20166 = vmatprep.mubr.msk.f32.mxu1 %vm23191_vm0, %v23190_v0 }
 0x9bb   :  { %20162 = vmatmul.mubr.msk.f32.vlgmr.msra.gmra.mrb[22].mxu0 %vm467_vm4, %v2917_v18 }
 0x9bc   :  { %20171 = vmatprep.mubr.msk.f32.mxu0 %vm23191_vm0, %v23190_v0 }
 0xa5f   :  { %v23873_v44 = vpop.f32.mrb[12].mxu0  ;;  %v23875_v19 = vpop.f32.mrb[14].mxu1 }
 0xa60   :  { %v20088_v46 = vpop.f32.mrb[13].mxu0  ;;  %v20098_v22 = vpop.f32.mrb[15].mxu1 }
 0xa63   :  { %v23877_v10 = vpop.f32.mrb[14].mxu0  ;;  %v23879_v11 = vpop.f32.mrb[16].mxu1 }
 0xa64   :  { %v20093_v25 = vpop.f32.mrb[15].mxu0  ;;  %v20108_v53 = vpop.f32.mrb[17].mxu1 }
 0xa67   :  { %v23881_v26 = vpop.f32.mrb[16].mxu0  ;;  %v23883_v55 = vpop.f32.mrb[18].mxu1 }
 0xa68   :  { %v20103_v27 = vpop.f32.mrb[17].mxu0  ;;  %v20118_v29 = vpop.f32.mrb[19].mxu1 }
 0xa6b   :  { %v23885_v30 = vpop.f32.mrb[18].mxu0 }
 0xa6c   :  { %v20113_v32 = vpop.f32.mrb[19].mxu0 }
 0xa6f   :  { %v23887_v3 = vpop.f32.mrb[20].mxu0 }
 0xa70   :  { %v20123_v6 = vpop.f32.mrb[21].mxu0 }
 0xa86   :  { %v2678_v21 = vpop.f32.mrb[20].mxu1 }
 0xa87   :  { %v20143_v33 = vpop.f32.mrb[21].mxu1  ;;  %v3000_v14 = vsel %vm467_vm4, %v2678_v21, -inf }
 0xa88   :  { %3001 = vmax.xlane.f32.xlu0 %v3000_v14 }
 0xa8e   :  { %v2990_v36 = vpop.f32.mrb[22].mxu0 }
 0xa8f   :  { %v20163_v38 = vpop.f32.mrb[23].mxu0  ;;  %v3003_v39 = vsel %vm467_vm4, %v2990_v36, -inf }
 0xa90   :  { %3004 = vmax.xlane.f32.xlu1 %v3003_v39 }
 0xa9e   :  { %3022 = vrot.lane.b32.xlu0 %v23645_v34, %s23196_s7 }
 0xaa1   :  { %3171 = vrot.lane.b32.xlu1 %v23649_v37, %s23196_s7 }
 0xaa5   :  { %3317 = vrot.lane.b32.xlu1 %v23655_v41, %s23196_s7 }
 0xaa9   :  { %3098 = vrot.lane.b32.xlu1 %v23661_v45, %s23196_s7 }
 0xaad   :  { %3244 = vrot.lane.b32.xlu1 %v23653_v40, %s23196_s7 }
 0xab1   :  { %3614 = vrot.lane.b32.xlu1 %v23645_v34, %s23197_s30 }
 0xab5   :  { %3612 = vrot.lane.b32.xlu1 %v23679_v51, %s23198_s8 }
 0xab9   :  { %3926 = vrot.lane.b32.xlu1 %v23655_v41, %s23197_s30 }
 0xabd   :  { %3924 = vrot.lane.b32.xlu1 %v23688_v54, %s23198_s8 }
 0xac1   :  { %4004 = vrot.lane.b32.xlu1 %v23665_v47, %s23197_s30 }
 0xac5   :  { %4002 = vrot.lane.b32.xlu1 %v23705_v61, %s23198_s8 }
 0xac9   :  { %4082 = vrot.lane.b32.xlu1 %v23669_v48, %s23197_s30 }
 0xacd   :  { %4080 = vrot.lane.b32.xlu1 %v23726_v7, %s23198_s8 }
 0xad1   :  { %4158 = vrot.lane.b32.xlu1 %v23743_v9, %s23198_s8 }
 0xb15   :  { %v3002_v42 = vpop.xlane.xlu0 %3001 }
 0xb16   :  { %v3006_v43 = vsub.f32 %v2678_v21, %v3002_v42 }
 0xb18   :  { %v3008_v50 = vmul.f32 1.442695, %v3006_v43 }
 0xb19   :  { %v3023_v52 = vpop.permute.xlu0 %3022 }
 0xb1a   :  { %22352 = vpow2.f32 %v3008_v50  ;;  %20165 = vmatpush3.msra.mxu1 %v3023_v52 }
 0xb1b   :  { %20174 = vmatprep.subr.mxu1 %v23190_v0 }
 0xb1d   :  { %v3005_v56 = vpop.xlane.xlu1 %3004 }
 0xb1e   :  { %v3007_v12 = vsub.f32 %v2990_v36, %v3005_v56 }
 0xb20   :  { %v3010_v28 = vmul.f32 1.442695, %v3007_v12 }
 0xb21   :  { %v3172_v59 = vpop.permute.xlu1 %3171 }
 0xb22   :  { %22354 = vpow2.f32 %v3010_v28 }
 0xb24   :  { %v22353_v60 = vpop.eup %22352 }
 0xb25   :  { %v3318_v62 = vpop.permute.xlu1 %3317  ;;  %v3012_v5 = vsel %vm467_vm4, %v22353_v60, 0.0 }
 0xb26   :  { %3013 = vadd.xlane.f32.xlu0 %v3012_v5 }
 0xb29   :  { %v3099_v8 = vpop.permute.xlu1 %3098 }
 0xb2a   :  { %20170 = vmatpush3.msra.mxu0 %v3099_v8 }
 0xb2b   :  { %20179 = vmatprep.subr.mxu0 %v23190_v0 }
 0xb2c   :  { %v22355_v16 = vpop.eup %22354 }
 0xb2d   :  { %v3015_v1 = vsel %vm467_vm4, %v22355_v16, 0.0  ;;  %v3245_v46 = vpop.permute.xlu1 %3244 }
 0xb31   :  { %v3615_v25 = vpop.permute.xlu1 %3614 }
 0xb35   :  { %v3613_v27 = vpop.permute.xlu1 %3612 }
 0xb39   :  { %v3927_v6 = vpop.permute.xlu1 %3926 }
 0xb3c   :  { %3466 = vrot.lane.b32.xlu0 %v23669_v48, %s23196_s7 }
 0xb3d   :  { %v3925_v36 = vpop.permute.xlu1 %3924 }
 0xb41   :  { %v4005_v42 = vpop.permute.xlu1 %4004 }
 0xb45   :  { %v4003_v50 = vpop.permute.xlu1 %4002 }
 0xb49   :  { %v4083_v56 = vpop.permute.xlu1 %4082 }
 0xb5b   :  { %3016 = vadd.xlane.f32.xlu0 %v3015_v1 }
 0xb71   :  { %3393 = vrot.lane.b32.xlu0 %v23665_v47, %s23196_s7 }
 0xb75   :  { %3539 = vrot.lane.b32.xlu0 %v23673_v49, %s23196_s7 }
 0xb79   :  { %3692 = vrot.lane.b32.xlu0 %v23661_v45, %s23197_s30 }
 0xb7d   :  { %3690 = vrot.lane.b32.xlu0 %v23697_v57, %s23198_s8 }
 0xb81   :  { %3770 = vrot.lane.b32.xlu0 %v23649_v37, %s23197_s30 }
 0xb85   :  { %3768 = vrot.lane.b32.xlu0 %v23717_v63, %s23198_s8 }
 0xb89   :  { %3848 = vrot.lane.b32.xlu0 %v23653_v40, %s23197_s30 }
 0xb8d   :  { %3846 = vrot.lane.b32.xlu0 %v23735_v58, %s23198_s8 }
 0xb91   :  { %4160 = vrot.lane.b32.xlu0 %v23673_v49, %s23197_s30 }
 0xbb3   :  { %v3014_v2 = vpop.xlane.xlu0 %3013 }
 0xbb4   :  { %22356 = vrcp.f32 %v3014_v2 }
 0xbb7   :  { %v3467_v22 = vpop.permute.xlu0 %3466 }
 0xbbe   :  { %v22357_v17 = vpop.eup %22356 }
 0xbbf   :  { %v3020_v18 = vmul.f32 %v22357_v17, %v22353_v60  ;;  %v4081_v60 = vpop.permute.xlu1 %4080 }
 0xbc1   :  { %20167 = vmatmul.mubr.msk.f32.vlgmr.msra.gmra.mrb[22].mxu1 %vm467_vm4, %v3020_v18  ;;  %20172 = vmatmul.mubr.msk.f32.vlgmr.msra.gmra.mrb[24].mxu0 %vm467_vm4, %v3020_v18 }
 0xbc2   :  { %20175 = vmatpush3.msra.mxu1 %v3172_v59  ;;  %20180 = vmatpush3.msra.mxu0 %v3245_v46 }
 0xbc3   :  { %20176 = vmatprep.mubr.msk.f32.mxu1 %vm23191_vm0, %v23190_v0  ;;  %20181 = vmatprep.mubr.msk.f32.mxu0 %vm23191_vm0, %v23190_v0  ;;  %v4159_v5 = vpop.permute.xlu1 %4158 }
 0xbc4   :  { %20184 = vmatprep.subr.mxu1 %v23190_v0  ;;  %20189 = vmatprep.subr.mxu0 %v23190_v0 }
 0xbc5   :  { %20177 = vmatmul.mubr.msk.f32.vlgmr.msra.gmra.mrb[24].mxu1 %vm467_vm4, %v3020_v18  ;;  %20182 = vmatmul.mubr.msk.f32.vlgmr.msra.gmra.mrb[26].mxu0 %vm467_vm4, %v3020_v18 }
 0xbc6   :  { %20185 = vmatpush3.msra.mxu1 %v3318_v62  ;;  %20186 = vmatprep.mubr.msk.f32.mxu1 %vm23191_vm0, %v23190_v0 }
 0xbc7   :  { %20191 = vmatprep.mubr.msk.f32.mxu0 %vm23191_vm0, %v23190_v0  ;;  %20194 = vmatprep.subr.mxu1 %v23190_v0 }
 0xbe8   :  { %v3017_v53 = vpop.xlane.xlu0 %3016 }
 0xbe9   :  { %22358 = vrcp.f32 %v3017_v53 }
 0xbec   :  { %v3394_v29 = vpop.permute.xlu0 %3393 }
 0xbed   :  { %20190 = vmatpush3.msra.mxu0 %v3394_v29 }
 0xbee   :  { %20199 = vmatprep.subr.mxu0 %v23190_v0 }
 0xbf0   :  { %v3540_v32 = vpop.permute.xlu0 %3539 }
 0xbf3   :  { %v22359_v21 = vpop.eup %22358 }
 0xbf4   :  { %v3693_v33 = vpop.permute.xlu0 %3692  ;;  %v3021_v14 = vmul.f32 %v22359_v21, %v22355_v16 }
 0xbf6   :  { %20187 = vmatmul.mubr.msk.f32.vlgmr.msra.gmra.mrb[26].mxu1 %vm467_vm4, %v3021_v14  ;;  %20192 = vmatmul.mubr.msk.f32.vlgmr.msra.gmra.mrb[28].mxu0 %vm467_vm4, %v3021_v14 }
 0xbf7   :  { %20195 = vmatpush3.msra.mxu1 %v3467_v22  ;;  %20200 = vmatpush3.msra.mxu0 %v3540_v32 }
 0xbf8   :  { %v3691_v38 = vpop.permute.xlu0 %3690  ;;  %20196 = vmatprep.mubr.msk.f32.mxu1 %vm23191_vm0, %v23190_v0  ;;  %20201 = vmatprep.mubr.msk.f32.mxu0 %vm23191_vm0, %v23190_v0 }
 0xbf9   :  { %20204 = vmatprep.subr.mxu1 %v23190_v0  ;;  %20224 = vmatprep.subr.mxu0 %v23190_v0 }
 0xbfa   :  { %20197 = vmatmul.mubr.msk.f32.vlgmr.msra.gmra.mrb[28].mxu1 %vm467_vm4, %v3021_v14  ;;  %20202 = vmatmul.mubr.msk.f32.vlgmr.msra.gmra.mrb[30].mxu0 %vm467_vm4, %v3021_v14 }
 0xbfb   :  { %20206 = vmatprep.mubr.msk.f32.mxu1 %vm23191_vm0, %v23190_v0  ;;  %20226 = vmatprep.mubr.msk.f32.mxu0 %vm23191_vm0, %v23190_v0 }
 0xbfc   :  { %v3771_v39 = vpop.permute.xlu0 %3770 }
 0xbfe   :  { %20205 = vmatpush3.xpose.msk.msra.mxu1 %vm467_vm4, %v3615_v25  ;;  %20225 = vmatpush3.xpose.msk.msra.mxu0 %vm467_vm4, %v3927_v6 }
 0xbff   :  { %20209 = vmatprep.subr.mxu1 %v23190_v0  ;;  %20229 = vmatprep.subr.mxu0 %v23190_v0 }
 0xc00   :  { %v3769_v43 = vpop.permute.xlu0 %3768 }
 0xc01   :  { %20207 = vmatmul.mubr.msk.f32.vlgmr.msra.gmra.mrb[30].mxu1 %vm467_vm4, %v3613_v27  ;;  %20227 = vmatmul.mubr.msk.f32.vlgmr.msra.gmra.mrb[32].mxu0 %vm467_vm4, %v3925_v36 }
 0xc02   :  { %20210 = vmatpush3.xpose.msk.msra.mxu1 %vm467_vm4, %v3693_v33  ;;  %20230 = vmatpush3.xpose.msk.msra.mxu0 %vm467_vm4, %v4005_v42 }
 0xc03   :  { %20211 = vmatprep.mubr.msk.f32.mxu1 %vm23191_vm0, %v23190_v0  ;;  %20214 = vmatprep.subr.mxu1 %v23190_v0 }
 0xc04   :  { %20231 = vmatprep.mubr.msk.f32.mxu0 %vm23191_vm0, %v23190_v0  ;;  %20234 = vmatprep.subr.mxu0 %v23190_v0  ;;  %v3849_v52 = vpop.permute.xlu0 %3848 }
 0xc08   :  { %v3847_v59 = vpop.permute.xlu0 %3846 }
 0xc09   :  { %20212 = vmatmul.mubr.msk.f32.vlgmr.msra.gmra.mrb[30].mxu1 %vm467_vm4, %v3691_v38  ;;  %20232 = vmatmul.mubr.msk.f32.vlgmr.msra.gmra.mrb[32].mxu0 %vm467_vm4, %v4003_v50 }
 0xc0a   :  { %20215 = vmatpush3.xpose.msk.msra.mxu1 %vm467_vm4, %v3771_v39  ;;  %20235 = vmatpush3.xpose.msk.msra.mxu0 %vm467_vm4, %v4083_v56 }
 0xc0b   :  { %20216 = vmatprep.mubr.msk.f32.mxu1 %vm23191_vm0, %v23190_v0  ;;  %20219 = vmatprep.subr.mxu1 %v23190_v0 }
 0xc0c   :  { %20236 = vmatprep.mubr.msk.f32.mxu0 %vm23191_vm0, %v23190_v0  ;;  %20239 = vmatprep.subr.mxu0 %v23190_v0  ;;  %v4161_v62 = vpop.permute.xlu0 %4160 }
 0xc11   :  { %20217 = vmatmul.mubr.msk.f32.vlgmr.msra.gmra.mrb[30].mxu1 %vm467_vm4, %v3769_v43  ;;  %20237 = vmatmul.mubr.msk.f32.vlgmr.msra.gmra.mrb[32].mxu0 %vm467_vm4, %v4081_v60 }
 0xc12   :  { %20220 = vmatpush3.xpose.msk.msra.mxu1 %vm467_vm4, %v3849_v52  ;;  %20240 = vmatpush3.xpose.msk.msra.mxu0 %vm467_vm4, %v4161_v62 }
 0xc13   :  { %20221 = vmatprep.mubr.msk.f32.mxu1 %vm23191_vm0, %v23190_v0  ;;  %20241 = vmatprep.mubr.msk.f32.mxu0 %vm23191_vm0, %v23190_v0 }
 0xc14   :  { %20244 = vmatprep.subr.mxu1 %v23190_v0  ;;  %20249 = vmatprep.subr.mxu0 %v23190_v0 }
 0xc19   :  { %20222 = vmatmul.mubr.msk.f32.vlgmr.msra.gmra.mrb[30].mxu1 %vm467_vm4, %v3847_v59  ;;  %20242 = vmatmul.mubr.msk.f32.vlgmr.msra.gmra.mrb[32].mxu0 %vm467_vm4, %v4159_v5 }
 0xc1a   :  { %20246 = vmatprep.mubr.msk.f32.mxu1 %vm23191_vm0, %v23190_v0  ;;  %20251 = vmatprep.mubr.msk.f32.mxu0 %vm23191_vm0, %v23190_v0 }
 0xc94   :  { %v24013_v8 = vpop.f32.mrb[22].mxu1  ;;  %v24015_v12 = vpop.f32.mrb[24].mxu0 }
 0xc95   :  { %v20168_v28 = vpop.f32.mrb[23].mxu1  ;;  %v20173_v16 = vpop.f32.mrb[25].mxu0 }
 0xc98   :  { %v24017_v1 = vpop.f32.mrb[24].mxu1  ;;  %v24019_v2 = vpop.f32.mrb[26].mxu0 }
 0xc99   :  { %v20178_v17 = vpop.f32.mrb[25].mxu1  ;;  %v20183_v18 = vpop.f32.mrb[27].mxu0 }
 0xcc9   :  { %v24021_v46 = vpop.f32.mrb[26].mxu1  ;;  %v24023_v22 = vpop.f32.mrb[28].mxu0 }
 0xcca   :  { %v20188_v25 = vpop.f32.mrb[27].mxu1  ;;  %v20193_v53 = vpop.f32.mrb[29].mxu0 }
 0xccd   :  { %v24025_v27 = vpop.f32.mrb[28].mxu1  ;;  %v24027_v29 = vpop.f32.mrb[30].mxu0 }
 0xcce   :  { %v20198_v32 = vpop.f32.mrb[29].mxu1  ;;  %v20203_v6 = vpop.f32.mrb[31].mxu0 }
 0xcec   :  { %v3920_v21 = vpop.f32.mrb[30].mxu1  ;;  %v4232_v33 = vpop.f32.mrb[32].mxu0 }
 0xced   :  { %v20223_v14 = vpop.f32.mrb[31].mxu1  ;;  %v20243_v36 = vpop.f32.mrb[33].mxu0  ;;  %v4242_v38 = vsel %vm467_vm4, %v3920_v21, -inf  ;;  %v4245_v39 = vsel %vm467_vm4, %v4232_v33, -inf }
 0xcee   :  { %4243 = vmax.xlane.f32.xlu0 %v4242_v38  ;;  %4246 = vmax.xlane.f32.xlu1 %v4245_v39 }
 0xcff   :  { %4413 = vrot.lane.b32.xlu1 %v23649_v37, %s23199_s10 }
 0xd03   :  { %4559 = vrot.lane.b32.xlu1 %v23655_v41, %s23199_s10 }
 0xd04   :  { %4264 = vrot.lane.b32.xlu0 %v23645_v34, %s23199_s10 }
 0xd07   :  { %4340 = vrot.lane.b32.xlu1 %v23661_v45, %s23199_s10 }
 0xd0b   :  { %4486 = vrot.lane.b32.xlu1 %v23653_v40, %s23199_s10 }
 0xd0f   :  { %4856 = vrot.lane.b32.xlu1 %v23645_v34, %s23200_s11 }
 0xd13   :  { %4854 = vrot.lane.b32.xlu1 %v23679_v51, %s23201_s15 }
 0xd17   :  { %5168 = vrot.lane.b32.xlu1 %v23655_v41, %s23200_s11 }
 0xd1b   :  { %5166 = vrot.lane.b32.xlu1 %v23688_v54, %s23201_s15 }
 0xd1f   :  { %5246 = vrot.lane.b32.xlu1 %v23665_v47, %s23200_s11 }
 0xd23   :  { %5244 = vrot.lane.b32.xlu1 %v23705_v61, %s23201_s15 }
 0xd27   :  { %5324 = vrot.lane.b32.xlu1 %v23669_v48, %s23200_s11 }
 0xd2b   :  { %5322 = vrot.lane.b32.xlu1 %v23726_v7, %s23201_s15 }
 0xd2f   :  { %5400 = vrot.lane.b32.xlu1 %v23743_v9, %s23201_s15 }
 0xd7b   :  { %v4244_v51 = vpop.xlane.xlu0 %4243  ;;  %v4247_v42 = vpop.xlane.xlu1 %4246 }
 0xd7c   :  { %v4248_v43 = vsub.f32 %v3920_v21, %v4244_v51  ;;  %v4249_v9 = vsub.f32 %v4232_v33, %v4247_v42 }
 0xd7e   :  { %v4250_v50 = vmul.f32 1.442695, %v4248_v43  ;;  %v4252_v60 = vmul.f32 1.442695, %v4249_v9 }
 0xd7f   :  { %v4265_v54 = vpop.permute.xlu0 %4264  ;;  %v4414_v52 = vpop.permute.xlu1 %4413 }
 0xd80   :  { %22360 = vpow2.f32 %v4250_v50  ;;  %20245 = vmatpush3.msra.mxu1 %v4265_v54 }
 0xd81   :  { %20254 = vmatprep.subr.mxu1 %v23190_v0  ;;  %22362 = vpow2.f32 %v4252_v60 }
 0xd83   :  { %v4560_v61 = vpop.permute.xlu1 %4559 }
 0xd87   :  { %v4341_v56 = vpop.permute.xlu1 %4340 }
 0xd88   :  { %20250 = vmatpush3.msra.mxu0 %v4341_v56 }
 0xd89   :  { %20259 = vmatprep.subr.mxu0 %v23190_v0 }
 0xd8a   :  { %v22361_v59 = vpop.eup %22360 }
 0xd8b   :  { %v4254_v7 = vsel %vm467_vm4, %v22361_v59, 0.0  ;;  %v22363_v62 = vpop.eup %22362 }
 0xd8c   :  { %4255 = vadd.xlane.f32.xlu0 %v4254_v7  ;;  %v4257_v5 = vsel %vm467_vm4, %v22363_v62, 0.0 }
 0xda2   :  { %4708 = vrot.lane.b32.xlu0 %v23669_v48, %s23199_s10 }
 0xdc1   :  { %4258 = vadd.xlane.f32.xlu0 %v4257_v5 }
 0xdd7   :  { %4635 = vrot.lane.b32.xlu0 %v23665_v47, %s23199_s10 }
 0xddb   :  { %4781 = vrot.lane.b32.xlu0 %v23673_v49, %s23199_s10 }
 0xddf   :  { %4934 = vrot.lane.b32.xlu0 %v23661_v45, %s23200_s11 }
 0xde3   :  { %4932 = vrot.lane.b32.xlu0 %v23697_v57, %s23201_s15  ;;  %v4487_v57 = vpop.permute.xlu1 %4486 }
 0xde7   :  { %5012 = vrot.lane.b32.xlu0 %v23649_v37, %s23200_s11 }
 0xdeb   :  { %5010 = vrot.lane.b32.xlu0 %v23717_v63, %s23201_s15 }
 0xdef   :  { %5090 = vrot.lane.b32.xlu0 %v23653_v40, %s23200_s11 }
 0xdf3   :  { %5088 = vrot.lane.b32.xlu0 %v23735_v58, %s23201_s15  ;;  %v4857_v58 = vpop.permute.xlu1 %4856 }
 0xdf7   :  { %5402 = vrot.lane.b32.xlu0 %v23673_v49, %s23200_s11  ;;  %v4855_v25 = vpop.permute.xlu1 %4854 }
 0xdfb   :  { %v5169_v6 = vpop.permute.xlu1 %5168 }
 0xdff   :  { %v5167_v36 = vpop.permute.xlu1 %5166 }
 0xe03   :  { %v5247_v51 = vpop.permute.xlu1 %5246 }
 0xe07   :  { %v5245_v43 = vpop.permute.xlu1 %5244 }
 0xe0b   :  { %v5325_v54 = vpop.permute.xlu1 %5324 }
 0xe19   :  { %v4256_v28 = vpop.xlane.xlu0 %4255 }
 0xe1a   :  { %22364 = vrcp.f32 %v4256_v28 }
 0xe1d   :  { %v4709_v63 = vpop.permute.xlu0 %4708 }
 0xe24   :  { %v22365_v16 = vpop.eup %22364 }
 0xe25   :  { %v4262_v17 = vmul.f32 %v22365_v16, %v22361_v59 }
 0xe27   :  { %20247 = vmatmul.mubr.msk.f32.vlgmr.msra.gmra.mrb[32].mxu1 %vm467_vm4, %v4262_v17  ;;  %20252 = vmatmul.mubr.msk.f32.vlgmr.msra.gmra.mrb[34].mxu0 %vm467_vm4, %v4262_v17 }
 0xe28   :  { %20255 = vmatpush3.msra.mxu1 %v4414_v52  ;;  %20260 = vmatpush3.msra.mxu0 %v4487_v57 }
 0xe29   :  { %20256 = vmatprep.mubr.msk.f32.mxu1 %vm23191_vm0, %v23190_v0  ;;  %20261 = vmatprep.mubr.msk.f32.mxu0 %vm23191_vm0, %v23190_v0 }
 0xe2a   :  { %20264 = vmatprep.subr.mxu1 %v23190_v0  ;;  %20269 = vmatprep.subr.mxu0 %v23190_v0 }
 0xe2b   :  { %20257 = vmatmul.mubr.msk.f32.vlgmr.msra.gmra.mrb[34].mxu1 %vm467_vm4, %v4262_v17  ;;  %20262 = vmatmul.mubr.msk.f32.vlgmr.msra.gmra.mrb[36].mxu0 %vm467_vm4, %v4262_v17 }
 0xe2c   :  { %20265 = vmatpush3.msra.mxu1 %v4560_v61  ;;  %20266 = vmatprep.mubr.msk.f32.mxu1 %vm23191_vm0, %v23190_v0  ;;  %v5323_v61 = vpop.permute.xlu1 %5322 }
 0xe2d   :  { %20271 = vmatprep.mubr.msk.f32.mxu0 %vm23191_vm0, %v23190_v0  ;;  %20274 = vmatprep.subr.mxu1 %v23190_v0 }
 0xe30   :  { %v5401_v59 = vpop.permute.xlu1 %5400 }
 0xe4e   :  { %v4259_v18 = vpop.xlane.xlu0 %4258 }
 0xe4f   :  { %22366 = vrcp.f32 %v4259_v18 }
 0xe52   :  { %v4636_v53 = vpop.permute.xlu0 %4635 }
 0xe53   :  { %20270 = vmatpush3.msra.mxu0 %v4636_v53 }
 0xe54   :  { %20279 = vmatprep.subr.mxu0 %v23190_v0 }
 0xe56   :  { %v4782_v32 = vpop.permute.xlu0 %4781 }
 0xe59   :  { %v22367_v21 = vpop.eup %22366 }
 0xe5a   :  { %v4935_v33 = vpop.permute.xlu0 %4934  ;;  %v4263_v14 = vmul.f32 %v22367_v21, %v22363_v62 }
 0xe5c   :  { %20267 = vmatmul.mubr.msk.f32.vlgmr.msra.gmra.mrb[36].mxu1 %vm467_vm4, %v4263_v14  ;;  %20272 = vmatmul.mubr.msk.f32.vlgmr.msra.gmra.mrb[38].mxu0 %vm467_vm4, %v4263_v14 }
 0xe5d   :  { %20275 = vmatpush3.msra.mxu1 %v4709_v63  ;;  %20280 = vmatpush3.msra.mxu0 %v4782_v32 }
 0xe5e   :  { %v4933_v38 = vpop.permute.xlu0 %4932  ;;  %20276 = vmatprep.mubr.msk.f32.mxu1 %vm23191_vm0, %v23190_v0  ;;  %20281 = vmatprep.mubr.msk.f32.mxu0 %vm23191_vm0, %v23190_v0 }
 0xe5f   :  { %20284 = vmatprep.subr.mxu1 %v23190_v0  ;;  %20304 = vmatprep.subr.mxu0 %v23190_v0 }
 0xe60   :  { %20277 = vmatmul.mubr.msk.f32.vlgmr.msra.gmra.mrb[38].mxu1 %vm467_vm4, %v4263_v14  ;;  %20282 = vmatmul.mubr.msk.f32.vlgmr.msra.gmra.mrb[40].mxu0 %vm467_vm4, %v4263_v14 }
 0xe61   :  { %20286 = vmatprep.mubr.msk.f32.mxu1 %vm23191_vm0, %v23190_v0  ;;  %20306 = vmatprep.mubr.msk.f32.mxu0 %vm23191_vm0, %v23190_v0 }
 0xe62   :  { %v5013_v39 = vpop.permute.xlu0 %5012 }
 0xe64   :  { %20285 = vmatpush3.xpose.msk.msra.mxu1 %vm467_vm4, %v4857_v58  ;;  %20305 = vmatpush3.xpose.msk.msra.mxu0 %vm467_vm4, %v5169_v6 }
 0xe65   :  { %20289 = vmatprep.subr.mxu1 %v23190_v0  ;;  %20309 = vmatprep.subr.mxu0 %v23190_v0 }
 0xe66   :  { %v5011_v42 = vpop.permute.xlu0 %5010 }
 0xe67   :  { %20287 = vmatmul.mubr.msk.f32.vlgmr.msra.gmra.mrb[40].mxu1 %vm467_vm4, %v4855_v25  ;;  %20307 = vmatmul.mubr.msk.f32.vlgmr.msra.gmra.mrb[42].mxu0 %vm467_vm4, %v5167_v36 }
 0xe68   :  { %20290 = vmatpush3.xpose.msk.msra.mxu1 %vm467_vm4, %v4935_v33  ;;  %20310 = vmatpush3.xpose.msk.msra.mxu0 %vm467_vm4, %v5247_v51 }
 0xe69   :  { %20291 = vmatprep.mubr.msk.f32.mxu1 %vm23191_vm0, %v23190_v0  ;;  %20294 = vmatprep.subr.mxu1 %v23190_v0 }
 0xe6a   :  { %20311 = vmatprep.mubr.msk.f32.mxu0 %vm23191_vm0, %v23190_v0  ;;  %20314 = vmatprep.subr.mxu0 %v23190_v0  ;;  %v5091_v50 = vpop.permute.xlu0 %5090 }
 0xe6e   :  { %v5089_v52 = vpop.permute.xlu0 %5088 }
 0xe6f   :  { %20292 = vmatmul.mubr.msk.f32.vlgmr.msra.gmra.mrb[40].mxu1 %vm467_vm4, %v4933_v38  ;;  %20312 = vmatmul.mubr.msk.f32.vlgmr.msra.gmra.mrb[42].mxu0 %vm467_vm4, %v5245_v43 }
 0xe70   :  { %20295 = vmatpush3.xpose.msk.msra.mxu1 %vm467_vm4, %v5013_v39  ;;  %20315 = vmatpush3.xpose.msk.msra.mxu0 %vm467_vm4, %v5325_v54 }
 0xe71   :  { %20296 = vmatprep.mubr.msk.f32.mxu1 %vm23191_vm0, %v23190_v0  ;;  %20299 = vmatprep.subr.mxu1 %v23190_v0 }
 0xe72   :  { %20316 = vmatprep.mubr.msk.f32.mxu0 %vm23191_vm0, %v23190_v0  ;;  %20319 = vmatprep.subr.mxu0 %v23190_v0  ;;  %v5403_v56 = vpop.permute.xlu0 %5402 }
 0xe77   :  { %20297 = vmatmul.mubr.msk.f32.vlgmr.msra.gmra.mrb[40].mxu1 %vm467_vm4, %v5011_v42  ;;  %20317 = vmatmul.mubr.msk.f32.vlgmr.msra.gmra.mrb[42].mxu0 %vm467_vm4, %v5323_v61 }
 0xe78   :  { %20300 = vmatpush3.xpose.msk.msra.mxu1 %vm467_vm4, %v5091_v50  ;;  %20320 = vmatpush3.xpose.msk.msra.mxu0 %vm467_vm4, %v5403_v56 }
 0xe79   :  { %20301 = vmatprep.mubr.msk.f32.mxu1 %vm23191_vm0, %v23190_v0  ;;  %20321 = vmatprep.mubr.msk.f32.mxu0 %vm23191_vm0, %v23190_v0 }
 0xe7a   :  { %20324 = vmatprep.subr.mxu1 %v23190_v0  ;;  %20329 = vmatprep.subr.mxu0 %v23190_v0 }
 0xe7f   :  { %20302 = vmatmul.mubr.msk.f32.vlgmr.msra.gmra.mrb[40].mxu1 %vm467_vm4, %v5089_v52  ;;  %20322 = vmatmul.mubr.msk.f32.vlgmr.msra.gmra.mrb[42].mxu0 %vm467_vm4, %v5401_v59  ;;  %v980_v59 = vld [vmem:[%s27111_s19] sm:$0xff] }
 0xe80   :  { %20326 = vmatprep.mubr.msk.f32.mxu1 %vm23191_vm0, %v23190_v0  ;;  %20331 = vmatprep.mubr.msk.f32.mxu0 %vm23191_vm0, %v23190_v0 }
 0xefa   :  { %v4336_v7 = vpop.f32.mrb[32].mxu1  ;;  %v4409_v9 = vpop.f32.mrb[34].mxu0 }
 0xefb   :  { %v20248_v60 = vpop.f32.mrb[33].mxu1  ;;  %v20253_v62 = vpop.f32.mrb[35].mxu0 }
 0xefc   :  { %v983_v62 = vld [vmem:[%s27111_s19 + $0x18] sm:$0xff] }
 0xefe   :  { %v4482_v5 = vpop.f32.mrb[34].mxu1  ;;  %v4555_v28 = vpop.f32.mrb[36].mxu0 }
 0xeff   :  { %v20258_v16 = vpop.f32.mrb[35].mxu1  ;;  %v20263_v17 = vpop.f32.mrb[37].mxu0 }
 0xf2f   :  { %v4631_v57 = vpop.f32.mrb[36].mxu1  ;;  %v4704_v63 = vpop.f32.mrb[38].mxu0 }
 0xf30   :  { %v20268_v58 = vpop.f32.mrb[37].mxu1  ;;  %v20273_v18 = vpop.f32.mrb[39].mxu0 }
 0xf33   :  { %v24153_v25 = vpop.f32.mrb[38].mxu1  ;;  %v24155_v53 = vpop.f32.mrb[40].mxu0 }
 0xf34   :  { %v20278_v32 = vpop.f32.mrb[39].mxu1  ;;  %v20283_v6 = vpop.f32.mrb[41].mxu0 }
 0xf52   :  { %v5162_v21 = vpop.f32.mrb[40].mxu1  ;;  %v5474_v33 = vpop.f32.mrb[42].mxu0 }
 0xf53   :  { %v20303_v14 = vpop.f32.mrb[41].mxu1  ;;  %v20323_v36 = vpop.f32.mrb[43].mxu0  ;;  %v5484_v38 = vsel %vm467_vm4, %v5162_v21, -inf  ;;  %v5487_v39 = vsel %vm467_vm4, %v5474_v33, -inf }
 0xf54   :  { %5485 = vmax.xlane.f32.xlu0 %v5484_v38  ;;  %5488 = vmax.xlane.f32.xlu1 %v5487_v39 }
 0xf65   :  { %5582 = vrot.lane.b32.xlu1 %v23661_v45, %s23202_s3 }
 0xf69   :  { %5655 = vrot.lane.b32.xlu1 %v23649_v37, %s23202_s3 }
 0xf6a   :  { %5506 = vrot.lane.b32.xlu0 %v23645_v34, %s23202_s3 }
 0xf6d   :  { %5728 = vrot.lane.b32.xlu1 %v23653_v40, %s23202_s3 }
 0xf71   :  { %5877 = vrot.lane.b32.xlu1 %v23665_v47, %s23202_s3 }
 0xf75   :  { %6023 = vrot.lane.b32.xlu1 %v23673_v49, %s23202_s3 }
 0xf79   :  { %6106 = vrot.lane.b32.xlu1 %v24015_v12, %s23203_s16 }
 0xf7d   :  { %6138 = vrot.lane.b32.xlu1 %v4409_v9, %s23178_s22  ;;  %v982_v9 = vld [vmem:[%s27111_s19 + $0x10] sm:$0xff] }
 0xf81   :  { %6110 = vrot.lane.b32.xlu1 %v24019_v2, %s23203_s16 }
 0xf85   :  { %6142 = vrot.lane.b32.xlu1 %v4555_v28, %s23178_s22 }
 0xf89   :  { %6114 = vrot.lane.b32.xlu1 %v24023_v22, %s23203_s16 }
 0xf8d   :  { %6146 = vrot.lane.b32.xlu1 %v4704_v63, %s23178_s22 }
 0xf91   :  { %6118 = vrot.lane.b32.xlu1 %v24027_v29, %s23203_s16 }
 0xfe1   :  { %v5486_v34 = vpop.xlane.xlu0 %5485  ;;  %v5489_v37 = vpop.xlane.xlu1 %5488 }
 0xfe2   :  { %v5490_v40 = vsub.f32 %v5162_v21, %v5486_v34  ;;  %v5491_v45 = vsub.f32 %v5474_v33, %v5489_v37 }
 0xfe4   :  { %v5492_v47 = vmul.f32 1.442695, %v5490_v40  ;;  %v5494_v49 = vmul.f32 1.442695, %v5491_v45 }
 0xfe5   :  { %v5507_v12 = vpop.permute.xlu0 %5506  ;;  %v5583_v51 = vpop.permute.xlu1 %5582 }
 0xfe6   :  { %22368 = vpow2.f32 %v5492_v47  ;;  %20325 = vmatpush3.msra.mxu1 %v5507_v12  ;;  %20330 = vmatpush3.msra.mxu0 %v5583_v51 }
 0xfe7   :  { %20334 = vmatprep.subr.mxu1 %v23190_v0  ;;  %20339 = vmatprep.subr.mxu0 %v23190_v0  ;;  %22370 = vpow2.f32 %v5494_v49 }
 0xff0   :  { %v22369_v2 = vpop.eup %22368 }
 0xff1   :  { %v5496_v22 = vsel %vm467_vm4, %v22369_v2, 0.0  ;;  %v22371_v29 = vpop.eup %22370 }
 0xff2   :  { %5497 = vadd.xlane.f32.xlu0 %v5496_v22  ;;  %v5499_v42 = vsel %vm467_vm4, %v22371_v29, 0.0 }
 0xff6   :  { %5500 = vadd.xlane.f32.xlu0 %v5499_v42 }
0x100c   :  { %5801 = vrot.lane.b32.xlu0 %v23655_v41, %s23202_s3 }
0x1010   :  { %5950 = vrot.lane.b32.xlu0 %v23669_v48, %s23202_s3  ;;  %v5656_v48 = vpop.permute.xlu1 %5655 }
0x1014   :  { %6104 = vrot.lane.b32.xlu0 %v24013_v8, %s23203_s16  ;;  %v5729_v8 = vpop.permute.xlu1 %5728 }
0x1018   :  { %6136 = vrot.lane.b32.xlu0 %v4336_v7, %s23178_s22  ;;  %v981_v7 = vld [vmem:[%s27111_s19 + $0x8] sm:$0xff] }
0x1019   :  { %v21400_v60 = vpack.c.bf16 %v981_v7, %v980_v59 }
0x101c   :  { %6108 = vrot.lane.b32.xlu0 %v24017_v1, %s23203_s16  ;;  %v5878_v1 = vpop.permute.xlu1 %5877 }
0x1020   :  { %6140 = vrot.lane.b32.xlu0 %v4482_v5, %s23178_s22  ;;  %v6024_v61 = vpop.permute.xlu1 %6023  ;;  %v21404_v5 = vpack.c.bf16 %v983_v62, %v982_v9 }
0x1024   :  { %6112 = vrot.lane.b32.xlu0 %v24021_v46, %s23203_s16  ;;  %v6107_v37 = vpop.permute.xlu1 %6106 }
0x1028   :  { %6144 = vrot.lane.b32.xlu0 %v4631_v57, %s23178_s22  ;;  %v6139_v45 = vpop.permute.xlu1 %6138 }
0x102c   :  { %6116 = vrot.lane.b32.xlu0 %v24025_v27, %s23203_s16  ;;  %v6111_v49 = vpop.permute.xlu1 %6110 }
0x1030   :  { %v6143_v51 = vpop.permute.xlu1 %6142 }
0x1034   :  { %v6115_v22 = vpop.permute.xlu1 %6114 }
0x107f   :  { %v5498_v41 = vpop.xlane.xlu0 %5497 }
0x1080   :  { %22372 = vrcp.f32 %v5498_v41 }
0x1083   :  { %v5501_v43 = vpop.xlane.xlu0 %5500 }
0x1084   :  { %22374 = vrcp.f32 %v5501_v43 }
0x1087   :  { %v5802_v46 = vpop.permute.xlu0 %5801 }
0x108a   :  { %v22373_v50 = vpop.eup %22372 }
0x108b   :  { %v5504_v54 = vmul.f32 %v22373_v50, %v22369_v2  ;;  %v5951_v56 = vpop.permute.xlu0 %5950 }
0x108d   :  { %20327 = vmatmul.mubr.msk.f32.vlgmr.msra.gmra.mrb[42].mxu1 %vm467_vm4, %v5504_v54  ;;  %20332 = vmatmul.mubr.msk.f32.vlgmr.msra.gmra.mrb[44].mxu0 %vm467_vm4, %v5504_v54 }
0x108e   :  { %20335 = vmatpush3.msra.mxu1 %v5656_v48  ;;  %20340 = vmatpush3.msra.mxu0 %v5729_v8  ;;  %v22375_v27 = vpop.eup %22374 }
0x108f   :  { %20336 = vmatprep.mubr.msk.f32.mxu1 %vm23191_vm0, %v23190_v0  ;;  %20341 = vmatprep.mubr.msk.f32.mxu0 %vm23191_vm0, %v23190_v0  ;;  %v5505_v52 = vmul.f32 %v22375_v27, %v22371_v29  ;;  %v6105_v40 = vpop.permute.xlu0 %6104 }
0x1090   :  { %20344 = vmatprep.subr.mxu1 %v23190_v0  ;;  %20349 = vmatprep.subr.mxu0 %v23190_v0  ;;  %v6192_v43 = vsel %vm467_vm4, %v23873_v44, %v6105_v40 }
0x1091   :  { %20337 = vmatmul.mubr.msk.f32.vlgmr.msra.gmra.mrb[44].mxu1 %vm467_vm4, %v5504_v54  ;;  %20342 = vmatmul.mubr.msk.f32.vlgmr.msra.gmra.mrb[46].mxu0 %vm467_vm4, %v5504_v54 }
0x1092   :  { %20345 = vmatpush3.msra.mxu1 %v5802_v46  ;;  %20350 = vmatpush3.msra.mxu0 %v5878_v1 }
0x1093   :  { %20346 = vmatprep.mubr.msk.f32.mxu1 %vm23191_vm0, %v23190_v0  ;;  %20351 = vmatprep.mubr.msk.f32.mxu0 %vm23191_vm0, %v23190_v0  ;;  %v6137_v47 = vpop.permute.xlu0 %6136 }
0x1094   :  { %20354 = vmatprep.subr.mxu1 %v23190_v0  ;;  %20359 = vmatprep.subr.mxu0 %v23190_v0  ;;  %v6200_v50 = vsel %vm302_vm3, %v6192_v43, %v6137_v47 }
0x1095   :  { %20347 = vmatmul.mubr.msk.f32.vlgmr.msra.gmra.mrb[46].mxu1 %vm467_vm4, %v5505_v52  ;;  %20352 = vmatmul.mubr.msk.f32.vlgmr.msra.gmra.mrb[48].mxu0 %vm467_vm4, %v5505_v52 }
0x1096   :  { %20355 = vmatpush3.msra.mxu1 %v5951_v56  ;;  %20360 = vmatpush3.msra.mxu0 %v6024_v61 }
0x1097   :  { %20356 = vmatprep.mubr.msk.f32.mxu1 %vm23191_vm0, %v23190_v0  ;;  %20361 = vmatprep.mubr.msk.f32.mxu0 %vm23191_vm0, %v23190_v0  ;;  %v6109_v12 = vpop.permute.xlu0 %6108 }
0x1098   :  { %21401 = vmatprep.subr.bf16.mxu1 %v21400_v60 }
0x1099   :  { %20357 = vmatmul.mubr.msk.f32.vlgmr.msra.gmra.mrb[48].mxu1 %vm467_vm4, %v5505_v52  ;;  %20362 = vmatmul.mubr.msk.f32.vlgmr.msra.gmra.mrb[50].mxu0 %vm467_vm4, %v5505_v52  ;;  %v6195_v52 = vsel %vm467_vm4, %v23881_v26, %v6111_v49  ;;  %v6197_v26 = vsel %vm467_vm4, %v23885_v30, %v6115_v22 }
0x109a   :  { %21403 = vmatpush3.bf16.msra.mxu1 %v21400_v60  ;;  %v6203_v44 = vsel %vm302_vm3, %v6195_v52, %v6143_v51 }
0x109b   :  { %21405 = vmatprep.subr.bf16.mxu1 %v21404_v5  ;;  %v6141_v2 = vpop.permute.xlu0 %6140 }
0x109e   :  { %21407 = vmatpush3.bf16.msra.mxu1 %v21404_v5 }
0x109f   :  { %v6113_v29 = vpop.permute.xlu0 %6112 }
0x10a3   :  { %v6145_v42 = vpop.permute.xlu0 %6144 }
0x10a7   :  { %v6117_v48 = vpop.permute.xlu0 %6116 }
0x1160   :  { %v5578_v28 = vpop.f32.mrb[42].mxu1  ;;  %v5651_v16 = vpop.f32.mrb[44].mxu0 }
0x1161   :  { %v20328_v17 = vpop.f32.mrb[43].mxu1  ;;  %6168 = vrot.lane.b32.xlu0 %v5578_v28, %s23204_s4  ;;  %6170 = vrot.lane.b32.xlu1 %v5651_v16, %s23204_s4  ;;  %v20333_v57 = vpop.f32.mrb[45].mxu0 }
0x1164   :  { %v5724_v63 = vpop.f32.mrb[44].mxu1  ;;  %v5797_v58 = vpop.f32.mrb[46].mxu0 }
0x1165   :  { %6172 = vrot.lane.b32.xlu0 %v5724_v63, %s23204_s4  ;;  %v20338_v18 = vpop.f32.mrb[45].mxu1  ;;  %6174 = vrot.lane.b32.xlu1 %v5797_v58, %s23204_s4  ;;  %v20343_v32 = vpop.f32.mrb[47].mxu0  ;;  %v6198_v63 = vsel %vm467_vm4, %v23883_v55, %v6117_v48 }
0x1168   :  { %v5873_v6 = vpop.f32.mrb[46].mxu1  ;;  %v5946_v21 = vpop.f32.mrb[48].mxu0 }
0x1169   :  { %6176 = vrot.lane.b32.xlu0 %v5873_v6, %s23204_s4  ;;  %v20348_v33 = vpop.f32.mrb[47].mxu1  ;;  %6178 = vrot.lane.b32.xlu1 %v5946_v21, %s23204_s4  ;;  %v20353_v14 = vpop.f32.mrb[49].mxu0 }
0x116a   :  { %v18860_v14 = vld [vmem:[%s27112_s21] ss:$0 sm:$0xff] }
0x116c   :  { %v6019_v36 = vpop.f32.mrb[48].mxu1  ;;  %v6092_v38 = vpop.f32.mrb[50].mxu0 }
0x116d   :  { %6148 = vrot.lane.b32.xlu0 %v24153_v25, %s23178_s22  ;;  %v20358_v39 = vpop.f32.mrb[49].mxu1  ;;  %6150 = vrot.lane.b32.xlu1 %v24155_v53, %s23178_s22  ;;  %v20363_v34 = vpop.f32.mrb[51].mxu0  ;;  %v6193_v53 = vsel %vm467_vm4, %v23877_v10, %v6107_v37  ;;  %v6194_v10 = vsel %vm467_vm4, %v23875_v19, %v6109_v12  ;;  %v6196_v19 = vsel %vm467_vm4, %v23879_v11, %v6113_v29 }
0x116e   :  { %v6147_v25 = vpop.permute.xlu1 %6146  ;;  %v6201_v8 = vsel %vm302_vm3, %v6193_v53, %v6139_v45  ;;  %v6202_v61 = vsel %vm302_vm3, %v6194_v10, %v6141_v2  ;;  %v6204_v62 = vsel %vm302_vm3, %v6196_v19, %v6145_v42 }
0x116f   :  { %v6205_v60 = vsel %vm302_vm3, %v6197_v26, %v6147_v25 }
0x1171   :  { %6180 = vrot.lane.b32.xlu0 %v6019_v36, %s23204_s4  ;;  %6182 = vrot.lane.b32.xlu1 %v6092_v38, %s23204_s4 }
0x1172   :  { %v6119_v41 = vpop.permute.xlu1 %6118 }
0x1173   :  { %v6199_v11 = vsel %vm467_vm4, %v23887_v3, %v6119_v41 }
0x11d3   :  { %v6169_v54 = vpop.permute.xlu0 %6168  ;;  %v6171_v1 = vpop.permute.xlu1 %6170 }
0x11d4   :  { %v6209_v46 = vsel %vm6208_vm6, %v6200_v50, %v6169_v54  ;;  %v6210_v27 = vsel %vm6208_vm6, %v6201_v8, %v6171_v1 }
0x11d5   :  { %20372 = vmatprep.mubr.msk.f32.mxu1 %vm703_vm5, %v6209_v46 }
0x11d6   :  { %20373 = vmatmul.mubr.msk.f32.vlgmr.msra.gmra.mrb[50].mxu1 %vm703_vm5, %v6210_v27 }
0x11d7   :  { %v6173_v56 = vpop.permute.xlu0 %6172  ;;  %v6175_v59 = vpop.permute.xlu1 %6174 }
0x11d8   :  { %v6211_v7 = vsel %vm6208_vm6, %v6202_v61, %v6173_v56  ;;  %v6212_v9 = vsel %vm6208_vm6, %v6203_v44, %v6175_v59 }
0x11d9   :  { %20375 = vmatprep.mubr.msk.f32.mxu1 %vm703_vm5, %v6211_v7 }
0x11da   :  { %20376 = vmatmul.mubr.msk.f32.gmra.mrb[52].mxu1 %vm703_vm5, %v6212_v9 }
0x11db   :  { %v6177_v5 = vpop.permute.xlu0 %6176  ;;  %v6179_v28 = vpop.permute.xlu1 %6178 }
0x11dc   :  { %v6213_v16 = vsel %vm6208_vm6, %v6204_v62, %v6177_v5  ;;  %v6214_v17 = vsel %vm6208_vm6, %v6205_v60, %v6179_v28 }
0x11dd   :  { %20378 = vmatprep.mubr.msk.f32.mxu1 %vm703_vm5, %v6213_v16 }
0x11de   :  { %20379 = vmatmul.mubr.msk.f32.gmra.mrb[54].mxu1 %vm703_vm5, %v6214_v17 }
0x11df   :  { %v6149_v30 = vpop.permute.xlu0 %6148  ;;  %v6151_v57 = vpop.permute.xlu1 %6150 }
0x11e0   :  { %v6206_v58 = vsel %vm302_vm3, %v6198_v63, %v6149_v30  ;;  %v6207_v18 = vsel %vm302_vm3, %v6199_v11, %v6151_v57 }
0x11e3   :  { %v6181_v32 = vpop.permute.xlu0 %6180  ;;  %v6183_v6 = vpop.permute.xlu1 %6182 }
0x11e4   :  { %v6215_v21 = vsel %vm6208_vm6, %v6206_v58, %v6181_v32  ;;  %v6216_v33 = vsel %vm6208_vm6, %v6207_v18, %v6183_v6 }
0x11e5   :  { %20381 = vmatprep.mubr.msk.f32.mxu1 %vm703_vm5, %v6215_v21 }
0x11e6   :  { %20382 = vmatmul.mubr.msk.f32.gmra.mrb[56].mxu1 %vm703_vm5, %v6216_v33 }
0x12a9   :  { %v20374_v36 = vpop.f32.mrb[50].mxu1 }
0x12aa   :  { %v6319_v3 = vadd.f32 %v20374_v36, %v18860_v14  ;;  %v6313_v38 = vpop.f32.mrb[51].mxu1 }
0x12ab   :  { %v6314_v39 = vadd.f32 %v18860_v14, %v6313_v38 }
0x12ac   :  { %v24283_v55 = vadd.f32 %v6319_v3, %v23538_v13 }
0x12ad   :  { %v24286_v34 = vadd.f32 %v6314_v39, %v23532_v4  ;;  %v20377_v37 = vpop.f32.mrb[52].mxu1 }
0x12ae   :  { %v6329_v40 = vadd.f32 %v20377_v37, %v18860_v14  ;;  %v6323_v45 = vpop.f32.mrb[53].mxu1  ;;  %v6365_v47 = vsel %vm703_vm5, %v24283_v55, 0.0 }
0x12af   :  { %v6324_v49 = vadd.f32 %v18860_v14, %v6323_v45  ;;  %6366 = vadd.xlane.f32.xlu1 %v6365_v47  ;;  %v6362_v12 = vsel %vm703_vm5, %v24286_v34, 0.0 }
0x12b0   :  { %v24293_v51 = vadd.f32 %v6329_v40, %v23548_v23  ;;  %6363 = vadd.xlane.f32.xlu0 %v6362_v12  ;;  %v6494_v12 = vld [vmem:[%s27113_s18] sm:$0xff] }
0x12b1   :  { %v20380_v13 = vpop.f32.mrb[54].mxu1  ;;  %v24298_v29 = vadd.f32 %v6324_v49, %v23541_v15 }
0x12b2   :  { %v6339_v2 = vadd.f32 %v20380_v13, %v18860_v14  ;;  %v6333_v22 = vpop.f32.mrb[55].mxu1  ;;  %v6371_v4 = vsel %vm703_vm5, %v24293_v51, 0.0  ;;  %v6495_v13 = vld [vmem:[%s27113_s18 + $0x8] sm:$0xff] }
0x12b3   :  { %v6334_v25 = vadd.f32 %v18860_v14, %v6333_v22  ;;  %v6368_v48 = vsel %vm703_vm5, %v24298_v29, 0.0  ;;  %v6496_v22 = vld [vmem:[%s27113_s18 + $0x10] sm:$0xff] }
0x12b4   :  { %v24301_v42 = vadd.f32 %v6339_v2, %v23558_v31  ;;  %6372 = vadd.xlane.f32.xlu0 %v6371_v4  ;;  %v21408_v2 = vpack.c.bf16 %v6495_v13, %v6494_v12  ;;  %v6497_v4 = vld [vmem:[%s27113_s18 + $0x18] sm:$0xff] }
0x12b5   :  { %v24306_v23 = vadd.f32 %v6334_v25, %v23551_v24  ;;  %v21412_v25 = vpack.c.bf16 %v6497_v4, %v6496_v22 }
0x12b6   :  { %v6377_v41 = vsel %vm703_vm5, %v24301_v42, 0.0  ;;  %21409 = vmatprep.subr.bf16.mxu0 %v21408_v2 }
0x12b7   :  { %6378 = vadd.xlane.f32.xlu1 %v6377_v41  ;;  %v6374_v31 = vsel %vm703_vm5, %v24306_v23, 0.0  ;;  %21411 = vmatpush3.bf16.msra.mxu0 %v21408_v2 }
0x12b8   :  { %6369 = vadd.xlane.f32.xlu0 %v6368_v48  ;;  %21413 = vmatprep.subr.bf16.mxu0 %v21412_v25 }
0x12b9   :  { %v20383_v53 = vpop.f32.mrb[56].mxu1 }
0x12ba   :  { %v6349_v43 = vadd.f32 %v20383_v53, %v18860_v14  ;;  %v6343_v15 = vpop.f32.mrb[57].mxu1 }
0x12bb   :  { %v6344_v8 = vadd.f32 %v18860_v14, %v6343_v15  ;;  %21415 = vmatpush3.bf16.msra.mxu0 %v21412_v25 }
0x12bc   :  { %v24313_v50 = vadd.f32 %v6349_v43, %v23567_v35  ;;  %6375 = vadd.xlane.f32.xlu0 %v6374_v31 }
0x12bd   :  { %v24316_v54 = vadd.f32 %v6344_v8, %v23561_v20 }
0x12be   :  { %v6383_v24 = vsel %vm703_vm5, %v24313_v50, 0.0 }
0x12bf   :  { %6384 = vadd.xlane.f32.xlu1 %v6383_v24  ;;  %v6380_v1 = vsel %vm703_vm5, %v24316_v54, 0.0 }
0x12c0   :  { %6381 = vadd.xlane.f32.xlu0 %v6380_v1 }
0x133c   :  { %v6367_v46 = vpop.xlane.xlu1 %6366 }
0x133d   :  { %v6387_v27 = vmul.f32 0.03125, %v6367_v46  ;;  %v6364_v52 = vpop.xlane.xlu0 %6363 }
0x133e   :  { %v6386_v10 = vmul.f32 0.03125, %v6364_v52 }
0x133f   :  { %v24323_v44 = vsub.f32 %v24283_v55, %v6387_v27 }
0x1340   :  { %v24326_v35 = vsub.f32 %v24286_v34, %v6386_v10 }
0x1341   :  { %v6373_v20 = vpop.xlane.xlu0 %6372  ;;  %v6403_v61 = vmul.f32 %v24323_v44, %v24323_v44 }
0x1342   :  { %v6389_v56 = vmul.f32 0.03125, %v6373_v20  ;;  %v6402_v59 = vmul.f32 %v24326_v35, %v24326_v35 }
0x1343   :  { %v6413_v7 = vsel %vm703_vm5, %v6403_v61, 0.0 }
0x1344   :  { %v24334_v9 = vsub.f32 %v24293_v51, %v6389_v56  ;;  %6414 = vadd.xlane.f32.xlu1 %v6413_v7  ;;  %v6379_v26 = vpop.xlane.xlu1 %6378  ;;  %v6410_v19 = vsel %vm703_vm5, %v6402_v59, 0.0 }
0x1345   :  { %v6391_v60 = vmul.f32 0.03125, %v6379_v26  ;;  %v6370_v62 = vpop.xlane.xlu0 %6369  ;;  %6411 = vadd.xlane.f32.xlu0 %v6410_v19  ;;  %v18869_v26 = vld [vmem:[#allocation11] ss:$0 sm:$0xff] }
0x1346   :  { %v6388_v5 = vmul.f32 0.03125, %v6370_v62  ;;  %v6405_v28 = vmul.f32 %v24334_v9, %v24334_v9 }
0x1347   :  { %v24340_v16 = vsub.f32 %v24301_v42, %v6391_v60 }
0x1348   :  { %v24343_v17 = vsub.f32 %v24298_v29, %v6388_v5  ;;  %v6419_v30 = vsel %vm703_vm5, %v6405_v28, 0.0 }
0x1349   :  { %v6376_v57 = vpop.xlane.xlu0 %6375  ;;  %6420 = vadd.xlane.f32.xlu1 %v6419_v30  ;;  %v6407_v11 = vmul.f32 %v24340_v16, %v24340_v16 }
0x134a   :  { %v6390_v63 = vmul.f32 0.03125, %v6376_v57  ;;  %v6404_v58 = vmul.f32 %v24343_v17, %v24343_v17 }
0x134b   :  { %v6425_v18 = vsel %vm703_vm5, %v6407_v11, 0.0 }
0x134c   :  { %v24352_v32 = vsub.f32 %v24306_v23, %v6390_v63  ;;  %v6385_v6 = vpop.xlane.xlu1 %6384  ;;  %v6416_v21 = vsel %vm703_vm5, %v6404_v58, 0.0  ;;  %v18870_v63 = vld [vmem:[#allocation13] ss:$0 sm:$0xff] }
0x134d   :  { %v6393_v33 = vmul.f32 0.03125, %v6385_v6  ;;  %6417 = vadd.xlane.f32.xlu0 %v6416_v21  ;;  %v6382_v14 = vpop.xlane.xlu0 %6381  ;;  %6426 = vadd.xlane.f32.xlu1 %v6425_v18 }
0x134e   :  { %v6392_v36 = vmul.f32 0.03125, %v6382_v14  ;;  %v6406_v3 = vmul.f32 %v24352_v32, %v24352_v32 }
0x134f   :  { %v24358_v38 = vsub.f32 %v24313_v50, %v6393_v33 }
0x1350   :  { %v24361_v39 = vsub.f32 %v24316_v54, %v6392_v36  ;;  %v6422_v37 = vsel %vm703_vm5, %v6406_v3, 0.0 }
0x1351   :  { %6423 = vadd.xlane.f32.xlu0 %v6422_v37  ;;  %v6409_v40 = vmul.f32 %v24358_v38, %v24358_v38 }
0x1352   :  { %v6408_v45 = vmul.f32 %v24361_v39, %v24361_v39 }
0x1353   :  { %v6431_v47 = vsel %vm703_vm5, %v6409_v40, 0.0 }
0x1354   :  { %6432 = vadd.xlane.f32.xlu1 %v6431_v47  ;;  %v6428_v49 = vsel %vm703_vm5, %v6408_v45, 0.0 }
0x1355   :  { %6429 = vadd.xlane.f32.xlu0 %v6428_v49 }
0x13d1   :  { %v6415_v41 = vpop.xlane.xlu1 %6414 }
0x13d2   :  { %v6435_v48 = vmul.f32 0.03125, %v6415_v41  ;;  %v6412_v53 = vpop.xlane.xlu0 %6411 }
0x13d3   :  { %v6434_v43 = vmul.f32 0.03125, %v6412_v53 }
0x13d4   :  { %v6443_v15 = vadd.f32 1e-12, %v6435_v48 }
0x13d5   :  { %v6442_v8 = vadd.f32 1e-12, %v6434_v43 }
0x13d6   :  { %22376 = vrsqrt.f32 %v6443_v15  ;;  %v6421_v31 = vpop.xlane.xlu1 %6420 }
0x13d7   :  { %22378 = vrsqrt.f32 %v6442_v8  ;;  %v6437_v24 = vmul.f32 0.03125, %v6421_v31  ;;  %v18871_v8 = vld [vmem:[#allocation14] ss:$0 sm:$0xff] }
0x13d9   :  { %v6445_v1 = vadd.f32 1e-12, %v6437_v24 }
0x13da   :  { %v6418_v46 = vpop.xlane.xlu0 %6417  ;;  %v6427_v27 = vpop.xlane.xlu1 %6426 }
0x13db   :  { %22380 = vrsqrt.f32 %v6445_v1  ;;  %v6436_v52 = vmul.f32 0.03125, %v6418_v46  ;;  %v6439_v10 = vmul.f32 0.03125, %v6427_v27 }
0x13dd   :  { %v6444_v20 = vadd.f32 1e-12, %v6436_v52  ;;  %v6447_v61 = vadd.f32 1e-12, %v6439_v10 }
0x13de   :  { %v6424_v56 = vpop.xlane.xlu0 %6423 }
0x13df   :  { %22382 = vrsqrt.f32 %v6444_v20  ;;  %v6438_v59 = vmul.f32 0.03125, %v6424_v56 }
0x13e0   :  { %v22377_v7 = vpop.eup %22376  ;;  %22384 = vrsqrt.f32 %v6447_v61 }
0x13e1   :  { %v22379_v19 = vpop.eup %22378  ;;  %v6459_v60 = vmul.f32 %v22377_v7, %v24323_v44  ;;  %v6446_v62 = vadd.f32 1e-12, %v6438_v59  ;;  %v6433_v5 = vpop.xlane.xlu1 %6432 }
0x13e2   :  { %v6441_v28 = vmul.f32 0.03125, %v6433_v5  ;;  %v6430_v30 = vpop.xlane.xlu0 %6429  ;;  %v6458_v57 = vmul.f32 %v22379_v19, %v24326_v35 }
0x13e3   :  { %22386 = vrsqrt.f32 %v6446_v62  ;;  %v6440_v11 = vmul.f32 0.03125, %v6430_v30  ;;  %v6473_v58 = vmul.f32 %v18869_v26, %v6459_v60 }
0x13e4   :  { %v6449_v18 = vadd.f32 1e-12, %v6441_v28  ;;  %v6472_v6 = vmul.f32 %v18869_v26, %v6458_v57 }
0x13e5   :  { %v22381_v21 = vpop.eup %22380  ;;  %v6448_v33 = vadd.f32 1e-12, %v6440_v11  ;;  %v6487_v36 = vadd.f32 %v18870_v63, %v6473_v58 }
0x13e6   :  { %22388 = vrsqrt.f32 %v6449_v18  ;;  %v6486_v14 = vadd.f32 %v18870_v63, %v6472_v6  ;;  %v6461_v44 = vmul.f32 %v22381_v21, %v24334_v9 }
0x13e7   :  { %22390 = vrsqrt.f32 %v6448_v33 }
0x13e8   :  { %20392 = vmatprep.mubr.msk.f32.mxu0 %vm703_vm5, %v6486_v14  ;;  %v6475_v40 = vmul.f32 %v18869_v26, %v6461_v44 }
0x13e9   :  { %v22383_v3 = vpop.eup %22382  ;;  %20393 = vmatmul.mubr.msk.f32.vlgmr.msra.gmra.mrb[52].mxu0 %vm703_vm5, %v6487_v36 }
0x13ea   :  { %v22385_v35 = vpop.eup %22384  ;;  %v6460_v37 = vmul.f32 %v22383_v3, %v24343_v17  ;;  %v6489_v2 = vadd.f32 %v18870_v63, %v6475_v40 }
0x13eb   :  { %v6463_v45 = vmul.f32 %v22385_v35, %v24340_v16 }
0x13ec   :  { %v6474_v47 = vmul.f32 %v18869_v26, %v6460_v37 }
0x13ed   :  { %v22387_v49 = vpop.eup %22386  ;;  %v6477_v22 = vmul.f32 %v18869_v26, %v6463_v45 }
0x13ee   :  { %v6488_v12 = vadd.f32 %v18870_v63, %v6474_v47  ;;  %v6462_v13 = vmul.f32 %v22387_v49, %v24352_v32 }
0x13ef   :  { %v6491_v16 = vadd.f32 %v18870_v63, %v6477_v22 }
0x13f0   :  { %v22389_v4 = vpop.eup %22388  ;;  %20395 = vmatprep.mubr.msk.f32.mxu0 %vm703_vm5, %v6488_v12  ;;  %v6476_v9 = vmul.f32 %v18869_v26, %v6462_v13 }
0x13f1   :  { %v22391_v25 = vpop.eup %22390  ;;  %20396 = vmatmul.mubr.msk.f32.gmra.mrb[54].mxu0 %vm703_vm5, %v6489_v2  ;;  %v6465_v41 = vmul.f32 %v22389_v4, %v24358_v38 }
0x13f2   :  { %v6490_v17 = vadd.f32 %v18870_v63, %v6476_v9  ;;  %v6464_v48 = vmul.f32 %v22391_v25, %v24361_v39 }
0x13f3   :  { %v6479_v53 = vmul.f32 %v18869_v26, %v6465_v41 }
0x13f4   :  { %20398 = vmatprep.mubr.msk.f32.mxu0 %vm703_vm5, %v6490_v17  ;;  %v6478_v43 = vmul.f32 %v18869_v26, %v6464_v48 }
0x13f5   :  { %20399 = vmatmul.mubr.msk.f32.gmra.mrb[56].mxu0 %vm703_vm5, %v6491_v16  ;;  %v6493_v15 = vadd.f32 %v18870_v63, %v6479_v53 }
0x13f6   :  { %v6492_v32 = vadd.f32 %v18870_v63, %v6478_v43 }
0x13f8   :  { %20401 = vmatprep.mubr.msk.f32.mxu0 %vm703_vm5, %v6492_v32 }
0x13f9   :  { %20402 = vmatmul.mubr.msk.f32.gmra.mrb[58].mxu0 %vm703_vm5, %v6493_v15 }
0x14bc   :  { %v20394_v31 = vpop.f32.mrb[52].mxu0 }
0x14bd   :  { %v6606_v24 = vadd.f32 %v20394_v31, %v18871_v8  ;;  %v6600_v38 = vpop.f32.mrb[53].mxu0 }
0x14be   :  { %v6601_v1 = vadd.f32 %v18871_v8, %v6600_v38 }
0x14bf   :  { %v24456_v9 = vmul.f32 0.35355338, %v6606_v24 }
0x14c0   :  { %v24390_v46 = vpack.i.bf16 %v6606_v24, %v6601_v1  ;;  %v24392_v39 = vmul.f32 0.35355338, %v6601_v1 }
0x14c2   :  { %21992 = vrot.lane.b32.xlu0 %v24390_v46, %s23192_s0  ;;  %20412 = vmatprep.mubr.msk.f32.mxu1 %vm467_vm4, %v24392_v39 }
0x14c4   :  { %v20397_v27 = vpop.f32.mrb[54].mxu0 }
0x14c5   :  { %v24398_v52 = vadd.f32 %v20397_v27, %v18871_v8  ;;  %v6610_v10 = vpop.f32.mrb[55].mxu0 }
0x14c6   :  { %v6611_v20 = vadd.f32 %v18871_v8, %v6610_v10  ;;  %22012 = vrot.lane.b32.xlu0 %v24390_v46, %s23193_s2 }
0x14c7   :  { %v24467_v43 = vmul.f32 0.35355338, %v24398_v52 }
0x14c8   :  { %v20400_v61 = vpop.f32.mrb[56].mxu0  ;;  %v24403_v56 = vpack.i.bf16 %v24398_v52, %v6611_v20  ;;  %v24458_v41 = vmul.f32 0.35355338, %v6611_v20 }
0x14c9   :  { %v24405_v59 = vadd.f32 %v20400_v61, %v18871_v8  ;;  %v6620_v7 = vpop.f32.mrb[57].mxu0 }
0x14ca   :  { %v6621_v26 = vadd.f32 %v18871_v8, %v6620_v7  ;;  %21997 = vrot.lane.b32.xlu1 %v24403_v56, %s23192_s0 }
0x14cb   :  { %v24481_v27 = vmul.f32 0.35355338, %v24405_v59 }
0x14cc   :  { %v20403_v19 = vpop.f32.mrb[58].mxu0  ;;  %v24409_v60 = vmul.f32 0.35355338, %v6621_v26  ;;  %v24412_v62 = vpack.i.bf16 %v24405_v59, %v6621_v26  ;;  %v24496_v26 = vld [vmem:[%s27116_s23 + $0x8] sm:$0xff] }
0x14cd   :  { %v24414_v5 = vadd.f32 %v20403_v19, %v18871_v8  ;;  %v6630_v28 = vpop.f32.mrb[59].mxu0  ;;  %v24499_v19 = vld [vmem:[%s27116_s23] sm:$0xff] }
0x14ce   :  { %v24416_v30 = vadd.f32 %v18871_v8, %v6630_v28  ;;  %20426 = vmatprep.mubr.msk.f32.mxu0 %vm467_vm4, %v24409_v60  ;;  %22002 = vrot.lane.b32.xlu1 %v24412_v62, %s23192_s0 }
0x14cf   :  { %22022 = vrot.lane.b32.xlu0 %v24412_v62, %s23193_s2  ;;  %v24491_v7 = vmul.f32 0.35355338, %v24414_v5 }
0x14d0   :  { %v24426_v57 = vpack.i.bf16 %v24414_v5, %v24416_v30  ;;  %v24484_v10 = vmul.f32 0.35355338, %v24416_v30 }
0x14d2   :  { %22007 = vrot.lane.b32.xlu1 %v24426_v57, %s23192_s0 }
0x14d6   :  { %22017 = vrot.lane.b32.xlu1 %v24403_v56, %s23193_s2 }
0x14da   :  { %22027 = vrot.lane.b32.xlu1 %v24390_v46, %s23194_s24 }
0x14de   :  { %22032 = vrot.lane.b32.xlu1 %v24403_v56, %s23194_s24 }
0x14e2   :  { %22037 = vrot.lane.b32.xlu1 %v24426_v57, %s23193_s2 }
0x1534   :  { %v21993_v11 = vpop.permute.xlu0 %21992 }
0x1535   :  { %v21995_v63 = vunpack.i.h.bf16 %v21993_v11  ;;  %v21994_v58 = vunpack.i.l.bf16 %v21993_v11 }
0x1537   :  { %v21416_v6 = vpack.c.bf16 %v21995_v63, %v21994_v58  ;;  %v24504_v58 = vld [vmem:[%s27116_s23 + $0x18] sm:$0xff] }
0x1538   :  { %v22013_v21 = vpop.permute.xlu0 %22012 }
0x1539   :  { %21418 = vmatprep.subr.msk.bf16.mxu1 %vm24440_vm7, %v21416_v6  ;;  %v22015_v14 = vunpack.i.h.bf16 %v22013_v21  ;;  %v22014_v36 = vunpack.i.l.bf16 %v22013_v21 }
0x153a   :  { %21421 = vmatpush3.bf16.xpose.msk.msra.mxu1 %vm24440_vm7, %v21416_v6  ;;  %v24508_v6 = vld [vmem:[%s27116_s23 + $0x10] sm:$0xff] }
0x153b   :  { %v21440_v47 = vpack.c.bf16 %v22015_v14, %v22014_v36 }
0x153c   :  { %v21998_v33 = vpop.permute.xlu1 %21997 }
0x153d   :  { %v22000_v44 = vunpack.i.h.bf16 %v21998_v33  ;;  %v21999_v3 = vunpack.i.l.bf16 %v21998_v33 }
0x153f   :  { %v21422_v35 = vpack.c.bf16 %v22000_v44, %v21999_v3 }
0x1540   :  { %v22003_v37 = vpop.permute.xlu1 %22002 }
0x1541   :  { %v22005_v40 = vunpack.i.h.bf16 %v22003_v37  ;;  %v22004_v45 = vunpack.i.l.bf16 %v22003_v37  ;;  %21424 = vmatprep.subr.msk.bf16.mxu1 %vm24440_vm7, %v21422_v35  ;;  %v22023_v22 = vpop.permute.xlu0 %22022 }
0x1542   :  { %21427 = vmatpush3.bf16.xpose.msk.msra.mxu1 %vm24440_vm7, %v21422_v35  ;;  %v22025_v17 = vunpack.i.h.bf16 %v22023_v22  ;;  %v22024_v48 = vunpack.i.l.bf16 %v22023_v22 }
0x1543   :  { %v21428_v49 = vpack.c.bf16 %v22005_v40, %v22004_v45  ;;  %21441 = vmatprep.subr.bf16.mxu1 %v21440_v47 }
0x1544   :  { %v22008_v12 = vpop.permute.xlu1 %22007  ;;  %v21448_v24 = vpack.c.bf16 %v22025_v17, %v22024_v48 }
0x1545   :  { %v22010_v13 = vunpack.i.h.bf16 %v22008_v12  ;;  %v22009_v2 = vunpack.i.l.bf16 %v22008_v12  ;;  %21430 = vmatprep.subr.msk.bf16.mxu0 %vm24440_vm7, %v21428_v49 }
0x1546   :  { %21433 = vmatpush3.bf16.xpose.msk.msra.mxu0 %vm24440_vm7, %v21428_v49 }
0x1547   :  { %v21434_v4 = vpack.c.bf16 %v22010_v13, %v22009_v2 }
0x1548   :  { %v22018_v25 = vpop.permute.xlu1 %22017 }
0x1549   :  { %v22020_v16 = vunpack.i.h.bf16 %v22018_v25  ;;  %v22019_v53 = vunpack.i.l.bf16 %v22018_v25  ;;  %20413 = vmatmul.mubr.msk.f32.vlgmr.msra.gmra.mrb[58].mxu1 %vm467_vm4, %v24456_v9  ;;  %21436 = vmatprep.subr.msk.bf16.mxu0 %vm24440_vm7, %v21434_v4 }
0x154a   :  { %20415 = vmatprep.mubr.msk.f32.mxu1 %vm467_vm4, %v24458_v41  ;;  %21443 = vmatpush3.bf16.msra.mxu1 %v21440_v47 }
0x154b   :  { %v21444_v32 = vpack.c.bf16 %v22020_v16, %v22019_v53 }
0x154c   :  { %v22028_v15 = vpop.permute.xlu1 %22027 }
0x154d   :  { %v22030_v8 = vunpack.i.h.bf16 %v22028_v15  ;;  %v22029_v31 = vunpack.i.l.bf16 %v22028_v15  ;;  %20416 = vmatmul.mubr.msk.f32.gmra.mrb[60].mxu1 %vm467_vm4, %v24467_v43  ;;  %21445 = vmatprep.subr.bf16.mxu1 %v21444_v32 }
0x154e   :  { %21439 = vmatpush3.bf16.xpose.msk.msra.mxu0 %vm24440_vm7, %v21434_v4  ;;  %21447 = vmatpush3.bf16.msra.mxu1 %v21444_v32 }
0x154f   :  { %v24473_v38 = vpack.c.bf16 %v22030_v8, %v22029_v31  ;;  %21449 = vmatprep.subr.bf16.mxu0 %v21448_v24 }
0x1550   :  { %v24475_v1 = vpop.permute.xlu1 %22032 }
0x1551   :  { %21458 = vmatprep.subr.msk.bf16.mxu1 %vm24440_vm7, %v24473_v38 }
0x1554   :  { %v22038_v52 = vpop.permute.xlu1 %22037 }
0x1555   :  { %v22040_v20 = vunpack.i.h.bf16 %v22038_v52  ;;  %v22039_v61 = vunpack.i.l.bf16 %v22038_v52  ;;  %20427 = vmatmul.mubr.msk.f32.vlgmr.msra.gmra.mrb[60].mxu0 %vm467_vm4, %v24481_v27 }
0x1556   :  { %20429 = vmatprep.mubr.msk.f32.mxu0 %vm467_vm4, %v24484_v10  ;;  %21451 = vmatpush3.bf16.msra.mxu0 %v21448_v24 }
0x1557   :  { %v21452_v59 = vpack.c.bf16 %v22040_v20, %v22039_v61 }
0x1559   :  { %20430 = vmatmul.mubr.msk.f32.gmra.mrb[62].mxu0 %vm467_vm4, %v24491_v7  ;;  %21453 = vmatprep.subr.bf16.mxu0 %v21452_v59 }
0x155a   :  { %21455 = vmatpush3.bf16.msra.mxu0 %v21452_v59 }
0x161c   :  { %v20414_v28 = vpop.f32.mrb[58].mxu1 }
0x161d   :  { %v6751_v30 = vadd.f32 %v20414_v28, %v24496_v26  ;;  %v6745_v11 = vpop.f32.mrb[59].mxu1 }
0x161e   :  { %v6746_v63 = vadd.f32 %v6745_v11, %v24499_v19 }
0x161f   :  { %v6884_v5 = vsel %vm703_vm5, %v6751_v30, -inf }
0x1620   :  { %6885 = vmax.xlane.f32.xlu1 %v6884_v5  ;;  %v20417_v21 = vpop.f32.mrb[60].mxu1  ;;  %v6881_v33 = vsel %vm703_vm5, %v6746_v63, -inf }
0x1621   :  { %v6761_v14 = vadd.f32 %v20417_v21, %v24504_v58  ;;  %v6755_v36 = vpop.f32.mrb[61].mxu1  ;;  %6882 = vmax.xlane.f32.xlu0 %v6881_v33 }
0x1622   :  { %v6756_v44 = vadd.f32 %v6755_v36, %v24508_v6 }
0x1623   :  { %v6890_v3 = vsel %vm703_vm5, %v6761_v14, -inf }
0x1624   :  { %6891 = vmax.xlane.f32.xlu1 %v6890_v3  ;;  %v6887_v35 = vsel %vm703_vm5, %v6756_v44, -inf }
0x1625   :  { %6888 = vmax.xlane.f32.xlu0 %v6887_v35 }
0x1628   :  { %v20428_v37 = vpop.f32.mrb[60].mxu0 }
0x1629   :  { %v6868_v40 = vadd.f32 %v20428_v37, %v24496_v26  ;;  %v6862_v45 = vpop.f32.mrb[61].mxu0 }
0x162a   :  { %v6863_v47 = vadd.f32 %v6862_v45, %v24499_v19 }
0x162b   :  { %v6896_v49 = vsel %vm703_vm5, %v6868_v40, -inf }
0x162c   :  { %v20431_v12 = vpop.f32.mrb[62].mxu0  ;;  %6897 = vmax.xlane.f32.xlu0 %v6896_v49  ;;  %v6893_v25 = vsel %vm703_vm5, %v6863_v47, -inf }
0x162d   :  { %v24519_v13 = vadd.f32 %v20431_v12, %v24504_v58  ;;  %v6872_v2 = vpop.f32.mrb[63].mxu0 }
0x162e   :  { %v24522_v22 = vadd.f32 %v6872_v2, %v24508_v6 }
0x162f   :  { %v6902_v4 = vsel %vm703_vm5, %v24519_v13, -inf }
0x1630   :  { %6903 = vmax.xlane.f32.xlu1 %v6902_v4  ;;  %6894 = vmax.xlane.f32.xlu0 %v6893_v25  ;;  %v6899_v17 = vsel %vm703_vm5, %v24522_v22, -inf }
0x1634   :  { %6900 = vmax.xlane.f32.xlu0 %v6899_v17 }
0x1641   :  { %22047 = vrot.lane.b32.xlu1 %v24426_v57, %s23194_s24 }
0x164a   :  { %22042 = vrot.lane.b32.xlu0 %v24412_v62, %s23194_s24 }
0x16ad   :  { %v6886_v48 = vpop.xlane.xlu1 %6885 }
0x16ae   :  { %v6906_v16 = vsub.f32 %v6751_v30, %v6886_v48  ;;  %v6883_v53 = vpop.xlane.xlu0 %6882 }
0x16af   :  { %v6905_v32 = vsub.f32 %v6746_v63, %v6883_v53 }
0x16b0   :  { %v6915_v15 = vmul.f32 1.442695, %v6906_v16 }
0x16b1   :  { %v6913_v8 = vmul.f32 1.442695, %v6905_v32  ;;  %v6892_v31 = vpop.xlane.xlu1 %6891 }
0x16b2   :  { %22392 = vpow2.f32 %v6915_v15  ;;  %v6908_v24 = vsub.f32 %v6761_v14, %v6892_v31  ;;  %v6889_v52 = vpop.xlane.xlu0 %6888 }
0x16b3   :  { %22394 = vpow2.f32 %v6913_v8  ;;  %v6907_v20 = vsub.f32 %v6756_v44, %v6889_v52 }
0x16b4   :  { %v6919_v61 = vmul.f32 1.442695, %v6908_v24 }
0x16b5   :  { %v6917_v59 = vmul.f32 1.442695, %v6907_v20 }
0x16b6   :  { %22396 = vpow2.f32 %v6919_v61 }
0x16b7   :  { %22398 = vpow2.f32 %v6917_v59 }
0x16b9   :  { %v6898_v28 = vpop.xlane.xlu0 %6897 }
0x16ba   :  { %v6910_v11 = vsub.f32 %v6868_v40, %v6898_v28 }
0x16bc   :  { %v24533_v5 = vpop.eup %22392  ;;  %v6923_v21 = vmul.f32 1.442695, %v6910_v11 }
0x16bd   :  { %v24535_v30 = vpop.eup %22394  ;;  %v6895_v63 = vpop.xlane.xlu0 %6894  ;;  %v6932_v33 = vsel %vm703_vm5, %v24533_v5, 0.0 }
0x16be   :  { %22400 = vpow2.f32 %v6923_v21  ;;  %v6909_v14 = vsub.f32 %v6863_v47, %v6895_v63  ;;  %6933 = vadd.xlane.f32.xlu1 %v6932_v33  ;;  %v6929_v36 = vsel %vm703_vm5, %v24535_v30, 0.0  ;;  %v6904_v16 = vpop.xlane.xlu1 %6903  ;;  %v22035_v63 = vunpack.i.h.bf16 %v24475_v1 }
0x16bf   :  { %6930 = vadd.xlane.f32.xlu0 %v6929_v36  ;;  %v6912_v32 = vsub.f32 %v24519_v13, %v6904_v16  ;;  %v22034_v33 = vunpack.i.l.bf16 %v24475_v1 }
0x16c0   :  { %v24541_v44 = vpop.eup %22396  ;;  %v6921_v3 = vmul.f32 1.442695, %v6909_v14 }
0x16c1   :  { %v24543_v35 = vpop.eup %22398  ;;  %v6901_v37 = vpop.xlane.xlu0 %6900  ;;  %v6938_v40 = vsel %vm703_vm5, %v24541_v44, 0.0  ;;  %v6927_v8 = vmul.f32 1.442695, %v6912_v32 }
0x16c2   :  { %6939 = vadd.xlane.f32.xlu1 %v6938_v40  ;;  %22402 = vpow2.f32 %v6921_v3  ;;  %v6935_v45 = vsel %vm703_vm5, %v24543_v35, 0.0  ;;  %v6911_v53 = vsub.f32 %v24522_v22, %v6901_v37  ;;  %v22048_v13 = vpop.permute.xlu1 %22047  ;;  %v21462_v40 = vpack.c.bf16 %v22035_v63, %v22034_v33 }
0x16c3   :  { %6936 = vadd.xlane.f32.xlu0 %v6935_v45 }
0x16c4   :  { %v6925_v15 = vmul.f32 1.442695, %v6911_v53 }
0x16c5   :  { %v22043_v47 = vpop.permute.xlu0 %22042 }
0x16c6   :  { %v22045_v49 = vunpack.i.h.bf16 %v22043_v47  ;;  %v22044_v12 = vunpack.i.l.bf16 %v22043_v47  ;;  %22404 = vpow2.f32 %v6925_v15 }
0x16c7   :  { %22406 = vpow2.f32 %v6927_v8 }
0x16c8   :  { %v24549_v2 = vpop.eup %22400  ;;  %v24551_v4 = vpack.c.bf16 %v22045_v49, %v22044_v12  ;;  %v22050_v12 = vunpack.i.h.bf16 %v22048_v13 }
0x16c9   :  { %v6944_v25 = vsel %vm703_vm5, %v24549_v2, 0.0 }
0x16ca   :  { %6945 = vadd.xlane.f32.xlu1 %v6944_v25  ;;  %21470 = vmatprep.subr.msk.bf16.mxu0 %vm24440_vm7, %v24551_v4  ;;  %v22049_v25 = vunpack.i.l.bf16 %v22048_v13 }
0x16cc   :  { %v24558_v17 = vpop.eup %22402 }
0x16cd   :  { %v6941_v48 = vsel %vm703_vm5, %v24558_v17, 0.0 }
0x16ce   :  { %6942 = vadd.xlane.f32.xlu0 %v6941_v48 }
0x16d0   :  { %v24570_v31 = vpop.eup %22404 }
0x16d1   :  { %v24572_v24 = vpop.eup %22406  ;;  %v6947_v52 = vsel %vm703_vm5, %v24570_v31, 0.0 }
0x16d2   :  { %v6950_v20 = vsel %vm703_vm5, %v24572_v24, 0.0 }
0x16db   :  { %7189 = vrot.lane.b32.xlu1 %v24456_v9, %s23195_s29 }
0x16df   :  { %7306 = vrot.lane.b32.xlu1 %v24481_v27, %s23195_s29 }
0x16e4   :  { %7187 = vrot.lane.b32.xlu0 %v24392_v39, %s23195_s29 }
0x1703   :  { %6948 = vadd.xlane.f32.xlu1 %v6947_v52  ;;  %6951 = vadd.xlane.f32.xlu0 %v6950_v20 }
0x1714   :  { %7193 = vrot.lane.b32.xlu1 %v24467_v43, %s23195_s29 }
0x1718   :  { %7310 = vrot.lane.b32.xlu1 %v24491_v7, %s23195_s29 }
0x1719   :  { %7304 = vrot.lane.b32.xlu0 %v24409_v60, %s23195_s29 }
0x171c   :  { %22057 = vrot.lane.b32.xlu1 %v24403_v56, %s23196_s7 }
0x171d   :  { %7191 = vrot.lane.b32.xlu0 %v24458_v41, %s23195_s29 }
0x1720   :  { %22067 = vrot.lane.b32.xlu1 %v24426_v57, %s23196_s7 }
0x1721   :  { %7308 = vrot.lane.b32.xlu0 %v24484_v10, %s23195_s29 }
0x1724   :  { %22072 = vrot.lane.b32.xlu1 %v24390_v46, %s23197_s30 }
0x1725   :  { %22052 = vrot.lane.b32.xlu0 %v24390_v46, %s23196_s7 }
0x1728   :  { %22077 = vrot.lane.b32.xlu1 %v24403_v56, %s23197_s30 }
0x1729   :  { %22062 = vrot.lane.b32.xlu0 %v24412_v62, %s23196_s7 }
0x174b   :  { %v6934_v22 = vpop.xlane.xlu1 %6933 }
0x174c   :  { %22408 = vrcp.f32 %v6934_v22  ;;  %v6931_v61 = vpop.xlane.xlu0 %6930 }
0x174d   :  { %22410 = vrcp.f32 %v6931_v61 }
0x174f   :  { %v6940_v59 = vpop.xlane.xlu1 %6939 }
0x1750   :  { %22412 = vrcp.f32 %v6940_v59  ;;  %v6937_v28 = vpop.xlane.xlu0 %6936 }
0x1751   :  { %22414 = vrcp.f32 %v6937_v28 }
0x1756   :  { %v22409_v11 = vpop.eup %22408 }
0x1757   :  { %v22411_v21 = vpop.eup %22410  ;;  %v6962_v36 = vmul.f32 %v22409_v11, %v24533_v5  ;;  %v6946_v3 = vpop.xlane.xlu1 %6945 }
0x1758   :  { %v6961_v14 = vmul.f32 %v22411_v21, %v24535_v30  ;;  %22416 = vrcp.f32 %v6946_v3 }
0x175a   :  { %20440 = vmatprep.mubr.msk.f32.mxu1 %vm703_vm5, %v6961_v14  ;;  %v22413_v37 = vpop.eup %22412 }
0x175b   :  { %20441 = vmatmul.mubr.msk.f32.vlgmr.msra.gmra.mrb[62].mxu1 %vm703_vm5, %v6962_v36  ;;  %v22415_v45 = vpop.eup %22414  ;;  %v6943_v47 = vpop.xlane.xlu0 %6942  ;;  %v6964_v5 = vmul.f32 %v22413_v37, %v24541_v44  ;;  %v21474_v44 = vpack.c.bf16 %v22050_v12, %v22049_v25 }
0x175c   :  { %21461 = vmatpush3.bf16.xpose.msk.msra.mxu1 %vm24440_vm7, %v24473_v38  ;;  %22418 = vrcp.f32 %v6943_v47  ;;  %v6963_v1 = vmul.f32 %v22415_v45, %v24543_v35  ;;  %v7190_v16 = vpop.permute.xlu1 %7189 }
0x175d   :  { %21464 = vmatprep.subr.msk.bf16.mxu1 %vm24440_vm7, %v21462_v40 }
0x175e   :  { %20443 = vmatprep.mubr.msk.f32.mxu1 %vm703_vm5, %v6963_v1 }
0x175f   :  { %20444 = vmatmul.mubr.msk.f32.gmra.mrb[64].mxu1 %vm703_vm5, %v6964_v5  ;;  %v7188_v30 = vpop.permute.xlu0 %7187 }
0x1760   :  { %20468 = vmatprep.mubr.msk.f32.mxu1 %vm467_vm4, %v7188_v30 }
0x1762   :  { %v22417_v38 = vpop.eup %22416 }
0x1763   :  { %v6966_v35 = vmul.f32 %v22417_v38, %v24549_v2 }
0x1764   :  { %21467 = vmatpush3.bf16.xpose.msk.msra.mxu1 %vm24440_vm7, %v21462_v40 }
0x1766   :  { %v22419_v49 = vpop.eup %22418 }
0x1767   :  { %v6965_v48 = vmul.f32 %v22419_v49, %v24558_v17  ;;  %v7307_v17 = vpop.permute.xlu1 %7306 }
0x1769   :  { %20454 = vmatprep.mubr.msk.f32.mxu0 %vm703_vm5, %v6965_v48 }
0x176a   :  { %20455 = vmatmul.mubr.msk.f32.vlgmr.msra.gmra.mrb[64].mxu0 %vm703_vm5, %v6966_v35 }
0x176b   :  { %20469 = vmatmul.mubr.msk.f32.vlgmr.msra.gmra.mrb[66].mxu1 %vm467_vm4, %v7190_v16  ;;  %21473 = vmatpush3.bf16.xpose.msk.msra.mxu0 %vm24440_vm7, %v24551_v4 }
0x176c   :  { %21476 = vmatprep.subr.msk.bf16.mxu0 %vm24440_vm7, %v21474_v44 }
0x1773   :  { %21479 = vmatpush3.bf16.xpose.msk.msra.mxu0 %vm24440_vm7, %v21474_v44 }
0x1790   :  { %v6949_v2 = vpop.xlane.xlu1 %6948  ;;  %v6952_v53 = vpop.xlane.xlu0 %6951 }
0x1791   :  { %22420 = vrcp.f32 %v6949_v2 }
0x1792   :  { %22422 = vrcp.f32 %v6952_v53 }
0x1794   :  { %v7194_v32 = vpop.permute.xlu1 %7193  ;;  %v7305_v15 = vpop.permute.xlu0 %7304 }
0x1798   :  { %v7311_v8 = vpop.permute.xlu1 %7310  ;;  %v7192_v52 = vpop.permute.xlu0 %7191 }
0x1799   :  { %20471 = vmatprep.mubr.msk.f32.mxu1 %vm467_vm4, %v7192_v52 }
0x179a   :  { %20472 = vmatmul.mubr.msk.f32.gmra.mrb[68].mxu1 %vm467_vm4, %v7194_v32 }
0x179b   :  { %v22421_v20 = vpop.eup %22420 }
0x179c   :  { %v22423_v4 = vpop.eup %22422  ;;  %v22058_v13 = vpop.permute.xlu1 %22057  ;;  %v6967_v22 = vmul.f32 %v22421_v20, %v24570_v31 }
0x179d   :  { %v7309_v61 = vpop.permute.xlu0 %7308  ;;  %v6968_v59 = vmul.f32 %v22423_v4, %v24572_v24  ;;  %v22060_v11 = vunpack.i.h.bf16 %v22058_v13  ;;  %v22059_v21 = vunpack.i.l.bf16 %v22058_v13 }
0x179e   :  { %20457 = vmatprep.mubr.msk.f32.mxu0 %vm703_vm5, %v6967_v22 }
0x179f   :  { %20458 = vmatmul.mubr.msk.f32.gmra.mrb[66].mxu0 %vm703_vm5, %v6968_v59  ;;  %v21484_v40 = vpack.c.bf16 %v22060_v11, %v22059_v21 }
0x17a0   :  { %v22068_v28 = vpop.permute.xlu1 %22067  ;;  %20482 = vmatprep.mubr.msk.f32.mxu0 %vm467_vm4, %v7305_v15 }
0x17a1   :  { %v22053_v63 = vpop.permute.xlu0 %22052  ;;  %v22070_v3 = vunpack.i.h.bf16 %v22068_v28  ;;  %v22069_v24 = vunpack.i.l.bf16 %v22068_v28 }
0x17a2   :  { %v22055_v33 = vunpack.i.h.bf16 %v22053_v63  ;;  %v22054_v14 = vunpack.i.l.bf16 %v22053_v63 }
0x17a3   :  { %20483 = vmatmul.mubr.msk.f32.vlgmr.msra.gmra.mrb[68].mxu0 %vm467_vm4, %v7307_v17  ;;  %v21492_v49 = vpack.c.bf16 %v22070_v3, %v22069_v24 }
0x17a4   :  { %v22073_v36 = vpop.permute.xlu1 %22072  ;;  %20485 = vmatprep.mubr.msk.f32.mxu0 %vm467_vm4, %v7309_v61  ;;  %v21480_v31 = vpack.c.bf16 %v22055_v33, %v22054_v14 }
0x17a5   :  { %v22063_v37 = vpop.permute.xlu0 %22062  ;;  %v22075_v45 = vunpack.i.h.bf16 %v22073_v36  ;;  %v22074_v47 = vunpack.i.l.bf16 %v22073_v36 }
0x17a6   :  { %v22065_v1 = vunpack.i.h.bf16 %v22063_v37  ;;  %v22064_v5 = vunpack.i.l.bf16 %v22063_v37  ;;  %21481 = vmatprep.subr.bf16.mxu1 %v21480_v31 }
0x17a7   :  { %21483 = vmatpush3.bf16.msra.mxu1 %v21480_v31  ;;  %20486 = vmatmul.mubr.msk.f32.gmra.mrb[70].mxu0 %vm467_vm4, %v7311_v8  ;;  %v24640_v38 = vpack.c.bf16 %v22075_v45, %v22074_v47 }
0x17a8   :  { %21485 = vmatprep.subr.bf16.mxu1 %v21484_v40  ;;  %v21488_v30 = vpack.c.bf16 %v22065_v1, %v22064_v5  ;;  %v24687_v47 = vpop.permute.xlu1 %22077 }
0x17aa   :  { %21489 = vmatprep.subr.bf16.mxu0 %v21488_v30 }
0x17ab   :  { %21487 = vmatpush3.bf16.msra.mxu1 %v21484_v40  ;;  %21491 = vmatpush3.bf16.msra.mxu0 %v21488_v30 }
0x17ac   :  { %21493 = vmatprep.subr.bf16.mxu0 %v21492_v49  ;;  %21498 = vmatprep.subr.msk.bf16.mxu1 %vm24440_vm7, %v24640_v38 }
0x17af   :  { %21495 = vmatpush3.bf16.msra.mxu0 %v21492_v49 }
0x182e   :  { %v24645_v12 = vpop.f32.mrb[62].mxu1 }
0x182f   :  { %v24647_v25 = vpop.f32.mrb[63].mxu1 }
0x1832   :  { %v24649_v48 = vpop.f32.mrb[64].mxu1 }
0x1833   :  { %v24651_v35 = vpop.f32.mrb[65].mxu1 }
0x183d   :  { %v24653_v16 = vpop.f32.mrb[64].mxu0 }
0x183e   :  { %v20470_v44 = vpop.f32.mrb[66].mxu1  ;;  %v24656_v2 = vpop.f32.mrb[65].mxu0 }
0x183f   :  { %v7291_v17 = vadd.f32 %v20470_v44, %v24496_v26  ;;  %v7285_v53 = vpop.f32.mrb[67].mxu1 }
0x1840   :  { %v7286_v32 = vadd.f32 %v7285_v53, %v24499_v19 }
0x1841   :  { %v7424_v15 = vsel %vm703_vm5, %v7291_v17, -inf }
0x1842   :  { %7425 = vmax.xlane.f32.xlu1 %v7424_v15  ;;  %v7421_v8 = vsel %vm703_vm5, %v7286_v32, -inf }
0x1843   :  { %7422 = vmax.xlane.f32.xlu0 %v7421_v8 }
0x186d   :  { %v20473_v52 = vpop.f32.mrb[68].mxu1 }
0x186e   :  { %v7301_v20 = vadd.f32 %v20473_v52, %v24504_v58  ;;  %v7295_v4 = vpop.f32.mrb[69].mxu1 }
0x186f   :  { %v7296_v13 = vadd.f32 %v7295_v4, %v24508_v6 }
0x1870   :  { %v7430_v22 = vsel %vm703_vm5, %v7301_v20, -inf }
0x1871   :  { %7431 = vmax.xlane.f32.xlu1 %v7430_v22  ;;  %v7427_v59 = vsel %vm703_vm5, %v7296_v13, -inf }
0x1872   :  { %v24664_v61 = vpop.f32.mrb[66].mxu0  ;;  %7428 = vmax.xlane.f32.xlu0 %v7427_v59 }
0x1873   :  { %v24667_v28 = vpop.f32.mrb[67].mxu0 }
0x1876   :  { %v20484_v11 = vpop.f32.mrb[68].mxu0 }
0x1877   :  { %v7408_v21 = vadd.f32 %v20484_v11, %v24496_v26  ;;  %v7402_v63 = vpop.f32.mrb[69].mxu0 }
0x1878   :  { %v7403_v33 = vadd.f32 %v7402_v63, %v24499_v19 }
0x1879   :  { %v7436_v14 = vsel %vm703_vm5, %v7408_v21, -inf }
0x187a   :  { %7437 = vmax.xlane.f32.xlu0 %v7436_v14  ;;  %v20487_v36 = vpop.f32.mrb[70].mxu0  ;;  %v7433_v40 = vsel %vm703_vm5, %v7403_v33, -inf }
0x187b   :  { %v24673_v31 = vadd.f32 %v20487_v36, %v24504_v58  ;;  %v7412_v3 = vpop.f32.mrb[71].mxu0 }
0x187c   :  { %v24676_v24 = vadd.f32 %v7412_v3, %v24508_v6 }
0x187d   :  { %v7442_v37 = vsel %vm703_vm5, %v24673_v31, -inf }
0x187e   :  { %7443 = vmax.xlane.f32.xlu1 %v7442_v37  ;;  %7434 = vmax.xlane.f32.xlu0 %v7433_v40  ;;  %v7439_v45 = vsel %vm703_vm5, %v24676_v24, -inf }
0x1882   :  { %7440 = vmax.xlane.f32.xlu0 %v7439_v45 }
0x188f   :  { %22087 = vrot.lane.b32.xlu1 %v24426_v57, %s23197_s30 }
0x1898   :  { %22082 = vrot.lane.b32.xlu0 %v24412_v62, %s23197_s30 }
0x18cf   :  { %v7426_v1 = vpop.xlane.xlu1 %7425 }
0x18d0   :  { %v7446_v5 = vsub.f32 %v7291_v17, %v7426_v1  ;;  %v7423_v30 = vpop.xlane.xlu0 %7422 }
0x18d1   :  { %v7445_v49 = vsub.f32 %v7286_v32, %v7423_v30 }
0x18d2   :  { %v7455_v44 = vmul.f32 1.442695, %v7446_v5 }
0x18d3   :  { %v7453_v53 = vmul.f32 1.442695, %v7445_v49 }
0x18d4   :  { %22424 = vpow2.f32 %v7455_v44 }
0x18d5   :  { %22426 = vpow2.f32 %v7453_v53 }
0x18de   :  { %v24689_v15 = vpop.eup %22424 }
0x18df   :  { %v24691_v8 = vpop.eup %22426  ;;  %v7472_v52 = vsel %vm703_vm5, %v24689_v15, 0.0 }
0x18e0   :  { %7473 = vadd.xlane.f32.xlu1 %v7472_v52  ;;  %v7469_v4 = vsel %vm703_vm5, %v24691_v8, 0.0 }
0x18e1   :  { %7470 = vadd.xlane.f32.xlu0 %v7469_v4 }
0x18fe   :  { %v7432_v22 = vpop.xlane.xlu1 %7431 }
0x18ff   :  { %v7448_v17 = vsub.f32 %v7301_v20, %v7432_v22  ;;  %v7429_v59 = vpop.xlane.xlu0 %7428 }
0x1900   :  { %v7447_v32 = vsub.f32 %v7296_v13, %v7429_v59 }
0x1901   :  { %v7459_v11 = vmul.f32 1.442695, %v7448_v17 }
0x1902   :  { %v7457_v63 = vmul.f32 1.442695, %v7447_v32 }
0x1903   :  { %22428 = vpow2.f32 %v7459_v11 }
0x1904   :  { %22430 = vpow2.f32 %v7457_v63 }
0x1907   :  { %v7438_v14 = vpop.xlane.xlu0 %7437 }
0x1908   :  { %v7450_v36 = vsub.f32 %v7408_v21, %v7438_v14 }
0x190a   :  { %v7463_v3 = vmul.f32 1.442695, %v7450_v36 }
0x190b   :  { %v7435_v37 = vpop.xlane.xlu0 %7434  ;;  %v7444_v17 = vpop.xlane.xlu1 %7443 }
0x190c   :  { %22432 = vpow2.f32 %v7463_v3  ;;  %v7449_v40 = vsub.f32 %v7403_v33, %v7435_v37  ;;  %v7452_v32 = vsub.f32 %v24673_v31, %v7444_v17 }
0x190d   :  { %v24697_v45 = vpop.eup %22428 }
0x190e   :  { %v7461_v1 = vmul.f32 1.442695, %v7449_v40  ;;  %v24699_v5 = vpop.eup %22430  ;;  %v7478_v20 = vsel %vm703_vm5, %v24697_v45, 0.0  ;;  %v7467_v63 = vmul.f32 1.442695, %v7452_v32 }
0x190f   :  { %v7441_v30 = vpop.xlane.xlu0 %7440  ;;  %7479 = vadd.xlane.f32.xlu1 %v7478_v20  ;;  %v7475_v13 = vsel %vm703_vm5, %v24699_v5, 0.0  ;;  %v22088_v31 = vpop.permute.xlu1 %22087 }
0x1910   :  { %22434 = vpow2.f32 %v7461_v1  ;;  %7476 = vadd.xlane.f32.xlu0 %v7475_v13  ;;  %v7451_v59 = vsub.f32 %v24676_v24, %v7441_v30  ;;  %v22080_v30 = vunpack.i.h.bf16 %v24687_v47  ;;  %v22079_v13 = vunpack.i.l.bf16 %v24687_v47 }
0x1912   :  { %v7465_v11 = vmul.f32 1.442695, %v7451_v59 }
0x1913   :  { %v22083_v21 = vpop.permute.xlu0 %22082 }
0x1914   :  { %v22085_v49 = vunpack.i.h.bf16 %v22083_v21  ;;  %v22084_v44 = vunpack.i.l.bf16 %v22083_v21  ;;  %22436 = vpow2.f32 %v7465_v11 }
0x1915   :  { %22438 = vpow2.f32 %v7467_v63 }
0x1916   :  { %v24705_v53 = vpop.eup %22432  ;;  %v24707_v33 = vpack.c.bf16 %v22085_v49, %v22084_v44  ;;  %v21502_v44 = vpack.c.bf16 %v22080_v30, %v22079_v13 }
0x1917   :  { %v7484_v52 = vsel %vm703_vm5, %v24705_v53, 0.0 }
0x1918   :  { %7485 = vadd.xlane.f32.xlu1 %v7484_v52  ;;  %21510 = vmatprep.subr.msk.bf16.mxu0 %vm24440_vm7, %v24707_v33 }
0x191a   :  { %v24714_v4 = vpop.eup %22434 }
0x191b   :  { %v7481_v22 = vsel %vm703_vm5, %v24714_v4, 0.0 }
0x191c   :  { %7482 = vadd.xlane.f32.xlu0 %v7481_v22 }
0x191e   :  { %v24726_v14 = vpop.eup %22436 }
0x191f   :  { %v24728_v36 = vpop.eup %22438  ;;  %v7487_v3 = vsel %vm703_vm5, %v24726_v14, 0.0 }
0x1920   :  { %v7490_v37 = vsel %vm703_vm5, %v24728_v36, 0.0 }
0x1929   :  { %7729 = vrot.lane.b32.xlu1 %v24456_v9, %s23198_s8 }
0x192d   :  { %7846 = vrot.lane.b32.xlu1 %v24481_v27, %s23198_s8 }
0x1932   :  { %7727 = vrot.lane.b32.xlu0 %v24392_v39, %s23198_s8 }
0x1951   :  { %7488 = vadd.xlane.f32.xlu1 %v7487_v3  ;;  %7491 = vadd.xlane.f32.xlu0 %v7490_v37  ;;  %v22090_v37 = vunpack.i.h.bf16 %v22088_v31 }
0x1962   :  { %7733 = vrot.lane.b32.xlu1 %v24467_v43, %s23198_s8 }
0x1966   :  { %7850 = vrot.lane.b32.xlu1 %v24491_v7, %s23198_s8 }
0x1967   :  { %7844 = vrot.lane.b32.xlu0 %v24409_v60, %s23198_s8 }
0x196a   :  { %22097 = vrot.lane.b32.xlu1 %v24403_v56, %s23199_s10 }
0x196b   :  { %7731 = vrot.lane.b32.xlu0 %v24458_v41, %s23198_s8 }
0x196d   :  { %v7474_v24 = vpop.xlane.xlu1 %7473 }
0x196e   :  { %22440 = vrcp.f32 %v7474_v24  ;;  %v7471_v40 = vpop.xlane.xlu0 %7470  ;;  %22107 = vrot.lane.b32.xlu1 %v24426_v57, %s23199_s10  ;;  %v22089_v24 = vunpack.i.l.bf16 %v22088_v31 }
0x196f   :  { %22442 = vrcp.f32 %v7471_v40  ;;  %7848 = vrot.lane.b32.xlu0 %v24484_v10, %s23198_s8 }
0x1972   :  { %22112 = vrot.lane.b32.xlu1 %v24390_v46, %s23200_s11 }
0x1973   :  { %22092 = vrot.lane.b32.xlu0 %v24390_v46, %s23199_s10 }
0x1976   :  { %22117 = vrot.lane.b32.xlu1 %v24403_v56, %s23200_s11 }
0x1977   :  { %22102 = vrot.lane.b32.xlu0 %v24412_v62, %s23199_s10 }
0x1978   :  { %v22441_v1 = vpop.eup %22440 }
0x1979   :  { %v22443_v20 = vpop.eup %22442  ;;  %v7502_v49 = vmul.f32 %v22441_v1, %v24689_v15 }
0x197a   :  { %22127 = vrot.lane.b32.xlu1 %v24426_v57, %s23200_s11  ;;  %v7501_v21 = vmul.f32 %v22443_v20, %v24691_v8 }
0x197b   :  { %22122 = vrot.lane.b32.xlu0 %v24412_v62, %s23200_s11 }
0x197c   :  { %20496 = vmatprep.mubr.msk.f32.mxu1 %vm703_vm5, %v7501_v21 }
0x197d   :  { %20497 = vmatmul.mubr.msk.f32.vlgmr.msra.gmra.mrb[70].mxu1 %vm703_vm5, %v7502_v49 }
0x197e   :  { %21501 = vmatpush3.bf16.xpose.msk.msra.mxu1 %vm24440_vm7, %v24640_v38 }
0x197f   :  { %21504 = vmatprep.subr.msk.bf16.mxu1 %vm24440_vm7, %v21502_v44 }
0x1986   :  { %21507 = vmatpush3.bf16.xpose.msk.msra.mxu1 %vm24440_vm7, %v21502_v44 }
0x199c   :  { %v7480_v47 = vpop.xlane.xlu1 %7479 }
0x199d   :  { %22444 = vrcp.f32 %v7480_v47  ;;  %v7477_v15 = vpop.xlane.xlu0 %7476 }
0x199e   :  { %22446 = vrcp.f32 %v7477_v15 }
0x19a5   :  { %v7486_v8 = vpop.xlane.xlu1 %7485 }
0x19a6   :  { %22448 = vrcp.f32 %v7486_v8 }
0x19a7   :  { %v22445_v52 = vpop.eup %22444 }
0x19a8   :  { %v22447_v22 = vpop.eup %22446  ;;  %v7504_v38 = vmul.f32 %v22445_v52, %v24697_v45  ;;  %v21514_v45 = vpack.c.bf16 %v22090_v37, %v22089_v24 }
0x19a9   :  { %v7483_v17 = vpop.xlane.xlu0 %7482  ;;  %v7503_v59 = vmul.f32 %v22447_v22, %v24699_v5  ;;  %v7730_v11 = vpop.permute.xlu1 %7729 }
0x19aa   :  { %22450 = vrcp.f32 %v7483_v17 }
0x19ab   :  { %20499 = vmatprep.mubr.msk.f32.mxu1 %vm703_vm5, %v7503_v59 }
0x19ac   :  { %20500 = vmatmul.mubr.msk.f32.gmra.mrb[72].mxu1 %vm703_vm5, %v7504_v38 }
0x19ad   :  { %v7728_v32 = vpop.permute.xlu0 %7727  ;;  %v7847_v31 = vpop.permute.xlu1 %7846 }
0x19ae   :  { %20524 = vmatprep.mubr.msk.f32.mxu1 %vm467_vm4, %v7728_v32 }
0x19b0   :  { %20525 = vmatmul.mubr.msk.f32.vlgmr.msra.gmra.mrb[74].mxu1 %vm467_vm4, %v7730_v11  ;;  %v22449_v63 = vpop.eup %22448 }
0x19b1   :  { %v7506_v5 = vmul.f32 %v22449_v63, %v24705_v53 }
0x19b4   :  { %v22451_v3 = vpop.eup %22450 }
0x19b5   :  { %v7505_v40 = vmul.f32 %v22451_v3, %v24714_v4 }
0x19b7   :  { %20510 = vmatprep.mubr.msk.f32.mxu0 %vm703_vm5, %v7505_v40 }
0x19b8   :  { %20511 = vmatmul.mubr.msk.f32.vlgmr.msra.gmra.mrb[72].mxu0 %vm703_vm5, %v7506_v5 }
0x19b9   :  { %21513 = vmatpush3.bf16.xpose.msk.msra.mxu0 %vm24440_vm7, %v24707_v33 }
0x19ba   :  { %21516 = vmatprep.subr.msk.bf16.mxu0 %vm24440_vm7, %v21514_v45 }
0x19c1   :  { %21519 = vmatpush3.bf16.xpose.msk.msra.mxu0 %vm24440_vm7, %v21514_v45 }
0x19de   :  { %v7489_v1 = vpop.xlane.xlu1 %7488  ;;  %v7492_v4 = vpop.xlane.xlu0 %7491 }
0x19df   :  { %22452 = vrcp.f32 %v7489_v1 }
0x19e0   :  { %22454 = vrcp.f32 %v7492_v4 }
0x19e2   :  { %v7734_v53 = vpop.permute.xlu1 %7733  ;;  %v7845_v20 = vpop.permute.xlu0 %7844 }
0x19e6   :  { %v7851_v30 = vpop.permute.xlu1 %7850  ;;  %v7732_v13 = vpop.permute.xlu0 %7731 }
0x19e7   :  { %20527 = vmatprep.mubr.msk.f32.mxu1 %vm467_vm4, %v7732_v13 }
0x19e8   :  { %20528 = vmatmul.mubr.msk.f32.gmra.mrb[76].mxu1 %vm467_vm4, %v7734_v53 }
0x19e9   :  { %v22453_v21 = vpop.eup %22452 }
0x19ea   :  { %v22455_v33 = vpop.eup %22454  ;;  %v22098_v49 = vpop.permute.xlu1 %22097  ;;  %v7507_v44 = vmul.f32 %v22453_v21, %v24726_v14 }
0x19eb   :  { %v7849_v47 = vpop.permute.xlu0 %7848  ;;  %v7508_v15 = vmul.f32 %v22455_v33, %v24728_v36  ;;  %v22100_v52 = vunpack.i.h.bf16 %v22098_v49  ;;  %v22099_v22 = vunpack.i.l.bf16 %v22098_v49 }
0x19ec   :  { %20513 = vmatprep.mubr.msk.f32.mxu0 %vm703_vm5, %v7507_v44 }
0x19ed   :  { %20514 = vmatmul.mubr.msk.f32.gmra.mrb[74].mxu0 %vm703_vm5, %v7508_v15  ;;  %v21524_v3 = vpack.c.bf16 %v22100_v52, %v22099_v22 }
0x19ee   :  { %v22108_v8 = vpop.permute.xlu1 %22107  ;;  %20538 = vmatprep.mubr.msk.f32.mxu0 %vm467_vm4, %v7845_v20 }
0x19ef   :  { %v22093_v17 = vpop.permute.xlu0 %22092  ;;  %v22110_v11 = vunpack.i.h.bf16 %v22108_v8  ;;  %v22109_v36 = vunpack.i.l.bf16 %v22108_v8 }
0x19f0   :  { %v22095_v59 = vunpack.i.h.bf16 %v22093_v17  ;;  %v22094_v38 = vunpack.i.l.bf16 %v22093_v17 }
0x19f1   :  { %20539 = vmatmul.mubr.msk.f32.vlgmr.msra.gmra.mrb[76].mxu0 %vm467_vm4, %v7847_v31  ;;  %v21532_v20 = vpack.c.bf16 %v22110_v11, %v22109_v36 }
0x19f2   :  { %v22113_v32 = vpop.permute.xlu1 %22112  ;;  %20541 = vmatprep.mubr.msk.f32.mxu0 %vm467_vm4, %v7849_v47  ;;  %v21520_v14 = vpack.c.bf16 %v22095_v59, %v22094_v38 }
0x19f3   :  { %v22103_v63 = vpop.permute.xlu0 %22102  ;;  %v22115_v37 = vunpack.i.h.bf16 %v22113_v32  ;;  %v22114_v24 = vunpack.i.l.bf16 %v22113_v32 }
0x19f4   :  { %v22105_v40 = vunpack.i.h.bf16 %v22103_v63  ;;  %v22104_v5 = vunpack.i.l.bf16 %v22103_v63  ;;  %21521 = vmatprep.subr.bf16.mxu1 %v21520_v14 }
0x19f5   :  { %21523 = vmatpush3.bf16.msra.mxu1 %v21520_v14  ;;  %20542 = vmatmul.mubr.msk.f32.gmra.mrb[78].mxu0 %vm467_vm4, %v7851_v30  ;;  %v24800_v31 = vpack.c.bf16 %v22115_v37, %v22114_v24 }
0x19f6   :  { %21525 = vmatprep.subr.bf16.mxu1 %v21524_v3  ;;  %v21528_v45 = vpack.c.bf16 %v22105_v40, %v22104_v5 }
0x19f7   :  { %v22123_v1 = vpop.permute.xlu0 %22122 }
0x19f8   :  { %v22125_v4 = vunpack.i.h.bf16 %v22123_v1  ;;  %v22124_v53 = vunpack.i.l.bf16 %v22123_v1  ;;  %21529 = vmatprep.subr.bf16.mxu0 %v21528_v45 }
0x19f9   :  { %21527 = vmatpush3.bf16.msra.mxu1 %v21524_v3  ;;  %21531 = vmatpush3.bf16.msra.mxu0 %v21528_v45 }
0x19fa   :  { %21533 = vmatprep.subr.bf16.mxu0 %v21532_v20  ;;  %21538 = vmatprep.subr.msk.bf16.mxu1 %vm24440_vm7, %v24800_v31  ;;  %v24805_v13 = vpack.c.bf16 %v22125_v4, %v22124_v53 }
0x19fd   :  { %21535 = vmatpush3.bf16.msra.mxu0 %v21532_v20 }
0x19fe   :  { %21550 = vmatprep.subr.msk.bf16.mxu0 %vm24440_vm7, %v24805_v13 }
0x1a50   :  { %v24810_v30 = vpop.f32.mrb[70].mxu1 }
0x1a51   :  { %v24812_v21 = vpop.f32.mrb[71].mxu1 }
0x1a7f   :  { %v24814_v33 = vpop.f32.mrb[72].mxu1 }
0x1a80   :  { %v24816_v49 = vpop.f32.mrb[73].mxu1 }
0x1a83   :  { %v20526_v44 = vpop.f32.mrb[74].mxu1 }
0x1a84   :  { %v7831_v47 = vadd.f32 %v20526_v44, %v24496_v26  ;;  %v7825_v15 = vpop.f32.mrb[75].mxu1 }
0x1a85   :  { %v7826_v8 = vadd.f32 %v7825_v15, %v24499_v19 }
0x1a86   :  { %v7964_v52 = vsel %vm703_vm5, %v7831_v47, -inf }
0x1a87   :  { %7965 = vmax.xlane.f32.xlu1 %v7964_v52  ;;  %v7961_v22 = vsel %vm703_vm5, %v7826_v8, -inf }
0x1a88   :  { %7962 = vmax.xlane.f32.xlu0 %v7961_v22 }
0x1a8b   :  { %v24822_v17 = vpop.f32.mrb[72].mxu0 }
0x1a8c   :  { %v24824_v59 = vpop.f32.mrb[73].mxu0 }
0x1abb   :  { %v20529_v38 = vpop.f32.mrb[76].mxu1 }
0x1abc   :  { %v7841_v32 = vadd.f32 %v20529_v38, %v24504_v58  ;;  %v7835_v14 = vpop.f32.mrb[77].mxu1 }
0x1abd   :  { %v7836_v11 = vadd.f32 %v7835_v14, %v24508_v6 }
0x1abe   :  { %v7970_v36 = vsel %vm703_vm5, %v7841_v32, -inf }
0x1abf   :  { %7971 = vmax.xlane.f32.xlu1 %v7970_v36  ;;  %v7967_v3 = vsel %vm703_vm5, %v7836_v11, -inf }
0x1ac0   :  { %v24829_v63 = vpop.f32.mrb[74].mxu0  ;;  %7968 = vmax.xlane.f32.xlu0 %v7967_v3 }
0x1ac1   :  { %v24832_v37 = vpop.f32.mrb[75].mxu0 }
0x1ac4   :  { %v20540_v24 = vpop.f32.mrb[76].mxu0 }
0x1ac5   :  { %v7948_v40 = vadd.f32 %v20540_v24, %v24496_v26  ;;  %v7942_v5 = vpop.f32.mrb[77].mxu0 }
0x1ac6   :  { %v7943_v45 = vadd.f32 %v7942_v5, %v24499_v19  ;;  %v24849_v19 = vpop.permute.xlu1 %22117 }
0x1ac7   :  { %v7976_v1 = vsel %vm703_vm5, %v7948_v40, -inf }
0x1ac8   :  { %7977 = vmax.xlane.f32.xlu0 %v7976_v1  ;;  %v20543_v4 = vpop.f32.mrb[78].mxu0  ;;  %v7973_v52 = vsel %vm703_vm5, %v7943_v45, -inf }
0x1ac9   :  { %v24838_v53 = vadd.f32 %v20543_v4, %v24504_v58  ;;  %v7952_v20 = vpop.f32.mrb[79].mxu0 }
0x1aca   :  { %v7953_v44 = vadd.f32 %v7952_v20, %v24508_v6  ;;  %v24851_v58 = vpop.permute.xlu1 %22127 }
0x1acb   :  { %v7982_v15 = vsel %vm703_vm5, %v24838_v53, -inf }
0x1acc   :  { %7983 = vmax.xlane.f32.xlu1 %v7982_v15  ;;  %7974 = vmax.xlane.f32.xlu0 %v7973_v52  ;;  %v7979_v26 = vsel %vm703_vm5, %v7953_v44, -inf }
0x1ad0   :  { %7980 = vmax.xlane.f32.xlu0 %v7979_v26 }
0x1add   :  { %8269 = vrot.lane.b32.xlu1 %v24456_v9, %s23201_s15 }
0x1ae6   :  { %8267 = vrot.lane.b32.xlu0 %v24392_v39, %s23201_s15 }
0x1b14   :  { %v7966_v6 = vpop.xlane.xlu1 %7965 }
0x1b15   :  { %v7986_v22 = vsub.f32 %v7831_v47, %v7966_v6  ;;  %v7963_v38 = vpop.xlane.xlu0 %7962 }
0x1b16   :  { %v7985_v14 = vsub.f32 %v7826_v8, %v7963_v38 }
0x1b17   :  { %v7995_v36 = vmul.f32 1.442695, %v7986_v22 }
0x1b18   :  { %v7993_v3 = vmul.f32 1.442695, %v7985_v14 }
0x1b19   :  { %22456 = vpow2.f32 %v7995_v36 }
0x1b1a   :  { %22458 = vpow2.f32 %v7993_v3 }
0x1b23   :  { %v24853_v24 = vpop.eup %22456 }
0x1b24   :  { %v24855_v5 = vpop.eup %22458  ;;  %v8012_v9 = vsel %vm703_vm5, %v24853_v24, 0.0 }
0x1b25   :  { %8013 = vadd.xlane.f32.xlu1 %v8012_v9  ;;  %v8009_v39 = vsel %vm703_vm5, %v24855_v5, 0.0 }
0x1b26   :  { %8010 = vadd.xlane.f32.xlu0 %v8009_v39 }
0x1b4c   :  { %v7972_v1 = vpop.xlane.xlu1 %7971 }
0x1b4d   :  { %v7988_v47 = vsub.f32 %v7841_v32, %v7972_v1  ;;  %v7969_v4 = vpop.xlane.xlu0 %7968 }
0x1b4e   :  { %v7987_v8 = vsub.f32 %v7836_v11, %v7969_v4 }
0x1b4f   :  { %v7999_v20 = vmul.f32 1.442695, %v7988_v47 }
0x1b50   :  { %v7997_v15 = vmul.f32 1.442695, %v7987_v8 }
0x1b51   :  { %22460 = vpow2.f32 %v7999_v20 }
0x1b52   :  { %22462 = vpow2.f32 %v7997_v15 }
0x1b55   :  { %v7978_v52 = vpop.xlane.xlu0 %7977 }
0x1b56   :  { %v7990_v26 = vsub.f32 %v7948_v40, %v7978_v52 }
0x1b58   :  { %v8003_v6 = vmul.f32 1.442695, %v7990_v26 }
0x1b59   :  { %v7975_v22 = vpop.xlane.xlu0 %7974  ;;  %v7984_v4 = vpop.xlane.xlu1 %7983 }
0x1b5a   :  { %22464 = vpow2.f32 %v8003_v6  ;;  %v7989_v38 = vsub.f32 %v7943_v45, %v7975_v22  ;;  %v7992_v20 = vsub.f32 %v24838_v53, %v7984_v4 }
0x1b5b   :  { %v24861_v14 = vpop.eup %22460 }
0x1b5c   :  { %v8001_v36 = vmul.f32 1.442695, %v7989_v38  ;;  %v22463_v3 = vpop.eup %22462  ;;  %v8018_v9 = vsel %vm703_vm5, %v24861_v14, 0.0  ;;  %v8007_v15 = vmul.f32 1.442695, %v7992_v20 }
0x1b5d   :  { %8019 = vadd.xlane.f32.xlu1 %v8018_v9  ;;  %v8015_v32 = vsel %vm703_vm5, %v22463_v3, 0.0  ;;  %v7981_v1 = vpop.xlane.xlu0 %7980  ;;  %v22120_v9 = vunpack.i.h.bf16 %v24849_v19 }
0x1b5e   :  { %22466 = vpow2.f32 %v8001_v36  ;;  %8016 = vadd.xlane.f32.xlu0 %v8015_v32  ;;  %v7991_v47 = vsub.f32 %v7953_v44, %v7981_v1 }
0x1b60   :  { %v8005_v8 = vmul.f32 1.442695, %v7991_v47 }
0x1b61   :  { %v8268_v53 = vpop.permute.xlu0 %8267 }
0x1b62   :  { %22468 = vpow2.f32 %v8005_v8 }
0x1b63   :  { %22470 = vpow2.f32 %v8007_v15  ;;  %v22130_v15 = vunpack.i.h.bf16 %v24851_v58 }
0x1b64   :  { %v24866_v11 = vpop.eup %22464 }
0x1b65   :  { %v8024_v40 = vsel %vm703_vm5, %v24866_v11, 0.0 }
0x1b66   :  { %8025 = vadd.xlane.f32.xlu1 %v8024_v40 }
0x1b68   :  { %v24870_v39 = vpop.eup %22466 }
0x1b69   :  { %v8021_v45 = vsel %vm703_vm5, %v24870_v39, 0.0 }
0x1b6a   :  { %8022 = vadd.xlane.f32.xlu0 %v8021_v45 }
0x1b6c   :  { %v24879_v52 = vpop.eup %22468 }
0x1b6d   :  { %v8027_v26 = vsel %vm703_vm5, %v24879_v52, 0.0  ;;  %v24883_v6 = vpop.eup %22470 }
0x1b77   :  { %8273 = vrot.lane.b32.xlu1 %v24467_v43, %s23201_s15  ;;  %v8270_v43 = vpop.permute.xlu1 %8269 }
0x1b80   :  { %8271 = vrot.lane.b32.xlu0 %v24458_v41, %s23201_s15  ;;  %v8030_v41 = vsel %vm703_vm5, %v24883_v6, 0.0 }
0x1b9b   :  { %8028 = vadd.xlane.f32.xlu1 %v8027_v26 }
0x1b9f   :  { %8031 = vadd.xlane.f32.xlu0 %v8030_v41 }
0x1bac   :  { %8386 = vrot.lane.b32.xlu1 %v24481_v27, %s23201_s15  ;;  %v22119_v27 = vunpack.i.l.bf16 %v24849_v19 }
0x1bae   :  { %v21542_v40 = vpack.c.bf16 %v22120_v9, %v22119_v27 }
0x1bb0   :  { %8390 = vrot.lane.b32.xlu1 %v24491_v7, %s23201_s15 }
0x1bb2   :  { %v8014_v44 = vpop.xlane.xlu1 %8013 }
0x1bb3   :  { %22472 = vrcp.f32 %v8014_v44  ;;  %v8011_v22 = vpop.xlane.xlu0 %8010 }
0x1bb4   :  { %22474 = vrcp.f32 %v8011_v22 }
0x1bb5   :  { %8384 = vrot.lane.b32.xlu0 %v24409_v60, %s23201_s15 }
0x1bb9   :  { %8388 = vrot.lane.b32.xlu0 %v24484_v10, %s23201_s15 }
0x1bbd   :  { %v22473_v38 = vpop.eup %22472 }
0x1bbe   :  { %v22475_v36 = vpop.eup %22474  ;;  %v8042_v7 = vmul.f32 %v22473_v38, %v24853_v24 }
0x1bbf   :  { %v8041_v32 = vmul.f32 %v22475_v36, %v24855_v5 }
0x1bc1   :  { %20552 = vmatprep.mubr.msk.f32.mxu1 %vm703_vm5, %v8041_v32 }
0x1bc2   :  { %20553 = vmatmul.mubr.msk.f32.vlgmr.msra.gmra.mrb[78].mxu1 %vm703_vm5, %v8042_v7  ;;  %v22808_v7 = vld [vmem:[%s27116_s23 + $0x8] sm:$0xff] }
0x1bc3   :  { %21541 = vmatpush3.bf16.xpose.msk.msra.mxu1 %vm24440_vm7, %v24800_v31 }
0x1bc4   :  { %21544 = vmatprep.subr.msk.bf16.mxu1 %vm24440_vm7, %v21542_v40 }
0x1bcb   :  { %21547 = vmatpush3.bf16.xpose.msk.msra.mxu1 %vm24440_vm7, %v21542_v40 }
0x1bea   :  { %v8020_v60 = vpop.xlane.xlu1 %8019 }
0x1beb   :  { %22476 = vrcp.f32 %v8020_v60  ;;  %v8017_v10 = vpop.xlane.xlu0 %8016 }
0x1bec   :  { %22478 = vrcp.f32 %v8017_v10  ;;  %v22809_v10 = vld [vmem:[%s27116_s23] sm:$0xff] }
0x1bf3   :  { %v8026_v19 = vpop.xlane.xlu1 %8025 }
0x1bf4   :  { %22480 = vrcp.f32 %v8026_v19 }
0x1bf5   :  { %v22477_v24 = vpop.eup %22476 }
0x1bf6   :  { %v22479_v5 = vpop.eup %22478  ;;  %v8044_v47 = vmul.f32 %v22477_v24, %v24861_v14 }
0x1bf7   :  { %v8023_v45 = vpop.xlane.xlu0 %8022  ;;  %v8043_v1 = vmul.f32 %v22479_v5, %v22463_v3  ;;  %v8274_v8 = vpop.permute.xlu1 %8273  ;;  %v22129_v3 = vunpack.i.l.bf16 %v24851_v58 }
0x1bf8   :  { %22482 = vrcp.f32 %v8023_v45 }
0x1bf9   :  { %20555 = vmatprep.mubr.msk.f32.mxu1 %vm703_vm5, %v8043_v1  ;;  %v21554_v41 = vpack.c.bf16 %v22130_v15, %v22129_v3  ;;  %v22810_v1 = vld [vmem:[%s27116_s23 + $0x18] sm:$0xff] }
0x1bfa   :  { %20556 = vmatmul.mubr.msk.f32.gmra.mrb[80].mxu1 %vm703_vm5, %v8044_v47 }
0x1bfb   :  { %20580 = vmatprep.mubr.msk.f32.mxu1 %vm467_vm4, %v8268_v53  ;;  %v8272_v31 = vpop.permute.xlu0 %8271 }
0x1bfe   :  { %20581 = vmatmul.mubr.msk.f32.vlgmr.msra.gmra.mrb[82].mxu1 %vm467_vm4, %v8270_v43  ;;  %v22481_v4 = vpop.eup %22480 }
0x1bff   :  { %20583 = vmatprep.mubr.msk.f32.mxu1 %vm467_vm4, %v8272_v31  ;;  %v8046_v26 = vmul.f32 %v22481_v4, %v24866_v11 }
0x1c02   :  { %v22483_v20 = vpop.eup %22482  ;;  %20584 = vmatmul.mubr.msk.f32.gmra.mrb[84].mxu1 %vm467_vm4, %v8274_v8  ;;  %v22811_v8 = vld [vmem:[%s27116_s23 + $0x10] sm:$0xff] }
0x1c03   :  { %v8045_v14 = vmul.f32 %v22483_v20, %v24870_v39 }
0x1c05   :  { %20566 = vmatprep.mubr.msk.f32.mxu0 %vm703_vm5, %v8045_v14 }
0x1c06   :  { %20567 = vmatmul.mubr.msk.f32.vlgmr.msra.gmra.mrb[80].mxu0 %vm703_vm5, %v8046_v26 }
0x1c07   :  { %21553 = vmatpush3.bf16.xpose.msk.msra.mxu0 %vm24440_vm7, %v24805_v13 }
0x1c08   :  { %21556 = vmatprep.subr.msk.bf16.mxu0 %vm24440_vm7, %v21554_v41 }
0x1c0f   :  { %21559 = vmatpush3.bf16.xpose.msk.msra.mxu0 %vm24440_vm7, %v21554_v41 }
0x1c28   :  { %v8029_v58 = vpop.xlane.xlu1 %8028 }
0x1c29   :  { %22484 = vrcp.f32 %v8029_v58 }
0x1c2c   :  { %v8032_v39 = vpop.xlane.xlu0 %8031  ;;  %v8387_v22 = vpop.permute.xlu1 %8386 }
0x1c2d   :  { %22486 = vrcp.f32 %v8032_v39 }
0x1c30   :  { %v8385_v44 = vpop.permute.xlu0 %8384  ;;  %v8391_v36 = vpop.permute.xlu1 %8390 }
0x1c33   :  { %v22485_v11 = vpop.eup %22484 }
0x1c34   :  { %v8047_v43 = vmul.f32 %v22485_v11, %v24879_v52  ;;  %v8389_v38 = vpop.permute.xlu0 %8388 }
0x1c36   :  { %20569 = vmatprep.mubr.msk.f32.mxu0 %vm703_vm5, %v8047_v43 }
0x1c37   :  { %v22487_v53 = vpop.eup %22486 }
0x1c38   :  { %v8048_v13 = vmul.f32 %v22487_v53, %v24883_v6 }
0x1c3a   :  { %20570 = vmatmul.mubr.msk.f32.gmra.mrb[82].mxu0 %vm703_vm5, %v8048_v13 }
0x1c3b   :  { %20594 = vmatprep.mubr.msk.f32.mxu0 %vm467_vm4, %v8385_v44 }
0x1c3e   :  { %20595 = vmatmul.mubr.msk.f32.vlgmr.msra.gmra.mrb[84].mxu0 %vm467_vm4, %v8387_v22 }
0x1c3f   :  { %20597 = vmatprep.mubr.msk.f32.mxu0 %vm467_vm4, %v8389_v38 }
0x1c42   :  { %20598 = vmatmul.mubr.msk.f32.gmra.mrb[86].mxu0 %vm467_vm4, %v8391_v36 }
0x1c95   :  { %v24936_v52 = vpop.f32.mrb[78].mxu1 }
0x1c96   :  { %v24938_v9 = vpop.f32.mrb[79].mxu1 }
0x1ccd   :  { %v24940_v6 = vpop.f32.mrb[80].mxu1 }
0x1cce   :  { %v24942_v27 = vpop.f32.mrb[81].mxu1 }
0x1cd1   :  { %v20582_v32 = vpop.f32.mrb[82].mxu1 }
0x1cd2   :  { %v8371_v40 = vadd.f32 %v22808_v7, %v20582_v32  ;;  %v8365_v60 = vpop.f32.mrb[83].mxu1 }
0x1cd3   :  { %v8366_v19 = vadd.f32 %v22809_v10, %v8365_v60 }
0x1cd4   :  { %v8504_v24 = vsel %vm703_vm5, %v8371_v40, -inf }
0x1cd5   :  { %8505 = vmax.xlane.f32.xlu1 %v8504_v24  ;;  %v20585_v5 = vpop.f32.mrb[84].mxu1  ;;  %v8501_v45 = vsel %vm703_vm5, %v8366_v19, -inf }
0x1cd6   :  { %v8381_v47 = vadd.f32 %v22810_v1, %v20585_v5  ;;  %8502 = vmax.xlane.f32.xlu0 %v8501_v45  ;;  %v8375_v31 = vpop.f32.mrb[85].mxu1 }
0x1cd7   :  { %v8376_v20 = vadd.f32 %v22811_v8, %v8375_v31 }
0x1cd8   :  { %v8510_v4 = vsel %vm703_vm5, %v8381_v47, -inf }
0x1cd9   :  { %v24951_v15 = vpop.f32.mrb[80].mxu0  ;;  %v8507_v14 = vsel %vm703_vm5, %v8376_v20, -inf }
0x1cda   :  { %v24953_v3 = vpop.f32.mrb[81].mxu0  ;;  %8511 = vmax.xlane.f32.xlu0 %v8510_v4 }
0x1cde   :  { %8508 = vmax.xlane.f32.xlu0 %v8507_v14 }
0x1d0d   :  { %v24956_v26 = vpop.f32.mrb[82].mxu0 }
0x1d0e   :  { %v24958_v41 = vpop.f32.mrb[83].mxu0 }
0x1d11   :  { %v20596_v58 = vpop.f32.mrb[84].mxu0 }
0x1d12   :  { %v8488_v39 = vadd.f32 %v22808_v7, %v20596_v58  ;;  %v8482_v11 = vpop.f32.mrb[85].mxu0 }
0x1d13   :  { %v8483_v43 = vadd.f32 %v22809_v10, %v8482_v11 }
0x1d14   :  { %v8516_v53 = vsel %vm703_vm5, %v8488_v39, -inf }
0x1d15   :  { %8517 = vmax.xlane.f32.xlu1 %v8516_v53  ;;  %v20599_v44 = vpop.f32.mrb[86].mxu0  ;;  %v8513_v13 = vsel %vm703_vm5, %v8483_v43, -inf }
0x1d16   :  { %v8498_v22 = vadd.f32 %v22810_v1, %v20599_v44  ;;  %8514 = vmax.xlane.f32.xlu0 %v8513_v13  ;;  %v8492_v38 = vpop.f32.mrb[87].mxu0 }
0x1d17   :  { %v8493_v36 = vadd.f32 %v22811_v8, %v8492_v38 }
0x1d18   :  { %v8522_v32 = vsel %vm703_vm5, %v8498_v22, -inf }
0x1d19   :  { %8523 = vmax.xlane.f32.xlu1 %v8522_v32  ;;  %v8519_v60 = vsel %vm703_vm5, %v8493_v36, -inf }
0x1d1a   :  { %8520 = vmax.xlane.f32.xlu0 %v8519_v60 }
0x1d2a   :  { %22137 = vrot.lane.b32.xlu1 %v24403_v56, %s23202_s3 }
0x1d30   :  { %22132 = vrot.lane.b32.xlu0 %v24390_v46, %s23202_s3 }
0x1d62   :  { %v8506_v7 = vpop.xlane.xlu1 %8505 }
0x1d63   :  { %v8526_v10 = vsub.f32 %v8371_v40, %v8506_v7  ;;  %v8503_v24 = vpop.xlane.xlu0 %8502 }
0x1d64   :  { %v8525_v5 = vsub.f32 %v8366_v19, %v8503_v24 }
0x1d65   :  { %v8535_v45 = vmul.f32 1.442695, %v8526_v10 }
0x1d66   :  { %v8533_v1 = vmul.f32 1.442695, %v8525_v5 }
0x1d67   :  { %22488 = vpow2.f32 %v8535_v45  ;;  %v8512_v31 = vpop.xlane.xlu0 %8511 }
0x1d68   :  { %22490 = vpow2.f32 %v8533_v1  ;;  %v8528_v4 = vsub.f32 %v8381_v47, %v8512_v31 }
0x1d6a   :  { %v8539_v8 = vmul.f32 1.442695, %v8528_v4 }
0x1d6b   :  { %v8509_v14 = vpop.xlane.xlu0 %8508 }
0x1d6c   :  { %22492 = vpow2.f32 %v8539_v8  ;;  %v8527_v58 = vsub.f32 %v8376_v20, %v8509_v14 }
0x1d6e   :  { %v8537_v11 = vmul.f32 1.442695, %v8527_v58 }
0x1d70   :  { %22494 = vpow2.f32 %v8537_v11 }
0x1d71   :  { %v24968_v56 = vpop.eup %22488 }
0x1d72   :  { %v24970_v53 = vpop.eup %22490  ;;  %v8552_v46 = vsel %vm703_vm5, %v24968_v56, 0.0 }
0x1d73   :  { %8553 = vadd.xlane.f32.xlu1 %v8552_v46  ;;  %v8549_v40 = vsel %vm703_vm5, %v24970_v53, 0.0 }
0x1d74   :  { %8550 = vadd.xlane.f32.xlu0 %v8549_v40 }
0x1d76   :  { %v24976_v19 = vpop.eup %22492 }
0x1d77   :  { %v8558_v47 = vsel %vm703_vm5, %v24976_v19, 0.0 }
0x1d78   :  { %8559 = vadd.xlane.f32.xlu1 %v8558_v47 }
0x1d7a   :  { %v24980_v20 = vpop.eup %22494 }
0x1d7b   :  { %v8555_v44 = vsel %vm703_vm5, %v24980_v20, 0.0 }
0x1d7c   :  { %8556 = vadd.xlane.f32.xlu0 %v8555_v44 }
0x1da2   :  { %v8518_v13 = vpop.xlane.xlu1 %8517 }
0x1da3   :  { %v8530_v38 = vsub.f32 %v8488_v39, %v8518_v13  ;;  %v8515_v32 = vpop.xlane.xlu0 %8514 }
0x1da4   :  { %v8529_v60 = vsub.f32 %v8483_v43, %v8515_v32 }
0x1da5   :  { %v8543_v7 = vmul.f32 1.442695, %v8530_v38 }
0x1da6   :  { %v8541_v10 = vmul.f32 1.442695, %v8529_v60  ;;  %v8524_v24 = vpop.xlane.xlu1 %8523 }
0x1da7   :  { %22496 = vpow2.f32 %v8543_v7  ;;  %v8532_v5 = vsub.f32 %v8498_v22, %v8524_v24  ;;  %v8521_v45 = vpop.xlane.xlu0 %8520 }
0x1da8   :  { %22498 = vpow2.f32 %v8541_v10  ;;  %v8531_v1 = vsub.f32 %v8493_v36, %v8521_v45 }
0x1da9   :  { %v8547_v31 = vmul.f32 1.442695, %v8532_v5 }
0x1daa   :  { %v8545_v4 = vmul.f32 1.442695, %v8531_v1  ;;  %v22138_v8 = vpop.permute.xlu1 %22137 }
0x1dab   :  { %22500 = vpow2.f32 %v8547_v31  ;;  %v22140_v14 = vunpack.i.h.bf16 %v22138_v8  ;;  %v22133_v58 = vpop.permute.xlu0 %22132  ;;  %v22139_v11 = vunpack.i.l.bf16 %v22138_v8 }
0x1dac   :  { %22502 = vpow2.f32 %v8545_v4  ;;  %v22135_v46 = vunpack.i.h.bf16 %v22133_v58  ;;  %v22134_v39 = vunpack.i.l.bf16 %v22133_v58 }
0x1dad   :  { %v21564_v43 = vpack.c.bf16 %v22140_v14, %v22139_v11 }
0x1dae   :  { %v21560_v40 = vpack.c.bf16 %v22135_v46, %v22134_v39 }
0x1db0   :  { %21561 = vmatprep.subr.bf16.mxu1 %v21560_v40 }
0x1db1   :  { %v24984_v47 = vpop.eup %22496  ;;  %21563 = vmatpush3.bf16.msra.mxu1 %v21560_v40  ;;  %v6499_v40 = vld [vmem:[%s27117_s20] sm:$0xff] }
0x1db2   :  { %v24986_v22 = vpop.eup %22498  ;;  %21565 = vmatprep.subr.bf16.mxu1 %v21564_v43  ;;  %v8564_v36 = vsel %vm703_vm5, %v24984_v47, 0.0 }
0x1db3   :  { %8565 = vadd.xlane.f32.xlu1 %v8564_v36  ;;  %v8561_v44 = vsel %vm703_vm5, %v24986_v22, 0.0 }
0x1db4   :  { %8562 = vadd.xlane.f32.xlu0 %v8561_v44  ;;  %v6502_v44 = vld [vmem:[%s27117_s20 + $0x18] sm:$0xff] }
0x1db5   :  { %v24992_v13 = vpop.eup %22500  ;;  %21567 = vmatpush3.bf16.msra.mxu1 %v21564_v43  ;;  %v6500_v43 = vld [vmem:[%s27117_s20 + $0x8] sm:$0xff] }
0x1db6   :  { %v24994_v38 = vpop.eup %22502  ;;  %v8570_v32 = vsel %vm703_vm5, %v24992_v13, 0.0  ;;  %v21576_v36 = vpack.c.bf16 %v6500_v43, %v6499_v40 }
0x1db7   :  { %v8567_v60 = vsel %vm703_vm5, %v24994_v38, 0.0 }
0x1db8   :  { %8571 = vadd.xlane.f32.xlu0 %v8570_v32  ;;  %8568 = vadd.xlane.f32.xlu1 %v8567_v60 }
0x1db9   :  { %21577 = vmatprep.subr.bf16.mxu1 %v21576_v36 }
0x1dc9   :  { %22147 = vrot.lane.b32.xlu1 %v24426_v57, %s23202_s3 }
0x1dcd   :  { %8815 = vrot.lane.b32.xlu1 %v24812_v21, %s23203_s16 }
0x1dce   :  { %22142 = vrot.lane.b32.xlu0 %v24412_v62, %s23202_s3 }
0x1dd1   :  { %8817 = vrot.lane.b32.xlu1 %v24810_v30, %s23203_s16 }
0x1dd2   :  { %8847 = vrot.lane.b32.xlu0 %v24938_v9, %s23178_s22 }
0x1dd5   :  { %8849 = vrot.lane.b32.xlu1 %v24936_v52, %s23178_s22 }
0x1dd6   :  { %8819 = vrot.lane.b32.xlu0 %v24816_v49, %s23203_s16 }
0x1dd9   :  { %8821 = vrot.lane.b32.xlu1 %v24814_v33, %s23203_s16 }
0x1dda   :  { %8851 = vrot.lane.b32.xlu0 %v24942_v27, %s23178_s22 }
0x1ddd   :  { %8853 = vrot.lane.b32.xlu1 %v24940_v6, %s23178_s22 }
0x1dde   :  { %8823 = vrot.lane.b32.xlu0 %v24824_v59, %s23203_s16 }
0x1de1   :  { %8825 = vrot.lane.b32.xlu1 %v24822_v17, %s23203_s16 }
0x1de2   :  { %8855 = vrot.lane.b32.xlu0 %v24953_v3, %s23178_s22 }
0x1de5   :  { %8857 = vrot.lane.b32.xlu1 %v24951_v15, %s23178_s22 }
0x1e00   :  { %v8554_v62 = vpop.xlane.xlu1 %8553 }
0x1e01   :  { %22504 = vrcp.f32 %v8554_v62  ;;  %v8551_v57 = vpop.xlane.xlu0 %8550 }
0x1e02   :  { %22506 = vrcp.f32 %v8551_v57 }
0x1e05   :  { %v8560_v30 = vpop.xlane.xlu1 %8559 }
0x1e06   :  { %22508 = vrcp.f32 %v8560_v30 }
0x1e09   :  { %v8557_v21 = vpop.xlane.xlu0 %8556 }
0x1e0a   :  { %22510 = vrcp.f32 %v8557_v21 }
0x1e0b   :  { %v22505_v33 = vpop.eup %22504 }
0x1e0c   :  { %v22507_v49 = vpop.eup %22506  ;;  %v8582_v17 = vmul.f32 %v22505_v33, %v24968_v56 }
0x1e0d   :  { %v8581_v59 = vmul.f32 %v22507_v49, %v24970_v53 }
0x1e0f   :  { %20608 = vmatprep.mubr.msk.f32.mxu1 %vm703_vm5, %v8581_v59 }
0x1e10   :  { %20609 = vmatmul.mubr.msk.f32.vlgmr.msra.gmra.mrb[86].mxu1 %vm703_vm5, %v8582_v17  ;;  %v22509_v52 = vpop.eup %22508 }
0x1e11   :  { %v8584_v27 = vmul.f32 %v22509_v52, %v24976_v19  ;;  %21579 = vmatpush3.bf16.msra.mxu1 %v21576_v36 }
0x1e14   :  { %v22511_v9 = vpop.eup %22510 }
0x1e15   :  { %v8583_v6 = vmul.f32 %v22511_v9, %v24980_v20 }
0x1e17   :  { %20611 = vmatprep.mubr.msk.f32.mxu1 %vm703_vm5, %v8583_v6 }
0x1e18   :  { %20612 = vmatmul.mubr.msk.f32.gmra.mrb[88].mxu1 %vm703_vm5, %v8584_v27 }
0x1e40   :  { %v8566_v15 = vpop.xlane.xlu1 %8565 }
0x1e41   :  { %v8563_v3 = vpop.xlane.xlu0 %8562 }
0x1e42   :  { %22512 = vrcp.f32 %v8563_v3 }
0x1e43   :  { %22514 = vrcp.f32 %v8566_v15 }
0x1e45   :  { %v8569_v53 = vpop.xlane.xlu1 %8568  ;;  %v8572_v7 = vpop.xlane.xlu0 %8571 }
0x1e46   :  { %22516 = vrcp.f32 %v8569_v53 }
0x1e47   :  { %22518 = vrcp.f32 %v8572_v7 }
0x1e49   :  { %v22148_v56 = vpop.permute.xlu1 %22147  ;;  %v22143_v10 = vpop.permute.xlu0 %22142 }
0x1e4a   :  { %v22150_v24 = vunpack.i.h.bf16 %v22148_v56  ;;  %v22149_v5 = vunpack.i.l.bf16 %v22148_v56  ;;  %v22145_v45 = vunpack.i.h.bf16 %v22143_v10  ;;  %v22144_v1 = vunpack.i.l.bf16 %v22143_v10 }
0x1e4c   :  { %v22513_v20 = vpop.eup %22512  ;;  %v21568_v19 = vpack.c.bf16 %v22145_v45, %v22144_v1  ;;  %v21572_v4 = vpack.c.bf16 %v22150_v24, %v22149_v5 }
0x1e4d   :  { %v8585_v31 = vmul.f32 %v22513_v20, %v24986_v22  ;;  %v22515_v8 = vpop.eup %22514  ;;  %v6501_v22 = vld [vmem:[%s27117_s20 + $0x10] sm:$0xff]  ;;  %v8816_v21 = vpop.permute.xlu1 %8815 }
0x1e4e   :  { %21569 = vmatprep.subr.bf16.mxu0 %v21568_v19  ;;  %v8586_v58 = vmul.f32 %v22515_v8, %v24984_v47  ;;  %v21580_v32 = vpack.c.bf16 %v6502_v44, %v6501_v22  ;;  %v8848_v17 = vpop.permute.xlu0 %8847 }
0x1e4f   :  { %21571 = vmatpush3.bf16.msra.mxu0 %v21568_v19  ;;  %20622 = vmatprep.mubr.msk.f32.mxu0 %vm703_vm5, %v8585_v31 }
0x1e50   :  { %21573 = vmatprep.subr.bf16.mxu0 %v21572_v4  ;;  %v22517_v14 = vpop.eup %22516  ;;  %21581 = vmatprep.subr.bf16.mxu1 %v21580_v32 }
0x1e51   :  { %v22519_v11 = vpop.eup %22518  ;;  %v8587_v46 = vmul.f32 %v22517_v14, %v24994_v38  ;;  %21583 = vmatpush3.bf16.msra.mxu1 %v21580_v32  ;;  %v8818_v49 = vpop.permute.xlu1 %8817 }
0x1e52   :  { %v8588_v39 = vmul.f32 %v22519_v11, %v24992_v13  ;;  %v8820_v9 = vpop.permute.xlu0 %8819  ;;  %v8904_v7 = vsel %vm467_vm4, %v24645_v12, %v8818_v49 }
0x1e53   :  { %21575 = vmatpush3.bf16.msra.mxu0 %v21572_v4 }
0x1e55   :  { %v8850_v59 = vpop.permute.xlu1 %8849 }
0x1e56   :  { %20623 = vmatmul.mubr.msk.f32.vlgmr.msra.gmra.mrb[88].mxu0 %vm703_vm5, %v8586_v58  ;;  %v8912_v10 = vsel %vm302_vm3, %v8904_v7, %v8850_v59 }
0x1e57   :  { %20625 = vmatprep.mubr.msk.f32.mxu0 %vm703_vm5, %v8587_v46 }
0x1e59   :  { %v8822_v52 = vpop.permute.xlu1 %8821 }
0x1e5a   :  { %20626 = vmatmul.mubr.msk.f32.gmra.mrb[90].mxu0 %vm703_vm5, %v8588_v39  ;;  %v8906_v12 = vsel %vm467_vm4, %v24649_v48, %v8822_v52 }
0x1e5d   :  { %v8854_v6 = vpop.permute.xlu1 %8853 }
0x1e5e   :  { %v8914_v19 = vsel %vm302_vm3, %v8906_v12, %v8854_v6 }
0x1e61   :  { %v8826_v27 = vpop.permute.xlu1 %8825 }
0x1e62   :  { %v8908_v48 = vsel %vm467_vm4, %v24653_v16, %v8826_v27 }
0x1ee3   :  { %v20610_v47 = vpop.f32.mrb[86].mxu1 }
0x1ee4   :  { %8881 = vrot.lane.b32.xlu1 %v20610_v47, %s23204_s4  ;;  %v8679_v38 = vpop.f32.mrb[87].mxu1 }
0x1ee5   :  { %8879 = vrot.lane.b32.xlu0 %v8679_v38, %s23204_s4 }
0x1eeb   :  { %v20613_v60 = vpop.f32.mrb[88].mxu1 }
0x1eec   :  { %8885 = vrot.lane.b32.xlu1 %v20613_v60, %s23204_s4  ;;  %v8689_v13 = vpop.f32.mrb[89].mxu1 }
0x1eed   :  { %8883 = vrot.lane.b32.xlu0 %v8689_v13, %s23204_s4 }
0x1f29   :  { %v20624_v62 = vpop.f32.mrb[88].mxu0 }
0x1f2a   :  { %v8788_v57 = vpop.f32.mrb[89].mxu0  ;;  %8889 = vrot.lane.b32.xlu1 %v20624_v62, %s23204_s4  ;;  %v18976_v62 = vld [vmem:[#allocation16] ss:$0 sm:$0xff] }
0x1f2b   :  { %8887 = vrot.lane.b32.xlu0 %v8788_v57, %s23204_s4 }
0x1f2d   :  { %v20627_v30 = vpop.f32.mrb[90].mxu0 }
0x1f2e   :  { %v8798_v33 = vpop.f32.mrb[91].mxu0  ;;  %8829 = vrot.lane.b32.xlu1 %v24829_v63, %s23203_s16  ;;  %v8852_v63 = vpop.permute.xlu0 %8851 }
0x1f2f   :  { %8827 = vrot.lane.b32.xlu0 %v24832_v37, %s23203_s16  ;;  %v8858_v37 = vpop.permute.xlu1 %8857 }
0x1f30   :  { %v8916_v11 = vsel %vm302_vm3, %v8908_v48, %v8858_v37 }
0x1f32   :  { %8861 = vrot.lane.b32.xlu1 %v24956_v26, %s23178_s22  ;;  %v8824_v15 = vpop.permute.xlu0 %8823  ;;  %v8903_v26 = vsel %vm467_vm4, %v24647_v25, %v8816_v21  ;;  %v8905_v25 = vsel %vm467_vm4, %v24651_v35, %v8820_v9 }
0x1f33   :  { %8859 = vrot.lane.b32.xlu0 %v24958_v41, %s23178_s22  ;;  %v8911_v41 = vsel %vm302_vm3, %v8903_v26, %v8848_v17  ;;  %v8913_v1 = vsel %vm302_vm3, %v8905_v25, %v8852_v63  ;;  %v8907_v35 = vsel %vm467_vm4, %v24656_v2, %v8824_v15 }
0x1f36   :  { %8893 = vrot.lane.b32.xlu1 %v20627_v30, %s23204_s4  ;;  %v8856_v3 = vpop.permute.xlu0 %8855 }
0x1f37   :  { %8891 = vrot.lane.b32.xlu0 %v8798_v33, %s23204_s4  ;;  %v8915_v14 = vsel %vm302_vm3, %v8907_v35, %v8856_v3 }
0x1f56   :  { %v8882_v53 = vpop.permute.xlu1 %8881 }
0x1f57   :  { %v8880_v56 = vpop.permute.xlu0 %8879  ;;  %v8920_v5 = vsel %vm6208_vm6, %v8912_v10, %v8882_v53 }
0x1f58   :  { %v8919_v24 = vsel %vm6208_vm6, %v8911_v41, %v8880_v56 }
0x1f59   :  { %20636 = vmatprep.mubr.msk.f32.mxu1 %vm703_vm5, %v8919_v24 }
0x1f5a   :  { %20637 = vmatmul.mubr.msk.f32.vlgmr.msra.gmra.mrb[90].mxu1 %vm703_vm5, %v8920_v5 }
0x1f5e   :  { %v8886_v45 = vpop.permute.xlu1 %8885 }
0x1f5f   :  { %v8884_v20 = vpop.permute.xlu0 %8883  ;;  %v8922_v4 = vsel %vm6208_vm6, %v8914_v19, %v8886_v45 }
0x1f60   :  { %v8921_v31 = vsel %vm6208_vm6, %v8913_v1, %v8884_v20 }
0x1f61   :  { %20639 = vmatprep.mubr.msk.f32.mxu1 %vm703_vm5, %v8921_v31 }
0x1f62   :  { %20640 = vmatmul.mubr.msk.f32.gmra.mrb[92].mxu1 %vm703_vm5, %v8922_v4 }
0x1f9c   :  { %v8890_v8 = vpop.permute.xlu1 %8889 }
0x1f9d   :  { %v8888_v58 = vpop.permute.xlu0 %8887  ;;  %v8924_v39 = vsel %vm6208_vm6, %v8916_v11, %v8890_v8 }
0x1f9e   :  { %v8923_v46 = vsel %vm6208_vm6, %v8915_v14, %v8888_v58 }
0x1f9f   :  { %20642 = vmatprep.mubr.msk.f32.mxu1 %vm703_vm5, %v8923_v46 }
0x1fa0   :  { %v8830_v40 = vpop.permute.xlu1 %8829  ;;  %20643 = vmatmul.mubr.msk.f32.gmra.mrb[94].mxu1 %vm703_vm5, %v8924_v39 }
0x1fa1   :  { %v8828_v43 = vpop.permute.xlu0 %8827  ;;  %v8910_v16 = vsel %vm467_vm4, %v24664_v61, %v8830_v40 }
0x1fa2   :  { %v8909_v36 = vsel %vm467_vm4, %v24667_v28, %v8828_v43 }
0x1fa4   :  { %v8862_v2 = vpop.permute.xlu1 %8861 }
0x1fa5   :  { %v8860_v22 = vpop.permute.xlu0 %8859  ;;  %v8918_v38 = vsel %vm302_vm3, %v8910_v16, %v8862_v2  ;;  %v9206_v16 = vld [vmem:[%s27118_s26 + $0x10] sm:$0xff] }
0x1fa6   :  { %v8917_v32 = vsel %vm302_vm3, %v8909_v36, %v8860_v22  ;;  %v9204_v22 = vld [vmem:[%s27118_s26] sm:$0xff]  ;;  %v9205_v36 = vld [vmem:[%s27118_s26 + $0x8] sm:$0xff] }
0x1fa8   :  { %v8894_v44 = vpop.permute.xlu1 %8893 }
0x1fa9   :  { %v8892_v47 = vpop.permute.xlu0 %8891  ;;  %v8926_v13 = vsel %vm6208_vm6, %v8918_v38, %v8894_v44  ;;  %v21584_v44 = vpack.c.bf16 %v9205_v36, %v9204_v22 }
0x1faa   :  { %v8925_v60 = vsel %vm6208_vm6, %v8917_v32, %v8892_v47  ;;  %v9207_v32 = vld [vmem:[%s27118_s26 + $0x18] sm:$0xff] }
0x1fab   :  { %20645 = vmatprep.mubr.msk.f32.mxu1 %vm703_vm5, %v8925_v60  ;;  %21585 = vmatprep.subr.bf16.mxu0 %v21584_v44  ;;  %v21588_v47 = vpack.c.bf16 %v9207_v32, %v9206_v16 }
0x1fac   :  { %20646 = vmatmul.mubr.msk.f32.gmra.mrb[96].mxu1 %vm703_vm5, %v8926_v13  ;;  %21587 = vmatpush3.bf16.msra.mxu0 %v21584_v44 }
0x1fad   :  { %21589 = vmatprep.subr.bf16.mxu0 %v21588_v47 }
0x1fb0   :  { %21591 = vmatpush3.bf16.msra.mxu0 %v21588_v47 }
0x202d   :  { %v20638_v57 = vpop.f32.mrb[90].mxu1 }
0x202e   :  { %v9029_v28 = vadd.f32 %v20638_v57, %v18976_v62  ;;  %v9023_v30 = vpop.f32.mrb[91].mxu1 }
0x202f   :  { %v9024_v21 = vadd.f32 %v18976_v62, %v9023_v30 }
0x2030   :  { %v25105_v61 = vadd.f32 %v9029_v28, %v24283_v55 }
0x2031   :  { %v25108_v33 = vadd.f32 %v9024_v21, %v24286_v34 }
0x2032   :  { %v9075_v49 = vsel %vm703_vm5, %v25105_v61, 0.0 }
0x2033   :  { %9076 = vadd.xlane.f32.xlu1 %v9075_v49  ;;  %v9072_v59 = vsel %vm703_vm5, %v25108_v33, 0.0 }
0x2034   :  { %9073 = vadd.xlane.f32.xlu0 %v9072_v59 }
0x2035   :  { %v20641_v17 = vpop.f32.mrb[92].mxu1 }
0x2036   :  { %v9039_v52 = vadd.f32 %v20641_v17, %v18976_v62  ;;  %v9033_v9 = vpop.f32.mrb[93].mxu1 }
0x2037   :  { %v9034_v6 = vadd.f32 %v18976_v62, %v9033_v9 }
0x2038   :  { %v25115_v63 = vadd.f32 %v9039_v52, %v24293_v51 }
0x2039   :  { %v25118_v55 = vadd.f32 %v9034_v6, %v24298_v29 }
0x203a   :  { %v9081_v34 = vsel %vm703_vm5, %v25115_v63, 0.0 }
0x203b   :  { %9082 = vadd.xlane.f32.xlu0 %v9081_v34  ;;  %v9078_v27 = vsel %vm703_vm5, %v25118_v55, 0.0 }
0x203f   :  { %9079 = vadd.xlane.f32.xlu0 %v9078_v27 }
0x2073   :  { %v20644_v15 = vpop.f32.mrb[94].mxu1 }
0x2074   :  { %v9049_v37 = vadd.f32 %v20644_v15, %v18976_v62  ;;  %v9043_v3 = vpop.f32.mrb[95].mxu1 }
0x2075   :  { %v9044_v26 = vadd.f32 %v18976_v62, %v9043_v3 }
0x2076   :  { %v25125_v53 = vadd.f32 %v9049_v37, %v24301_v42 }
0x2077   :  { %v25128_v51 = vadd.f32 %v9044_v26, %v24306_v23 }
0x2078   :  { %v9087_v29 = vsel %vm703_vm5, %v25125_v53, 0.0 }
0x2079   :  { %9088 = vadd.xlane.f32.xlu1 %v9087_v29  ;;  %v9084_v41 = vsel %vm703_vm5, %v25128_v51, 0.0 }
0x207a   :  { %9085 = vadd.xlane.f32.xlu0 %v9084_v41 }
0x207f   :  { %v20647_v7 = vpop.f32.mrb[96].mxu1 }
0x2080   :  { %v9059_v56 = vadd.f32 %v20647_v7, %v18976_v62  ;;  %v9053_v10 = vpop.f32.mrb[97].mxu1 }
0x2081   :  { %v9054_v24 = vadd.f32 %v18976_v62, %v9053_v10 }
0x2082   :  { %v25135_v5 = vadd.f32 %v9059_v56, %v24313_v50 }
0x2083   :  { %v25138_v42 = vadd.f32 %v9054_v24, %v24316_v54 }
0x2084   :  { %v9093_v23 = vsel %vm703_vm5, %v25135_v5, 0.0 }
0x2085   :  { %9094 = vadd.xlane.f32.xlu1 %v9093_v23  ;;  %v9090_v25 = vsel %vm703_vm5, %v25138_v42, 0.0 }
0x2086   :  { %9091 = vadd.xlane.f32.xlu0 %v9090_v25 }
0x20c0   :  { %v9077_v45 = vpop.xlane.xlu1 %9076 }
0x20c1   :  { %v9097_v1 = vmul.f32 0.03125, %v9077_v45  ;;  %v9074_v12 = vpop.xlane.xlu0 %9073 }
0x20c2   :  { %v9096_v20 = vmul.f32 0.03125, %v9074_v12 }
0x20c3   :  { %v25145_v19 = vsub.f32 %v25105_v61, %v9097_v1 }
0x20c4   :  { %v25148_v50 = vsub.f32 %v25108_v33, %v9096_v20 }
0x20c5   :  { %v9113_v54 = vmul.f32 %v25145_v19, %v25145_v19 }
0x20c6   :  { %v9112_v31 = vmul.f32 %v25148_v50, %v25148_v50 }
0x20c7   :  { %v9123_v4 = vsel %vm703_vm5, %v9113_v54, 0.0  ;;  %v18985_v54 = vld [vmem:[#allocation17] ss:$0 sm:$0xff] }
0x20c8   :  { %9124 = vadd.xlane.f32.xlu1 %v9123_v4  ;;  %v9083_v35 = vpop.xlane.xlu0 %9082  ;;  %v9120_v8 = vsel %vm703_vm5, %v9112_v31, 0.0 }
0x20c9   :  { %v9099_v14 = vmul.f32 0.03125, %v9083_v35  ;;  %9121 = vadd.xlane.f32.xlu0 %v9120_v8 }
0x20cb   :  { %v25157_v48 = vsub.f32 %v25115_v63, %v9099_v14 }
0x20cc   :  { %v9080_v58 = vpop.xlane.xlu0 %9079 }
0x20cd   :  { %v9098_v11 = vmul.f32 0.03125, %v9080_v58  ;;  %v9115_v46 = vmul.f32 %v25157_v48, %v25157_v48  ;;  %v18986_v58 = vld [vmem:[#allocation19] ss:$0 sm:$0xff] }
0x20cf   :  { %v25162_v39 = vsub.f32 %v25118_v55, %v9098_v11  ;;  %v9129_v40 = vsel %vm703_vm5, %v9115_v46, 0.0 }
0x20d0   :  { %9130 = vadd.xlane.f32.xlu1 %v9129_v40 }
0x20d1   :  { %v9114_v43 = vmul.f32 %v25162_v39, %v25162_v39 }
0x20d3   :  { %v9126_v2 = vsel %vm703_vm5, %v9114_v43, 0.0 }
0x20d4   :  { %9127 = vadd.xlane.f32.xlu0 %v9126_v2 }
0x2106   :  { %v9089_v38 = vpop.xlane.xlu1 %9088 }
0x2107   :  { %v9101_v60 = vmul.f32 0.03125, %v9089_v38  ;;  %v9086_v13 = vpop.xlane.xlu0 %9085 }
0x2108   :  { %v9100_v62 = vmul.f32 0.03125, %v9086_v13 }
0x2109   :  { %v25173_v57 = vsub.f32 %v25125_v53, %v9101_v60 }
0x210a   :  { %v25176_v28 = vsub.f32 %v25128_v51, %v9100_v62 }
0x210b   :  { %v9117_v30 = vmul.f32 %v25173_v57, %v25173_v57 }
0x210c   :  { %v9116_v21 = vmul.f32 %v25176_v28, %v25176_v28 }
0x210d   :  { %v9135_v49 = vsel %vm703_vm5, %v9117_v30, 0.0 }
0x210e   :  { %9136 = vadd.xlane.f32.xlu1 %v9135_v49  ;;  %v9132_v59 = vsel %vm703_vm5, %v9116_v21, 0.0 }
0x210f   :  { %9133 = vadd.xlane.f32.xlu0 %v9132_v59 }
0x2112   :  { %v9095_v17 = vpop.xlane.xlu1 %9094 }
0x2113   :  { %v9103_v52 = vmul.f32 0.03125, %v9095_v17  ;;  %v9092_v9 = vpop.xlane.xlu0 %9091 }
0x2114   :  { %v9102_v6 = vmul.f32 0.03125, %v9092_v9 }
0x2115   :  { %v25185_v34 = vsub.f32 %v25135_v5, %v9103_v52 }
0x2116   :  { %v25188_v27 = vsub.f32 %v25138_v42, %v9102_v6 }
0x2117   :  { %v9119_v15 = vmul.f32 %v25185_v34, %v25185_v34 }
0x2118   :  { %v9118_v37 = vmul.f32 %v25188_v27, %v25188_v27 }
0x2119   :  { %v9141_v3 = vsel %vm703_vm5, %v9119_v15, 0.0 }
0x211a   :  { %9142 = vadd.xlane.f32.xlu1 %v9141_v3  ;;  %v9138_v26 = vsel %vm703_vm5, %v9118_v37, 0.0 }
0x211b   :  { %9139 = vadd.xlane.f32.xlu0 %v9138_v26 }
0x2155   :  { %v9125_v29 = vpop.xlane.xlu1 %9124 }
0x2156   :  { %v9145_v41 = vmul.f32 0.03125, %v9125_v29  ;;  %v9122_v7 = vpop.xlane.xlu0 %9121 }
0x2157   :  { %v9144_v56 = vmul.f32 0.03125, %v9122_v7 }
0x2158   :  { %v9153_v10 = vadd.f32 1e-12, %v9145_v41 }
0x2159   :  { %v9152_v24 = vadd.f32 1e-12, %v9144_v56 }
0x215a   :  { %22520 = vrsqrt.f32 %v9153_v10 }
0x215b   :  { %22522 = vrsqrt.f32 %v9152_v24 }
0x215d   :  { %v9131_v23 = vpop.xlane.xlu1 %9130 }
0x215e   :  { %v9147_v25 = vmul.f32 0.03125, %v9131_v23  ;;  %v9416_v23 = vld [vmem:[%s23360_s17] sm:$0xff] }
0x2160   :  { %v9155_v45 = vadd.f32 1e-12, %v9147_v25  ;;  %v9417_v25 = vld [vmem:[%s23360_s17 + $0x8] sm:$0xff] }
0x2161   :  { %v9128_v1 = vpop.xlane.xlu0 %9127 }
0x2162   :  { %22524 = vrsqrt.f32 %v9155_v45  ;;  %v9146_v12 = vmul.f32 0.03125, %v9128_v1  ;;  %v21592_v45 = vpack.c.bf16 %v9417_v25, %v9416_v23  ;;  %v9419_v1 = vld [vmem:[%s23360_s17 + $0x18] sm:$0xff] }
0x2164   :  { %v22521_v20 = vpop.eup %22520  ;;  %v9154_v31 = vadd.f32 1e-12, %v9146_v12  ;;  %21593 = vmatprep.subr.bf16.mxu1 %v21592_v45  ;;  %v9420_v12 = vld [vmem:[%s23360_s17 + $0x20] sm:$0xff] }
0x2165   :  { %v22523_v4 = vpop.eup %22522  ;;  %v9169_v35 = vmul.f32 %v22521_v20, %v25145_v19  ;;  %21595 = vmatpush3.bf16.msra.mxu1 %v21592_v45  ;;  %v9421_v20 = vld [vmem:[%s23360_s17 + $0x28] sm:$0xff] }
0x2166   :  { %22526 = vrsqrt.f32 %v9154_v31  ;;  %v9168_v8 = vmul.f32 %v22523_v4, %v25148_v50  ;;  %v9422_v31 = vld [vmem:[%s23360_s17 + $0x30] sm:$0xff]  ;;  %v9423_v4 = vld [vmem:[%s23360_s17 + $0x38] sm:$0xff] }
0x2167   :  { %v9183_v14 = vmul.f32 %v18985_v54, %v9169_v35  ;;  %v21604_v35 = vpack.c.bf16 %v9423_v4, %v9422_v31 }
0x2168   :  { %v9182_v11 = vmul.f32 %v18985_v54, %v9168_v8  ;;  %v25221_v8 = vld [vmem:[#allocation20] ss:$0 sm:$0xff] }
0x2169   :  { %v9197_v40 = vadd.f32 %v18986_v58, %v9183_v14 }
0x216a   :  { %v9196_v46 = vadd.f32 %v18986_v58, %v9182_v11 }
0x216c   :  { %v22525_v43 = vpop.eup %22524  ;;  %20656 = vmatprep.mubr.msk.f32.mxu0 %vm703_vm5, %v9196_v46 }
0x216d   :  { %20657 = vmatmul.mubr.msk.f32.vlgmr.msra.gmra.mrb[92].mxu0 %vm703_vm5, %v9197_v40  ;;  %v9171_v2 = vmul.f32 %v22525_v43, %v25157_v48 }
0x216f   :  { %v9185_v44 = vmul.f32 %v18985_v54, %v9171_v2 }
0x2170   :  { %v22527_v22 = vpop.eup %22526 }
0x2171   :  { %v9170_v36 = vmul.f32 %v22527_v22, %v25162_v39  ;;  %v9199_v32 = vadd.f32 %v18986_v58, %v9185_v44 }
0x2173   :  { %v9184_v19 = vmul.f32 %v18985_v54, %v9170_v36 }
0x2175   :  { %v9198_v16 = vadd.f32 %v18986_v58, %v9184_v19 }
0x2177   :  { %20659 = vmatprep.mubr.msk.f32.mxu0 %vm703_vm5, %v9198_v16 }
0x2178   :  { %20660 = vmatmul.mubr.msk.f32.gmra.mrb[94].mxu0 %vm703_vm5, %v9199_v32 }
0x219b   :  { %v9137_v50 = vpop.xlane.xlu1 %9136 }
0x219c   :  { %v9149_v47 = vmul.f32 0.03125, %v9137_v50  ;;  %v9134_v38 = vpop.xlane.xlu0 %9133 }
0x219d   :  { %v9148_v60 = vmul.f32 0.03125, %v9134_v38 }
0x219e   :  { %v9157_v13 = vadd.f32 1e-12, %v9149_v47 }
0x219f   :  { %v9156_v62 = vadd.f32 1e-12, %v9148_v60 }
0x21a0   :  { %22528 = vrsqrt.f32 %v9157_v13 }
0x21a1   :  { %22530 = vrsqrt.f32 %v9156_v62 }
0x21a7   :  { %v9143_v48 = vpop.xlane.xlu1 %9142 }
0x21a8   :  { %v9151_v30 = vmul.f32 0.03125, %v9143_v48  ;;  %v9140_v21 = vpop.xlane.xlu0 %9139 }
0x21a9   :  { %v9150_v39 = vmul.f32 0.03125, %v9140_v21 }
0x21aa   :  { %v22529_v49 = vpop.eup %22528  ;;  %v9159_v59 = vadd.f32 1e-12, %v9151_v30 }
0x21ab   :  { %v22531_v17 = vpop.eup %22530  ;;  %v9158_v52 = vadd.f32 1e-12, %v9150_v39  ;;  %v9173_v9 = vmul.f32 %v22529_v49, %v25173_v57 }
0x21ac   :  { %22532 = vrsqrt.f32 %v9159_v59  ;;  %v9172_v6 = vmul.f32 %v22531_v17, %v25176_v28 }
0x21ad   :  { %22534 = vrsqrt.f32 %v9158_v52  ;;  %v9187_v15 = vmul.f32 %v18985_v54, %v9173_v9 }
0x21ae   :  { %v9186_v37 = vmul.f32 %v18985_v54, %v9172_v6 }
0x21af   :  { %v9201_v26 = vadd.f32 %v18986_v58, %v9187_v15 }
0x21b0   :  { %v9200_v3 = vadd.f32 %v18986_v58, %v9186_v37 }
0x21b2   :  { %20662 = vmatprep.mubr.msk.f32.mxu0 %vm703_vm5, %v9200_v3 }
0x21b3   :  { %20663 = vmatmul.mubr.msk.f32.gmra.mrb[96].mxu0 %vm703_vm5, %v9201_v26 }
0x21b6   :  { %v22533_v29 = vpop.eup %22532 }
0x21b7   :  { %v22535_v41 = vpop.eup %22534  ;;  %v9175_v57 = vmul.f32 %v22533_v29, %v25185_v34  ;;  %v9418_v34 = vld [vmem:[%s23360_s17 + $0x10] sm:$0xff] }
0x21b8   :  { %v9174_v7 = vmul.f32 %v22535_v41, %v25188_v27  ;;  %v21596_v27 = vpack.c.bf16 %v9419_v1, %v9418_v34 }
0x21b9   :  { %v9189_v28 = vmul.f32 %v18985_v54, %v9175_v57 }
0x21ba   :  { %v9188_v56 = vmul.f32 %v18985_v54, %v9174_v7  ;;  %21597 = vmatprep.subr.bf16.mxu1 %v21596_v27  ;;  %v21600_v54 = vpack.c.bf16 %v9421_v20, %v9420_v12 }
0x21bb   :  { %v9203_v24 = vadd.f32 %v18986_v58, %v9189_v28  ;;  %21599 = vmatpush3.bf16.msra.mxu1 %v21596_v27 }
0x21bc   :  { %v9202_v10 = vadd.f32 %v18986_v58, %v9188_v56  ;;  %21601 = vmatprep.subr.bf16.mxu1 %v21600_v54 }
0x21be   :  { %20665 = vmatprep.mubr.msk.f32.mxu0 %vm703_vm5, %v9202_v10 }
0x21bf   :  { %20666 = vmatmul.mubr.msk.f32.gmra.mrb[98].mxu0 %vm703_vm5, %v9203_v24  ;;  %21603 = vmatpush3.bf16.msra.mxu1 %v21600_v54 }
0x21c0   :  { %21605 = vmatprep.subr.bf16.mxu1 %v21604_v35 }
0x21c3   :  { %21607 = vmatpush3.bf16.msra.mxu1 %v21604_v35 }
0x21c4   :  { %20716 = vmatprep.subr.mxu1 %v23190_v0 }
0x2240   :  { %v20658_v14 = vpop.f32.mrb[92].mxu0 }
0x2241   :  { %v9311_v58 = vadd.f32 %v20658_v14, %v25221_v8  ;;  %v9305_v11 = vpop.f32.mrb[93].mxu0 }
0x2242   :  { %v9306_v46 = vadd.f32 %v25221_v8, %v9305_v11 }
0x2243   :  { %v9353_v40 = vmul.f32 0.044715, %v9311_v58  ;;  %v9345_v29 = vmul.f32 0.5, %v9311_v58 }
0x2244   :  { %v9352_v43 = vmul.f32 0.044715, %v9306_v46  ;;  %v9344_v3 = vmul.f32 0.5, %v9306_v46 }
0x2245   :  { %v9361_v2 = vmul.f32 %v9353_v40, %v9311_v58 }
0x2246   :  { %v9360_v22 = vmul.f32 %v9352_v43, %v9306_v46 }
0x2247   :  { %v9369_v36 = vmul.f32 %v9361_v2, %v9311_v58 }
0x2248   :  { %v9368_v44 = vmul.f32 %v9360_v22, %v9306_v46 }
0x2249   :  { %v9377_v19 = vadd.f32 %v9369_v36, %v9311_v58 }
0x224a   :  { %v9376_v16 = vadd.f32 %v9368_v44, %v9306_v46 }
0x224b   :  { %v9385_v32 = vmul.f32 0.7978846, %v9377_v19  ;;  %v20661_v50 = vpop.f32.mrb[94].mxu0 }
0x224c   :  { %v9321_v47 = vadd.f32 %v20661_v50, %v25221_v8  ;;  %v9315_v38 = vpop.f32.mrb[95].mxu0  ;;  %v9384_v60 = vmul.f32 0.7978846, %v9376_v16 }
0x224d   :  { %22536 = vtanh.f32 %v9385_v32  ;;  %v9316_v13 = vadd.f32 %v25221_v8, %v9315_v38 }
0x224e   :  { %v9355_v62 = vmul.f32 0.044715, %v9321_v47  ;;  %22538 = vtanh.f32 %v9384_v60  ;;  %v9347_v23 = vmul.f32 0.5, %v9321_v47 }
0x224f   :  { %v9354_v48 = vmul.f32 0.044715, %v9316_v13  ;;  %v9346_v10 = vmul.f32 0.5, %v9316_v13 }
0x2250   :  { %v9363_v30 = vmul.f32 %v9355_v62, %v9321_v47 }
0x2251   :  { %v9362_v21 = vmul.f32 %v9354_v48, %v9316_v13 }
0x2252   :  { %v9371_v39 = vmul.f32 %v9363_v30, %v9321_v47 }
0x2253   :  { %v9370_v49 = vmul.f32 %v9362_v21, %v9316_v13 }
0x2254   :  { %v9379_v59 = vadd.f32 %v9371_v39, %v9321_v47 }
0x2255   :  { %v9378_v17 = vadd.f32 %v9370_v49, %v9316_v13 }
0x2256   :  { %v9387_v52 = vmul.f32 0.7978846, %v9379_v59 }
0x2257   :  { %v22537_v9 = vpop.eup %22536  ;;  %v9386_v6 = vmul.f32 0.7978846, %v9378_v17 }
0x2258   :  { %v22539_v15 = vpop.eup %22538  ;;  %v9401_v37 = vadd.f32 1.0, %v22537_v9  ;;  %22540 = vtanh.f32 %v9387_v52 }
0x2259   :  { %v9400_v26 = vadd.f32 1.0, %v22539_v15  ;;  %22542 = vtanh.f32 %v9386_v6 }
0x225a   :  { %v9409_v57 = vmul.f32 %v9401_v37, %v9345_v29 }
0x225b   :  { %v9408_v41 = vmul.f32 %v9400_v26, %v9344_v3 }
0x225d   :  { %20684 = vmatprep.mubr.msk.f32.mxu1 %vm9424_vm8, %v9408_v41 }
0x225e   :  { %20685 = vmatmul.mubr.msk.f32.vlgmr.msra.gmra.mrb[98].mxu1 %vm9424_vm8, %v9409_v57  ;;  %v19004_v57 = vld [vmem:[#allocation22] ss:$0 sm:$0xff] }
0x2262   :  { %v22541_v7 = vpop.eup %22540 }
0x2263   :  { %v22543_v28 = vpop.eup %22542  ;;  %v9403_v56 = vadd.f32 1.0, %v22541_v7 }
0x2264   :  { %v9402_v24 = vadd.f32 1.0, %v22543_v28 }
0x2265   :  { %v9411_v45 = vmul.f32 %v9403_v56, %v9347_v23 }
0x2266   :  { %v9410_v25 = vmul.f32 %v9402_v24, %v9346_v10 }
0x2268   :  { %20687 = vmatprep.mubr.msk.f32.mxu1 %vm9424_vm8, %v9410_v25 }
0x2269   :  { %20688 = vmatmul.mubr.msk.f32.gmra.mrb[100].mxu1 %vm9424_vm8, %v9411_v45 }
0x2286   :  { %v20664_v34 = vpop.f32.mrb[96].mxu0 }
0x2287   :  { %v9331_v1 = vadd.f32 %v20664_v34, %v25221_v8  ;;  %v9325_v27 = vpop.f32.mrb[97].mxu0 }
0x2288   :  { %v9326_v12 = vadd.f32 %v25221_v8, %v9325_v27 }
0x2289   :  { %v9357_v20 = vmul.f32 0.044715, %v9331_v1  ;;  %v9349_v59 = vmul.f32 0.5, %v9331_v1 }
0x228a   :  { %v9356_v54 = vmul.f32 0.044715, %v9326_v12  ;;  %v9348_v39 = vmul.f32 0.5, %v9326_v12 }
0x228b   :  { %v9365_v31 = vmul.f32 %v9357_v20, %v9331_v1 }
0x228c   :  { %v9364_v4 = vmul.f32 %v9356_v54, %v9326_v12 }
0x228d   :  { %v9373_v35 = vmul.f32 %v9365_v31, %v9331_v1 }
0x228e   :  { %v9372_v14 = vmul.f32 %v9364_v4, %v9326_v12 }
0x228f   :  { %v9381_v58 = vadd.f32 %v9373_v35, %v9331_v1 }
0x2290   :  { %v9380_v11 = vadd.f32 %v9372_v14, %v9326_v12 }
0x2291   :  { %v9389_v46 = vmul.f32 0.7978846, %v9381_v58 }
0x2292   :  { %v20667_v40 = vpop.f32.mrb[98].mxu0  ;;  %v9388_v43 = vmul.f32 0.7978846, %v9380_v11 }
0x2293   :  { %v9341_v2 = vadd.f32 %v20667_v40, %v25221_v8  ;;  %v9335_v22 = vpop.f32.mrb[99].mxu0  ;;  %22544 = vtanh.f32 %v9389_v46 }
0x2294   :  { %v9336_v36 = vadd.f32 %v25221_v8, %v9335_v22  ;;  %22546 = vtanh.f32 %v9388_v43 }
0x2295   :  { %v9359_v44 = vmul.f32 0.044715, %v9341_v2  ;;  %v9351_v3 = vmul.f32 0.5, %v9341_v2 }
0x2296   :  { %v9358_v19 = vmul.f32 0.044715, %v9336_v36  ;;  %v9350_v15 = vmul.f32 0.5, %v9336_v36 }
0x2297   :  { %v9367_v16 = vmul.f32 %v9359_v44, %v9341_v2 }
0x2298   :  { %v9366_v32 = vmul.f32 %v9358_v19, %v9336_v36 }
0x2299   :  { %v9375_v50 = vmul.f32 %v9367_v16, %v9341_v2 }
0x229a   :  { %v9374_v47 = vmul.f32 %v9366_v32, %v9336_v36 }
0x229b   :  { %v9383_v38 = vadd.f32 %v9375_v50, %v9341_v2 }
0x229c   :  { %v9382_v60 = vadd.f32 %v9374_v47, %v9336_v36 }
0x229d   :  { %v22545_v13 = vpop.eup %22544  ;;  %v9391_v62 = vmul.f32 0.7978846, %v9383_v38 }
0x229e   :  { %v22547_v48 = vpop.eup %22546  ;;  %v9405_v30 = vadd.f32 1.0, %v22545_v13  ;;  %v9390_v21 = vmul.f32 0.7978846, %v9382_v60 }
0x229f   :  { %v9404_v49 = vadd.f32 1.0, %v22547_v48  ;;  %22548 = vtanh.f32 %v9391_v62 }
0x22a0   :  { %22550 = vtanh.f32 %v9390_v21  ;;  %v9413_v17 = vmul.f32 %v9405_v30, %v9349_v59 }
0x22a1   :  { %v9412_v8 = vmul.f32 %v9404_v49, %v9348_v39 }
0x22a3   :  { %20690 = vmatprep.mubr.msk.f32.mxu1 %vm9424_vm8, %v9412_v8 }
0x22a4   :  { %20691 = vmatmul.mubr.msk.f32.gmra.mrb[102].mxu1 %vm9424_vm8, %v9413_v17  ;;  %v19009_v17 = vld [vmem:[%s27107_s9 + $0x20] sm:$0xff] }
0x22a9   :  { %v22549_v52 = vpop.eup %22548 }
0x22aa   :  { %v22551_v9 = vpop.eup %22550  ;;  %v9407_v6 = vadd.f32 1.0, %v22549_v52  ;;  %v19010_v52 = vld [vmem:[%s27107_s9 + $0x28] sm:$0xff] }
0x22ab   :  { %v9406_v37 = vadd.f32 1.0, %v22551_v9  ;;  %v21608_v9 = vpack.c.bf16 %v19010_v52, %v19009_v17 }
0x22ac   :  { %v9415_v29 = vmul.f32 %v9407_v6, %v9351_v3  ;;  %v19011_v6 = vld [vmem:[%s27107_s9 + $0x30] sm:$0xff] }
0x22ad   :  { %v9414_v26 = vmul.f32 %v9406_v37, %v9350_v15  ;;  %21609 = vmatprep.subr.bf16.mxu0 %v21608_v9  ;;  %v19012_v15 = vld [vmem:[%s27107_s9 + $0x38] sm:$0xff] }
0x22ae   :  { %21611 = vmatpush3.bf16.msra.mxu0 %v21608_v9  ;;  %v21612_v37 = vpack.c.bf16 %v19012_v15, %v19011_v6 }
0x22af   :  { %20693 = vmatprep.mubr.msk.f32.mxu1 %vm9424_vm8, %v9414_v26 }
0x22b0   :  { %20694 = vmatmul.mubr.msk.f32.gmra.mrb[104].mxu1 %vm9424_vm8, %v9415_v29  ;;  %21613 = vmatprep.subr.bf16.mxu0 %v21612_v37 }
0x22b1   :  { %20718 = vmatprep.mubr.msk.f32.mxu1 %vm23191_vm0, %v23190_v0 }
0x22b2   :  { %21615 = vmatpush3.bf16.msra.mxu0 %v21612_v37 }
0x22b3   :  { %20736 = vmatprep.subr.mxu0 %v23190_v0 }
0x2331   :  { %v20686_v41 = vpop.f32.mrb[98].mxu1 }
0x2332   :  { %v9555_v7 = vadd.f32 %v20686_v41, %v25105_v61  ;;  %v9515_v28 = vpop.f32.mrb[99].mxu1 }
0x2333   :  { %v9554_v56 = vadd.f32 %v9515_v28, %v25108_v33 }
0x2334   :  { %v25243_v10 = vadd.f32 %v19004_v57, %v9555_v7 }
0x2335   :  { %v25245_v24 = vadd.f32 %v19004_v57, %v9554_v56 }
0x2336   :  { %v9584_v23 = vsel %vm703_vm5, %v25243_v10, 0.0 }
0x2337   :  { %9585 = vadd.xlane.f32.xlu1 %v9584_v23  ;;  %v9581_v25 = vsel %vm703_vm5, %v25245_v24, 0.0 }
0x2338   :  { %9582 = vadd.xlane.f32.xlu0 %v9581_v25 }
0x233c   :  { %v20689_v45 = vpop.f32.mrb[100].mxu1 }
0x233d   :  { %v9557_v34 = vadd.f32 %v20689_v45, %v25115_v63  ;;  %v9525_v1 = vpop.f32.mrb[101].mxu1 }
0x233e   :  { %v9556_v61 = vadd.f32 %v9525_v1, %v25118_v55 }
0x233f   :  { %v25253_v27 = vadd.f32 %v19004_v57, %v9557_v34 }
0x2340   :  { %v25255_v33 = vadd.f32 %v19004_v57, %v9556_v61 }
0x2341   :  { %v9590_v12 = vsel %vm703_vm5, %v25253_v27, 0.0 }
0x2342   :  { %9591 = vadd.xlane.f32.xlu1 %v9590_v12  ;;  %v9587_v20 = vsel %vm703_vm5, %v25255_v33, 0.0 }
0x2343   :  { %9588 = vadd.xlane.f32.xlu0 %v9587_v20 }
0x2377   :  { %v20692_v54 = vpop.f32.mrb[102].mxu1 }
0x2378   :  { %v9559_v31 = vadd.f32 %v20692_v54, %v25125_v53  ;;  %v9535_v4 = vpop.f32.mrb[103].mxu1 }
0x2379   :  { %v9558_v63 = vadd.f32 %v9535_v4, %v25128_v51 }
0x237a   :  { %v25263_v35 = vadd.f32 %v19004_v57, %v9559_v31 }
0x237b   :  { %v25265_v55 = vadd.f32 %v19004_v57, %v9558_v63 }
0x237c   :  { %v9596_v14 = vsel %vm703_vm5, %v25263_v35, 0.0 }
0x237d   :  { %9597 = vadd.xlane.f32.xlu1 %v9596_v14  ;;  %v9593_v58 = vsel %vm703_vm5, %v25265_v55, 0.0 }
0x237e   :  { %9594 = vadd.xlane.f32.xlu0 %v9593_v58 }
0x2383   :  { %v20695_v11 = vpop.f32.mrb[104].mxu1 }
0x2384   :  { %v9561_v46 = vadd.f32 %v20695_v11, %v25135_v5  ;;  %v9545_v40 = vpop.f32.mrb[105].mxu1 }
0x2385   :  { %v9560_v53 = vadd.f32 %v9545_v40, %v25138_v42 }
0x2386   :  { %v25273_v43 = vadd.f32 %v19004_v57, %v9561_v46 }
0x2387   :  { %v25275_v51 = vadd.f32 %v19004_v57, %v9560_v53 }
0x2388   :  { %v9602_v2 = vsel %vm703_vm5, %v25273_v43, 0.0 }
0x2389   :  { %9603 = vadd.xlane.f32.xlu1 %v9602_v2  ;;  %v9599_v22 = vsel %vm703_vm5, %v25275_v51, 0.0 }
0x238a   :  { %9600 = vadd.xlane.f32.xlu0 %v9599_v22 }
0x23c4   :  { %v9586_v36 = vpop.xlane.xlu1 %9585 }
0x23c5   :  { %v9606_v44 = vmul.f32 0.03125, %v9586_v36  ;;  %v9583_v19 = vpop.xlane.xlu0 %9582 }
0x23c6   :  { %v9605_v16 = vmul.f32 0.03125, %v9583_v19 }
0x23c7   :  { %v25282_v5 = vsub.f32 %v25243_v10, %v9606_v44 }
0x23c8   :  { %v25285_v42 = vsub.f32 %v25245_v24, %v9605_v16 }
0x23c9   :  { %v9622_v32 = vmul.f32 %v25282_v5, %v25282_v5 }
0x23ca   :  { %v9621_v50 = vmul.f32 %v25285_v42, %v25285_v42 }
0x23cb   :  { %v9632_v47 = vsel %vm703_vm5, %v9622_v32, 0.0  ;;  %v19007_v32 = vld [vmem:[%s27108_s13 + $0x1] ss:$0 sm:$0xff] }
0x23cc   :  { %9633 = vadd.xlane.f32.xlu1 %v9632_v47  ;;  %v9629_v38 = vsel %vm703_vm5, %v9621_v50, 0.0 }
0x23cd   :  { %9630 = vadd.xlane.f32.xlu0 %v9629_v38 }
0x23cf   :  { %v9592_v60 = vpop.xlane.xlu1 %9591 }
0x23d0   :  { %v9608_v13 = vmul.f32 0.03125, %v9592_v60  ;;  %v9589_v62 = vpop.xlane.xlu0 %9588 }
0x23d1   :  { %v9607_v48 = vmul.f32 0.03125, %v9589_v62  ;;  %v19008_v62 = vld [vmem:[%s27109_s25 + $0x1] ss:$0 sm:$0xff] }
0x23d2   :  { %v25294_v30 = vsub.f32 %v25253_v27, %v9608_v13 }
0x23d3   :  { %v25297_v21 = vsub.f32 %v25255_v33, %v9607_v48 }
0x23d4   :  { %v9624_v39 = vmul.f32 %v25294_v30, %v25294_v30 }
0x23d5   :  { %v9623_v49 = vmul.f32 %v25297_v21, %v25297_v21 }
0x23d6   :  { %v9638_v59 = vsel %vm703_vm5, %v9624_v39, 0.0 }
0x23d7   :  { %9639 = vadd.xlane.f32.xlu1 %v9638_v59  ;;  %v9635_v8 = vsel %vm703_vm5, %v9623_v49, 0.0 }
0x23d8   :  { %9636 = vadd.xlane.f32.xlu0 %v9635_v8 }
0x240a   :  { %v9598_v3 = vpop.xlane.xlu1 %9597 }
0x240b   :  { %v9610_v26 = vmul.f32 0.03125, %v9598_v3  ;;  %v9595_v29 = vpop.xlane.xlu0 %9594 }
0x240c   :  { %v9609_v41 = vmul.f32 0.03125, %v9595_v29 }
0x240d   :  { %v25311_v57 = vsub.f32 %v25263_v35, %v9610_v26 }
0x240e   :  { %v25314_v7 = vsub.f32 %v25265_v55, %v9609_v41 }
0x240f   :  { %v9626_v28 = vmul.f32 %v25311_v57, %v25311_v57 }
0x2410   :  { %v9625_v56 = vmul.f32 %v25314_v7, %v25314_v7 }
0x2411   :  { %v9644_v23 = vsel %vm703_vm5, %v9626_v28, 0.0 }
0x2412   :  { %9645 = vadd.xlane.f32.xlu1 %v9644_v23  ;;  %v9641_v25 = vsel %vm703_vm5, %v9625_v56, 0.0 }
0x2413   :  { %9642 = vadd.xlane.f32.xlu0 %v9641_v25 }
0x2416   :  { %v9604_v45 = vpop.xlane.xlu1 %9603 }
0x2417   :  { %v9612_v34 = vmul.f32 0.03125, %v9604_v45  ;;  %v9601_v1 = vpop.xlane.xlu0 %9600 }
0x2418   :  { %v9611_v61 = vmul.f32 0.03125, %v9601_v1 }
0x2419   :  { %v25323_v12 = vsub.f32 %v25273_v43, %v9612_v34 }
0x241a   :  { %v25326_v20 = vsub.f32 %v25275_v51, %v9611_v61 }
0x241b   :  { %v9628_v54 = vmul.f32 %v25323_v12, %v25323_v12 }
0x241c   :  { %v9627_v31 = vmul.f32 %v25326_v20, %v25326_v20 }
0x241d   :  { %v9650_v4 = vsel %vm703_vm5, %v9628_v54, 0.0 }
0x241e   :  { %9651 = vadd.xlane.f32.xlu1 %v9650_v4  ;;  %v9647_v63 = vsel %vm703_vm5, %v9627_v31, 0.0 }
0x241f   :  { %9648 = vadd.xlane.f32.xlu0 %v9647_v63 }
0x2459   :  { %v9634_v14 = vpop.xlane.xlu1 %9633 }
0x245a   :  { %v9654_v58 = vmul.f32 0.03125, %v9634_v14  ;;  %v9631_v11 = vpop.xlane.xlu0 %9630 }
0x245b   :  { %v9653_v46 = vmul.f32 0.03125, %v9631_v11 }
0x245c   :  { %v9662_v40 = vadd.f32 1e-12, %v9654_v58 }
0x245d   :  { %v9661_v53 = vadd.f32 1e-12, %v9653_v46 }
0x245e   :  { %22552 = vrsqrt.f32 %v9662_v40 }
0x245f   :  { %22554 = vrsqrt.f32 %v9661_v53 }
0x2464   :  { %v9640_v2 = vpop.xlane.xlu1 %9639 }
0x2465   :  { %v9656_v22 = vmul.f32 0.03125, %v9640_v2  ;;  %v9637_v36 = vpop.xlane.xlu0 %9636  ;;  %v19019_v2 = vld [vmem:[%s27110_s14 + $0x1] ss:$0 sm:$0xff] }
0x2466   :  { %v9655_v44 = vmul.f32 0.03125, %v9637_v36 }
0x2467   :  { %v9664_v19 = vadd.f32 1e-12, %v9656_v22 }
0x2468   :  { %v22553_v16 = vpop.eup %22552  ;;  %v9663_v50 = vadd.f32 1e-12, %v9655_v44 }
0x2469   :  { %v22555_v47 = vpop.eup %22554  ;;  %v9678_v38 = vmul.f32 %v22553_v16, %v25282_v5  ;;  %22556 = vrsqrt.f32 %v9664_v19 }
0x246a   :  { %22558 = vrsqrt.f32 %v9663_v50  ;;  %v9677_v60 = vmul.f32 %v22555_v47, %v25285_v42 }
0x246b   :  { %v9692_v13 = vmul.f32 %v19007_v32, %v9678_v38 }
0x246c   :  { %v9691_v48 = vmul.f32 %v19007_v32, %v9677_v60 }
0x246d   :  { %v9706_v49 = vadd.f32 %v19008_v62, %v9692_v13 }
0x246e   :  { %v9705_v39 = vadd.f32 %v19008_v62, %v9691_v48 }
0x2470   :  { %20704 = vmatprep.mubr.msk.f32.mxu0 %vm703_vm5, %v9705_v39 }
0x2471   :  { %20705 = vmatmul.mubr.msk.f32.vlgmr.msra.gmra.mrb[100].mxu0 %vm703_vm5, %v9706_v49 }
0x2473   :  { %v22557_v59 = vpop.eup %22556 }
0x2474   :  { %v22559_v8 = vpop.eup %22558  ;;  %v9680_v17 = vmul.f32 %v22557_v59, %v25294_v30 }
0x2475   :  { %v9679_v52 = vmul.f32 %v22559_v8, %v25297_v21 }
0x2476   :  { %v9694_v5 = vmul.f32 %v19007_v32, %v9680_v17 }
0x2477   :  { %v9693_v9 = vmul.f32 %v19007_v32, %v9679_v52 }
0x2478   :  { %v9708_v15 = vadd.f32 %v19008_v62, %v9694_v5 }
0x2479   :  { %v9707_v6 = vadd.f32 %v19008_v62, %v9693_v9 }
0x247b   :  { %20707 = vmatprep.mubr.msk.f32.mxu0 %vm703_vm5, %v9707_v6 }
0x247c   :  { %20708 = vmatmul.mubr.msk.f32.gmra.mrb[102].mxu0 %vm703_vm5, %v9708_v15 }
0x249f   :  { %v9646_v42 = vpop.xlane.xlu1 %9645 }
0x24a0   :  { %v9658_v37 = vmul.f32 0.03125, %v9646_v42  ;;  %v9643_v3 = vpop.xlane.xlu0 %9642 }
0x24a1   :  { %v9657_v26 = vmul.f32 0.03125, %v9643_v3 }
0x24a2   :  { %v9666_v29 = vadd.f32 1e-12, %v9658_v37 }
0x24a3   :  { %v9665_v41 = vadd.f32 1e-12, %v9657_v26 }
0x24a4   :  { %22560 = vrsqrt.f32 %v9666_v29 }
0x24a5   :  { %22562 = vrsqrt.f32 %v9665_v41 }
0x24ab   :  { %v9652_v28 = vpop.xlane.xlu1 %9651 }
0x24ac   :  { %v9660_v30 = vmul.f32 0.03125, %v9652_v28  ;;  %v9649_v56 = vpop.xlane.xlu0 %9648 }
0x24ad   :  { %v9659_v21 = vmul.f32 0.03125, %v9649_v56 }
0x24ae   :  { %v22561_v23 = vpop.eup %22560  ;;  %v9668_v25 = vadd.f32 1e-12, %v9660_v30 }
0x24af   :  { %v22563_v45 = vpop.eup %22562  ;;  %v9667_v34 = vadd.f32 1e-12, %v9659_v21  ;;  %v9682_v1 = vmul.f32 %v22561_v23, %v25311_v57 }
0x24b0   :  { %22564 = vrsqrt.f32 %v9668_v25  ;;  %v9681_v61 = vmul.f32 %v22563_v45, %v25314_v7 }
0x24b1   :  { %22566 = vrsqrt.f32 %v9667_v34  ;;  %v9696_v54 = vmul.f32 %v19007_v32, %v9682_v1 }
0x24b2   :  { %v9695_v31 = vmul.f32 %v19007_v32, %v9681_v61 }
0x24b3   :  { %v9710_v63 = vadd.f32 %v19008_v62, %v9696_v54 }
0x24b4   :  { %v9709_v4 = vadd.f32 %v19008_v62, %v9695_v31 }
0x24b6   :  { %20710 = vmatprep.mubr.msk.f32.mxu0 %vm703_vm5, %v9709_v4 }
0x24b7   :  { %20711 = vmatmul.mubr.msk.f32.gmra.mrb[104].mxu0 %vm703_vm5, %v9710_v63 }
0x24ba   :  { %v22565_v14 = vpop.eup %22564 }
0x24bb   :  { %v22567_v58 = vpop.eup %22566  ;;  %v9684_v11 = vmul.f32 %v22565_v14, %v25323_v12 }
0x24bc   :  { %v9683_v46 = vmul.f32 %v22567_v58, %v25326_v20 }
0x24bd   :  { %v9698_v57 = vmul.f32 %v19007_v32, %v9684_v11 }
0x24be   :  { %v9697_v40 = vmul.f32 %v19007_v32, %v9683_v46 }
0x24bf   :  { %v9712_v7 = vadd.f32 %v19008_v62, %v9698_v57 }
0x24c0   :  { %v9711_v53 = vadd.f32 %v19008_v62, %v9697_v40 }
0x24c2   :  { %20713 = vmatprep.mubr.msk.f32.mxu0 %vm703_vm5, %v9711_v53 }
0x24c3   :  { %20714 = vmatmul.mubr.msk.f32.gmra.mrb[106].mxu0 %vm703_vm5, %v9712_v7 }
0x24c4   :  { %20738 = vmatprep.mubr.msk.f32.mxu0 %vm23191_vm0, %v23190_v0 }
0x2544   :  { %v20706_v22 = vpop.f32.mrb[100].mxu0 }
0x2545   :  { %v25355_v36 = vadd.f32 %v20706_v22, %v19019_v2  ;;  %v9823_v44 = vpop.f32.mrb[101].mxu0 }
0x2546   :  { %v25357_v19 = vadd.f32 %v19019_v2, %v9823_v44 }
0x2547   :  { %9949 = vrot.lane.b32.xlu1 %v25355_v36, %s23192_s0  ;;  %v25399_v17 = vmul.f32 0.17677669, %v25355_v36 }
0x2548   :  { %9871 = vrot.lane.b32.xlu0 %v25357_v19, %s23192_s0  ;;  %v25389_v59 = vmul.f32 0.17677669, %v25357_v19 }
0x254f   :  { %v20709_v12 = vpop.f32.mrb[102].mxu0 }
0x2550   :  { %v9833_v20 = vpop.f32.mrb[103].mxu0  ;;  %v25375_v60 = vadd.f32 %v20709_v12, %v19019_v2 }
0x2551   :  { %v25371_v38 = vadd.f32 %v19019_v2, %v9833_v20 }
0x2552   :  { %v25436_v26 = vmul.f32 0.17677669, %v25375_v60 }
0x2553   :  { %v25415_v15 = vmul.f32 0.17677669, %v25371_v38 }
0x258a   :  { %v20712_v16 = vpop.f32.mrb[104].mxu0 }
0x258b   :  { %v25363_v32 = vadd.f32 %v20712_v16, %v19019_v2  ;;  %v9843_v50 = vpop.f32.mrb[105].mxu0 }
0x258c   :  { %v25365_v47 = vadd.f32 %v19019_v2, %v9843_v50 }
0x258d   :  { %10261 = vrot.lane.b32.xlu0 %v25363_v32, %s23192_s0  ;;  %v25427_v37 = vmul.f32 0.17677669, %v25363_v32 }
0x258e   :  { %10183 = vrot.lane.b32.xlu1 %v25365_v47, %s23192_s0  ;;  %v25408_v5 = vmul.f32 0.17677669, %v25365_v47 }
0x2592   :  { %10027 = vrot.lane.b32.xlu1 %v25371_v38, %s23192_s0 }
0x2596   :  { %10105 = vrot.lane.b32.xlu1 %v25375_v60, %s23192_s0  ;;  %v20715_v13 = vpop.f32.mrb[106].mxu0 }
0x2597   :  { %v25379_v62 = vadd.f32 %v20715_v13, %v19019_v2  ;;  %v9853_v48 = vpop.f32.mrb[107].mxu0 }
0x2598   :  { %v25381_v39 = vadd.f32 %v19019_v2, %v9853_v48 }
0x2599   :  { %v25453_v28 = vmul.f32 0.17677669, %v25379_v62 }
0x259a   :  { %10417 = vrot.lane.b32.xlu1 %v25379_v62, %s23192_s0  ;;  %10339 = vrot.lane.b32.xlu0 %v25381_v39, %s23192_s0  ;;  %v25444_v29 = vmul.f32 0.17677669, %v25381_v39 }
0x25b9   :  { %v9950_v8 = vpop.permute.xlu1 %9949 }
0x25ba   :  { %v9872_v49 = vpop.permute.xlu0 %9871 }
0x25bb   :  { %20717 = vmatpush3.xpose.msk.msra.mxu1 %vm467_vm4, %v9872_v49 }
0x25bc   :  { %20721 = vmatprep.subr.mxu1 %v23190_v0 }
0x25be   :  { %20719 = vmatmul.mubr.msk.f32.vlgmr.msra.gmra.mrb[106].mxu1 %vm467_vm4, %v25389_v59 }
0x25bf   :  { %20722 = vmatpush3.xpose.msk.msra.mxu1 %vm467_vm4, %v9950_v8  ;;  %20723 = vmatprep.mubr.msk.f32.mxu1 %vm23191_vm0, %v23190_v0 }
0x25c0   :  { %20726 = vmatprep.subr.mxu1 %v23190_v0 }
0x25c6   :  { %20724 = vmatmul.mubr.msk.f32.vlgmr.msra.gmra.mrb[106].mxu1 %vm467_vm4, %v25399_v17 }
0x25c7   :  { %20728 = vmatprep.mubr.msk.f32.mxu1 %vm23191_vm0, %v23190_v0 }
0x25ff   :  { %v10262_v9 = vpop.permute.xlu0 %10261 }
0x2600   :  { %v10184_v52 = vpop.permute.xlu1 %10183 }
0x2601   :  { %20737 = vmatpush3.xpose.msk.msra.mxu0 %vm467_vm4, %v10184_v52 }
0x2602   :  { %20741 = vmatprep.subr.mxu0 %v23190_v0 }
0x2604   :  { %v10028_v6 = vpop.permute.xlu1 %10027  ;;  %20739 = vmatmul.mubr.msk.f32.vlgmr.msra.gmra.mrb[108].mxu0 %vm467_vm4, %v25408_v5 }
0x2605   :  { %20727 = vmatpush3.xpose.msk.msra.mxu1 %vm467_vm4, %v10028_v6  ;;  %20742 = vmatpush3.xpose.msk.msra.mxu0 %vm467_vm4, %v10262_v9 }
0x2606   :  { %20731 = vmatprep.subr.mxu1 %v23190_v0  ;;  %20743 = vmatprep.mubr.msk.f32.mxu0 %vm23191_vm0, %v23190_v0 }
0x2607   :  { %20746 = vmatprep.subr.mxu0 %v23190_v0 }
0x2608   :  { %v10106_v42 = vpop.permute.xlu1 %10105  ;;  %20729 = vmatmul.mubr.msk.f32.vlgmr.msra.gmra.mrb[106].mxu1 %vm467_vm4, %v25415_v15 }
0x2609   :  { %20732 = vmatpush3.xpose.msk.msra.mxu1 %vm467_vm4, %v10106_v42  ;;  %20733 = vmatprep.mubr.msk.f32.mxu1 %vm23191_vm0, %v23190_v0 }
0x260a   :  { %20756 = vmatprep.subr.mxu1 %v23190_v0 }
0x260c   :  { %20744 = vmatmul.mubr.msk.f32.vlgmr.msra.gmra.mrb[108].mxu0 %vm467_vm4, %v25427_v37  ;;  %v10340_v3 = vpop.permute.xlu0 %10339  ;;  %v10418_v41 = vpop.permute.xlu1 %10417 }
0x260d   :  { %20747 = vmatpush3.xpose.msk.msra.mxu0 %vm467_vm4, %v10340_v3  ;;  %20748 = vmatprep.mubr.msk.f32.mxu0 %vm23191_vm0, %v23190_v0 }
0x260e   :  { %20751 = vmatprep.subr.mxu0 %v23190_v0 }
0x2610   :  { %20734 = vmatmul.mubr.msk.f32.vlgmr.msra.gmra.mrb[106].mxu1 %vm467_vm4, %v25436_v26 }
0x2611   :  { %20758 = vmatprep.mubr.msk.f32.mxu1 %vm23191_vm0, %v23190_v0 }
0x2614   :  { %20749 = vmatmul.mubr.msk.f32.vlgmr.msra.gmra.mrb[108].mxu0 %vm467_vm4, %v25444_v29 }
0x2615   :  { %20752 = vmatpush3.xpose.msk.msra.mxu0 %vm467_vm4, %v10418_v41  ;;  %20753 = vmatprep.mubr.msk.f32.mxu0 %vm23191_vm0, %v23190_v0 }
0x2616   :  { %20761 = vmatprep.subr.mxu0 %v23190_v0 }
0x261c   :  { %20754 = vmatmul.mubr.msk.f32.vlgmr.msra.gmra.mrb[108].mxu0 %vm467_vm4, %v25453_v28 }
0x261d   :  { %20763 = vmatprep.mubr.msk.f32.mxu0 %vm23191_vm0, %v23190_v0 }
0x26e3   :  { %v10178_v30 = vpop.f32.mrb[106].mxu1 }
0x26e4   :  { %v20735_v56 = vpop.f32.mrb[107].mxu1  ;;  %v10500_v21 = vsel %vm467_vm4, %v10178_v30, -inf }
0x26e5   :  { %10501 = vmax.xlane.f32.xlu0 %v10500_v21 }
0x26ef   :  { %v10490_v23 = vpop.f32.mrb[108].mxu0 }
0x26f0   :  { %v20755_v25 = vpop.f32.mrb[109].mxu0  ;;  %v10503_v45 = vsel %vm467_vm4, %v10490_v23, -inf }
0x26f1   :  { %10504 = vmax.xlane.f32.xlu1 %v10503_v45 }
0x26fb   :  { %10522 = vrot.lane.b32.xlu0 %v25357_v19, %s23193_s2 }
0x2702   :  { %10671 = vrot.lane.b32.xlu1 %v25371_v38, %s23193_s2 }
0x2706   :  { %10817 = vrot.lane.b32.xlu1 %v25365_v47, %s23193_s2 }
0x270a   :  { %10598 = vrot.lane.b32.xlu1 %v25355_v36, %s23193_s2 }
0x270e   :  { %10744 = vrot.lane.b32.xlu1 %v25375_v60, %s23193_s2 }
0x2712   :  { %11114 = vrot.lane.b32.xlu1 %v25357_v19, %s23194_s24 }
0x2716   :  { %11112 = vrot.lane.b32.xlu1 %v25389_v59, %s23195_s29 }
0x271a   :  { %11426 = vrot.lane.b32.xlu1 %v25365_v47, %s23194_s24 }
0x271e   :  { %11424 = vrot.lane.b32.xlu1 %v25408_v5, %s23195_s29 }
0x2722   :  { %11504 = vrot.lane.b32.xlu1 %v25363_v32, %s23194_s24 }
0x2726   :  { %11502 = vrot.lane.b32.xlu1 %v25427_v37, %s23195_s29 }
0x272a   :  { %11582 = vrot.lane.b32.xlu1 %v25381_v39, %s23194_s24 }
0x272e   :  { %11580 = vrot.lane.b32.xlu1 %v25444_v29, %s23195_s29 }
0x2732   :  { %11658 = vrot.lane.b32.xlu1 %v25453_v28, %s23195_s29 }
0x2772   :  { %v10502_v34 = vpop.xlane.xlu0 %10501 }
0x2773   :  { %v10506_v1 = vsub.f32 %v10178_v30, %v10502_v34 }
0x2775   :  { %v10508_v61 = vmul.f32 1.442695, %v10506_v1 }
0x2776   :  { %v10523_v54 = vpop.permute.xlu0 %10522 }
0x2777   :  { %22568 = vpow2.f32 %v10508_v61  ;;  %20757 = vmatpush3.msra.mxu1 %v10523_v54 }
0x2778   :  { %20766 = vmatprep.subr.mxu1 %v23190_v0 }
0x277e   :  { %v10505_v31 = vpop.xlane.xlu1 %10504 }
0x277f   :  { %v10507_v46 = vsub.f32 %v10490_v23, %v10505_v31 }
0x2781   :  { %v22569_v4 = vpop.eup %22568  ;;  %v10510_v57 = vmul.f32 1.442695, %v10507_v46 }
0x2782   :  { %v10672_v63 = vpop.permute.xlu1 %10671  ;;  %v10512_v14 = vsel %vm467_vm4, %v22569_v4, 0.0 }
0x2783   :  { %10513 = vadd.xlane.f32.xlu0 %v10512_v14  ;;  %22570 = vpow2.f32 %v10510_v57 }
0x2786   :  { %v10818_v58 = vpop.permute.xlu1 %10817 }
0x278a   :  { %v10599_v11 = vpop.permute.xlu1 %10598 }
0x278b   :  { %20762 = vmatpush3.msra.mxu0 %v10599_v11 }
0x278c   :  { %20771 = vmatprep.subr.mxu0 %v23190_v0 }
0x278d   :  { %v22571_v40 = vpop.eup %22570 }
0x278e   :  { %v10515_v53 = vsel %vm467_vm4, %v22571_v40, 0.0  ;;  %v10745_v44 = vpop.permute.xlu1 %10744 }
0x2792   :  { %v11115_v20 = vpop.permute.xlu1 %11114 }
0x2796   :  { %v11113_v50 = vpop.permute.xlu1 %11112 }
0x2799   :  { %10966 = vrot.lane.b32.xlu0 %v25381_v39, %s23193_s2 }
0x279a   :  { %v11427_v49 = vpop.permute.xlu1 %11426 }
0x279e   :  { %v11425_v6 = vpop.permute.xlu1 %11424 }
0x27a2   :  { %v11505_v41 = vpop.permute.xlu1 %11504 }
0x27a6   :  { %v11503_v56 = vpop.permute.xlu1 %11502 }
0x27aa   :  { %v11583_v23 = vpop.permute.xlu1 %11582 }
0x27ae   :  { %v11581_v45 = vpop.permute.xlu1 %11580 }
0x27b2   :  { %v11659_v1 = vpop.permute.xlu1 %11658 }
0x27b8   :  { %10516 = vadd.xlane.f32.xlu0 %v10515_v53 }
0x27ce   :  { %10893 = vrot.lane.b32.xlu0 %v25363_v32, %s23193_s2 }
0x27d2   :  { %11039 = vrot.lane.b32.xlu0 %v25379_v62, %s23193_s2 }
0x27d6   :  { %11192 = vrot.lane.b32.xlu0 %v25355_v36, %s23194_s24 }
0x27da   :  { %11190 = vrot.lane.b32.xlu0 %v25399_v17, %s23195_s29 }
0x27de   :  { %11270 = vrot.lane.b32.xlu0 %v25371_v38, %s23194_s24 }
0x27e2   :  { %11268 = vrot.lane.b32.xlu0 %v25415_v15, %s23195_s29 }
0x27e6   :  { %11348 = vrot.lane.b32.xlu0 %v25375_v60, %s23194_s24 }
0x27ea   :  { %11346 = vrot.lane.b32.xlu0 %v25436_v26, %s23195_s29 }
0x27ee   :  { %11660 = vrot.lane.b32.xlu0 %v25379_v62, %s23194_s24 }
0x2810   :  { %v10514_v7 = vpop.xlane.xlu0 %10513 }
0x2811   :  { %22572 = vrcp.f32 %v10514_v7 }
0x2814   :  { %v10967_v12 = vpop.permute.xlu0 %10966 }
0x281b   :  { %v22573_v2 = vpop.eup %22572 }
0x281c   :  { %v10520_v22 = vmul.f32 %v22573_v2, %v22569_v4 }
0x281e   :  { %20759 = vmatmul.mubr.msk.f32.vlgmr.msra.gmra.mrb[108].mxu1 %vm467_vm4, %v10520_v22  ;;  %20764 = vmatmul.mubr.msk.f32.vlgmr.msra.gmra.mrb[110].mxu0 %vm467_vm4, %v10520_v22 }
0x281f   :  { %20767 = vmatpush3.msra.mxu1 %v10672_v63  ;;  %20772 = vmatpush3.msra.mxu0 %v10745_v44 }
0x2820   :  { %20768 = vmatprep.mubr.msk.f32.mxu1 %vm23191_vm0, %v23190_v0  ;;  %20773 = vmatprep.mubr.msk.f32.mxu0 %vm23191_vm0, %v23190_v0 }
0x2821   :  { %20776 = vmatprep.subr.mxu1 %v23190_v0  ;;  %20781 = vmatprep.subr.mxu0 %v23190_v0 }
0x2822   :  { %20769 = vmatmul.mubr.msk.f32.vlgmr.msra.gmra.mrb[110].mxu1 %vm467_vm4, %v10520_v22  ;;  %20774 = vmatmul.mubr.msk.f32.vlgmr.msra.gmra.mrb[112].mxu0 %vm467_vm4, %v10520_v22 }
0x2823   :  { %20777 = vmatpush3.msra.mxu1 %v10818_v58  ;;  %20778 = vmatprep.mubr.msk.f32.mxu1 %vm23191_vm0, %v23190_v0 }
0x2824   :  { %20783 = vmatprep.mubr.msk.f32.mxu0 %vm23191_vm0, %v23190_v0  ;;  %20786 = vmatprep.subr.mxu1 %v23190_v0 }
0x2845   :  { %v10517_v16 = vpop.xlane.xlu0 %10516 }
0x2846   :  { %22574 = vrcp.f32 %v10517_v16 }
0x2849   :  { %v10894_v13 = vpop.permute.xlu0 %10893 }
0x284a   :  { %20782 = vmatpush3.msra.mxu0 %v10894_v13 }
0x284b   :  { %20791 = vmatprep.subr.mxu0 %v23190_v0 }
0x284d   :  { %v11040_v48 = vpop.permute.xlu0 %11039 }
0x2850   :  { %v22575_v8 = vpop.eup %22574 }
0x2851   :  { %v11193_v52 = vpop.permute.xlu0 %11192  ;;  %v10521_v9 = vmul.f32 %v22575_v8, %v22571_v40 }
0x2853   :  { %20779 = vmatmul.mubr.msk.f32.vlgmr.msra.gmra.mrb[112].mxu1 %vm467_vm4, %v10521_v9  ;;  %20784 = vmatmul.mubr.msk.f32.vlgmr.msra.gmra.mrb[114].mxu0 %vm467_vm4, %v10521_v9 }
0x2854   :  { %20787 = vmatpush3.msra.mxu1 %v10967_v12  ;;  %20792 = vmatpush3.msra.mxu0 %v11040_v48 }
0x2855   :  { %v11191_v42 = vpop.permute.xlu0 %11190  ;;  %20788 = vmatprep.mubr.msk.f32.mxu1 %vm23191_vm0, %v23190_v0  ;;  %20793 = vmatprep.mubr.msk.f32.mxu0 %vm23191_vm0, %v23190_v0 }
0x2856   :  { %20796 = vmatprep.subr.mxu1 %v23190_v0  ;;  %20816 = vmatprep.subr.mxu0 %v23190_v0 }
0x2857   :  { %20789 = vmatmul.mubr.msk.f32.vlgmr.msra.gmra.mrb[114].mxu1 %vm467_vm4, %v10521_v9  ;;  %20794 = vmatmul.mubr.msk.f32.vlgmr.msra.gmra.mrb[116].mxu0 %vm467_vm4, %v10521_v9 }
0x2858   :  { %20798 = vmatprep.mubr.msk.f32.mxu1 %vm23191_vm0, %v23190_v0  ;;  %20818 = vmatprep.mubr.msk.f32.mxu0 %vm23191_vm0, %v23190_v0 }
0x2859   :  { %v11271_v3 = vpop.permute.xlu0 %11270 }
0x285b   :  { %20797 = vmatpush3.xpose.msk.msra.mxu1 %vm467_vm4, %v11115_v20  ;;  %20817 = vmatpush3.xpose.msk.msra.mxu0 %vm467_vm4, %v11427_v49 }
0x285c   :  { %20801 = vmatprep.subr.mxu1 %v23190_v0  ;;  %20821 = vmatprep.subr.mxu0 %v23190_v0 }
0x285d   :  { %v11269_v30 = vpop.permute.xlu0 %11268 }
0x285e   :  { %20799 = vmatmul.mubr.msk.f32.vlgmr.msra.gmra.mrb[116].mxu1 %vm467_vm4, %v11113_v50  ;;  %20819 = vmatmul.mubr.msk.f32.vlgmr.msra.gmra.mrb[118].mxu0 %vm467_vm4, %v11425_v6 }
0x285f   :  { %20802 = vmatpush3.xpose.msk.msra.mxu1 %vm467_vm4, %v11193_v52  ;;  %20822 = vmatpush3.xpose.msk.msra.mxu0 %vm467_vm4, %v11505_v41 }
0x2860   :  { %20803 = vmatprep.mubr.msk.f32.mxu1 %vm23191_vm0, %v23190_v0  ;;  %20806 = vmatprep.subr.mxu1 %v23190_v0 }
0x2861   :  { %20823 = vmatprep.mubr.msk.f32.mxu0 %vm23191_vm0, %v23190_v0  ;;  %20826 = vmatprep.subr.mxu0 %v23190_v0  ;;  %v11349_v21 = vpop.permute.xlu0 %11348 }
0x2865   :  { %v11347_v25 = vpop.permute.xlu0 %11346 }
0x2866   :  { %20804 = vmatmul.mubr.msk.f32.vlgmr.msra.gmra.mrb[116].mxu1 %vm467_vm4, %v11191_v42  ;;  %20824 = vmatmul.mubr.msk.f32.vlgmr.msra.gmra.mrb[118].mxu0 %vm467_vm4, %v11503_v56 }
0x2867   :  { %20807 = vmatpush3.xpose.msk.msra.mxu1 %vm467_vm4, %v11271_v3  ;;  %20827 = vmatpush3.xpose.msk.msra.mxu0 %vm467_vm4, %v11583_v23 }
0x2868   :  { %20808 = vmatprep.mubr.msk.f32.mxu1 %vm23191_vm0, %v23190_v0  ;;  %20811 = vmatprep.subr.mxu1 %v23190_v0 }
0x2869   :  { %20828 = vmatprep.mubr.msk.f32.mxu0 %vm23191_vm0, %v23190_v0  ;;  %20831 = vmatprep.subr.mxu0 %v23190_v0  ;;  %v11661_v34 = vpop.permute.xlu0 %11660 }
0x286e   :  { %20809 = vmatmul.mubr.msk.f32.vlgmr.msra.gmra.mrb[116].mxu1 %vm467_vm4, %v11269_v30  ;;  %20829 = vmatmul.mubr.msk.f32.vlgmr.msra.gmra.mrb[118].mxu0 %vm467_vm4, %v11581_v45 }
0x286f   :  { %20812 = vmatpush3.xpose.msk.msra.mxu1 %vm467_vm4, %v11349_v21  ;;  %20832 = vmatpush3.xpose.msk.msra.mxu0 %vm467_vm4, %v11661_v34 }
0x2870   :  { %20813 = vmatprep.mubr.msk.f32.mxu1 %vm23191_vm0, %v23190_v0  ;;  %20833 = vmatprep.mubr.msk.f32.mxu0 %vm23191_vm0, %v23190_v0 }
0x2871   :  { %20836 = vmatprep.subr.mxu1 %v23190_v0  ;;  %20841 = vmatprep.subr.mxu0 %v23190_v0 }
0x2876   :  { %20814 = vmatmul.mubr.msk.f32.vlgmr.msra.gmra.mrb[116].mxu1 %vm467_vm4, %v11347_v25  ;;  %20834 = vmatmul.mubr.msk.f32.vlgmr.msra.gmra.mrb[118].mxu0 %vm467_vm4, %v11659_v1 }
0x2877   :  { %20838 = vmatprep.mubr.msk.f32.mxu1 %vm23191_vm0, %v23190_v0  ;;  %20843 = vmatprep.mubr.msk.f32.mxu0 %vm23191_vm0, %v23190_v0 }
0x28f1   :  { %v25583_v61 = vpop.f32.mrb[108].mxu1  ;;  %v25585_v54 = vpop.f32.mrb[110].mxu0 }
0x28f2   :  { %v20760_v31 = vpop.f32.mrb[109].mxu1  ;;  %v20765_v4 = vpop.f32.mrb[111].mxu0 }
0x28f5   :  { %v25587_v63 = vpop.f32.mrb[110].mxu1  ;;  %v25589_v14 = vpop.f32.mrb[112].mxu0 }
0x28f6   :  { %v20770_v58 = vpop.f32.mrb[111].mxu1  ;;  %v20775_v11 = vpop.f32.mrb[113].mxu0 }
0x2926   :  { %v25591_v46 = vpop.f32.mrb[112].mxu1  ;;  %v25593_v57 = vpop.f32.mrb[114].mxu0 }
0x2927   :  { %v20780_v40 = vpop.f32.mrb[113].mxu1  ;;  %v20785_v53 = vpop.f32.mrb[115].mxu0 }
0x292a   :  { %v25595_v7 = vpop.f32.mrb[114].mxu1  ;;  %v25597_v2 = vpop.f32.mrb[116].mxu0 }
0x292b   :  { %v20790_v22 = vpop.f32.mrb[115].mxu1  ;;  %v20795_v44 = vpop.f32.mrb[117].mxu0 }
0x2949   :  { %v11420_v12 = vpop.f32.mrb[116].mxu1  ;;  %v11732_v20 = vpop.f32.mrb[118].mxu0 }
0x294a   :  { %v20815_v16 = vpop.f32.mrb[117].mxu1  ;;  %v20835_v50 = vpop.f32.mrb[119].mxu0  ;;  %v11742_v13 = vsel %vm467_vm4, %v11420_v12, -inf  ;;  %v11745_v48 = vsel %vm467_vm4, %v11732_v20, -inf }
0x294b   :  { %11743 = vmax.xlane.f32.xlu0 %v11742_v13  ;;  %11746 = vmax.xlane.f32.xlu1 %v11745_v48 }
0x295c   :  { %11913 = vrot.lane.b32.xlu1 %v25371_v38, %s23196_s7 }
0x2960   :  { %12059 = vrot.lane.b32.xlu1 %v25365_v47, %s23196_s7 }
0x2961   :  { %11764 = vrot.lane.b32.xlu0 %v25357_v19, %s23196_s7 }
0x2964   :  { %11840 = vrot.lane.b32.xlu1 %v25355_v36, %s23196_s7 }
0x2968   :  { %11986 = vrot.lane.b32.xlu1 %v25375_v60, %s23196_s7 }
0x296c   :  { %12356 = vrot.lane.b32.xlu1 %v25357_v19, %s23197_s30 }
0x2970   :  { %12354 = vrot.lane.b32.xlu1 %v25389_v59, %s23198_s8 }
0x2974   :  { %12668 = vrot.lane.b32.xlu1 %v25365_v47, %s23197_s30 }
0x2978   :  { %12666 = vrot.lane.b32.xlu1 %v25408_v5, %s23198_s8 }
0x297c   :  { %12746 = vrot.lane.b32.xlu1 %v25363_v32, %s23197_s30 }
0x2980   :  { %12744 = vrot.lane.b32.xlu1 %v25427_v37, %s23198_s8 }
0x2984   :  { %12824 = vrot.lane.b32.xlu1 %v25381_v39, %s23197_s30 }
0x2988   :  { %12822 = vrot.lane.b32.xlu1 %v25444_v29, %s23198_s8 }
0x298c   :  { %12900 = vrot.lane.b32.xlu1 %v25453_v28, %s23198_s8 }
0x29d8   :  { %v11747_v49 = vpop.xlane.xlu1 %11746  ;;  %v11744_v8 = vpop.xlane.xlu0 %11743 }
0x29d9   :  { %v11748_v52 = vsub.f32 %v11420_v12, %v11744_v8  ;;  %v11749_v21 = vsub.f32 %v11732_v20, %v11747_v49 }
0x29db   :  { %v11750_v9 = vmul.f32 1.442695, %v11748_v52  ;;  %v11752_v23 = vmul.f32 1.442695, %v11749_v21 }
0x29dc   :  { %v11914_v6 = vpop.permute.xlu1 %11913  ;;  %v11765_v42 = vpop.permute.xlu0 %11764 }
0x29dd   :  { %20837 = vmatpush3.msra.mxu1 %v11765_v42  ;;  %22576 = vpow2.f32 %v11750_v9 }
0x29de   :  { %20846 = vmatprep.subr.mxu1 %v23190_v0  ;;  %22578 = vpow2.f32 %v11752_v23 }
0x29e0   :  { %v12060_v3 = vpop.permute.xlu1 %12059 }
0x29e4   :  { %v11841_v41 = vpop.permute.xlu1 %11840 }
0x29e5   :  { %20842 = vmatpush3.msra.mxu0 %v11841_v41 }
0x29e6   :  { %20851 = vmatprep.subr.mxu0 %v23190_v0 }
0x29e7   :  { %v22577_v30 = vpop.eup %22576 }
0x29e8   :  { %v11754_v56 = vsel %vm467_vm4, %v22577_v30, 0.0  ;;  %v22579_v25 = vpop.eup %22578  ;;  %v11987_v4 = vpop.permute.xlu1 %11986 }
0x29e9   :  { %11755 = vadd.xlane.f32.xlu0 %v11754_v56  ;;  %v11757_v45 = vsel %vm467_vm4, %v22579_v25, 0.0 }
0x29ec   :  { %v12357_v11 = vpop.permute.xlu1 %12356 }
0x29f0   :  { %v12355_v53 = vpop.permute.xlu1 %12354 }
0x29f4   :  { %v12669_v12 = vpop.permute.xlu1 %12668 }
0x29f8   :  { %v12667_v13 = vpop.permute.xlu1 %12666 }
0x29fc   :  { %v12747_v8 = vpop.permute.xlu1 %12746 }
0x29ff   :  { %12208 = vrot.lane.b32.xlu0 %v25381_v39, %s23196_s7 }
0x2a00   :  { %v12745_v9 = vpop.permute.xlu1 %12744 }
0x2a04   :  { %v12825_v42 = vpop.permute.xlu1 %12824 }
0x2a08   :  { %v12823_v41 = vpop.permute.xlu1 %12822 }
0x2a0c   :  { %v12901_v56 = vpop.permute.xlu1 %12900 }
0x2a1e   :  { %11758 = vadd.xlane.f32.xlu0 %v11757_v45 }
0x2a34   :  { %12135 = vrot.lane.b32.xlu0 %v25363_v32, %s23196_s7 }
0x2a38   :  { %12281 = vrot.lane.b32.xlu0 %v25379_v62, %s23196_s7 }
0x2a3c   :  { %12434 = vrot.lane.b32.xlu0 %v25355_v36, %s23197_s30 }
0x2a40   :  { %12432 = vrot.lane.b32.xlu0 %v25399_v17, %s23198_s8 }
0x2a44   :  { %12512 = vrot.lane.b32.xlu0 %v25371_v38, %s23197_s30 }
0x2a48   :  { %12510 = vrot.lane.b32.xlu0 %v25415_v15, %s23198_s8 }
0x2a4c   :  { %12590 = vrot.lane.b32.xlu0 %v25375_v60, %s23197_s30 }
0x2a50   :  { %12588 = vrot.lane.b32.xlu0 %v25436_v26, %s23198_s8 }
0x2a54   :  { %12902 = vrot.lane.b32.xlu0 %v25379_v62, %s23197_s30 }
0x2a76   :  { %v11756_v34 = vpop.xlane.xlu0 %11755 }
0x2a77   :  { %22580 = vrcp.f32 %v11756_v34 }
0x2a7a   :  { %v12209_v58 = vpop.permute.xlu0 %12208 }
0x2a81   :  { %v22581_v1 = vpop.eup %22580 }
0x2a82   :  { %v11762_v31 = vmul.f32 %v22581_v1, %v22577_v30 }
0x2a84   :  { %20839 = vmatmul.mubr.msk.f32.vlgmr.msra.gmra.mrb[118].mxu1 %vm467_vm4, %v11762_v31  ;;  %20844 = vmatmul.mubr.msk.f32.vlgmr.msra.gmra.mrb[120].mxu0 %vm467_vm4, %v11762_v31 }
0x2a85   :  { %20847 = vmatpush3.msra.mxu1 %v11914_v6  ;;  %20852 = vmatpush3.msra.mxu0 %v11987_v4 }
0x2a86   :  { %20848 = vmatprep.mubr.msk.f32.mxu1 %vm23191_vm0, %v23190_v0  ;;  %20853 = vmatprep.mubr.msk.f32.mxu0 %vm23191_vm0, %v23190_v0 }
0x2a87   :  { %20856 = vmatprep.subr.mxu1 %v23190_v0  ;;  %20861 = vmatprep.subr.mxu0 %v23190_v0 }
0x2a88   :  { %20849 = vmatmul.mubr.msk.f32.vlgmr.msra.gmra.mrb[120].mxu1 %vm467_vm4, %v11762_v31  ;;  %20854 = vmatmul.mubr.msk.f32.vlgmr.msra.gmra.mrb[122].mxu0 %vm467_vm4, %v11762_v31 }
0x2a89   :  { %20857 = vmatpush3.msra.mxu1 %v12060_v3  ;;  %20858 = vmatprep.mubr.msk.f32.mxu1 %vm23191_vm0, %v23190_v0 }
0x2a8a   :  { %20863 = vmatprep.mubr.msk.f32.mxu0 %vm23191_vm0, %v23190_v0  ;;  %20866 = vmatprep.subr.mxu1 %v23190_v0 }
0x2aab   :  { %v11759_v40 = vpop.xlane.xlu0 %11758 }
0x2aac   :  { %22582 = vrcp.f32 %v11759_v40 }
0x2aaf   :  { %v12136_v22 = vpop.permute.xlu0 %12135 }
0x2ab0   :  { %20862 = vmatpush3.msra.mxu0 %v12136_v22 }
0x2ab1   :  { %20871 = vmatprep.subr.mxu0 %v23190_v0 }
0x2ab3   :  { %v12282_v44 = vpop.permute.xlu0 %12281 }
0x2ab6   :  { %v22583_v20 = vpop.eup %22582 }
0x2ab7   :  { %v12435_v16 = vpop.permute.xlu0 %12434  ;;  %v11763_v50 = vmul.f32 %v22583_v20, %v22579_v25 }
0x2ab9   :  { %20859 = vmatmul.mubr.msk.f32.vlgmr.msra.gmra.mrb[122].mxu1 %vm467_vm4, %v11763_v50  ;;  %20864 = vmatmul.mubr.msk.f32.vlgmr.msra.gmra.mrb[124].mxu0 %vm467_vm4, %v11763_v50 }
0x2aba   :  { %20867 = vmatpush3.msra.mxu1 %v12209_v58  ;;  %20872 = vmatpush3.msra.mxu0 %v12282_v44 }
0x2abb   :  { %v12433_v48 = vpop.permute.xlu0 %12432  ;;  %20868 = vmatprep.mubr.msk.f32.mxu1 %vm23191_vm0, %v23190_v0  ;;  %20873 = vmatprep.mubr.msk.f32.mxu0 %vm23191_vm0, %v23190_v0 }
0x2abc   :  { %20876 = vmatprep.subr.mxu1 %v23190_v0  ;;  %20896 = vmatprep.subr.mxu0 %v23190_v0 }
0x2abd   :  { %20869 = vmatmul.mubr.msk.f32.vlgmr.msra.gmra.mrb[124].mxu1 %vm467_vm4, %v11763_v50  ;;  %20874 = vmatmul.mubr.msk.f32.vlgmr.msra.gmra.mrb[126].mxu0 %vm467_vm4, %v11763_v50 }
0x2abe   :  { %20878 = vmatprep.mubr.msk.f32.mxu1 %vm23191_vm0, %v23190_v0  ;;  %20898 = vmatprep.mubr.msk.f32.mxu0 %vm23191_vm0, %v23190_v0 }
0x2abf   :  { %v12513_v49 = vpop.permute.xlu0 %12512 }
0x2ac1   :  { %20877 = vmatpush3.xpose.msk.msra.mxu1 %vm467_vm4, %v12357_v11  ;;  %20897 = vmatpush3.xpose.msk.msra.mxu0 %vm467_vm4, %v12669_v12 }
0x2ac2   :  { %20881 = vmatprep.subr.mxu1 %v23190_v0  ;;  %20901 = vmatprep.subr.mxu0 %v23190_v0 }
0x2ac3   :  { %v12511_v52 = vpop.permute.xlu0 %12510 }
0x2ac4   :  { %20879 = vmatmul.mubr.msk.f32.vlgmr.msra.gmra.mrb[126].mxu1 %vm467_vm4, %v12355_v53  ;;  %20899 = vmatmul.mubr.msk.f32.vlgmr.msra.gmra.mrb[128].mxu0 %vm467_vm4, %v12667_v13 }
0x2ac5   :  { %20882 = vmatpush3.xpose.msk.msra.mxu1 %vm467_vm4, %v12435_v16  ;;  %20902 = vmatpush3.xpose.msk.msra.mxu0 %vm467_vm4, %v12747_v8 }
0x2ac6   :  { %20883 = vmatprep.mubr.msk.f32.mxu1 %vm23191_vm0, %v23190_v0  ;;  %20886 = vmatprep.subr.mxu1 %v23190_v0 }
0x2ac7   :  { %20903 = vmatprep.mubr.msk.f32.mxu0 %vm23191_vm0, %v23190_v0  ;;  %20906 = vmatprep.subr.mxu0 %v23190_v0  ;;  %v12591_v6 = vpop.permute.xlu0 %12590 }
0x2acb   :  { %v12589_v3 = vpop.permute.xlu0 %12588 }
0x2acc   :  { %20884 = vmatmul.mubr.msk.f32.vlgmr.msra.gmra.mrb[126].mxu1 %vm467_vm4, %v12433_v48  ;;  %20904 = vmatmul.mubr.msk.f32.vlgmr.msra.gmra.mrb[128].mxu0 %vm467_vm4, %v12745_v9 }
0x2acd   :  { %20887 = vmatpush3.xpose.msk.msra.mxu1 %vm467_vm4, %v12513_v49  ;;  %20907 = vmatpush3.xpose.msk.msra.mxu0 %vm467_vm4, %v12825_v42 }
0x2ace   :  { %20888 = vmatprep.mubr.msk.f32.mxu1 %vm23191_vm0, %v23190_v0  ;;  %20891 = vmatprep.subr.mxu1 %v23190_v0 }
0x2acf   :  { %20908 = vmatprep.mubr.msk.f32.mxu0 %vm23191_vm0, %v23190_v0  ;;  %20911 = vmatprep.subr.mxu0 %v23190_v0  ;;  %v12903_v30 = vpop.permute.xlu0 %12902 }
0x2ad4   :  { %20889 = vmatmul.mubr.msk.f32.vlgmr.msra.gmra.mrb[126].mxu1 %vm467_vm4, %v12511_v52  ;;  %20909 = vmatmul.mubr.msk.f32.vlgmr.msra.gmra.mrb[128].mxu0 %vm467_vm4, %v12823_v41 }
0x2ad5   :  { %20892 = vmatpush3.xpose.msk.msra.mxu1 %vm467_vm4, %v12591_v6  ;;  %20912 = vmatpush3.xpose.msk.msra.mxu0 %vm467_vm4, %v12903_v30 }
0x2ad6   :  { %20893 = vmatprep.mubr.msk.f32.mxu1 %vm23191_vm0, %v23190_v0  ;;  %20913 = vmatprep.mubr.msk.f32.mxu0 %vm23191_vm0, %v23190_v0 }
0x2ad7   :  { %20916 = vmatprep.subr.mxu1 %v23190_v0  ;;  %20921 = vmatprep.subr.mxu0 %v23190_v0 }
0x2adc   :  { %20894 = vmatmul.mubr.msk.f32.vlgmr.msra.gmra.mrb[126].mxu1 %vm467_vm4, %v12589_v3  ;;  %20914 = vmatmul.mubr.msk.f32.vlgmr.msra.gmra.mrb[128].mxu0 %vm467_vm4, %v12901_v56 }
0x2add   :  { %20918 = vmatprep.mubr.msk.f32.mxu1 %vm23191_vm0, %v23190_v0  ;;  %20923 = vmatprep.mubr.msk.f32.mxu0 %vm23191_vm0, %v23190_v0 }
0x2b57   :  { %v25723_v21 = vpop.f32.mrb[118].mxu1  ;;  %v25725_v23 = vpop.f32.mrb[120].mxu0 }
0x2b58   :  { %v20840_v25 = vpop.f32.mrb[119].mxu1  ;;  %v20845_v45 = vpop.f32.mrb[121].mxu0 }
0x2b5b   :  { %v25727_v34 = vpop.f32.mrb[120].mxu1  ;;  %v25729_v1 = vpop.f32.mrb[122].mxu0 }
0x2b5c   :  { %v20850_v31 = vpop.f32.mrb[121].mxu1  ;;  %v20855_v4 = vpop.f32.mrb[123].mxu0 }
0x2b8c   :  { %v25731_v58 = vpop.f32.mrb[122].mxu1  ;;  %v25733_v11 = vpop.f32.mrb[124].mxu0 }
0x2b8d   :  { %v20860_v40 = vpop.f32.mrb[123].mxu1  ;;  %v20865_v53 = vpop.f32.mrb[125].mxu0 }
0x2b90   :  { %v25735_v22 = vpop.f32.mrb[124].mxu1  ;;  %v25737_v44 = vpop.f32.mrb[126].mxu0 }
0x2b91   :  { %v20870_v12 = vpop.f32.mrb[125].mxu1  ;;  %v20875_v20 = vpop.f32.mrb[127].mxu0 }
0x2baf   :  { %v12662_v16 = vpop.f32.mrb[126].mxu1  ;;  %v12974_v50 = vpop.f32.mrb[128].mxu0 }
0x2bb0   :  { %v20895_v13 = vpop.f32.mrb[127].mxu1  ;;  %v20915_v48 = vpop.f32.mrb[129].mxu0  ;;  %v12984_v49 = vsel %vm467_vm4, %v12662_v16, -inf  ;;  %v12987_v8 = vsel %vm467_vm4, %v12974_v50, -inf }
0x2bb1   :  { %12985 = vmax.xlane.f32.xlu0 %v12984_v49  ;;  %12988 = vmax.xlane.f32.xlu1 %v12987_v8 }
0x2bc2   :  { %13155 = vrot.lane.b32.xlu1 %v25371_v38, %s23199_s10 }
0x2bc6   :  { %13301 = vrot.lane.b32.xlu1 %v25365_v47, %s23199_s10 }
0x2bc7   :  { %13006 = vrot.lane.b32.xlu0 %v25357_v19, %s23199_s10 }
0x2bca   :  { %13082 = vrot.lane.b32.xlu1 %v25355_v36, %s23199_s10 }
0x2bce   :  { %13228 = vrot.lane.b32.xlu1 %v25375_v60, %s23199_s10 }
0x2bd2   :  { %13598 = vrot.lane.b32.xlu1 %v25357_v19, %s23200_s11 }
0x2bd6   :  { %13596 = vrot.lane.b32.xlu1 %v25389_v59, %s23201_s15 }
0x2bda   :  { %13910 = vrot.lane.b32.xlu1 %v25365_v47, %s23200_s11 }
0x2bde   :  { %13908 = vrot.lane.b32.xlu1 %v25408_v5, %s23201_s15 }
0x2be2   :  { %13988 = vrot.lane.b32.xlu1 %v25363_v32, %s23200_s11 }
0x2be6   :  { %13986 = vrot.lane.b32.xlu1 %v25427_v37, %s23201_s15 }
0x2bea   :  { %14066 = vrot.lane.b32.xlu1 %v25381_v39, %s23200_s11 }
0x2bee   :  { %14064 = vrot.lane.b32.xlu1 %v25444_v29, %s23201_s15 }
0x2bf2   :  { %14142 = vrot.lane.b32.xlu1 %v25453_v28, %s23201_s15 }
0x2c3e   :  { %v12989_v59 = vpop.xlane.xlu1 %12988  ;;  %v12986_v52 = vpop.xlane.xlu0 %12985 }
0x2c3f   :  { %v12990_v9 = vsub.f32 %v12662_v16, %v12986_v52  ;;  %v12991_v28 = vsub.f32 %v12974_v50, %v12989_v59 }
0x2c41   :  { %v12992_v6 = vmul.f32 1.442695, %v12990_v9  ;;  %v12994_v30 = vmul.f32 1.442695, %v12991_v28 }
0x2c42   :  { %v13156_v5 = vpop.permute.xlu1 %13155  ;;  %v13007_v42 = vpop.permute.xlu0 %13006 }
0x2c43   :  { %20917 = vmatpush3.msra.mxu1 %v13007_v42  ;;  %22584 = vpow2.f32 %v12992_v6 }
0x2c44   :  { %20926 = vmatprep.subr.mxu1 %v23190_v0  ;;  %22586 = vpow2.f32 %v12994_v30 }
0x2c46   :  { %v13302_v37 = vpop.permute.xlu1 %13301 }
0x2c4a   :  { %v13083_v3 = vpop.permute.xlu1 %13082 }
0x2c4b   :  { %20922 = vmatpush3.msra.mxu0 %v13083_v3 }
0x2c4c   :  { %20931 = vmatprep.subr.mxu0 %v23190_v0 }
0x2c4d   :  { %v22585_v41 = vpop.eup %22584 }
0x2c4e   :  { %v12996_v29 = vsel %vm467_vm4, %v22585_v41, 0.0  ;;  %v22587_v56 = vpop.eup %22586 }
0x2c4f   :  { %12997 = vadd.xlane.f32.xlu0 %v12996_v29  ;;  %v12999_v25 = vsel %vm467_vm4, %v22587_v56, 0.0 }
0x2c65   :  { %13450 = vrot.lane.b32.xlu0 %v25381_v39, %s23199_s10 }
0x2c84   :  { %13000 = vadd.xlane.f32.xlu0 %v12999_v25 }
0x2c9a   :  { %13377 = vrot.lane.b32.xlu0 %v25363_v32, %s23199_s10 }
0x2c9e   :  { %13523 = vrot.lane.b32.xlu0 %v25379_v62, %s23199_s10 }
0x2ca2   :  { %13676 = vrot.lane.b32.xlu0 %v25355_v36, %s23200_s11 }
0x2ca6   :  { %13674 = vrot.lane.b32.xlu0 %v25399_v17, %s23201_s15  ;;  %v13229_v17 = vpop.permute.xlu1 %13228 }
0x2caa   :  { %13754 = vrot.lane.b32.xlu0 %v25371_v38, %s23200_s11 }
0x2cae   :  { %13752 = vrot.lane.b32.xlu0 %v25415_v15, %s23201_s15 }
0x2cb2   :  { %13832 = vrot.lane.b32.xlu0 %v25375_v60, %s23200_s11 }
0x2cb6   :  { %13830 = vrot.lane.b32.xlu0 %v25436_v26, %s23201_s15  ;;  %v13599_v26 = vpop.permute.xlu1 %13598 }
0x2cba   :  { %14144 = vrot.lane.b32.xlu0 %v25379_v62, %s23200_s11  ;;  %v13597_v53 = vpop.permute.xlu1 %13596 }
0x2cbe   :  { %v13911_v16 = vpop.permute.xlu1 %13910 }
0x2cc2   :  { %v13909_v49 = vpop.permute.xlu1 %13908 }
0x2cc6   :  { %v13989_v52 = vpop.permute.xlu1 %13988 }
0x2cca   :  { %v13987_v6 = vpop.permute.xlu1 %13986 }
0x2cce   :  { %v14067_v42 = vpop.permute.xlu1 %14066 }
0x2cd2   :  { %v14065_v3 = vpop.permute.xlu1 %14064 }
0x2cd6   :  { %v14143_v29 = vpop.permute.xlu1 %14142 }
0x2cdc   :  { %v12998_v45 = vpop.xlane.xlu0 %12997 }
0x2cdd   :  { %22588 = vrcp.f32 %v12998_v45 }
0x2ce0   :  { %v13451_v15 = vpop.permute.xlu0 %13450 }
0x2ce7   :  { %v22589_v31 = vpop.eup %22588 }
0x2ce8   :  { %v13004_v4 = vmul.f32 %v22589_v31, %v22585_v41 }
0x2cea   :  { %20919 = vmatmul.mubr.msk.f32.vlgmr.msra.gmra.mrb[128].mxu1 %vm467_vm4, %v13004_v4  ;;  %20924 = vmatmul.mubr.msk.f32.vlgmr.msra.gmra.mrb[130].mxu0 %vm467_vm4, %v13004_v4 }
0x2ceb   :  { %20927 = vmatpush3.msra.mxu1 %v13156_v5  ;;  %20932 = vmatpush3.msra.mxu0 %v13229_v17 }
0x2cec   :  { %20928 = vmatprep.mubr.msk.f32.mxu1 %vm23191_vm0, %v23190_v0  ;;  %20933 = vmatprep.mubr.msk.f32.mxu0 %vm23191_vm0, %v23190_v0 }
0x2ced   :  { %20936 = vmatprep.subr.mxu1 %v23190_v0  ;;  %20941 = vmatprep.subr.mxu0 %v23190_v0 }
0x2cee   :  { %20929 = vmatmul.mubr.msk.f32.vlgmr.msra.gmra.mrb[130].mxu1 %vm467_vm4, %v13004_v4  ;;  %20934 = vmatmul.mubr.msk.f32.vlgmr.msra.gmra.mrb[132].mxu0 %vm467_vm4, %v13004_v4 }
0x2cef   :  { %20937 = vmatpush3.msra.mxu1 %v13302_v37  ;;  %20938 = vmatprep.mubr.msk.f32.mxu1 %vm23191_vm0, %v23190_v0 }
0x2cf0   :  { %20943 = vmatprep.mubr.msk.f32.mxu0 %vm23191_vm0, %v23190_v0  ;;  %20946 = vmatprep.subr.mxu1 %v23190_v0 }
0x2d11   :  { %v13001_v40 = vpop.xlane.xlu0 %13000 }
0x2d12   :  { %22590 = vrcp.f32 %v13001_v40 }
0x2d15   :  { %v13378_v12 = vpop.permute.xlu0 %13377 }
0x2d16   :  { %20942 = vmatpush3.msra.mxu0 %v13378_v12 }
0x2d17   :  { %20951 = vmatprep.subr.mxu0 %v23190_v0 }
0x2d19   :  { %v13524_v20 = vpop.permute.xlu0 %13523 }
0x2d1c   :  { %v22591_v50 = vpop.eup %22590 }
0x2d1d   :  { %v13677_v13 = vpop.permute.xlu0 %13676  ;;  %v13005_v48 = vmul.f32 %v22591_v50, %v22587_v56 }
0x2d1f   :  { %20939 = vmatmul.mubr.msk.f32.vlgmr.msra.gmra.mrb[132].mxu1 %vm467_vm4, %v13005_v48  ;;  %20944 = vmatmul.mubr.msk.f32.vlgmr.msra.gmra.mrb[134].mxu0 %vm467_vm4, %v13005_v48 }
0x2d20   :  { %20947 = vmatpush3.msra.mxu1 %v13451_v15  ;;  %20952 = vmatpush3.msra.mxu0 %v13524_v20 }
0x2d21   :  { %v13675_v8 = vpop.permute.xlu0 %13674  ;;  %20948 = vmatprep.mubr.msk.f32.mxu1 %vm23191_vm0, %v23190_v0  ;;  %20953 = vmatprep.mubr.msk.f32.mxu0 %vm23191_vm0, %v23190_v0 }
0x2d22   :  { %20956 = vmatprep.subr.mxu1 %v23190_v0  ;;  %20976 = vmatprep.subr.mxu0 %v23190_v0 }
0x2d23   :  { %20949 = vmatmul.mubr.msk.f32.vlgmr.msra.gmra.mrb[134].mxu1 %vm467_vm4, %v13005_v48  ;;  %20954 = vmatmul.mubr.msk.f32.vlgmr.msra.gmra.mrb[136].mxu0 %vm467_vm4, %v13005_v48 }
0x2d24   :  { %20958 = vmatprep.mubr.msk.f32.mxu1 %vm23191_vm0, %v23190_v0  ;;  %20978 = vmatprep.mubr.msk.f32.mxu0 %vm23191_vm0, %v23190_v0 }
0x2d25   :  { %v13755_v59 = vpop.permute.xlu0 %13754 }
0x2d27   :  { %20957 = vmatpush3.xpose.msk.msra.mxu1 %vm467_vm4, %v13599_v26  ;;  %20977 = vmatpush3.xpose.msk.msra.mxu0 %vm467_vm4, %v13911_v16 }
0x2d28   :  { %20961 = vmatprep.subr.mxu1 %v23190_v0  ;;  %20981 = vmatprep.subr.mxu0 %v23190_v0 }
0x2d29   :  { %v13753_v9 = vpop.permute.xlu0 %13752 }
0x2d2a   :  { %20959 = vmatmul.mubr.msk.f32.vlgmr.msra.gmra.mrb[136].mxu1 %vm467_vm4, %v13597_v53  ;;  %20979 = vmatmul.mubr.msk.f32.vlgmr.msra.gmra.mrb[138].mxu0 %vm467_vm4, %v13909_v49 }
0x2d2b   :  { %20962 = vmatpush3.xpose.msk.msra.mxu1 %vm467_vm4, %v13677_v13  ;;  %20982 = vmatpush3.xpose.msk.msra.mxu0 %vm467_vm4, %v13989_v52 }
0x2d2c   :  { %20963 = vmatprep.mubr.msk.f32.mxu1 %vm23191_vm0, %v23190_v0  ;;  %20966 = vmatprep.subr.mxu1 %v23190_v0 }
0x2d2d   :  { %20983 = vmatprep.mubr.msk.f32.mxu0 %vm23191_vm0, %v23190_v0  ;;  %20986 = vmatprep.subr.mxu0 %v23190_v0  ;;  %v13833_v5 = vpop.permute.xlu0 %13832 }
0x2d31   :  { %v13831_v37 = vpop.permute.xlu0 %13830 }
0x2d32   :  { %20964 = vmatmul.mubr.msk.f32.vlgmr.msra.gmra.mrb[136].mxu1 %vm467_vm4, %v13675_v8  ;;  %20984 = vmatmul.mubr.msk.f32.vlgmr.msra.gmra.mrb[138].mxu0 %vm467_vm4, %v13987_v6 }
0x2d33   :  { %20967 = vmatpush3.xpose.msk.msra.mxu1 %vm467_vm4, %v13755_v59  ;;  %20987 = vmatpush3.xpose.msk.msra.mxu0 %vm467_vm4, %v14067_v42 }
0x2d34   :  { %20968 = vmatprep.mubr.msk.f32.mxu1 %vm23191_vm0, %v23190_v0  ;;  %20971 = vmatprep.subr.mxu1 %v23190_v0 }
0x2d35   :  { %20988 = vmatprep.mubr.msk.f32.mxu0 %vm23191_vm0, %v23190_v0  ;;  %20991 = vmatprep.subr.mxu0 %v23190_v0  ;;  %v14145_v41 = vpop.permute.xlu0 %14144 }
0x2d3a   :  { %20969 = vmatmul.mubr.msk.f32.vlgmr.msra.gmra.mrb[136].mxu1 %vm467_vm4, %v13753_v9  ;;  %20989 = vmatmul.mubr.msk.f32.vlgmr.msra.gmra.mrb[138].mxu0 %vm467_vm4, %v14065_v3 }
0x2d3b   :  { %20972 = vmatpush3.xpose.msk.msra.mxu1 %vm467_vm4, %v13833_v5  ;;  %20992 = vmatpush3.xpose.msk.msra.mxu0 %vm467_vm4, %v14145_v41 }
0x2d3c   :  { %20973 = vmatprep.mubr.msk.f32.mxu1 %vm23191_vm0, %v23190_v0  ;;  %20993 = vmatprep.mubr.msk.f32.mxu0 %vm23191_vm0, %v23190_v0 }
0x2d3d   :  { %20996 = vmatprep.subr.mxu1 %v23190_v0  ;;  %21001 = vmatprep.subr.mxu0 %v23190_v0 }
0x2d42   :  { %20974 = vmatmul.mubr.msk.f32.vlgmr.msra.gmra.mrb[136].mxu1 %vm467_vm4, %v13831_v37  ;;  %20994 = vmatmul.mubr.msk.f32.vlgmr.msra.gmra.mrb[138].mxu0 %vm467_vm4, %v14143_v29 }
0x2d43   :  { %20998 = vmatprep.mubr.msk.f32.mxu1 %vm23191_vm0, %v23190_v0  ;;  %21003 = vmatprep.mubr.msk.f32.mxu0 %vm23191_vm0, %v23190_v0 }
0x2dbd   :  { %v13078_v28 = vpop.f32.mrb[128].mxu1  ;;  %v13151_v30 = vpop.f32.mrb[130].mxu0 }
0x2dbe   :  { %v20920_v56 = vpop.f32.mrb[129].mxu1  ;;  %v20925_v25 = vpop.f32.mrb[131].mxu0 }
0x2dbf   :  { %v19016_v56 = vld [vmem:[%s27111_s19 + $0x30] sm:$0xff] }
0x2dc1   :  { %v13224_v45 = vpop.f32.mrb[130].mxu1  ;;  %v13297_v31 = vpop.f32.mrb[132].mxu0 }
0x2dc2   :  { %v20930_v4 = vpop.f32.mrb[131].mxu1  ;;  %v20935_v17 = vpop.f32.mrb[133].mxu0 }
0x2df2   :  { %v13373_v15 = vpop.f32.mrb[132].mxu1  ;;  %v13446_v26 = vpop.f32.mrb[134].mxu0 }
0x2df3   :  { %v20940_v40 = vpop.f32.mrb[133].mxu1  ;;  %v20945_v53 = vpop.f32.mrb[135].mxu0 }
0x2df6   :  { %v25863_v12 = vpop.f32.mrb[134].mxu1  ;;  %v25865_v20 = vpop.f32.mrb[136].mxu0 }
0x2df7   :  { %v20950_v16 = vpop.f32.mrb[135].mxu1  ;;  %v20955_v50 = vpop.f32.mrb[137].mxu0 }
0x2e15   :  { %v13904_v13 = vpop.f32.mrb[136].mxu1  ;;  %v14216_v48 = vpop.f32.mrb[138].mxu0 }
0x2e16   :  { %v20975_v49 = vpop.f32.mrb[137].mxu1  ;;  %v20995_v8 = vpop.f32.mrb[139].mxu0  ;;  %v14226_v59 = vsel %vm467_vm4, %v13904_v13, -inf  ;;  %v14229_v52 = vsel %vm467_vm4, %v14216_v48, -inf }
0x2e17   :  { %14227 = vmax.xlane.f32.xlu0 %v14226_v59  ;;  %14230 = vmax.xlane.f32.xlu1 %v14229_v52 }
0x2e28   :  { %14324 = vrot.lane.b32.xlu1 %v25355_v36, %s23202_s3 }
0x2e2c   :  { %14397 = vrot.lane.b32.xlu1 %v25371_v38, %s23202_s3 }
0x2e2d   :  { %14248 = vrot.lane.b32.xlu0 %v25357_v19, %s23202_s3 }
0x2e30   :  { %14470 = vrot.lane.b32.xlu1 %v25375_v60, %s23202_s3 }
0x2e34   :  { %14619 = vrot.lane.b32.xlu1 %v25363_v32, %s23202_s3 }
0x2e38   :  { %14765 = vrot.lane.b32.xlu1 %v25379_v62, %s23202_s3 }
0x2e3c   :  { %14848 = vrot.lane.b32.xlu1 %v25725_v23, %s23203_s16 }
0x2e40   :  { %14880 = vrot.lane.b32.xlu1 %v13151_v30, %s23178_s22  ;;  %v19015_v30 = vld [vmem:[%s27111_s19 + $0x28] sm:$0xff] }
0x2e44   :  { %14852 = vrot.lane.b32.xlu1 %v25729_v1, %s23203_s16 }
0x2e48   :  { %14884 = vrot.lane.b32.xlu1 %v13297_v31, %s23178_s22 }
0x2e4c   :  { %14856 = vrot.lane.b32.xlu1 %v25733_v11, %s23203_s16 }
0x2e50   :  { %14888 = vrot.lane.b32.xlu1 %v13446_v26, %s23178_s22 }
0x2e54   :  { %14860 = vrot.lane.b32.xlu1 %v25737_v44, %s23203_s16 }
0x2ea4   :  { %v14231_v36 = vpop.xlane.xlu1 %14230  ;;  %v14228_v19 = vpop.xlane.xlu0 %14227 }
0x2ea5   :  { %v14233_v32 = vsub.f32 %v14216_v48, %v14231_v36  ;;  %v14232_v38 = vsub.f32 %v13904_v13, %v14228_v19 }
0x2ea7   :  { %v14234_v60 = vmul.f32 1.442695, %v14232_v38  ;;  %v14236_v62 = vmul.f32 1.442695, %v14233_v32 }
0x2ea8   :  { %v14325_v23 = vpop.permute.xlu1 %14324  ;;  %v14249_v9 = vpop.permute.xlu0 %14248 }
0x2ea9   :  { %20997 = vmatpush3.msra.mxu1 %v14249_v9  ;;  %21002 = vmatpush3.msra.mxu0 %v14325_v23  ;;  %22592 = vpow2.f32 %v14234_v60 }
0x2eaa   :  { %21006 = vmatprep.subr.mxu1 %v23190_v0  ;;  %21011 = vmatprep.subr.mxu0 %v23190_v0  ;;  %22594 = vpow2.f32 %v14236_v62 }
0x2eb3   :  { %v22593_v1 = vpop.eup %22592 }
0x2eb4   :  { %v14238_v11 = vsel %vm467_vm4, %v22593_v1, 0.0  ;;  %v22595_v44 = vpop.eup %22594 }
0x2eb5   :  { %14239 = vadd.xlane.f32.xlu0 %v14238_v11  ;;  %v14241_v6 = vsel %vm467_vm4, %v22595_v44, 0.0 }
0x2eb9   :  { %14242 = vadd.xlane.f32.xlu0 %v14241_v6 }
0x2ecf   :  { %14543 = vrot.lane.b32.xlu0 %v25365_v47, %s23202_s3 }
0x2ed3   :  { %14692 = vrot.lane.b32.xlu0 %v25381_v39, %s23202_s3  ;;  %v14398_v39 = vpop.permute.xlu1 %14397 }
0x2ed7   :  { %14846 = vrot.lane.b32.xlu0 %v25723_v21, %s23203_s16  ;;  %v14471_v21 = vpop.permute.xlu1 %14470 }
0x2edb   :  { %14878 = vrot.lane.b32.xlu0 %v13078_v28, %s23178_s22  ;;  %v19014_v28 = vld [vmem:[%s27111_s19 + $0x20] sm:$0xff] }
0x2edc   :  { %v21616_v25 = vpack.c.bf16 %v19015_v30, %v19014_v28 }
0x2edf   :  { %14850 = vrot.lane.b32.xlu0 %v25727_v34, %s23203_s16  ;;  %v14620_v34 = vpop.permute.xlu1 %14619 }
0x2ee3   :  { %14882 = vrot.lane.b32.xlu0 %v13224_v45, %s23178_s22  ;;  %v14766_v41 = vpop.permute.xlu1 %14765  ;;  %v19017_v45 = vld [vmem:[%s27111_s19 + $0x38] sm:$0xff] }
0x2ee4   :  { %v21620_v31 = vpack.c.bf16 %v19017_v45, %v19016_v56 }
0x2ee7   :  { %14854 = vrot.lane.b32.xlu0 %v25731_v58, %s23203_s16  ;;  %v14849_v19 = vpop.permute.xlu1 %14848 }
0x2eeb   :  { %14886 = vrot.lane.b32.xlu0 %v13373_v15, %s23178_s22  ;;  %v14881_v38 = vpop.permute.xlu1 %14880 }
0x2eef   :  { %14858 = vrot.lane.b32.xlu0 %v25735_v22, %s23203_s16  ;;  %v14853_v62 = vpop.permute.xlu1 %14852 }
0x2ef3   :  { %v14885_v9 = vpop.permute.xlu1 %14884 }
0x2ef7   :  { %v14857_v11 = vpop.permute.xlu1 %14856 }
0x2f42   :  { %v14240_v47 = vpop.xlane.xlu0 %14239 }
0x2f43   :  { %22596 = vrcp.f32 %v14240_v47 }
0x2f46   :  { %v14243_v5 = vpop.xlane.xlu0 %14242 }
0x2f47   :  { %22598 = vrcp.f32 %v14243_v5 }
0x2f4a   :  { %v14544_v58 = vpop.permute.xlu0 %14543 }
0x2f4d   :  { %v22597_v42 = vpop.eup %22596 }
0x2f4e   :  { %v14246_v37 = vmul.f32 %v22597_v42, %v22593_v1  ;;  %v14693_v29 = vpop.permute.xlu0 %14692 }
0x2f50   :  { %20999 = vmatmul.mubr.msk.f32.vlgmr.msra.gmra.mrb[138].mxu1 %vm467_vm4, %v14246_v37  ;;  %21004 = vmatmul.mubr.msk.f32.vlgmr.msra.gmra.mrb[140].mxu0 %vm467_vm4, %v14246_v37 }
0x2f51   :  { %21007 = vmatpush3.msra.mxu1 %v14398_v39  ;;  %21012 = vmatpush3.msra.mxu0 %v14471_v21  ;;  %v22599_v22 = vpop.eup %22598 }
0x2f52   :  { %21008 = vmatprep.mubr.msk.f32.mxu1 %vm23191_vm0, %v23190_v0  ;;  %21013 = vmatprep.mubr.msk.f32.mxu0 %vm23191_vm0, %v23190_v0  ;;  %v14247_v3 = vmul.f32 %v22599_v22, %v22595_v44  ;;  %v14847_v32 = vpop.permute.xlu0 %14846 }
0x2f53   :  { %21016 = vmatprep.subr.mxu1 %v23190_v0  ;;  %21021 = vmatprep.subr.mxu0 %v23190_v0  ;;  %v14934_v5 = vsel %vm467_vm4, %v25583_v61, %v14847_v32 }
0x2f54   :  { %21009 = vmatmul.mubr.msk.f32.vlgmr.msra.gmra.mrb[140].mxu1 %vm467_vm4, %v14246_v37  ;;  %21014 = vmatmul.mubr.msk.f32.vlgmr.msra.gmra.mrb[142].mxu0 %vm467_vm4, %v14246_v37 }
0x2f55   :  { %21017 = vmatpush3.msra.mxu1 %v14544_v58  ;;  %21022 = vmatpush3.msra.mxu0 %v14620_v34 }
0x2f56   :  { %21018 = vmatprep.mubr.msk.f32.mxu1 %vm23191_vm0, %v23190_v0  ;;  %21023 = vmatprep.mubr.msk.f32.mxu0 %vm23191_vm0, %v23190_v0  ;;  %v14879_v60 = vpop.permute.xlu0 %14878 }
0x2f57   :  { %21026 = vmatprep.subr.mxu1 %v23190_v0  ;;  %21031 = vmatprep.subr.mxu0 %v23190_v0  ;;  %v14942_v42 = vsel %vm302_vm3, %v14934_v5, %v14879_v60 }
0x2f58   :  { %21019 = vmatmul.mubr.msk.f32.vlgmr.msra.gmra.mrb[142].mxu1 %vm467_vm4, %v14247_v3  ;;  %21024 = vmatmul.mubr.msk.f32.vlgmr.msra.gmra.mrb[144].mxu0 %vm467_vm4, %v14247_v3 }
0x2f59   :  { %21027 = vmatpush3.msra.mxu1 %v14693_v29  ;;  %21032 = vmatpush3.msra.mxu0 %v14766_v41 }
0x2f5a   :  { %21028 = vmatprep.mubr.msk.f32.mxu1 %vm23191_vm0, %v23190_v0  ;;  %21033 = vmatprep.mubr.msk.f32.mxu0 %vm23191_vm0, %v23190_v0  ;;  %v14851_v23 = vpop.permute.xlu0 %14850 }
0x2f5b   :  { %21617 = vmatprep.subr.bf16.mxu1 %v21616_v25 }
0x2f5c   :  { %21029 = vmatmul.mubr.msk.f32.vlgmr.msra.gmra.mrb[144].mxu1 %vm467_vm4, %v14247_v3  ;;  %21034 = vmatmul.mubr.msk.f32.vlgmr.msra.gmra.mrb[146].mxu0 %vm467_vm4, %v14247_v3  ;;  %v14937_v3 = vsel %vm467_vm4, %v25589_v14, %v14853_v62  ;;  %v14939_v14 = vsel %vm467_vm4, %v25593_v57, %v14857_v11 }
0x2f5d   :  { %21619 = vmatpush3.bf16.msra.mxu1 %v21616_v25  ;;  %v14945_v61 = vsel %vm302_vm3, %v14937_v3, %v14885_v9 }
0x2f5e   :  { %21621 = vmatprep.subr.bf16.mxu1 %v21620_v31  ;;  %v14883_v1 = vpop.permute.xlu0 %14882 }
0x2f61   :  { %21623 = vmatpush3.bf16.msra.mxu1 %v21620_v31 }
0x2f62   :  { %v14855_v44 = vpop.permute.xlu0 %14854 }
0x2f66   :  { %v14887_v6 = vpop.permute.xlu0 %14886 }
0x2f6a   :  { %v14859_v39 = vpop.permute.xlu0 %14858 }
0x3023   :  { %v14320_v4 = vpop.f32.mrb[138].mxu1  ;;  %v14393_v17 = vpop.f32.mrb[140].mxu0 }
0x3024   :  { %14912 = vrot.lane.b32.xlu1 %v14393_v17, %s23204_s4  ;;  %v21005_v15 = vpop.f32.mrb[141].mxu0  ;;  %14910 = vrot.lane.b32.xlu0 %v14320_v4, %s23204_s4  ;;  %v21000_v0 = vpop.f32.mrb[139].mxu1 }
0x3027   :  { %v14466_v26 = vpop.f32.mrb[140].mxu1  ;;  %v14539_v40 = vpop.f32.mrb[142].mxu0 }
0x3028   :  { %14916 = vrot.lane.b32.xlu1 %v14539_v40, %s23204_s4  ;;  %v21015_v53 = vpop.f32.mrb[143].mxu0  ;;  %14914 = vrot.lane.b32.xlu0 %v14466_v26, %s23204_s4  ;;  %v21010_v16 = vpop.f32.mrb[141].mxu1  ;;  %v14940_v26 = vsel %vm467_vm4, %v25595_v7, %v14859_v39 }
0x302b   :  { %v14615_v50 = vpop.f32.mrb[142].mxu1  ;;  %v14688_v13 = vpop.f32.mrb[144].mxu0 }
0x302c   :  { %14920 = vrot.lane.b32.xlu1 %v14688_v13, %s23204_s4  ;;  %v21025_v48 = vpop.f32.mrb[145].mxu0  ;;  %14918 = vrot.lane.b32.xlu0 %v14615_v50, %s23204_s4  ;;  %v21020_v49 = vpop.f32.mrb[143].mxu1 }
0x302d   :  { %v19124_v49 = vld [vmem:[%s27112_s21 + $0x1] ss:$0 sm:$0xff] }
0x302f   :  { %v14761_v8 = vpop.f32.mrb[144].mxu1  ;;  %v14834_v59 = vpop.f32.mrb[146].mxu0 }
0x3030   :  { %14892 = vrot.lane.b32.xlu1 %v25865_v20, %s23178_s22  ;;  %v21035_v52 = vpop.f32.mrb[147].mxu0  ;;  %14890 = vrot.lane.b32.xlu0 %v25863_v12, %s23178_s22  ;;  %v21030_v36 = vpop.f32.mrb[145].mxu1  ;;  %v14935_v12 = vsel %vm467_vm4, %v25585_v54, %v14849_v19  ;;  %v14936_v54 = vsel %vm467_vm4, %v25587_v63, %v14851_v23  ;;  %v14938_v63 = vsel %vm467_vm4, %v25591_v46, %v14855_v44 }
0x3031   :  { %v14889_v20 = vpop.permute.xlu1 %14888  ;;  %v14943_v21 = vsel %vm302_vm3, %v14935_v12, %v14881_v38  ;;  %v14944_v41 = vsel %vm302_vm3, %v14936_v54, %v14883_v1  ;;  %v14946_v45 = vsel %vm302_vm3, %v14938_v63, %v14887_v6 }
0x3032   :  { %v14947_v25 = vsel %vm302_vm3, %v14939_v14, %v14889_v20 }
0x3034   :  { %14924 = vrot.lane.b32.xlu1 %v14834_v59, %s23204_s4  ;;  %14922 = vrot.lane.b32.xlu0 %v14761_v8, %s23204_s4 }
0x3035   :  { %v14861_v47 = vpop.permute.xlu1 %14860 }
0x3036   :  { %v14941_v46 = vsel %vm467_vm4, %v25597_v2, %v14861_v47 }
0x3096   :  { %v14913_v37 = vpop.permute.xlu1 %14912  ;;  %v14911_v34 = vpop.permute.xlu0 %14910 }
0x3097   :  { %v14951_v58 = vsel %vm6208_vm6, %v14943_v21, %v14913_v37  ;;  %v14950_v22 = vsel %vm6208_vm6, %v14942_v42, %v14911_v34 }
0x3098   :  { %21044 = vmatprep.mubr.msk.f32.mxu1 %vm703_vm5, %v14950_v22 }
0x3099   :  { %21045 = vmatmul.mubr.msk.f32.vlgmr.msra.gmra.mrb[146].mxu1 %vm703_vm5, %v14951_v58 }
0x309a   :  { %v14917_v29 = vpop.permute.xlu1 %14916  ;;  %v14915_v28 = vpop.permute.xlu0 %14914 }
0x309b   :  { %v14953_v30 = vsel %vm6208_vm6, %v14945_v61, %v14917_v29  ;;  %v14952_v56 = vsel %vm6208_vm6, %v14944_v41, %v14915_v28 }
0x309c   :  { %21047 = vmatprep.mubr.msk.f32.mxu1 %vm703_vm5, %v14952_v56 }
0x309d   :  { %21048 = vmatmul.mubr.msk.f32.gmra.mrb[148].mxu1 %vm703_vm5, %v14953_v30 }
0x309e   :  { %v14921_v31 = vpop.permute.xlu1 %14920  ;;  %v14919_v4 = vpop.permute.xlu0 %14918 }
0x309f   :  { %v14955_v17 = vsel %vm6208_vm6, %v14947_v25, %v14921_v31  ;;  %v14954_v15 = vsel %vm6208_vm6, %v14946_v45, %v14919_v4 }
0x30a0   :  { %21050 = vmatprep.mubr.msk.f32.mxu1 %vm703_vm5, %v14954_v15 }
0x30a1   :  { %21051 = vmatmul.mubr.msk.f32.gmra.mrb[150].mxu1 %vm703_vm5, %v14955_v17 }
0x30a2   :  { %v14893_v57 = vpop.permute.xlu1 %14892  ;;  %v14891_v0 = vpop.permute.xlu0 %14890 }
0x30a3   :  { %v14949_v40 = vsel %vm302_vm3, %v14941_v46, %v14893_v57  ;;  %v14948_v53 = vsel %vm302_vm3, %v14940_v26, %v14891_v0 }
0x30a6   :  { %v14925_v16 = vpop.permute.xlu1 %14924  ;;  %v14923_v50 = vpop.permute.xlu0 %14922 }
0x30a7   :  { %v14957_v13 = vsel %vm6208_vm6, %v14949_v40, %v14925_v16  ;;  %v14956_v48 = vsel %vm6208_vm6, %v14948_v53, %v14923_v50 }
0x30a8   :  { %21053 = vmatprep.mubr.msk.f32.mxu1 %vm703_vm5, %v14956_v48 }
0x30a9   :  { %21054 = vmatmul.mubr.msk.f32.gmra.mrb[152].mxu1 %vm703_vm5, %v14957_v13 }
0x316c   :  { %v21046_v8 = vpop.f32.mrb[146].mxu1 }
0x316d   :  { %v15060_v2 = vadd.f32 %v21046_v8, %v19124_v49  ;;  %v15054_v59 = vpop.f32.mrb[147].mxu1 }
0x316e   :  { %v15055_v52 = vadd.f32 %v19124_v49, %v15054_v59 }
0x316f   :  { %v25993_v7 = vadd.f32 %v15060_v2, %v25243_v10 }
0x3170   :  { %v25996_v36 = vadd.f32 %v15055_v52, %v25245_v24  ;;  %v21049_v19 = vpop.f32.mrb[148].mxu1 }
0x3171   :  { %v15070_v32 = vadd.f32 %v21049_v19, %v19124_v49  ;;  %v15064_v38 = vpop.f32.mrb[149].mxu1  ;;  %v15108_v60 = vsel %vm703_vm5, %v25993_v7, 0.0 }
0x3172   :  { %v15065_v62 = vadd.f32 %v19124_v49, %v15064_v38  ;;  %15109 = vadd.xlane.f32.xlu1 %v15108_v60  ;;  %v15105_v23 = vsel %vm703_vm5, %v25996_v36, 0.0 }
0x3173   :  { %v26003_v9 = vadd.f32 %v15070_v32, %v25253_v27  ;;  %15106 = vadd.xlane.f32.xlu0 %v15105_v23  ;;  %v19135_v23 = vld [vmem:[%s27113_s18 + $0x20] sm:$0xff] }
0x3174   :  { %v21052_v10 = vpop.f32.mrb[150].mxu1  ;;  %v26008_v44 = vadd.f32 %v15065_v62, %v25255_v33 }
0x3175   :  { %v15080_v1 = vadd.f32 %v21052_v10, %v19124_v49  ;;  %v15074_v11 = vpop.f32.mrb[151].mxu1  ;;  %v15114_v24 = vsel %vm703_vm5, %v26003_v9, 0.0  ;;  %v19136_v10 = vld [vmem:[%s27113_s18 + $0x28] sm:$0xff] }
0x3176   :  { %v15075_v20 = vadd.f32 %v19124_v49, %v15074_v11  ;;  %v15111_v39 = vsel %vm703_vm5, %v26008_v44, 0.0  ;;  %v19137_v11 = vld [vmem:[%s27113_s18 + $0x30] sm:$0xff] }
0x3177   :  { %v26011_v6 = vadd.f32 %v15080_v1, %v25263_v35  ;;  %15115 = vadd.xlane.f32.xlu0 %v15114_v24  ;;  %v21624_v1 = vpack.c.bf16 %v19136_v10, %v19135_v23  ;;  %v19138_v24 = vld [vmem:[%s27113_s18 + $0x38] sm:$0xff] }
0x3178   :  { %v26016_v27 = vadd.f32 %v15075_v20, %v25265_v55  ;;  %v21628_v20 = vpack.c.bf16 %v19138_v24, %v19137_v11 }
0x3179   :  { %v15120_v47 = vsel %vm703_vm5, %v26011_v6, 0.0  ;;  %21625 = vmatprep.subr.bf16.mxu0 %v21624_v1 }
0x317a   :  { %15121 = vadd.xlane.f32.xlu1 %v15120_v47  ;;  %v15117_v35 = vsel %vm703_vm5, %v26016_v27, 0.0  ;;  %21627 = vmatpush3.bf16.msra.mxu0 %v21624_v1 }
0x317b   :  { %15112 = vadd.xlane.f32.xlu0 %v15111_v39  ;;  %21629 = vmatprep.subr.bf16.mxu0 %v21628_v20 }
0x317c   :  { %v21055_v12 = vpop.f32.mrb[152].mxu1 }
0x317d   :  { %v15090_v5 = vadd.f32 %v21055_v12, %v19124_v49  ;;  %v15084_v33 = vpop.f32.mrb[153].mxu1 }
0x317e   :  { %v15085_v21 = vadd.f32 %v19124_v49, %v15084_v33  ;;  %21631 = vmatpush3.bf16.msra.mxu0 %v21628_v20 }
0x317f   :  { %v26023_v42 = vadd.f32 %v15090_v5, %v25273_v43  ;;  %15118 = vadd.xlane.f32.xlu0 %v15117_v35 }
0x3180   :  { %v26026_v37 = vadd.f32 %v15085_v21, %v25275_v51 }
0x3181   :  { %v15126_v55 = vsel %vm703_vm5, %v26023_v42, 0.0 }
0x3182   :  { %15127 = vadd.xlane.f32.xlu1 %v15126_v55  ;;  %v15123_v34 = vsel %vm703_vm5, %v26026_v37, 0.0 }
0x3183   :  { %15124 = vadd.xlane.f32.xlu0 %v15123_v34 }
0x31ff   :  { %v15110_v58 = vpop.xlane.xlu1 %15109 }
0x3200   :  { %v15130_v22 = vmul.f32 0.03125, %v15110_v58  ;;  %v15107_v3 = vpop.xlane.xlu0 %15106 }
0x3201   :  { %v15129_v54 = vmul.f32 0.03125, %v15107_v3 }
0x3202   :  { %v26033_v61 = vsub.f32 %v25993_v7, %v15130_v22 }
0x3203   :  { %v26036_v43 = vsub.f32 %v25996_v36, %v15129_v54 }
0x3204   :  { %v15116_v51 = vpop.xlane.xlu0 %15115  ;;  %v15146_v41 = vmul.f32 %v26033_v61, %v26033_v61 }
0x3205   :  { %v15132_v29 = vmul.f32 0.03125, %v15116_v51  ;;  %v15145_v28 = vmul.f32 %v26036_v43, %v26036_v43 }
0x3206   :  { %v15156_v30 = vsel %vm703_vm5, %v15146_v41, 0.0 }
0x3207   :  { %v26044_v56 = vsub.f32 %v26003_v9, %v15132_v29  ;;  %v15122_v14 = vpop.xlane.xlu1 %15121  ;;  %15157 = vadd.xlane.f32.xlu1 %v15156_v30  ;;  %v15153_v63 = vsel %vm703_vm5, %v15145_v28, 0.0 }
0x3208   :  { %v15134_v25 = vmul.f32 0.03125, %v15122_v14  ;;  %15154 = vadd.xlane.f32.xlu0 %v15153_v63  ;;  %v15113_v45 = vpop.xlane.xlu0 %15112  ;;  %v19133_v14 = vld [vmem:[#allocation11 + $0x1] ss:$0 sm:$0xff] }
0x3209   :  { %v15131_v31 = vmul.f32 0.03125, %v15113_v45  ;;  %v15148_v4 = vmul.f32 %v26044_v56, %v26044_v56 }
0x320a   :  { %v26050_v17 = vsub.f32 %v26011_v6, %v15134_v25 }
0x320b   :  { %v26053_v15 = vsub.f32 %v26008_v44, %v15131_v31  ;;  %v15162_v57 = vsel %vm703_vm5, %v15148_v4, 0.0 }
0x320c   :  { %15163 = vadd.xlane.f32.xlu1 %v15162_v57  ;;  %v15119_v0 = vpop.xlane.xlu0 %15118  ;;  %v15150_v46 = vmul.f32 %v26050_v17, %v26050_v17 }
0x320d   :  { %v15133_v26 = vmul.f32 0.03125, %v15119_v0  ;;  %v15147_v40 = vmul.f32 %v26053_v15, %v26053_v15 }
0x320e   :  { %v15168_v53 = vsel %vm703_vm5, %v15150_v46, 0.0 }
0x320f   :  { %v26062_v16 = vsub.f32 %v26016_v27, %v15133_v26  ;;  %v15128_v50 = vpop.xlane.xlu1 %15127  ;;  %v15159_v13 = vsel %vm703_vm5, %v15147_v40, 0.0  ;;  %v19134_v26 = vld [vmem:[#allocation13 + $0x1] ss:$0 sm:$0xff] }
0x3210   :  { %v15136_v48 = vmul.f32 0.03125, %v15128_v50  ;;  %15169 = vadd.xlane.f32.xlu1 %v15168_v53  ;;  %15160 = vadd.xlane.f32.xlu0 %v15159_v13  ;;  %v15125_v49 = vpop.xlane.xlu0 %15124 }
0x3211   :  { %v15135_v8 = vmul.f32 0.03125, %v15125_v49  ;;  %v15149_v2 = vmul.f32 %v26062_v16, %v26062_v16 }
0x3212   :  { %v26068_v59 = vsub.f32 %v26023_v42, %v15136_v48 }
0x3213   :  { %v26071_v52 = vsub.f32 %v26026_v37, %v15135_v8  ;;  %v15165_v19 = vsel %vm703_vm5, %v15149_v2, 0.0 }
0x3214   :  { %15166 = vadd.xlane.f32.xlu0 %v15165_v19  ;;  %v15152_v32 = vmul.f32 %v26068_v59, %v26068_v59 }
0x3215   :  { %v15151_v38 = vmul.f32 %v26071_v52, %v26071_v52 }
0x3216   :  { %v15174_v60 = vsel %vm703_vm5, %v15152_v32, 0.0 }
0x3217   :  { %15175 = vadd.xlane.f32.xlu1 %v15174_v60  ;;  %v15171_v62 = vsel %vm703_vm5, %v15151_v38, 0.0 }
0x3218   :  { %15172 = vadd.xlane.f32.xlu0 %v15171_v62 }
0x3294   :  { %v15158_v47 = vpop.xlane.xlu1 %15157 }
0x3295   :  { %v15178_v39 = vmul.f32 0.03125, %v15158_v47  ;;  %v15155_v12 = vpop.xlane.xlu0 %15154 }
0x3296   :  { %v15177_v5 = vmul.f32 0.03125, %v15155_v12 }
0x3297   :  { %v15186_v33 = vadd.f32 1e-12, %v15178_v39 }
0x3298   :  { %v15185_v21 = vadd.f32 1e-12, %v15177_v5 }
0x3299   :  { %22600 = vrsqrt.f32 %v15186_v33  ;;  %v15164_v35 = vpop.xlane.xlu1 %15163 }
0x329a   :  { %22602 = vrsqrt.f32 %v15185_v21  ;;  %v15180_v55 = vmul.f32 0.03125, %v15164_v35  ;;  %v19143_v21 = vld [vmem:[#allocation14 + $0x1] ss:$0 sm:$0xff] }
0x329c   :  { %v15188_v34 = vadd.f32 1e-12, %v15180_v55 }
0x329d   :  { %v15170_v58 = vpop.xlane.xlu1 %15169  ;;  %v15161_v22 = vpop.xlane.xlu0 %15160 }
0x329e   :  { %22604 = vrsqrt.f32 %v15188_v34  ;;  %v15182_v3 = vmul.f32 0.03125, %v15170_v58  ;;  %v15179_v54 = vmul.f32 0.03125, %v15161_v22 }
0x32a0   :  { %v15190_v51 = vadd.f32 1e-12, %v15182_v3  ;;  %v15187_v41 = vadd.f32 1e-12, %v15179_v54 }
0x32a1   :  { %v15167_v29 = vpop.xlane.xlu0 %15166 }
0x32a2   :  { %22606 = vrsqrt.f32 %v15190_v51  ;;  %v15181_v28 = vmul.f32 0.03125, %v15167_v29 }
0x32a3   :  { %v22601_v30 = vpop.eup %22600  ;;  %22608 = vrsqrt.f32 %v15187_v41 }
0x32a4   :  { %v22603_v63 = vpop.eup %22602  ;;  %v15202_v25 = vmul.f32 %v22601_v30, %v26033_v61  ;;  %v15189_v45 = vadd.f32 1e-12, %v15181_v28  ;;  %v15176_v31 = vpop.xlane.xlu1 %15175 }
0x32a5   :  { %v15184_v4 = vmul.f32 0.03125, %v15176_v31  ;;  %v15173_v57 = vpop.xlane.xlu0 %15172  ;;  %v15201_v0 = vmul.f32 %v22603_v63, %v26036_v43 }
0x32a6   :  { %22610 = vrsqrt.f32 %v15189_v45  ;;  %v15183_v46 = vmul.f32 0.03125, %v15173_v57  ;;  %v15216_v40 = vmul.f32 %v19133_v14, %v15202_v25 }
0x32a7   :  { %v15192_v53 = vadd.f32 1e-12, %v15184_v4  ;;  %v15215_v50 = vmul.f32 %v19133_v14, %v15201_v0 }
0x32a8   :  { %v22605_v13 = vpop.eup %22604  ;;  %v15191_v48 = vadd.f32 1e-12, %v15183_v46  ;;  %v15230_v8 = vadd.f32 %v19134_v26, %v15216_v40 }
0x32a9   :  { %22612 = vrsqrt.f32 %v15192_v53  ;;  %v15229_v49 = vadd.f32 %v19134_v26, %v15215_v50  ;;  %v15204_v61 = vmul.f32 %v22605_v13, %v26044_v56 }
0x32aa   :  { %22614 = vrsqrt.f32 %v15191_v48 }
0x32ab   :  { %21064 = vmatprep.mubr.msk.f32.mxu0 %vm703_vm5, %v15229_v49  ;;  %v15218_v32 = vmul.f32 %v19133_v14, %v15204_v61 }
0x32ac   :  { %v22607_v2 = vpop.eup %22606  ;;  %21065 = vmatmul.mubr.msk.f32.vlgmr.msra.gmra.mrb[148].mxu0 %vm703_vm5, %v15230_v8 }
0x32ad   :  { %v22609_v43 = vpop.eup %22608  ;;  %v15206_v38 = vmul.f32 %v22607_v2, %v26050_v17  ;;  %v15232_v11 = vadd.f32 %v19134_v26, %v15218_v32 }
0x32ae   :  { %v15203_v19 = vmul.f32 %v22609_v43, %v26053_v15 }
0x32af   :  { %v15220_v20 = vmul.f32 %v19133_v14, %v15206_v38 }
0x32b0   :  { %v22611_v60 = vpop.eup %22610  ;;  %v15217_v62 = vmul.f32 %v19133_v14, %v15203_v19 }
0x32b1   :  { %v15205_v23 = vmul.f32 %v22611_v60, %v26062_v16  ;;  %v15234_v17 = vadd.f32 %v19134_v26, %v15220_v20 }
0x32b2   :  { %v15231_v10 = vadd.f32 %v19134_v26, %v15217_v62 }
0x32b3   :  { %v22613_v1 = vpop.eup %22612  ;;  %v15219_v24 = vmul.f32 %v19133_v14, %v15205_v23 }
0x32b4   :  { %v22615_v47 = vpop.eup %22614  ;;  %21067 = vmatprep.mubr.msk.f32.mxu0 %vm703_vm5, %v15231_v10  ;;  %v15208_v56 = vmul.f32 %v22613_v1, %v26068_v59 }
0x32b5   :  { %21068 = vmatmul.mubr.msk.f32.gmra.mrb[150].mxu0 %vm703_vm5, %v15232_v11  ;;  %v15233_v15 = vadd.f32 %v19134_v26, %v15219_v24  ;;  %v15207_v39 = vmul.f32 %v22615_v47, %v26071_v52 }
0x32b6   :  { %v15222_v16 = vmul.f32 %v19133_v14, %v15208_v56 }
0x32b7   :  { %21070 = vmatprep.mubr.msk.f32.mxu0 %vm703_vm5, %v15233_v15  ;;  %v15221_v12 = vmul.f32 %v19133_v14, %v15207_v39 }
0x32b8   :  { %v15236_v33 = vadd.f32 %v19134_v26, %v15222_v16 }
0x32b9   :  { %21071 = vmatmul.mubr.msk.f32.gmra.mrb[152].mxu0 %vm703_vm5, %v15234_v17  ;;  %v15235_v5 = vadd.f32 %v19134_v26, %v15221_v12 }
0x32bb   :  { %21073 = vmatprep.mubr.msk.f32.mxu0 %vm703_vm5, %v15235_v5 }
0x32bd   :  { %21074 = vmatmul.mubr.msk.f32.gmra.mrb[154].mxu0 %vm703_vm5, %v15236_v33 }
0x337f   :  { %v21066_v59 = vpop.f32.mrb[148].mxu0 }
0x3380   :  { %v15353_v35 = vadd.f32 %v21066_v59, %v19143_v21  ;;  %v15347_v55 = vpop.f32.mrb[149].mxu0 }
0x3381   :  { %v15348_v34 = vadd.f32 %v19143_v21, %v15347_v55 }
0x3382   :  { %v26160_v24 = vmul.f32 0.35355338, %v15353_v35 }
0x3383   :  { %v26100_v58 = vpack.i.bf16 %v15353_v35, %v15348_v34  ;;  %v26102_v52 = vmul.f32 0.35355338, %v15348_v34 }
0x3385   :  { %22152 = vrot.lane.b32.xlu0 %v26100_v58, %s23192_s0  ;;  %21084 = vmatprep.mubr.msk.f32.mxu1 %vm467_vm4, %v26102_v52 }
0x3388   :  { %v21069_v22 = vpop.f32.mrb[150].mxu0 }
0x3389   :  { %v26108_v3 = vadd.f32 %v21069_v22, %v19143_v21  ;;  %v15357_v54 = vpop.f32.mrb[151].mxu0  ;;  %22172 = vrot.lane.b32.xlu0 %v26100_v58, %s23193_s2 }
0x338a   :  { %v15358_v51 = vadd.f32 %v19143_v21, %v15357_v54 }
0x338b   :  { %v26171_v12 = vmul.f32 0.35355338, %v26108_v3 }
0x338c   :  { %v21072_v41 = vpop.f32.mrb[152].mxu0  ;;  %v26113_v29 = vpack.i.bf16 %v26108_v3, %v15358_v51  ;;  %v26162_v47 = vmul.f32 0.35355338, %v15358_v51 }
0x338d   :  { %v26115_v28 = vadd.f32 %v21072_v41, %v19143_v21  ;;  %v15367_v30 = vpop.f32.mrb[153].mxu0 }
0x338e   :  { %v15368_v14 = vadd.f32 %v19143_v21, %v15367_v30  ;;  %22157 = vrot.lane.b32.xlu1 %v26113_v29, %s23192_s0 }
0x338f   :  { %v26185_v34 = vmul.f32 0.35355338, %v26115_v28 }
0x3390   :  { %v21075_v63 = vpop.f32.mrb[154].mxu0  ;;  %v26120_v25 = vpack.i.bf16 %v26115_v28, %v15368_v14  ;;  %v26122_v45 = vmul.f32 0.35355338, %v15368_v14  ;;  %v26200_v14 = vld [vmem:[%s27116_s23 + $0x8] sm:$0xff] }
0x3391   :  { %v26124_v31 = vadd.f32 %v21075_v63, %v19143_v21  ;;  %v15377_v4 = vpop.f32.mrb[155].mxu0 }
0x3392   :  { %v26126_v57 = vadd.f32 %v19143_v21, %v15377_v4  ;;  %22182 = vrot.lane.b32.xlu0 %v26120_v25, %s23193_s2  ;;  %22162 = vrot.lane.b32.xlu1 %v26120_v25, %s23192_s0 }
0x3393   :  { %21098 = vmatprep.mubr.msk.f32.mxu0 %vm467_vm4, %v26122_v45  ;;  %v26195_v41 = vmul.f32 0.35355338, %v26124_v31 }
0x3394   :  { %v26136_v0 = vpack.i.bf16 %v26124_v31, %v26126_v57  ;;  %v26188_v3 = vmul.f32 0.35355338, %v26126_v57  ;;  %v26204_v57 = vld [vmem:[%s27116_s23] sm:$0xff] }
0x3396   :  { %22167 = vrot.lane.b32.xlu1 %v26136_v0, %s23192_s0 }
0x339a   :  { %22177 = vrot.lane.b32.xlu1 %v26113_v29, %s23193_s2 }
0x339e   :  { %22187 = vrot.lane.b32.xlu1 %v26100_v58, %s23194_s24 }
0x33a2   :  { %22192 = vrot.lane.b32.xlu1 %v26113_v29, %s23194_s24 }
0x33a6   :  { %22197 = vrot.lane.b32.xlu1 %v26136_v0, %s23193_s2 }
0x33f7   :  { %v22153_v46 = vpop.permute.xlu0 %22152 }
0x33f8   :  { %v22155_v26 = vunpack.i.h.bf16 %v22153_v46  ;;  %v22154_v40 = vunpack.i.l.bf16 %v22153_v46 }
0x33fa   :  { %v21632_v53 = vpack.c.bf16 %v22155_v26, %v22154_v40 }
0x33fb   :  { %v22173_v50 = vpop.permute.xlu0 %22172 }
0x33fc   :  { %21634 = vmatprep.subr.msk.bf16.mxu1 %vm24440_vm7, %v21632_v53  ;;  %v22175_v48 = vunpack.i.h.bf16 %v22173_v50  ;;  %v22174_v49 = vunpack.i.l.bf16 %v22173_v50 }
0x33fd   :  { %21637 = vmatpush3.bf16.xpose.msk.msra.mxu1 %vm24440_vm7, %v21632_v53  ;;  %v26210_v53 = vld [vmem:[%s27116_s23 + $0x18] sm:$0xff] }
0x33fe   :  { %v21656_v38 = vpack.c.bf16 %v22175_v48, %v22174_v49  ;;  %v26214_v48 = vld [vmem:[%s27116_s23 + $0x10] sm:$0xff] }
0x3400   :  { %v22158_v13 = vpop.permute.xlu1 %22157 }
0x3401   :  { %v22160_v8 = vunpack.i.h.bf16 %v22158_v13  ;;  %v22159_v61 = vunpack.i.l.bf16 %v22158_v13 }
0x3403   :  { %v21638_v2 = vpack.c.bf16 %v22160_v8, %v22159_v61 }
0x3404   :  { %v22163_v43 = vpop.permute.xlu1 %22162  ;;  %v22183_v1 = vpop.permute.xlu0 %22182 }
0x3405   :  { %v22165_v19 = vunpack.i.h.bf16 %v22163_v43  ;;  %v22164_v32 = vunpack.i.l.bf16 %v22163_v43  ;;  %21640 = vmatprep.subr.msk.bf16.mxu1 %vm24440_vm7, %v21638_v2  ;;  %v22185_v56 = vunpack.i.h.bf16 %v22183_v1  ;;  %v22184_v15 = vunpack.i.l.bf16 %v22183_v1 }
0x3406   :  { %21643 = vmatpush3.bf16.xpose.msk.msra.mxu1 %vm24440_vm7, %v21638_v2 }
0x3407   :  { %v21644_v60 = vpack.c.bf16 %v22165_v19, %v22164_v32  ;;  %21657 = vmatprep.subr.bf16.mxu1 %v21656_v38  ;;  %v21664_v59 = vpack.c.bf16 %v22185_v56, %v22184_v15 }
0x3408   :  { %v22168_v62 = vpop.permute.xlu1 %22167 }
0x3409   :  { %v22170_v23 = vunpack.i.h.bf16 %v22168_v62  ;;  %v22169_v10 = vunpack.i.l.bf16 %v22168_v62  ;;  %21646 = vmatprep.subr.msk.bf16.mxu0 %vm24440_vm7, %v21644_v60 }
0x340a   :  { %21649 = vmatpush3.bf16.xpose.msk.msra.mxu0 %vm24440_vm7, %v21644_v60 }
0x340b   :  { %v21650_v11 = vpack.c.bf16 %v22170_v23, %v22169_v10 }
0x340c   :  { %v22178_v20 = vpop.permute.xlu1 %22177 }
0x340d   :  { %v22180_v39 = vunpack.i.h.bf16 %v22178_v20  ;;  %v22179_v17 = vunpack.i.l.bf16 %v22178_v20  ;;  %21085 = vmatmul.mubr.msk.f32.vlgmr.msra.gmra.mrb[154].mxu1 %vm467_vm4, %v26160_v24  ;;  %21652 = vmatprep.subr.msk.bf16.mxu0 %vm24440_vm7, %v21650_v11 }
0x340e   :  { %21087 = vmatprep.mubr.msk.f32.mxu1 %vm467_vm4, %v26162_v47  ;;  %21659 = vmatpush3.bf16.msra.mxu1 %v21656_v38 }
0x340f   :  { %v21660_v16 = vpack.c.bf16 %v22180_v39, %v22179_v17 }
0x3410   :  { %v22188_v5 = vpop.permute.xlu1 %22187 }
0x3411   :  { %v22190_v33 = vunpack.i.h.bf16 %v22188_v5  ;;  %v22189_v21 = vunpack.i.l.bf16 %v22188_v5  ;;  %21088 = vmatmul.mubr.msk.f32.gmra.mrb[156].mxu1 %vm467_vm4, %v26171_v12  ;;  %21661 = vmatprep.subr.bf16.mxu1 %v21660_v16 }
0x3412   :  { %21655 = vmatpush3.bf16.xpose.msk.msra.mxu0 %vm24440_vm7, %v21650_v11  ;;  %21663 = vmatpush3.bf16.msra.mxu1 %v21660_v16 }
0x3413   :  { %v26177_v35 = vpack.c.bf16 %v22190_v33, %v22189_v21  ;;  %21665 = vmatprep.subr.bf16.mxu0 %v21664_v59 }
0x3414   :  { %v26179_v55 = vpop.permute.xlu1 %22192 }
0x3415   :  { %21674 = vmatprep.subr.msk.bf16.mxu1 %vm24440_vm7, %v26177_v35 }
0x3418   :  { %v22198_v22 = vpop.permute.xlu1 %22197 }
0x3419   :  { %v22200_v54 = vunpack.i.h.bf16 %v22198_v22  ;;  %v22199_v51 = vunpack.i.l.bf16 %v22198_v22  ;;  %21099 = vmatmul.mubr.msk.f32.vlgmr.msra.gmra.mrb[156].mxu0 %vm467_vm4, %v26185_v34 }
0x341a   :  { %21101 = vmatprep.mubr.msk.f32.mxu0 %vm467_vm4, %v26188_v3  ;;  %21667 = vmatpush3.bf16.msra.mxu0 %v21664_v59 }
0x341b   :  { %v21668_v28 = vpack.c.bf16 %v22200_v54, %v22199_v51 }
0x341d   :  { %21102 = vmatmul.mubr.msk.f32.gmra.mrb[158].mxu0 %vm467_vm4, %v26195_v41  ;;  %21669 = vmatprep.subr.bf16.mxu0 %v21668_v28 }
0x341e   :  { %21671 = vmatpush3.bf16.msra.mxu0 %v21668_v28 }
0x34e0   :  { %v21086_v30 = vpop.f32.mrb[154].mxu1 }
0x34e1   :  { %v15498_v63 = vadd.f32 %v26200_v14, %v21086_v30  ;;  %v15492_v4 = vpop.f32.mrb[155].mxu1 }
0x34e2   :  { %v15493_v46 = vadd.f32 %v26204_v57, %v15492_v4 }
0x34e3   :  { %v15631_v31 = vsel %vm703_vm5, %v15498_v63, -inf }
0x34e4   :  { %15632 = vmax.xlane.f32.xlu1 %v15631_v31  ;;  %v21089_v26 = vpop.f32.mrb[156].mxu1  ;;  %v15628_v40 = vsel %vm703_vm5, %v15493_v46, -inf }
0x34e5   :  { %v15508_v50 = vadd.f32 %v26210_v53, %v21089_v26  ;;  %v15502_v13 = vpop.f32.mrb[157].mxu1  ;;  %15629 = vmax.xlane.f32.xlu0 %v15628_v40 }
0x34e6   :  { %v15503_v49 = vadd.f32 %v26214_v48, %v15502_v13 }
0x34e7   :  { %v15637_v8 = vsel %vm703_vm5, %v15508_v50, -inf }
0x34e8   :  { %15638 = vmax.xlane.f32.xlu1 %v15637_v8  ;;  %v15634_v61 = vsel %vm703_vm5, %v15503_v49, -inf }
0x34e9   :  { %15635 = vmax.xlane.f32.xlu0 %v15634_v61 }
0x34ec   :  { %v21100_v2 = vpop.f32.mrb[156].mxu0 }
0x34ed   :  { %v15615_v43 = vadd.f32 %v26200_v14, %v21100_v2  ;;  %v15609_v19 = vpop.f32.mrb[157].mxu0 }
0x34ee   :  { %v15610_v32 = vadd.f32 %v26204_v57, %v15609_v19 }
0x34ef   :  { %v15643_v38 = vsel %vm703_vm5, %v15615_v43, -inf }
0x34f0   :  { %v21103_v60 = vpop.f32.mrb[158].mxu0  ;;  %15644 = vmax.xlane.f32.xlu0 %v15643_v38  ;;  %v15640_v11 = vsel %vm703_vm5, %v15610_v32, -inf }
0x34f1   :  { %v26223_v62 = vadd.f32 %v26210_v53, %v21103_v60  ;;  %v15619_v23 = vpop.f32.mrb[159].mxu0 }
0x34f2   :  { %v26226_v10 = vadd.f32 %v26214_v48, %v15619_v23 }
0x34f3   :  { %v15649_v1 = vsel %vm703_vm5, %v26223_v62, -inf }
0x34f4   :  { %15650 = vmax.xlane.f32.xlu1 %v15649_v1  ;;  %15641 = vmax.xlane.f32.xlu0 %v15640_v11  ;;  %v15646_v20 = vsel %vm703_vm5, %v26226_v10, -inf }
0x34f8   :  { %15647 = vmax.xlane.f32.xlu0 %v15646_v20 }
0x3505   :  { %22207 = vrot.lane.b32.xlu1 %v26136_v0, %s23194_s24 }
0x350e   :  { %22202 = vrot.lane.b32.xlu0 %v26120_v25, %s23194_s24 }
0x3571   :  { %v15633_v56 = vpop.xlane.xlu1 %15632 }
0x3572   :  { %v15653_v15 = vsub.f32 %v15498_v63, %v15633_v56  ;;  %v15630_v39 = vpop.xlane.xlu0 %15629 }
0x3573   :  { %v15652_v17 = vsub.f32 %v15493_v46, %v15630_v39 }
0x3574   :  { %v15662_v16 = vmul.f32 1.442695, %v15653_v15 }
0x3575   :  { %v15660_v5 = vmul.f32 1.442695, %v15652_v17  ;;  %v15639_v33 = vpop.xlane.xlu1 %15638 }
0x3576   :  { %22616 = vpow2.f32 %v15662_v16  ;;  %v15655_v21 = vsub.f32 %v15508_v50, %v15639_v33  ;;  %v15636_v59 = vpop.xlane.xlu0 %15635 }
0x3577   :  { %22618 = vpow2.f32 %v15660_v5  ;;  %v15654_v22 = vsub.f32 %v15503_v49, %v15636_v59 }
0x3578   :  { %v15666_v54 = vmul.f32 1.442695, %v15655_v21 }
0x3579   :  { %v15664_v51 = vmul.f32 1.442695, %v15654_v22 }
0x357a   :  { %22620 = vpow2.f32 %v15666_v54 }
0x357b   :  { %22622 = vpow2.f32 %v15664_v51 }
0x357d   :  { %v15645_v28 = vpop.xlane.xlu0 %15644 }
0x357e   :  { %v15657_v30 = vsub.f32 %v15615_v43, %v15645_v28 }
0x3580   :  { %v26237_v4 = vpop.eup %22616  ;;  %v15670_v31 = vmul.f32 1.442695, %v15657_v30 }
0x3581   :  { %v26239_v63 = vpop.eup %22618  ;;  %v15642_v46 = vpop.xlane.xlu0 %15641  ;;  %v15679_v26 = vsel %vm703_vm5, %v26237_v4, 0.0 }
0x3582   :  { %22624 = vpow2.f32 %v15670_v31  ;;  %v15656_v40 = vsub.f32 %v15610_v32, %v15642_v46  ;;  %15680 = vadd.xlane.f32.xlu1 %v15679_v26  ;;  %v15676_v50 = vsel %vm703_vm5, %v26239_v63, 0.0  ;;  %v15651_v56 = vpop.xlane.xlu1 %15650  ;;  %v22195_v31 = vunpack.i.h.bf16 %v26179_v55 }
0x3583   :  { %15677 = vadd.xlane.f32.xlu0 %v15676_v50  ;;  %v15659_v39 = vsub.f32 %v26223_v62, %v15651_v56  ;;  %v22194_v46 = vunpack.i.l.bf16 %v26179_v55 }
0x3584   :  { %v26245_v13 = vpop.eup %22620  ;;  %v15668_v49 = vmul.f32 1.442695, %v15656_v40 }
0x3585   :  { %v26247_v8 = vpop.eup %22622  ;;  %v15648_v61 = vpop.xlane.xlu0 %15647  ;;  %v15685_v2 = vsel %vm703_vm5, %v26245_v13, 0.0  ;;  %v15674_v16 = vmul.f32 1.442695, %v15659_v39 }
0x3586   :  { %15686 = vadd.xlane.f32.xlu1 %v15685_v2  ;;  %22626 = vpow2.f32 %v15668_v49  ;;  %v15682_v43 = vsel %vm703_vm5, %v26247_v8, 0.0  ;;  %v15658_v15 = vsub.f32 %v26226_v10, %v15648_v61  ;;  %v22208_v62 = vpop.permute.xlu1 %22207  ;;  %v21678_v61 = vpack.c.bf16 %v22195_v31, %v22194_v46 }
0x3587   :  { %15683 = vadd.xlane.f32.xlu0 %v15682_v43 }
0x3588   :  { %v15672_v17 = vmul.f32 1.442695, %v15658_v15 }
0x3589   :  { %v22203_v19 = vpop.permute.xlu0 %22202 }
0x358a   :  { %v22205_v32 = vunpack.i.h.bf16 %v22203_v19  ;;  %v22204_v38 = vunpack.i.l.bf16 %v22203_v19  ;;  %22628 = vpow2.f32 %v15672_v17 }
0x358b   :  { %22630 = vpow2.f32 %v15674_v16 }
0x358c   :  { %v26253_v60 = vpop.eup %22624  ;;  %v26255_v23 = vpack.c.bf16 %v22205_v32, %v22204_v38  ;;  %v22210_v32 = vunpack.i.h.bf16 %v22208_v62  ;;  %v22209_v38 = vunpack.i.l.bf16 %v22208_v62 }
0x358d   :  { %v15691_v1 = vsel %vm703_vm5, %v26253_v60, 0.0 }
0x358e   :  { %15692 = vadd.xlane.f32.xlu1 %v15691_v1  ;;  %21686 = vmatprep.subr.msk.bf16.mxu0 %vm24440_vm7, %v26255_v23 }
0x3590   :  { %v26262_v11 = vpop.eup %22626 }
0x3591   :  { %v15688_v20 = vsel %vm703_vm5, %v26262_v11, 0.0 }
0x3592   :  { %15689 = vadd.xlane.f32.xlu0 %v15688_v20 }
0x3594   :  { %v26274_v5 = vpop.eup %22628 }
0x3595   :  { %v26276_v33 = vpop.eup %22630  ;;  %v15694_v21 = vsel %vm703_vm5, %v26274_v5, 0.0 }
0x3596   :  { %v15697_v59 = vsel %vm703_vm5, %v26276_v33, 0.0 }
0x359f   :  { %15936 = vrot.lane.b32.xlu1 %v26160_v24, %s23195_s29 }
0x35a3   :  { %16053 = vrot.lane.b32.xlu1 %v26185_v34, %s23195_s29 }
0x35a8   :  { %15934 = vrot.lane.b32.xlu0 %v26102_v52, %s23195_s29 }
0x35c7   :  { %15695 = vadd.xlane.f32.xlu1 %v15694_v21  ;;  %15698 = vadd.xlane.f32.xlu0 %v15697_v59 }
0x35d8   :  { %15940 = vrot.lane.b32.xlu1 %v26171_v12, %s23195_s29 }
0x35dc   :  { %16057 = vrot.lane.b32.xlu1 %v26195_v41, %s23195_s29 }
0x35dd   :  { %16051 = vrot.lane.b32.xlu0 %v26122_v45, %s23195_s29 }
0x35e0   :  { %22217 = vrot.lane.b32.xlu1 %v26113_v29, %s23196_s7 }
0x35e1   :  { %15938 = vrot.lane.b32.xlu0 %v26162_v47, %s23195_s29 }
0x35e4   :  { %22227 = vrot.lane.b32.xlu1 %v26136_v0, %s23196_s7 }
0x35e5   :  { %16055 = vrot.lane.b32.xlu0 %v26188_v3, %s23195_s29 }
0x35e8   :  { %22232 = vrot.lane.b32.xlu1 %v26100_v58, %s23197_s30 }
0x35e9   :  { %22212 = vrot.lane.b32.xlu0 %v26100_v58, %s23196_s7 }
0x35ec   :  { %22237 = vrot.lane.b32.xlu1 %v26113_v29, %s23197_s30 }
0x35ed   :  { %22222 = vrot.lane.b32.xlu0 %v26120_v25, %s23196_s7 }
0x360f   :  { %v15681_v10 = vpop.xlane.xlu1 %15680 }
0x3610   :  { %22632 = vrcp.f32 %v15681_v10  ;;  %v15678_v22 = vpop.xlane.xlu0 %15677 }
0x3611   :  { %22634 = vrcp.f32 %v15678_v22 }
0x3613   :  { %v15687_v54 = vpop.xlane.xlu1 %15686 }
0x3614   :  { %22636 = vrcp.f32 %v15687_v54  ;;  %v15684_v51 = vpop.xlane.xlu0 %15683 }
0x3615   :  { %22638 = vrcp.f32 %v15684_v51 }
0x361a   :  { %v22633_v28 = vpop.eup %22632 }
0x361b   :  { %v22635_v30 = vpop.eup %22634  ;;  %v15709_v40 = vmul.f32 %v22633_v28, %v26237_v4  ;;  %v15693_v50 = vpop.xlane.xlu1 %15692 }
0x361c   :  { %v15708_v26 = vmul.f32 %v22635_v30, %v26239_v63  ;;  %22640 = vrcp.f32 %v15693_v50 }
0x361e   :  { %21112 = vmatprep.mubr.msk.f32.mxu1 %vm703_vm5, %v15708_v26  ;;  %v22637_v49 = vpop.eup %22636 }
0x361f   :  { %21113 = vmatmul.mubr.msk.f32.vlgmr.msra.gmra.mrb[158].mxu1 %vm703_vm5, %v15709_v40  ;;  %v22639_v2 = vpop.eup %22638  ;;  %v15690_v43 = vpop.xlane.xlu0 %15689  ;;  %v15711_v4 = vmul.f32 %v22637_v49, %v26245_v13  ;;  %v21690_v13 = vpack.c.bf16 %v22210_v32, %v22209_v38 }
0x3620   :  { %21677 = vmatpush3.bf16.xpose.msk.msra.mxu1 %vm24440_vm7, %v26177_v35  ;;  %22642 = vrcp.f32 %v15690_v43  ;;  %v15710_v55 = vmul.f32 %v22639_v2, %v26247_v8  ;;  %v15937_v20 = vpop.permute.xlu1 %15936 }
0x3621   :  { %21680 = vmatprep.subr.msk.bf16.mxu1 %vm24440_vm7, %v21678_v61 }
0x3622   :  { %21115 = vmatprep.mubr.msk.f32.mxu1 %vm703_vm5, %v15710_v55 }
0x3623   :  { %21116 = vmatmul.mubr.msk.f32.gmra.mrb[160].mxu1 %vm703_vm5, %v15711_v4  ;;  %v15935_v63 = vpop.permute.xlu0 %15934 }
0x3624   :  { %21140 = vmatprep.mubr.msk.f32.mxu1 %vm467_vm4, %v15935_v63 }
0x3626   :  { %v22641_v35 = vpop.eup %22640 }
0x3627   :  { %v15713_v8 = vmul.f32 %v22641_v35, %v26253_v60 }
0x3628   :  { %21683 = vmatpush3.bf16.xpose.msk.msra.mxu1 %vm24440_vm7, %v21678_v61 }
0x362a   :  { %v22643_v19 = vpop.eup %22642 }
0x362b   :  { %v15712_v1 = vmul.f32 %v22643_v19, %v26262_v11  ;;  %v16054_v11 = vpop.permute.xlu1 %16053 }
0x362d   :  { %21126 = vmatprep.mubr.msk.f32.mxu0 %vm703_vm5, %v15712_v1 }
0x362e   :  { %21127 = vmatmul.mubr.msk.f32.vlgmr.msra.gmra.mrb[160].mxu0 %vm703_vm5, %v15713_v8 }
0x362f   :  { %21141 = vmatmul.mubr.msk.f32.vlgmr.msra.gmra.mrb[162].mxu1 %vm467_vm4, %v15937_v20  ;;  %21689 = vmatpush3.bf16.xpose.msk.msra.mxu0 %vm24440_vm7, %v26255_v23 }
0x3630   :  { %21692 = vmatprep.subr.msk.bf16.mxu0 %vm24440_vm7, %v21690_v13 }
0x3637   :  { %21695 = vmatpush3.bf16.xpose.msk.msra.mxu0 %vm24440_vm7, %v21690_v13 }
0x3654   :  { %v15696_v60 = vpop.xlane.xlu1 %15695  ;;  %v15699_v56 = vpop.xlane.xlu0 %15698 }
0x3655   :  { %22644 = vrcp.f32 %v15696_v60 }
0x3656   :  { %22646 = vrcp.f32 %v15699_v56 }
0x3658   :  { %v15941_v15 = vpop.permute.xlu1 %15940  ;;  %v16052_v39 = vpop.permute.xlu0 %16051 }
0x365c   :  { %v16058_v17 = vpop.permute.xlu1 %16057  ;;  %v15939_v16 = vpop.permute.xlu0 %15938 }
0x365d   :  { %21143 = vmatprep.mubr.msk.f32.mxu1 %vm467_vm4, %v15939_v16 }
0x365e   :  { %21144 = vmatmul.mubr.msk.f32.gmra.mrb[164].mxu1 %vm467_vm4, %v15941_v15 }
0x365f   :  { %v22645_v21 = vpop.eup %22644 }
0x3660   :  { %v22647_v23 = vpop.eup %22646  ;;  %v22218_v59 = vpop.permute.xlu1 %22217  ;;  %v15714_v62 = vmul.f32 %v22645_v21, %v26274_v5 }
0x3661   :  { %v16056_v10 = vpop.permute.xlu0 %16055  ;;  %v15715_v22 = vmul.f32 %v22647_v23, %v26276_v33  ;;  %v22220_v51 = vunpack.i.h.bf16 %v22218_v59  ;;  %v22219_v28 = vunpack.i.l.bf16 %v22218_v59 }
0x3662   :  { %21129 = vmatprep.mubr.msk.f32.mxu0 %vm703_vm5, %v15714_v62 }
0x3663   :  { %21130 = vmatmul.mubr.msk.f32.gmra.mrb[162].mxu0 %vm703_vm5, %v15715_v22  ;;  %v21700_v49 = vpack.c.bf16 %v22220_v51, %v22219_v28 }
0x3664   :  { %v22228_v54 = vpop.permute.xlu1 %22227  ;;  %21154 = vmatprep.mubr.msk.f32.mxu0 %vm467_vm4, %v16052_v39 }
0x3665   :  { %v22213_v30 = vpop.permute.xlu0 %22212  ;;  %v22230_v40 = vunpack.i.h.bf16 %v22228_v54  ;;  %v22229_v33 = vunpack.i.l.bf16 %v22228_v54 }
0x3666   :  { %v22215_v31 = vunpack.i.h.bf16 %v22213_v30  ;;  %v22214_v46 = vunpack.i.l.bf16 %v22213_v30 }
0x3667   :  { %21155 = vmatmul.mubr.msk.f32.vlgmr.msra.gmra.mrb[164].mxu0 %vm467_vm4, %v16054_v11  ;;  %v21708_v35 = vpack.c.bf16 %v22230_v40, %v22229_v33 }
0x3668   :  { %v22233_v26 = vpop.permute.xlu1 %22232  ;;  %21157 = vmatprep.mubr.msk.f32.mxu0 %vm467_vm4, %v16056_v10  ;;  %v21696_v5 = vpack.c.bf16 %v22215_v31, %v22214_v46 }
0x3669   :  { %v22223_v50 = vpop.permute.xlu0 %22222  ;;  %v22235_v61 = vunpack.i.h.bf16 %v22233_v26  ;;  %v22234_v2 = vunpack.i.l.bf16 %v22233_v26 }
0x366a   :  { %v22225_v43 = vunpack.i.h.bf16 %v22223_v50  ;;  %v22224_v55 = vunpack.i.l.bf16 %v22223_v50  ;;  %21697 = vmatprep.subr.bf16.mxu1 %v21696_v5 }
0x366b   :  { %21699 = vmatpush3.bf16.msra.mxu1 %v21696_v5  ;;  %21158 = vmatmul.mubr.msk.f32.gmra.mrb[166].mxu0 %vm467_vm4, %v16058_v17  ;;  %v26344_v63 = vpack.c.bf16 %v22235_v61, %v22234_v2 }
0x366c   :  { %21701 = vmatprep.subr.bf16.mxu1 %v21700_v49  ;;  %v21704_v4 = vpack.c.bf16 %v22225_v43, %v22224_v55  ;;  %v26391_v61 = vpop.permute.xlu1 %22237 }
0x366e   :  { %21705 = vmatprep.subr.bf16.mxu0 %v21704_v4 }
0x366f   :  { %21703 = vmatpush3.bf16.msra.mxu1 %v21700_v49  ;;  %21707 = vmatpush3.bf16.msra.mxu0 %v21704_v4 }
0x3670   :  { %21709 = vmatprep.subr.bf16.mxu0 %v21708_v35  ;;  %21714 = vmatprep.subr.msk.bf16.mxu1 %vm24440_vm7, %v26344_v63 }
0x3673   :  { %21711 = vmatpush3.bf16.msra.mxu0 %v21708_v35 }
0x36f2   :  { %v26349_v19 = vpop.f32.mrb[158].mxu1 }
0x36f3   :  { %v26351_v32 = vpop.f32.mrb[159].mxu1 }
0x36f6   :  { %v26353_v38 = vpop.f32.mrb[160].mxu1 }
0x36f7   :  { %v26355_v1 = vpop.f32.mrb[161].mxu1 }
0x3701   :  { %v26357_v8 = vpop.f32.mrb[160].mxu0 }
0x3702   :  { %v21142_v20 = vpop.f32.mrb[162].mxu1  ;;  %v26360_v11 = vpop.f32.mrb[161].mxu0 }
0x3703   :  { %v16038_v13 = vadd.f32 %v26200_v14, %v21142_v20  ;;  %v16032_v60 = vpop.f32.mrb[163].mxu1 }
0x3704   :  { %v16033_v56 = vadd.f32 %v26204_v57, %v16032_v60 }
0x3705   :  { %v16171_v15 = vsel %vm703_vm5, %v16038_v13, -inf }
0x3706   :  { %16172 = vmax.xlane.f32.xlu1 %v16171_v15  ;;  %v16168_v39 = vsel %vm703_vm5, %v16033_v56, -inf }
0x3707   :  { %16169 = vmax.xlane.f32.xlu0 %v16168_v39 }
0x3731   :  { %v21145_v17 = vpop.f32.mrb[164].mxu1 }
0x3732   :  { %v16048_v16 = vadd.f32 %v26210_v53, %v21145_v17  ;;  %v16042_v21 = vpop.f32.mrb[165].mxu1 }
0x3733   :  { %v16043_v23 = vadd.f32 %v26214_v48, %v16042_v21 }
0x3734   :  { %v16177_v59 = vsel %vm703_vm5, %v16048_v16, -inf }
0x3735   :  { %16178 = vmax.xlane.f32.xlu1 %v16177_v59  ;;  %v16174_v10 = vsel %vm703_vm5, %v16043_v23, -inf }
0x3736   :  { %v26368_v62 = vpop.f32.mrb[162].mxu0  ;;  %16175 = vmax.xlane.f32.xlu0 %v16174_v10 }
0x3737   :  { %v26371_v22 = vpop.f32.mrb[163].mxu0 }
0x373a   :  { %v21156_v54 = vpop.f32.mrb[164].mxu0 }
0x373b   :  { %v16155_v51 = vadd.f32 %v26200_v14, %v21156_v54  ;;  %v16149_v28 = vpop.f32.mrb[165].mxu0 }
0x373c   :  { %v16150_v30 = vadd.f32 %v26204_v57, %v16149_v28 }
0x373d   :  { %v16183_v31 = vsel %vm703_vm5, %v16155_v51, -inf }
0x373e   :  { %16184 = vmax.xlane.f32.xlu0 %v16183_v31  ;;  %v21159_v46 = vpop.f32.mrb[166].mxu0  ;;  %v16180_v50 = vsel %vm703_vm5, %v16150_v30, -inf }
0x373f   :  { %v26377_v26 = vadd.f32 %v26210_v53, %v21159_v46  ;;  %v16159_v5 = vpop.f32.mrb[167].mxu0 }
0x3740   :  { %v26380_v40 = vadd.f32 %v26214_v48, %v16159_v5 }
0x3741   :  { %v16189_v33 = vsel %vm703_vm5, %v26377_v26, -inf }
0x3742   :  { %16190 = vmax.xlane.f32.xlu1 %v16189_v33  ;;  %16181 = vmax.xlane.f32.xlu0 %v16180_v50  ;;  %v16186_v49 = vsel %vm703_vm5, %v26380_v40, -inf }
0x3746   :  { %16187 = vmax.xlane.f32.xlu0 %v16186_v49 }
0x3753   :  { %22247 = vrot.lane.b32.xlu1 %v26136_v0, %s23197_s30 }
0x375c   :  { %22242 = vrot.lane.b32.xlu0 %v26120_v25, %s23197_s30 }
0x3793   :  { %v16173_v2 = vpop.xlane.xlu1 %16172 }
0x3794   :  { %v16193_v43 = vsub.f32 %v16038_v13, %v16173_v2  ;;  %v16170_v55 = vpop.xlane.xlu0 %16169 }
0x3795   :  { %v16192_v4 = vsub.f32 %v16033_v56, %v16170_v55 }
0x3796   :  { %v16202_v35 = vmul.f32 1.442695, %v16193_v43 }
0x3797   :  { %v16200_v20 = vmul.f32 1.442695, %v16192_v4 }
0x3798   :  { %22648 = vpow2.f32 %v16202_v35 }
0x3799   :  { %22650 = vpow2.f32 %v16200_v20 }
0x37a2   :  { %v26393_v60 = vpop.eup %22648 }
0x37a3   :  { %v26395_v15 = vpop.eup %22650  ;;  %v16219_v39 = vsel %vm703_vm5, %v26393_v60, 0.0 }
0x37a4   :  { %16220 = vadd.xlane.f32.xlu1 %v16219_v39  ;;  %v16216_v17 = vsel %vm703_vm5, %v26395_v15, 0.0 }
0x37a5   :  { %16217 = vadd.xlane.f32.xlu0 %v16216_v17 }
0x37c2   :  { %v16179_v21 = vpop.xlane.xlu1 %16178 }
0x37c3   :  { %v16195_v13 = vsub.f32 %v16048_v16, %v16179_v21  ;;  %v16176_v59 = vpop.xlane.xlu0 %16175 }
0x37c4   :  { %v16194_v56 = vsub.f32 %v16043_v23, %v16176_v59 }
0x37c5   :  { %v16206_v10 = vmul.f32 1.442695, %v16195_v13 }
0x37c6   :  { %v16204_v54 = vmul.f32 1.442695, %v16194_v56 }
0x37c7   :  { %22652 = vpow2.f32 %v16206_v10 }
0x37c8   :  { %22654 = vpow2.f32 %v16204_v54 }
0x37cb   :  { %v16185_v28 = vpop.xlane.xlu0 %16184 }
0x37cc   :  { %v16197_v31 = vsub.f32 %v16155_v51, %v16185_v28 }
0x37ce   :  { %v16210_v46 = vmul.f32 1.442695, %v16197_v31 }
0x37cf   :  { %v16182_v5 = vpop.xlane.xlu0 %16181  ;;  %v16191_v21 = vpop.xlane.xlu1 %16190 }
0x37d0   :  { %22656 = vpow2.f32 %v16210_v46  ;;  %v16196_v33 = vsub.f32 %v16150_v30, %v16182_v5  ;;  %v16199_v59 = vsub.f32 %v26377_v26, %v16191_v21 }
0x37d1   :  { %v26401_v50 = vpop.eup %22652 }
0x37d2   :  { %v16208_v49 = vmul.f32 1.442695, %v16196_v33  ;;  %v26403_v2 = vpop.eup %22654  ;;  %v16225_v16 = vsel %vm703_vm5, %v26401_v50, 0.0  ;;  %v16214_v10 = vmul.f32 1.442695, %v16199_v59 }
0x37d3   :  { %v16188_v43 = vpop.xlane.xlu0 %16187  ;;  %16226 = vadd.xlane.f32.xlu1 %v16225_v16  ;;  %v16222_v23 = vsel %vm703_vm5, %v26403_v2, 0.0  ;;  %v22248_v26 = vpop.permute.xlu1 %22247  ;;  %v22240_v16 = vunpack.i.h.bf16 %v26391_v61 }
0x37d4   :  { %22658 = vpow2.f32 %v16208_v49  ;;  %16223 = vadd.xlane.f32.xlu0 %v16222_v23  ;;  %v16198_v13 = vsub.f32 %v26380_v40, %v16188_v43  ;;  %v22239_v43 = vunpack.i.l.bf16 %v26391_v61 }
0x37d6   :  { %v16212_v56 = vmul.f32 1.442695, %v16198_v13 }
0x37d7   :  { %v22243_v51 = vpop.permute.xlu0 %22242 }
0x37d8   :  { %v22245_v55 = vunpack.i.h.bf16 %v22243_v51  ;;  %v22244_v4 = vunpack.i.l.bf16 %v22243_v51  ;;  %22660 = vpow2.f32 %v16212_v56 }
0x37d9   :  { %22662 = vpow2.f32 %v16214_v10 }
0x37da   :  { %v26409_v35 = vpop.eup %22656  ;;  %v26411_v30 = vpack.c.bf16 %v22245_v55, %v22244_v4  ;;  %v21718_v55 = vpack.c.bf16 %v22240_v16, %v22239_v43 }
0x37db   :  { %v16231_v20 = vsel %vm703_vm5, %v26409_v35, 0.0 }
0x37dc   :  { %16232 = vadd.xlane.f32.xlu1 %v16231_v20  ;;  %21726 = vmatprep.subr.msk.bf16.mxu0 %vm24440_vm7, %v26411_v30 }
0x37de   :  { %v26418_v39 = vpop.eup %22658 }
0x37df   :  { %v16228_v17 = vsel %vm703_vm5, %v26418_v39, 0.0 }
0x37e0   :  { %16229 = vadd.xlane.f32.xlu0 %v16228_v17 }
0x37e2   :  { %v26430_v54 = vpop.eup %22660 }
0x37e3   :  { %v26432_v28 = vpop.eup %22662  ;;  %v16234_v31 = vsel %vm703_vm5, %v26430_v54, 0.0 }
0x37e4   :  { %v16237_v46 = vsel %vm703_vm5, %v26432_v28, 0.0 }
0x37ed   :  { %16476 = vrot.lane.b32.xlu1 %v26160_v24, %s23198_s8 }
0x37f1   :  { %16593 = vrot.lane.b32.xlu1 %v26185_v34, %s23198_s8 }
0x37f6   :  { %16474 = vrot.lane.b32.xlu0 %v26102_v52, %s23198_s8 }
0x3815   :  { %16235 = vadd.xlane.f32.xlu1 %v16234_v31  ;;  %16238 = vadd.xlane.f32.xlu0 %v16237_v46  ;;  %v22250_v31 = vunpack.i.h.bf16 %v22248_v26  ;;  %v22249_v46 = vunpack.i.l.bf16 %v22248_v26 }
0x3826   :  { %16480 = vrot.lane.b32.xlu1 %v26171_v12, %s23198_s8 }
0x382a   :  { %16597 = vrot.lane.b32.xlu1 %v26195_v41, %s23198_s8 }
0x382b   :  { %16591 = vrot.lane.b32.xlu0 %v26122_v45, %s23198_s8 }
0x382e   :  { %22257 = vrot.lane.b32.xlu1 %v26113_v29, %s23199_s10 }
0x382f   :  { %16478 = vrot.lane.b32.xlu0 %v26162_v47, %s23198_s8 }
0x3831   :  { %v16221_v40 = vpop.xlane.xlu1 %16220 }
0x3832   :  { %22664 = vrcp.f32 %v16221_v40  ;;  %v16218_v5 = vpop.xlane.xlu0 %16217  ;;  %22267 = vrot.lane.b32.xlu1 %v26136_v0, %s23199_s10 }
0x3833   :  { %22666 = vrcp.f32 %v16218_v5  ;;  %16595 = vrot.lane.b32.xlu0 %v26188_v3, %s23198_s8 }
0x3836   :  { %22272 = vrot.lane.b32.xlu1 %v26100_v58, %s23200_s11 }
0x3837   :  { %22252 = vrot.lane.b32.xlu0 %v26100_v58, %s23199_s10 }
0x383a   :  { %22277 = vrot.lane.b32.xlu1 %v26113_v29, %s23200_s11 }
0x383b   :  { %22262 = vrot.lane.b32.xlu0 %v26120_v25, %s23199_s10 }
0x383c   :  { %v22665_v33 = vpop.eup %22664 }
0x383d   :  { %v22667_v49 = vpop.eup %22666  ;;  %v16249_v51 = vmul.f32 %v22665_v33, %v26393_v60 }
0x383e   :  { %22287 = vrot.lane.b32.xlu1 %v26136_v0, %s23200_s11  ;;  %v16248_v23 = vmul.f32 %v22667_v49, %v26395_v15 }
0x383f   :  { %22282 = vrot.lane.b32.xlu0 %v26120_v25, %s23200_s11 }
0x3840   :  { %21168 = vmatprep.mubr.msk.f32.mxu1 %vm703_vm5, %v16248_v23 }
0x3841   :  { %21169 = vmatmul.mubr.msk.f32.vlgmr.msra.gmra.mrb[166].mxu1 %vm703_vm5, %v16249_v51 }
0x3842   :  { %21717 = vmatpush3.bf16.xpose.msk.msra.mxu1 %vm24440_vm7, %v26344_v63 }
0x3843   :  { %21720 = vmatprep.subr.msk.bf16.mxu1 %vm24440_vm7, %v21718_v55 }
0x384a   :  { %21723 = vmatpush3.bf16.xpose.msk.msra.mxu1 %vm24440_vm7, %v21718_v55 }
0x3860   :  { %v16227_v61 = vpop.xlane.xlu1 %16226 }
0x3861   :  { %22668 = vrcp.f32 %v16227_v61  ;;  %v16224_v60 = vpop.xlane.xlu0 %16223 }
0x3862   :  { %22670 = vrcp.f32 %v16224_v60 }
0x3869   :  { %v16233_v15 = vpop.xlane.xlu1 %16232 }
0x386a   :  { %22672 = vrcp.f32 %v16233_v15 }
0x386b   :  { %v22669_v4 = vpop.eup %22668 }
0x386c   :  { %v22671_v20 = vpop.eup %22670  ;;  %v16251_v63 = vmul.f32 %v22669_v4, %v26401_v50  ;;  %v21730_v50 = vpack.c.bf16 %v22250_v31, %v22249_v46 }
0x386d   :  { %v16230_v17 = vpop.xlane.xlu0 %16229  ;;  %v16250_v21 = vmul.f32 %v22671_v20, %v26403_v2  ;;  %v16477_v59 = vpop.permute.xlu1 %16476 }
0x386e   :  { %22674 = vrcp.f32 %v16230_v17 }
0x386f   :  { %21171 = vmatprep.mubr.msk.f32.mxu1 %vm703_vm5, %v16250_v21 }
0x3870   :  { %21172 = vmatmul.mubr.msk.f32.gmra.mrb[168].mxu1 %vm703_vm5, %v16251_v63 }
0x3871   :  { %v16475_v13 = vpop.permute.xlu0 %16474  ;;  %v16594_v26 = vpop.permute.xlu1 %16593 }
0x3872   :  { %21196 = vmatprep.mubr.msk.f32.mxu1 %vm467_vm4, %v16475_v13 }
0x3874   :  { %21197 = vmatmul.mubr.msk.f32.vlgmr.msra.gmra.mrb[170].mxu1 %vm467_vm4, %v16477_v59  ;;  %v22673_v56 = vpop.eup %22672 }
0x3875   :  { %v16253_v2 = vmul.f32 %v22673_v56, %v26409_v35 }
0x3878   :  { %v22675_v10 = vpop.eup %22674 }
0x3879   :  { %v16252_v40 = vmul.f32 %v22675_v10, %v26418_v39 }
0x387b   :  { %21182 = vmatprep.mubr.msk.f32.mxu0 %vm703_vm5, %v16252_v40 }
0x387c   :  { %21183 = vmatmul.mubr.msk.f32.vlgmr.msra.gmra.mrb[168].mxu0 %vm703_vm5, %v16253_v2 }
0x387d   :  { %21729 = vmatpush3.bf16.xpose.msk.msra.mxu0 %vm24440_vm7, %v26411_v30 }
0x387e   :  { %21732 = vmatprep.subr.msk.bf16.mxu0 %vm24440_vm7, %v21730_v50 }
0x3885   :  { %21735 = vmatpush3.bf16.xpose.msk.msra.mxu0 %vm24440_vm7, %v21730_v50 }
0x38a2   :  { %v16236_v5 = vpop.xlane.xlu1 %16235  ;;  %v16239_v39 = vpop.xlane.xlu0 %16238 }
0x38a3   :  { %22676 = vrcp.f32 %v16236_v5 }
0x38a4   :  { %22678 = vrcp.f32 %v16239_v39 }
0x38a6   :  { %v16481_v35 = vpop.permute.xlu1 %16480  ;;  %v16592_v33 = vpop.permute.xlu0 %16591 }
0x38aa   :  { %v16598_v49 = vpop.permute.xlu1 %16597  ;;  %v16479_v16 = vpop.permute.xlu0 %16478 }
0x38ab   :  { %21199 = vmatprep.mubr.msk.f32.mxu1 %vm467_vm4, %v16479_v16 }
0x38ac   :  { %21200 = vmatmul.mubr.msk.f32.gmra.mrb[172].mxu1 %vm467_vm4, %v16481_v35 }
0x38ad   :  { %v22677_v43 = vpop.eup %22676 }
0x38ae   :  { %v22679_v30 = vpop.eup %22678  ;;  %v22258_v23 = vpop.permute.xlu1 %22257  ;;  %v16254_v51 = vmul.f32 %v22677_v43, %v26430_v54 }
0x38af   :  { %v16596_v55 = vpop.permute.xlu0 %16595  ;;  %v16255_v61 = vmul.f32 %v22679_v30, %v26432_v28  ;;  %v22260_v15 = vunpack.i.h.bf16 %v22258_v23  ;;  %v22259_v4 = vunpack.i.l.bf16 %v22258_v23 }
0x38b0   :  { %21185 = vmatprep.mubr.msk.f32.mxu0 %vm703_vm5, %v16254_v51 }
0x38b1   :  { %21186 = vmatmul.mubr.msk.f32.gmra.mrb[170].mxu0 %vm703_vm5, %v16255_v61  ;;  %v21740_v56 = vpack.c.bf16 %v22260_v15, %v22259_v4 }
0x38b2   :  { %v22268_v60 = vpop.permute.xlu1 %22267  ;;  %21210 = vmatprep.mubr.msk.f32.mxu0 %vm467_vm4, %v16592_v33 }
0x38b3   :  { %v22253_v20 = vpop.permute.xlu0 %22252  ;;  %v22270_v13 = vunpack.i.h.bf16 %v22268_v60  ;;  %v22269_v28 = vunpack.i.l.bf16 %v22268_v60 }
0x38b4   :  { %v22255_v17 = vunpack.i.h.bf16 %v22253_v20  ;;  %v22254_v21 = vunpack.i.l.bf16 %v22253_v20 }
0x38b5   :  { %21211 = vmatmul.mubr.msk.f32.vlgmr.msra.gmra.mrb[172].mxu0 %vm467_vm4, %v16594_v26  ;;  %v21748_v35 = vpack.c.bf16 %v22270_v13, %v22269_v28 }
0x38b6   :  { %v22273_v63 = vpop.permute.xlu1 %22272  ;;  %21213 = vmatprep.mubr.msk.f32.mxu0 %vm467_vm4, %v16596_v55  ;;  %v21736_v54 = vpack.c.bf16 %v22255_v17, %v22254_v21 }
0x38b7   :  { %v22263_v59 = vpop.permute.xlu0 %22262  ;;  %v22275_v10 = vunpack.i.h.bf16 %v22273_v63  ;;  %v22274_v31 = vunpack.i.l.bf16 %v22273_v63 }
0x38b8   :  { %v22265_v46 = vunpack.i.h.bf16 %v22263_v59  ;;  %v22264_v40 = vunpack.i.l.bf16 %v22263_v59  ;;  %21737 = vmatprep.subr.bf16.mxu1 %v21736_v54 }
0x38b9   :  { %21739 = vmatpush3.bf16.msra.mxu1 %v21736_v54  ;;  %21214 = vmatmul.mubr.msk.f32.gmra.mrb[174].mxu0 %vm467_vm4, %v16598_v49  ;;  %v26504_v26 = vpack.c.bf16 %v22275_v10, %v22274_v31 }
0x38ba   :  { %21741 = vmatprep.subr.bf16.mxu1 %v21740_v56  ;;  %v21744_v2 = vpack.c.bf16 %v22265_v46, %v22264_v40 }
0x38bb   :  { %v22283_v50 = vpop.permute.xlu0 %22282 }
0x38bc   :  { %v22285_v5 = vunpack.i.h.bf16 %v22283_v50  ;;  %v22284_v39 = vunpack.i.l.bf16 %v22283_v50  ;;  %21745 = vmatprep.subr.bf16.mxu0 %v21744_v2 }
0x38bd   :  { %21743 = vmatpush3.bf16.msra.mxu1 %v21740_v56  ;;  %21747 = vmatpush3.bf16.msra.mxu0 %v21744_v2 }
0x38be   :  { %21749 = vmatprep.subr.bf16.mxu0 %v21748_v35  ;;  %21754 = vmatprep.subr.msk.bf16.mxu1 %vm24440_vm7, %v26504_v26  ;;  %v26509_v33 = vpack.c.bf16 %v22285_v5, %v22284_v39 }
0x38c1   :  { %21751 = vmatpush3.bf16.msra.mxu0 %v21748_v35 }
0x38c2   :  { %21766 = vmatprep.subr.msk.bf16.mxu0 %vm24440_vm7, %v26509_v33 }
0x3914   :  { %v26514_v49 = vpop.f32.mrb[166].mxu1 }
0x3915   :  { %v26516_v16 = vpop.f32.mrb[167].mxu1 }
0x3943   :  { %v26518_v43 = vpop.f32.mrb[168].mxu1 }
0x3944   :  { %v26520_v30 = vpop.f32.mrb[169].mxu1 }
0x3947   :  { %v21198_v23 = vpop.f32.mrb[170].mxu1 }
0x3948   :  { %v16578_v51 = vadd.f32 %v26200_v14, %v21198_v23  ;;  %v16572_v55 = vpop.f32.mrb[171].mxu1 }
0x3949   :  { %v16573_v61 = vadd.f32 %v26204_v57, %v16572_v55 }
0x394a   :  { %v16711_v60 = vsel %vm703_vm5, %v16578_v51, -inf }
0x394b   :  { %16712 = vmax.xlane.f32.xlu1 %v16711_v60  ;;  %v16708_v15 = vsel %vm703_vm5, %v16573_v61, -inf }
0x394c   :  { %16709 = vmax.xlane.f32.xlu0 %v16708_v15 }
0x394f   :  { %v26526_v4 = vpop.f32.mrb[168].mxu0 }
0x3950   :  { %v26528_v20 = vpop.f32.mrb[169].mxu0 }
0x397f   :  { %v21201_v17 = vpop.f32.mrb[172].mxu1 }
0x3980   :  { %v16588_v21 = vadd.f32 %v26210_v53, %v21201_v17  ;;  %v16582_v63 = vpop.f32.mrb[173].mxu1 }
0x3981   :  { %v16583_v54 = vadd.f32 %v26214_v48, %v16582_v63 }
0x3982   :  { %v16717_v13 = vsel %vm703_vm5, %v16588_v21, -inf }
0x3983   :  { %16718 = vmax.xlane.f32.xlu1 %v16717_v13  ;;  %v16714_v59 = vsel %vm703_vm5, %v16583_v54, -inf }
0x3984   :  { %v26533_v28 = vpop.f32.mrb[170].mxu0  ;;  %16715 = vmax.xlane.f32.xlu0 %v16714_v59 }
0x3985   :  { %v26536_v56 = vpop.f32.mrb[171].mxu0 }
0x3988   :  { %v21212_v10 = vpop.f32.mrb[172].mxu0 }
0x3989   :  { %v16695_v31 = vadd.f32 %v26200_v14, %v21212_v10  ;;  %v16689_v46 = vpop.f32.mrb[173].mxu0 }
0x398a   :  { %v16690_v40 = vadd.f32 %v26204_v57, %v16689_v46  ;;  %v26553_v57 = vpop.permute.xlu1 %22277 }
0x398b   :  { %v16723_v2 = vsel %vm703_vm5, %v16695_v31, -inf }
0x398c   :  { %16724 = vmax.xlane.f32.xlu0 %v16723_v2  ;;  %v21215_v50 = vpop.f32.mrb[174].mxu0  ;;  %v16720_v55 = vsel %vm703_vm5, %v16690_v40, -inf }
0x398d   :  { %v26542_v5 = vadd.f32 %v26210_v53, %v21215_v50  ;;  %v16699_v39 = vpop.f32.mrb[175].mxu0 }
0x398e   :  { %v16700_v35 = vadd.f32 %v26214_v48, %v16699_v39  ;;  %v26555_v53 = vpop.permute.xlu1 %22287 }
0x398f   :  { %v16729_v23 = vsel %vm703_vm5, %v26542_v5, -inf }
0x3990   :  { %16730 = vmax.xlane.f32.xlu1 %v16729_v23  ;;  %16721 = vmax.xlane.f32.xlu0 %v16720_v55  ;;  %v16726_v14 = vsel %vm703_vm5, %v16700_v35, -inf }
0x3994   :  { %16727 = vmax.xlane.f32.xlu0 %v16726_v14 }
0x39a1   :  { %17016 = vrot.lane.b32.xlu1 %v26160_v24, %s23201_s15 }
0x39aa   :  { %17014 = vrot.lane.b32.xlu0 %v26102_v52, %s23201_s15 }
0x39d8   :  { %v16713_v48 = vpop.xlane.xlu1 %16712 }
0x39d9   :  { %v16733_v60 = vsub.f32 %v16578_v51, %v16713_v48  ;;  %v16710_v15 = vpop.xlane.xlu0 %16709 }
0x39da   :  { %v16732_v17 = vsub.f32 %v16573_v61, %v16710_v15 }
0x39db   :  { %v16742_v63 = vmul.f32 1.442695, %v16733_v60 }
0x39dc   :  { %v16740_v13 = vmul.f32 1.442695, %v16732_v17 }
0x39dd   :  { %22680 = vpow2.f32 %v16742_v63 }
0x39de   :  { %22682 = vpow2.f32 %v16740_v13 }
0x39e7   :  { %v26557_v59 = vpop.eup %22680 }
0x39e8   :  { %v26559_v10 = vpop.eup %22682  ;;  %v16759_v24 = vsel %vm703_vm5, %v26557_v59, 0.0 }
0x39e9   :  { %16760 = vadd.xlane.f32.xlu1 %v16759_v24  ;;  %v16756_v52 = vsel %vm703_vm5, %v26559_v10, 0.0 }
0x39ea   :  { %16757 = vadd.xlane.f32.xlu0 %v16756_v52 }
0x3a10   :  { %v16719_v46 = vpop.xlane.xlu1 %16718 }
0x3a11   :  { %v16735_v51 = vsub.f32 %v16588_v21, %v16719_v46  ;;  %v16716_v2 = vpop.xlane.xlu0 %16715 }
0x3a12   :  { %v16734_v61 = vsub.f32 %v16583_v54, %v16716_v2 }
0x3a13   :  { %v16746_v50 = vmul.f32 1.442695, %v16735_v51 }
0x3a14   :  { %v16744_v39 = vmul.f32 1.442695, %v16734_v61 }
0x3a15   :  { %22684 = vpow2.f32 %v16746_v50 }
0x3a16   :  { %22686 = vpow2.f32 %v16744_v39 }
0x3a19   :  { %v16725_v23 = vpop.xlane.xlu0 %16724 }
0x3a1a   :  { %v16737_v55 = vsub.f32 %v16695_v31, %v16725_v23 }
0x3a1c   :  { %v16750_v14 = vmul.f32 1.442695, %v16737_v55 }
0x3a1d   :  { %v16722_v48 = vpop.xlane.xlu0 %16721  ;;  %v16731_v46 = vpop.xlane.xlu1 %16730 }
0x3a1e   :  { %22688 = vpow2.f32 %v16750_v14  ;;  %v16736_v60 = vsub.f32 %v16690_v40, %v16722_v48  ;;  %v16739_v2 = vsub.f32 %v26542_v5, %v16731_v46 }
0x3a1f   :  { %v26565_v15 = vpop.eup %22684 }
0x3a20   :  { %v16748_v17 = vmul.f32 1.442695, %v16736_v60  ;;  %v22687_v63 = vpop.eup %22686  ;;  %v16765_v13 = vsel %vm703_vm5, %v26565_v15, 0.0  ;;  %v16754_v50 = vmul.f32 1.442695, %v16739_v2  ;;  %v22280_v60 = vunpack.i.h.bf16 %v26553_v57 }
0x3a21   :  { %16766 = vadd.xlane.f32.xlu1 %v16765_v13  ;;  %v16762_v21 = vsel %vm703_vm5, %v22687_v63, 0.0  ;;  %v16728_v52 = vpop.xlane.xlu0 %16727 }
0x3a22   :  { %22690 = vpow2.f32 %v16748_v17  ;;  %16763 = vadd.xlane.f32.xlu0 %v16762_v21  ;;  %v16738_v51 = vsub.f32 %v16700_v35, %v16728_v52  ;;  %v22279_v17 = vunpack.i.l.bf16 %v26553_v57 }
0x3a24   :  { %v16752_v61 = vmul.f32 1.442695, %v16738_v51  ;;  %v21758_v21 = vpack.c.bf16 %v22280_v60, %v22279_v17  ;;  %v22816_v17 = vld [vmem:[%s27116_s23 + $0x8] sm:$0xff] }
0x3a25   :  { %v17015_v5 = vpop.permute.xlu0 %17014 }
0x3a26   :  { %22692 = vpow2.f32 %v16752_v61  ;;  %v22290_v61 = vunpack.i.h.bf16 %v26555_v53 }
0x3a27   :  { %22694 = vpow2.f32 %v16754_v50 }
0x3a28   :  { %v26570_v54 = vpop.eup %22688 }
0x3a29   :  { %v16771_v31 = vsel %vm703_vm5, %v26570_v54, 0.0 }
0x3a2a   :  { %16772 = vadd.xlane.f32.xlu1 %v16771_v31 }
0x3a2c   :  { %v26574_v24 = vpop.eup %22690 }
0x3a2d   :  { %v16768_v40 = vsel %vm703_vm5, %v26574_v24, 0.0 }
0x3a2e   :  { %16769 = vadd.xlane.f32.xlu0 %v16768_v40 }
0x3a30   :  { %v26585_v39 = vpop.eup %22692 }
0x3a31   :  { %v26587_v23 = vpop.eup %22694 }
0x3a3b   :  { %17020 = vrot.lane.b32.xlu1 %v26171_v12, %s23201_s15  ;;  %v16774_v12 = vsel %vm703_vm5, %v26585_v39, 0.0 }
0x3a3f   :  { %17133 = vrot.lane.b32.xlu1 %v26185_v34, %s23201_s15  ;;  %v16777_v34 = vsel %vm703_vm5, %v26587_v23, 0.0 }
0x3a44   :  { %17018 = vrot.lane.b32.xlu0 %v26162_v47, %s23201_s15  ;;  %v17017_v47 = vpop.permute.xlu1 %17016 }
0x3a63   :  { %16775 = vadd.xlane.f32.xlu1 %v16774_v12  ;;  %16778 = vadd.xlane.f32.xlu0 %v16777_v34 }
0x3a74   :  { %17137 = vrot.lane.b32.xlu1 %v26195_v41, %s23201_s15 }
0x3a76   :  { %v16761_v35 = vpop.xlane.xlu1 %16760 }
0x3a77   :  { %22696 = vrcp.f32 %v16761_v35  ;;  %v16758_v55 = vpop.xlane.xlu0 %16757 }
0x3a78   :  { %22698 = vrcp.f32 %v16758_v55 }
0x3a79   :  { %17131 = vrot.lane.b32.xlu0 %v26122_v45, %s23201_s15 }
0x3a7d   :  { %17135 = vrot.lane.b32.xlu0 %v26188_v3, %s23201_s15 }
0x3a81   :  { %v22697_v14 = vpop.eup %22696 }
0x3a82   :  { %v22699_v48 = vpop.eup %22698  ;;  %v16789_v41 = vmul.f32 %v22697_v14, %v26557_v59 }
0x3a83   :  { %v16788_v13 = vmul.f32 %v22699_v48, %v26559_v10 }
0x3a85   :  { %21224 = vmatprep.mubr.msk.f32.mxu1 %vm703_vm5, %v16788_v13 }
0x3a86   :  { %21225 = vmatmul.mubr.msk.f32.vlgmr.msra.gmra.mrb[174].mxu1 %vm703_vm5, %v16789_v41 }
0x3a87   :  { %21757 = vmatpush3.bf16.xpose.msk.msra.mxu1 %vm24440_vm7, %v26504_v26 }
0x3a88   :  { %21760 = vmatprep.subr.msk.bf16.mxu1 %vm24440_vm7, %v21758_v21 }
0x3a8f   :  { %21763 = vmatpush3.bf16.xpose.msk.msra.mxu1 %vm24440_vm7, %v21758_v21  ;;  %v22817_v21 = vld [vmem:[%s27116_s23] sm:$0xff] }
0x3aae   :  { %v16767_v45 = vpop.xlane.xlu1 %16766 }
0x3aaf   :  { %22700 = vrcp.f32 %v16767_v45  ;;  %v16764_v3 = vpop.xlane.xlu0 %16763 }
0x3ab0   :  { %22702 = vrcp.f32 %v16764_v3 }
0x3ab7   :  { %v16773_v57 = vpop.xlane.xlu1 %16772 }
0x3ab8   :  { %22704 = vrcp.f32 %v16773_v57 }
0x3ab9   :  { %v22701_v59 = vpop.eup %22700 }
0x3aba   :  { %v22703_v10 = vpop.eup %22702  ;;  %v16791_v52 = vmul.f32 %v22701_v59, %v26565_v15 }
0x3abb   :  { %v16770_v31 = vpop.xlane.xlu0 %16769  ;;  %v16790_v40 = vmul.f32 %v22703_v10, %v22687_v63  ;;  %v17021_v51 = vpop.permute.xlu1 %17020  ;;  %v22289_v63 = vunpack.i.l.bf16 %v26555_v53  ;;  %v22818_v10 = vld [vmem:[%s27116_s23 + $0x18] sm:$0xff] }
0x3abc   :  { %22706 = vrcp.f32 %v16770_v31 }
0x3abd   :  { %21227 = vmatprep.mubr.msk.f32.mxu1 %vm703_vm5, %v16790_v40  ;;  %v21770_v12 = vpack.c.bf16 %v22290_v61, %v22289_v63 }
0x3abe   :  { %21228 = vmatmul.mubr.msk.f32.gmra.mrb[176].mxu1 %vm703_vm5, %v16791_v52 }
0x3abf   :  { %21252 = vmatprep.mubr.msk.f32.mxu1 %vm467_vm4, %v17015_v5  ;;  %v17019_v26 = vpop.permute.xlu0 %17018  ;;  %v17134_v53 = vpop.permute.xlu1 %17133 }
0x3ac2   :  { %21253 = vmatmul.mubr.msk.f32.vlgmr.msra.gmra.mrb[178].mxu1 %vm467_vm4, %v17017_v47  ;;  %v22705_v46 = vpop.eup %22704 }
0x3ac3   :  { %21255 = vmatprep.mubr.msk.f32.mxu1 %vm467_vm4, %v17019_v26  ;;  %v16793_v50 = vmul.f32 %v22705_v46, %v26570_v54  ;;  %v22819_v26 = vld [vmem:[%s27116_s23 + $0x10] sm:$0xff] }
0x3ac6   :  { %v22707_v2 = vpop.eup %22706  ;;  %21256 = vmatmul.mubr.msk.f32.gmra.mrb[180].mxu1 %vm467_vm4, %v17021_v51 }
0x3ac7   :  { %v16792_v15 = vmul.f32 %v22707_v2, %v26574_v24 }
0x3ac9   :  { %21238 = vmatprep.mubr.msk.f32.mxu0 %vm703_vm5, %v16792_v15 }
0x3aca   :  { %21239 = vmatmul.mubr.msk.f32.vlgmr.msra.gmra.mrb[176].mxu0 %vm703_vm5, %v16793_v50 }
0x3acb   :  { %21769 = vmatpush3.bf16.xpose.msk.msra.mxu0 %vm24440_vm7, %v26509_v33 }
0x3acc   :  { %21772 = vmatprep.subr.msk.bf16.mxu0 %vm24440_vm7, %v21770_v12 }
0x3ad3   :  { %21775 = vmatpush3.bf16.xpose.msk.msra.mxu0 %vm24440_vm7, %v21770_v12 }
0x3af0   :  { %v16776_v34 = vpop.xlane.xlu1 %16775  ;;  %v16779_v24 = vpop.xlane.xlu0 %16778 }
0x3af1   :  { %22708 = vrcp.f32 %v16776_v34 }
0x3af2   :  { %22710 = vrcp.f32 %v16779_v24 }
0x3af4   :  { %v17132_v35 = vpop.permute.xlu0 %17131  ;;  %v17138_v33 = vpop.permute.xlu1 %17137 }
0x3af8   :  { %v17136_v18 = vpop.permute.xlu0 %17135 }
0x3afb   :  { %v22709_v54 = vpop.eup %22708 }
0x3afc   :  { %v22711_v47 = vpop.eup %22710  ;;  %v16794_v5 = vmul.f32 %v22709_v54, %v26585_v39 }
0x3afd   :  { %v16795_v55 = vmul.f32 %v22711_v47, %v26587_v23 }
0x3afe   :  { %21241 = vmatprep.mubr.msk.f32.mxu0 %vm703_vm5, %v16794_v5 }
0x3aff   :  { %21242 = vmatmul.mubr.msk.f32.gmra.mrb[178].mxu0 %vm703_vm5, %v16795_v55 }
0x3b00   :  { %21266 = vmatprep.mubr.msk.f32.mxu0 %vm467_vm4, %v17132_v35 }
0x3b03   :  { %21267 = vmatmul.mubr.msk.f32.vlgmr.msra.gmra.mrb[180].mxu0 %vm467_vm4, %v17134_v53 }
0x3b04   :  { %21269 = vmatprep.mubr.msk.f32.mxu0 %vm467_vm4, %v17136_v18 }
0x3b07   :  { %21270 = vmatmul.mubr.msk.f32.gmra.mrb[182].mxu0 %vm467_vm4, %v17138_v33 }
0x3b59   :  { %v26640_v39 = vpop.f32.mrb[174].mxu1 }
0x3b5a   :  { %v26642_v14 = vpop.f32.mrb[175].mxu1 }
0x3b91   :  { %v26644_v23 = vpop.f32.mrb[176].mxu1 }
0x3b92   :  { %v26646_v48 = vpop.f32.mrb[177].mxu1 }
0x3b95   :  { %v21254_v60 = vpop.f32.mrb[178].mxu1 }
0x3b96   :  { %v17118_v13 = vadd.f32 %v22816_v17, %v21254_v60  ;;  %v17112_v41 = vpop.f32.mrb[179].mxu1 }
0x3b97   :  { %v17113_v45 = vadd.f32 %v22817_v21, %v17112_v41 }
0x3b98   :  { %v17251_v3 = vsel %vm703_vm5, %v17118_v13, -inf }
0x3b99   :  { %17252 = vmax.xlane.f32.xlu1 %v17251_v3  ;;  %v21257_v57 = vpop.f32.mrb[180].mxu1  ;;  %v17248_v59 = vsel %vm703_vm5, %v17113_v45, -inf }
0x3b9a   :  { %v17128_v31 = vadd.f32 %v22818_v10, %v21257_v57  ;;  %17249 = vmax.xlane.f32.xlu0 %v17248_v59  ;;  %v17122_v40 = vpop.f32.mrb[181].mxu1 }
0x3b9b   :  { %v17123_v46 = vadd.f32 %v22819_v26, %v17122_v40 }
0x3b9c   :  { %v17257_v52 = vsel %vm703_vm5, %v17128_v31, -inf }
0x3b9d   :  { %v26655_v51 = vpop.f32.mrb[176].mxu0  ;;  %v17254_v61 = vsel %vm703_vm5, %v17123_v46, -inf }
0x3b9e   :  { %v26657_v2 = vpop.f32.mrb[177].mxu0  ;;  %17258 = vmax.xlane.f32.xlu0 %v17257_v52 }
0x3ba2   :  { %17255 = vmax.xlane.f32.xlu0 %v17254_v61 }
0x3bd2   :  { %v26660_v63 = vpop.f32.mrb[178].mxu0 }
0x3bd3   :  { %v26662_v15 = vpop.f32.mrb[179].mxu0 }
0x3bd6   :  { %v21268_v50 = vpop.f32.mrb[180].mxu0 }
0x3bd7   :  { %v17235_v12 = vadd.f32 %v22816_v17, %v21268_v50  ;;  %v17229_v53 = vpop.f32.mrb[181].mxu0 }
0x3bd8   :  { %v17230_v34 = vadd.f32 %v22817_v21, %v17229_v53 }
0x3bd9   :  { %v17263_v24 = vsel %vm703_vm5, %v17235_v12, -inf }
0x3bda   :  { %17264 = vmax.xlane.f32.xlu1 %v17263_v24  ;;  %v21271_v54 = vpop.f32.mrb[182].mxu0  ;;  %v17260_v47 = vsel %vm703_vm5, %v17230_v34, -inf }
0x3bdb   :  { %v17245_v5 = vadd.f32 %v22818_v10, %v21271_v54  ;;  %17261 = vmax.xlane.f32.xlu0 %v17260_v47  ;;  %v17239_v35 = vpop.f32.mrb[183].mxu0 }
0x3bdc   :  { %v17240_v55 = vadd.f32 %v22819_v26, %v17239_v35 }
0x3bdd   :  { %v17269_v18 = vsel %vm703_vm5, %v17245_v5, -inf }
0x3bde   :  { %17270 = vmax.xlane.f32.xlu1 %v17269_v18  ;;  %v17266_v33 = vsel %vm703_vm5, %v17240_v55, -inf }
0x3bdf   :  { %17267 = vmax.xlane.f32.xlu0 %v17266_v33 }
0x3c26   :  { %v17253_v60 = vpop.xlane.xlu1 %17252 }
0x3c27   :  { %v17273_v17 = vsub.f32 %v17118_v13, %v17253_v60  ;;  %v17250_v41 = vpop.xlane.xlu0 %17249 }
0x3c28   :  { %v17272_v21 = vsub.f32 %v17113_v45, %v17250_v41 }
0x3c29   :  { %v17282_v3 = vmul.f32 1.442695, %v17273_v17 }
0x3c2a   :  { %v17280_v57 = vmul.f32 1.442695, %v17272_v21 }
0x3c2b   :  { %22712 = vpow2.f32 %v17282_v3  ;;  %v17259_v59 = vpop.xlane.xlu0 %17258 }
0x3c2c   :  { %22714 = vpow2.f32 %v17280_v57  ;;  %v17275_v40 = vsub.f32 %v17128_v31, %v17259_v59 }
0x3c2e   :  { %v17286_v10 = vmul.f32 1.442695, %v17275_v40 }
0x3c2f   :  { %v17256_v52 = vpop.xlane.xlu0 %17255 }
0x3c30   :  { %22716 = vpow2.f32 %v17286_v10  ;;  %v17274_v26 = vsub.f32 %v17123_v46, %v17256_v52 }
0x3c32   :  { %v17284_v61 = vmul.f32 1.442695, %v17274_v26 }
0x3c34   :  { %22718 = vpow2.f32 %v17284_v61 }
0x3c35   :  { %v26668_v50 = vpop.eup %22712 }
0x3c36   :  { %v22715_v53 = vpop.eup %22714  ;;  %v17299_v13 = vsel %vm703_vm5, %v26668_v50, 0.0 }
0x3c37   :  { %17300 = vadd.xlane.f32.xlu1 %v17299_v13  ;;  %v17296_v45 = vsel %vm703_vm5, %v22715_v53, 0.0 }
0x3c38   :  { %17297 = vadd.xlane.f32.xlu0 %v17296_v45 }
0x3c3a   :  { %v26673_v24 = vpop.eup %22716 }
0x3c3b   :  { %v17305_v31 = vsel %vm703_vm5, %v26673_v24, 0.0 }
0x3c3c   :  { %17306 = vadd.xlane.f32.xlu1 %v17305_v31 }
0x3c3e   :  { %v26677_v54 = vpop.eup %22718 }
0x3c3f   :  { %v17302_v46 = vsel %vm703_vm5, %v26677_v54, 0.0 }
0x3c40   :  { %17303 = vadd.xlane.f32.xlu0 %v17302_v46 }
0x3c67   :  { %v17265_v47 = vpop.xlane.xlu1 %17264 }
0x3c68   :  { %v17277_v35 = vsub.f32 %v17235_v12, %v17265_v47  ;;  %v17262_v18 = vpop.xlane.xlu0 %17261 }
0x3c69   :  { %v17276_v33 = vsub.f32 %v17230_v34, %v17262_v18 }
0x3c6a   :  { %v17290_v60 = vmul.f32 1.442695, %v17277_v35 }
0x3c6b   :  { %v17288_v17 = vmul.f32 1.442695, %v17276_v33  ;;  %v17271_v41 = vpop.xlane.xlu1 %17270 }
0x3c6c   :  { %22720 = vpow2.f32 %v17290_v60  ;;  %v17279_v21 = vsub.f32 %v17245_v5, %v17271_v41  ;;  %v17268_v3 = vpop.xlane.xlu0 %17267 }
0x3c6d   :  { %22722 = vpow2.f32 %v17288_v17  ;;  %v17278_v57 = vsub.f32 %v17240_v55, %v17268_v3 }
0x3c6e   :  { %v17294_v59 = vmul.f32 1.442695, %v17279_v21 }
0x3c6f   :  { %v17292_v40 = vmul.f32 1.442695, %v17278_v57 }
0x3c70   :  { %22724 = vpow2.f32 %v17294_v59 }
0x3c71   :  { %22726 = vpow2.f32 %v17292_v40 }
0x3c76   :  { %v26681_v10 = vpop.eup %22720 }
0x3c77   :  { %v22723_v52 = vpop.eup %22722  ;;  %v17311_v12 = vsel %vm703_vm5, %v26681_v10, 0.0 }
0x3c78   :  { %17312 = vadd.xlane.f32.xlu1 %v17311_v12  ;;  %v17308_v34 = vsel %vm703_vm5, %v22723_v52, 0.0  ;;  %v19139_v12 = vld [vmem:[%s27117_s20 + $0x20] sm:$0xff] }
0x3c79   :  { %17309 = vadd.xlane.f32.xlu0 %v17308_v34  ;;  %v19140_v34 = vld [vmem:[%s27117_s20 + $0x28] sm:$0xff] }
0x3c7a   :  { %v26686_v26 = vpop.eup %22724 }
0x3c7b   :  { %v26688_v5 = vpop.eup %22726  ;;  %v17317_v55 = vsel %vm703_vm5, %v26686_v26, 0.0 }
0x3c7c   :  { %17318 = vadd.xlane.f32.xlu1 %v17317_v55  ;;  %v17314_v61 = vsel %vm703_vm5, %v26688_v5, 0.0  ;;  %v21792_v55 = vpack.c.bf16 %v19140_v34, %v19139_v12 }
0x3c7d   :  { %17315 = vadd.xlane.f32.xlu0 %v17314_v61  ;;  %v19142_v61 = vld [vmem:[%s27117_s20 + $0x38] sm:$0xff] }
0x3c8d   :  { %22297 = vrot.lane.b32.xlu1 %v26113_v29, %s23202_s3 }
0x3c91   :  { %22302 = vrot.lane.b32.xlu1 %v26120_v25, %s23202_s3 }
0x3c93   :  { %22292 = vrot.lane.b32.xlu0 %v26100_v58, %s23202_s3 }
0x3c95   :  { %22307 = vrot.lane.b32.xlu1 %v26136_v0, %s23202_s3 }
0x3c97   :  { %17562 = vrot.lane.b32.xlu0 %v26516_v16, %s23203_s16 }
0x3c99   :  { %17564 = vrot.lane.b32.xlu1 %v26514_v49, %s23203_s16 }
0x3c9b   :  { %17594 = vrot.lane.b32.xlu0 %v26642_v14, %s23178_s22 }
0x3c9d   :  { %17596 = vrot.lane.b32.xlu1 %v26640_v39, %s23178_s22 }
0x3c9f   :  { %17566 = vrot.lane.b32.xlu0 %v26520_v30, %s23203_s16 }
0x3ca1   :  { %17568 = vrot.lane.b32.xlu1 %v26518_v43, %s23203_s16 }
0x3ca3   :  { %17598 = vrot.lane.b32.xlu0 %v26646_v48, %s23178_s22 }
0x3ca5   :  { %17600 = vrot.lane.b32.xlu1 %v26644_v23, %s23178_s22 }
0x3ca7   :  { %17570 = vrot.lane.b32.xlu0 %v26528_v20, %s23203_s16 }
0x3ca9   :  { %17572 = vrot.lane.b32.xlu1 %v26526_v4, %s23203_s16 }
0x3cab   :  { %17602 = vrot.lane.b32.xlu0 %v26657_v2, %s23178_s22 }
0x3cad   :  { %17604 = vrot.lane.b32.xlu1 %v26655_v51, %s23178_s22 }
0x3caf   :  { %17574 = vrot.lane.b32.xlu0 %v26536_v56, %s23203_s16 }
0x3cb1   :  { %17576 = vrot.lane.b32.xlu1 %v26533_v28, %s23203_s16 }
0x3cb3   :  { %17606 = vrot.lane.b32.xlu0 %v26662_v15, %s23178_s22 }
0x3cb5   :  { %17608 = vrot.lane.b32.xlu1 %v26660_v63, %s23178_s22  ;;  %s27120_s22 = sld [smem:[#allocation36_spill]] }
0x3cc4   :  { %v17301_v0 = vpop.xlane.xlu1 %17300 }
0x3cc5   :  { %v17298_v58 = vpop.xlane.xlu0 %17297 }
0x3cc6   :  { %22728 = vrcp.f32 %v17298_v58 }
0x3cc9   :  { %v17307_v49 = vpop.xlane.xlu1 %17306 }
0x3ccd   :  { %v17304_v16 = vpop.xlane.xlu0 %17303 }
0x3cd0   :  { %v22729_v29 = vpop.eup %22728 }
0x3cd1   :  { %v17328_v25 = vmul.f32 %v22729_v29, %v22715_v53 }
0x3cd3   :  { %21280 = vmatprep.mubr.msk.f32.mxu1 %vm703_vm5, %v17328_v25 }
0x3d05   :  { %v17313_v43 = vpop.xlane.xlu1 %17312 }
0x3d06   :  { %v17310_v30 = vpop.xlane.xlu0 %17309 }
0x3d07   :  { %22730 = vrcp.f32 %v17310_v30 }
0x3d08   :  { %22732 = vrcp.f32 %v17301_v0 }
0x3d09   :  { %v17319_v4 = vpop.xlane.xlu1 %17318  ;;  %22734 = vrcp.f32 %v17307_v49 }
0x3d0a   :  { %v17316_v20 = vpop.xlane.xlu0 %17315  ;;  %22736 = vrcp.f32 %v17304_v16 }
0x3d0b   :  { %22738 = vrcp.f32 %v17313_v43 }
0x3d0c   :  { %22740 = vrcp.f32 %v17316_v20 }
0x3d0d   :  { %v22298_v28 = vpop.permute.xlu1 %22297  ;;  %22742 = vrcp.f32 %v17319_v4 }
0x3d0e   :  { %v22293_v56 = vpop.permute.xlu0 %22292  ;;  %v22300_v39 = vunpack.i.h.bf16 %v22298_v28  ;;  %v22299_v14 = vunpack.i.l.bf16 %v22298_v28 }
0x3d0f   :  { %v22295_v23 = vunpack.i.h.bf16 %v22293_v56  ;;  %v22294_v48 = vunpack.i.l.bf16 %v22293_v56 }
0x3d10   :  { %v21780_v45 = vpack.c.bf16 %v22300_v39, %v22299_v14 }
0x3d11   :  { %v22731_v51 = vpop.eup %22730  ;;  %v21776_v2 = vpack.c.bf16 %v22295_v23, %v22294_v48  ;;  %v22303_v63 = vpop.permute.xlu1 %22302 }
0x3d12   :  { %v22305_v15 = vunpack.i.h.bf16 %v22303_v63  ;;  %v22304_v53 = vunpack.i.l.bf16 %v22303_v63  ;;  %v17332_v13 = vmul.f32 %v22731_v51, %v22723_v52  ;;  %v22733_v46 = vpop.eup %22732  ;;  %v17563_v30 = vpop.permute.xlu0 %17562 }
0x3d13   :  { %21777 = vmatprep.subr.bf16.mxu1 %v21776_v2  ;;  %v22735_v35 = vpop.eup %22734  ;;  %v17329_v21 = vmul.f32 %v22733_v46, %v26668_v50 }
0x3d14   :  { %v21784_v31 = vpack.c.bf16 %v22305_v15, %v22304_v53  ;;  %21779 = vmatpush3.bf16.msra.mxu1 %v21776_v2  ;;  %21294 = vmatprep.mubr.msk.f32.mxu0 %vm703_vm5, %v17332_v13  ;;  %v22737_v60 = vpop.eup %22736  ;;  %v17331_v52 = vmul.f32 %v22735_v35, %v26673_v24 }
0x3d15   :  { %v22308_v47 = vpop.permute.xlu1 %22307  ;;  %21781 = vmatprep.subr.bf16.mxu1 %v21780_v45  ;;  %v22739_v17 = vpop.eup %22738  ;;  %v17330_v57 = vmul.f32 %v22737_v60, %v26677_v54 }
0x3d16   :  { %v22310_v18 = vunpack.i.h.bf16 %v22308_v47  ;;  %v22309_v33 = vunpack.i.l.bf16 %v22308_v47  ;;  %21785 = vmatprep.subr.bf16.mxu0 %v21784_v31  ;;  %v22741_v3 = vpop.eup %22740  ;;  %v17333_v59 = vmul.f32 %v22739_v17, %v26681_v10  ;;  %v19141_v10 = vld [vmem:[%s27117_s20 + $0x30] sm:$0xff]  ;;  %v17595_v20 = vpop.permute.xlu0 %17594 }
0x3d17   :  { %21787 = vmatpush3.bf16.msra.mxu0 %v21784_v31  ;;  %v22743_v40 = vpop.eup %22742  ;;  %v17334_v50 = vmul.f32 %v22741_v3, %v26688_v5  ;;  %v21796_v58 = vpack.c.bf16 %v19142_v61, %v19141_v10 }
0x3d18   :  { %v21788_v41 = vpack.c.bf16 %v22310_v18, %v22309_v33  ;;  %21783 = vmatpush3.bf16.msra.mxu1 %v21780_v45  ;;  %v17335_v54 = vmul.f32 %v22743_v40, %v26686_v26  ;;  %v17650_v45 = vsel %vm467_vm4, %v26351_v32, %v17563_v30 }
0x3d19   :  { %21793 = vmatprep.subr.bf16.mxu1 %v21792_v55  ;;  %v17565_v43 = vpop.permute.xlu1 %17564  ;;  %v17658_v46 = vsel %vm302_vm3, %v17650_v45, %v17595_v20 }
0x3d1a   :  { %21789 = vmatprep.subr.bf16.mxu0 %v21788_v41  ;;  %v17567_v56 = vpop.permute.xlu0 %17566  ;;  %v17651_v47 = vsel %vm467_vm4, %v26349_v19, %v17565_v43 }
0x3d1b   :  { %21281 = vmatmul.mubr.msk.f32.vlgmr.msra.gmra.mrb[182].mxu1 %vm703_vm5, %v17329_v21  ;;  %21791 = vmatpush3.bf16.msra.mxu0 %v21788_v41  ;;  %v17652_v17 = vsel %vm467_vm4, %v26355_v1, %v17567_v56 }
0x3d1c   :  { %21283 = vmatprep.mubr.msk.f32.mxu1 %vm703_vm5, %v17330_v57  ;;  %21795 = vmatpush3.bf16.msra.mxu1 %v21792_v55 }
0x3d1d   :  { %21797 = vmatprep.subr.bf16.mxu1 %v21796_v58  ;;  %v17597_v4 = vpop.permute.xlu1 %17596 }
0x3d1e   :  { %21295 = vmatmul.mubr.msk.f32.vlgmr.msra.gmra.mrb[184].mxu0 %vm703_vm5, %v17333_v59  ;;  %v17599_v14 = vpop.permute.xlu0 %17598  ;;  %v17659_v18 = vsel %vm302_vm3, %v17651_v47, %v17597_v4 }
0x3d1f   :  { %21284 = vmatmul.mubr.msk.f32.gmra.mrb[184].mxu1 %vm703_vm5, %v17331_v52  ;;  %21297 = vmatprep.mubr.msk.f32.mxu0 %vm703_vm5, %v17334_v50  ;;  %v17660_v41 = vsel %vm302_vm3, %v17652_v17, %v17599_v14 }
0x3d20   :  { %21799 = vmatpush3.bf16.msra.mxu1 %v21796_v58 }
0x3d21   :  { %v17569_v28 = vpop.permute.xlu1 %17568 }
0x3d22   :  { %21298 = vmatmul.mubr.msk.f32.gmra.mrb[186].mxu0 %vm703_vm5, %v17335_v54  ;;  %v17571_v48 = vpop.permute.xlu0 %17570  ;;  %v17653_v19 = vsel %vm467_vm4, %v26353_v38, %v17569_v28 }
0x3d23   :  { %v17654_v1 = vsel %vm467_vm4, %v26360_v11, %v17571_v48 }
0x3d25   :  { %v17601_v39 = vpop.permute.xlu1 %17600 }
0x3d26   :  { %v17603_v2 = vpop.permute.xlu0 %17602  ;;  %v17661_v3 = vsel %vm302_vm3, %v17653_v19, %v17601_v39 }
0x3d27   :  { %v17662_v52 = vsel %vm302_vm3, %v17654_v1, %v17603_v2 }
0x3d29   :  { %v17573_v23 = vpop.permute.xlu1 %17572 }
0x3d2a   :  { %v17575_v15 = vpop.permute.xlu0 %17574  ;;  %v17655_v38 = vsel %vm467_vm4, %v26357_v8, %v17573_v23 }
0x3d2b   :  { %v17656_v11 = vsel %vm467_vm4, %v26371_v22, %v17575_v15  ;;  %v19248_v22 = vld [vmem:[#allocation16 + $0x1] ss:$0 sm:$0xff] }
0x3d2d   :  { %v17605_v51 = vpop.permute.xlu1 %17604 }
0x3d2e   :  { %v17607_v13 = vpop.permute.xlu0 %17606  ;;  %v17663_v54 = vsel %vm302_vm3, %v17655_v38, %v17605_v51 }
0x3d2f   :  { %v17664_v55 = vsel %vm302_vm3, %v17656_v11, %v17607_v13 }
0x3d31   :  { %v17577_v63 = vpop.permute.xlu1 %17576 }
0x3d32   :  { %v17657_v8 = vsel %vm467_vm4, %v26368_v62, %v17577_v63 }
0x3d35   :  { %v17609_v53 = vpop.permute.xlu1 %17608 }
0x3d36   :  { %v17665_v58 = vsel %vm302_vm3, %v17657_v8, %v17609_v53 }
0x3dee   :  { %v21282_v24 = vpop.f32.mrb[182].mxu1 }
0x3def   :  { %17628 = vrot.lane.b32.xlu1 %v21282_v24, %s23204_s4  ;;  %v17426_v5 = vpop.f32.mrb[183].mxu1 }
0x3df0   :  { %17626 = vrot.lane.b32.xlu0 %v17426_v5, %s23204_s4 }
0x3df1   :  { %v21296_v29 = vpop.f32.mrb[184].mxu0 }
0x3df2   :  { %v21285_v26 = vpop.f32.mrb[184].mxu1  ;;  %v17535_v25 = vpop.f32.mrb[185].mxu0 }
0x3df3   :  { %17632 = vrot.lane.b32.xlu1 %v21285_v26, %s23204_s4  ;;  %v17436_v0 = vpop.f32.mrb[185].mxu1 }
0x3df4   :  { %17630 = vrot.lane.b32.xlu0 %v17436_v0, %s23204_s4 }
0x3df5   :  { %v21299_v49 = vpop.f32.mrb[186].mxu0 }
0x3df6   :  { %v17545_v16 = vpop.f32.mrb[187].mxu0 }
0x3df7   :  { %17636 = vrot.lane.b32.xlu1 %v21296_v29, %s23204_s4 }
0x3df8   :  { %17634 = vrot.lane.b32.xlu0 %v17535_v25, %s23204_s4 }
0x3dfb   :  { %17640 = vrot.lane.b32.xlu1 %v21299_v49, %s23204_s4 }
0x3dfc   :  { %17638 = vrot.lane.b32.xlu0 %v17545_v16, %s23204_s4 }
0x3e61   :  { %v17629_v31 = vpop.permute.xlu1 %17628 }
0x3e62   :  { %v17627_v35 = vpop.permute.xlu0 %17626  ;;  %v17667_v60 = vsel %vm6208_vm6, %v17659_v18, %v17629_v31 }
0x3e63   :  { %v17666_v33 = vsel %vm6208_vm6, %v17658_v46, %v17627_v35 }
0x3e64   :  { %21308 = vmatprep.mubr.msk.f32.mxu1 %vm703_vm5, %v17666_v33 }
0x3e65   :  { %21309 = vmatmul.mubr.msk.f32.vlgmr.msra.gmra.mrb[186].mxu1 %vm703_vm5, %v17667_v60  ;;  %v17633_v32 = vpop.permute.xlu1 %17632 }
0x3e66   :  { %v17631_v21 = vpop.permute.xlu0 %17630  ;;  %v17669_v59 = vsel %vm6208_vm6, %v17661_v3, %v17633_v32 }
0x3e67   :  { %v17668_v57 = vsel %vm6208_vm6, %v17660_v41, %v17631_v21 }
0x3e68   :  { %21311 = vmatprep.mubr.msk.f32.mxu1 %vm703_vm5, %v17668_v57 }
0x3e69   :  { %v17637_v40 = vpop.permute.xlu1 %17636  ;;  %21312 = vmatmul.mubr.msk.f32.gmra.mrb[188].mxu1 %vm703_vm5, %v17669_v59 }
0x3e6a   :  { %v17635_v50 = vpop.permute.xlu0 %17634  ;;  %v17671_v34 = vsel %vm6208_vm6, %v17663_v54, %v17637_v40 }
0x3e6b   :  { %v17670_v12 = vsel %vm6208_vm6, %v17662_v52, %v17635_v50 }
0x3e6c   :  { %21314 = vmatprep.mubr.msk.f32.mxu1 %vm703_vm5, %v17670_v12 }
0x3e6d   :  { %v17641_v10 = vpop.permute.xlu1 %17640  ;;  %21315 = vmatmul.mubr.msk.f32.gmra.mrb[190].mxu1 %vm703_vm5, %v17671_v34 }
0x3e6e   :  { %v17639_v61 = vpop.permute.xlu0 %17638  ;;  %v17673_v5 = vsel %vm6208_vm6, %v17665_v58, %v17641_v10 }
0x3e6f   :  { %v17672_v24 = vsel %vm6208_vm6, %v17664_v55, %v17639_v61 }
0x3e70   :  { %21317 = vmatprep.mubr.msk.f32.mxu1 %vm703_vm5, %v17672_v24 }
0x3e71   :  { %21318 = vmatmul.mubr.msk.f32.gmra.mrb[192].mxu1 %vm703_vm5, %v17673_v5 }
0x3f38   :  { %v21310_v29 = vpop.f32.mrb[186].mxu1 }
0x3f39   :  { %v17776_v26 = vadd.f32 %v21310_v29, %v19248_v22  ;;  %v17770_v25 = vpop.f32.mrb[187].mxu1 }
0x3f3a   :  { %v17771_v0 = vadd.f32 %v19248_v22, %v17770_v25 }
0x3f3b   :  { %v26801_v49 = vadd.f32 %v17776_v26, %v25993_v7 }
0x3f3c   :  { %v26804_v62 = vadd.f32 %v17771_v0, %v25996_v36  ;;  %v21313_v16 = vpop.f32.mrb[188].mxu1 }
0x3f3d   :  { %v17786_v43 = vadd.f32 %v21313_v16, %v19248_v22  ;;  %v17780_v30 = vpop.f32.mrb[189].mxu1  ;;  %v17824_v4 = vsel %vm703_vm5, %v26801_v49, 0.0 }
0x3f3e   :  { %v17781_v20 = vadd.f32 %v19248_v22, %v17780_v30  ;;  %17825 = vadd.xlane.f32.xlu1 %v17824_v4  ;;  %v17821_v28 = vsel %vm703_vm5, %v26804_v62, 0.0 }
0x3f3f   :  { %v26811_v56 = vadd.f32 %v17786_v43, %v26003_v9  ;;  %17822 = vadd.xlane.f32.xlu0 %v17821_v28  ;;  %v19260_v28 = vld [vmem:[%s27118_s26 + $0x28] sm:$0xff] }
0x3f40   :  { %v21316_v7 = vpop.f32.mrb[190].mxu1  ;;  %v26816_v23 = vadd.f32 %v17781_v20, %v26008_v44  ;;  %v19259_v20 = vld [vmem:[%s27118_s26 + $0x20] sm:$0xff] }
0x3f41   :  { %v17796_v39 = vadd.f32 %v21316_v7, %v19248_v22  ;;  %v17790_v14 = vpop.f32.mrb[191].mxu1  ;;  %v17830_v36 = vsel %vm703_vm5, %v26811_v56, 0.0  ;;  %v21800_v7 = vpack.c.bf16 %v19260_v28, %v19259_v20 }
0x3f42   :  { %v17791_v48 = vadd.f32 %v19248_v22, %v17790_v14  ;;  %v17827_v44 = vsel %vm703_vm5, %v26816_v23, 0.0  ;;  %v19262_v14 = vld [vmem:[%s27118_s26 + $0x38] sm:$0xff] }
0x3f43   :  { %v26819_v51 = vadd.f32 %v17796_v39, %v26011_v6  ;;  %17831 = vadd.xlane.f32.xlu0 %v17830_v36  ;;  %21801 = vmatprep.subr.bf16.mxu0 %v21800_v7  ;;  %v19261_v39 = vld [vmem:[%s27118_s26 + $0x30] sm:$0xff] }
0x3f44   :  { %v21319_v2 = vpop.f32.mrb[192].mxu1  ;;  %v26824_v53 = vadd.f32 %v17791_v48, %v26016_v27  ;;  %21803 = vmatpush3.bf16.msra.mxu0 %v21800_v7  ;;  %v21804_v36 = vpack.c.bf16 %v19262_v14, %v19261_v39 }
0x3f45   :  { %v17806_v63 = vadd.f32 %v21319_v2, %v19248_v22  ;;  %v17800_v15 = vpop.f32.mrb[193].mxu1  ;;  %v17836_v9 = vsel %vm703_vm5, %v26819_v51, 0.0 }
0x3f46   :  { %v17801_v13 = vadd.f32 %v19248_v22, %v17800_v15  ;;  %17837 = vadd.xlane.f32.xlu1 %v17836_v9  ;;  %v17833_v27 = vsel %vm703_vm5, %v26824_v53, 0.0  ;;  %21805 = vmatprep.subr.bf16.mxu0 %v21804_v36 }
0x3f47   :  { %v26829_v45 = vadd.f32 %v17806_v63, %v26023_v42  ;;  %17828 = vadd.xlane.f32.xlu0 %v17827_v44 }
0x3f48   :  { %v26834_v31 = vadd.f32 %v17801_v13, %v26026_v37  ;;  %21807 = vmatpush3.bf16.msra.mxu0 %v21804_v36 }
0x3f49   :  { %v17842_v6 = vsel %vm703_vm5, %v26829_v45, 0.0 }
0x3f4a   :  { %17843 = vadd.xlane.f32.xlu1 %v17842_v6  ;;  %v17839_v46 = vsel %vm703_vm5, %v26834_v31, 0.0 }
0x3f4b   :  { %17834 = vadd.xlane.f32.xlu0 %v17833_v27 }
0x3f4f   :  { %17840 = vadd.xlane.f32.xlu0 %v17839_v46 }
0x3fcb   :  { %v17826_v47 = vpop.xlane.xlu1 %17825 }
0x3fcc   :  { %v17846_v35 = vmul.f32 0.03125, %v17826_v47  ;;  %v17823_v42 = vpop.xlane.xlu0 %17822 }
0x3fcd   :  { %v17845_v18 = vmul.f32 0.03125, %v17823_v42 }
0x3fce   :  { %v26841_v33 = vsub.f32 %v26801_v49, %v17846_v35 }
0x3fcf   :  { %v26844_v60 = vsub.f32 %v26804_v62, %v17845_v18 }
0x3fd0   :  { %v17832_v37 = vpop.xlane.xlu0 %17831  ;;  %v17862_v17 = vmul.f32 %v26841_v33, %v26841_v33 }
0x3fd1   :  { %v17848_v32 = vmul.f32 0.03125, %v17832_v37  ;;  %v17861_v41 = vmul.f32 %v26844_v60, %v26844_v60 }
0x3fd2   :  { %v17872_v19 = vsel %vm703_vm5, %v17862_v17, 0.0 }
0x3fd3   :  { %v26852_v21 = vsub.f32 %v26811_v56, %v17848_v32  ;;  %v17838_v3 = vpop.xlane.xlu1 %17837  ;;  %17873 = vadd.xlane.f32.xlu1 %v17872_v19  ;;  %v17869_v57 = vsel %vm703_vm5, %v17861_v41, 0.0 }
0x3fd4   :  { %v17850_v59 = vmul.f32 0.03125, %v17838_v3  ;;  %17870 = vadd.xlane.f32.xlu0 %v17869_v57  ;;  %v17829_v1 = vpop.xlane.xlu0 %17828  ;;  %v19257_v57 = vld [vmem:[#allocation17 + $0x1] ss:$0 sm:$0xff] }
0x3fd5   :  { %v17847_v40 = vmul.f32 0.03125, %v17829_v1  ;;  %v17864_v52 = vmul.f32 %v26852_v21, %v26852_v21 }
0x3fd6   :  { %v26858_v38 = vsub.f32 %v26819_v51, %v17850_v59 }
0x3fd7   :  { %v26861_v50 = vsub.f32 %v26816_v23, %v17847_v40  ;;  %v17844_v54 = vpop.xlane.xlu1 %17843  ;;  %v17878_v12 = vsel %vm703_vm5, %v17864_v52, 0.0 }
0x3fd8   :  { %v17852_v34 = vmul.f32 0.03125, %v17844_v54  ;;  %17879 = vadd.xlane.f32.xlu1 %v17878_v12  ;;  %v17835_v11 = vpop.xlane.xlu0 %17834  ;;  %v17866_v10 = vmul.f32 %v26858_v38, %v26858_v38 }
0x3fd9   :  { %v17849_v55 = vmul.f32 0.03125, %v17835_v11  ;;  %v17863_v8 = vmul.f32 %v26861_v50, %v26861_v50 }
0x3fda   :  { %v26869_v61 = vsub.f32 %v26829_v45, %v17852_v34  ;;  %v17884_v58 = vsel %vm703_vm5, %v17866_v10, 0.0  ;;  %v19258_v34 = vld [vmem:[#allocation19 + $0x1] ss:$0 sm:$0xff] }
0x3fdb   :  { %v26873_v24 = vsub.f32 %v26824_v53, %v17849_v55  ;;  %v17875_v5 = vsel %vm703_vm5, %v17863_v8, 0.0 }
0x3fdc   :  { %17885 = vadd.xlane.f32.xlu1 %v17884_v58  ;;  %17876 = vadd.xlane.f32.xlu0 %v17875_v5  ;;  %v17841_v22 = vpop.xlane.xlu0 %17840  ;;  %v17868_v29 = vmul.f32 %v26869_v61, %v26869_v61 }
0x3fdd   :  { %v17851_v26 = vmul.f32 0.03125, %v17841_v22  ;;  %v17865_v25 = vmul.f32 %v26873_v24, %v26873_v24 }
0x3fde   :  { %v17890_v0 = vsel %vm703_vm5, %v17868_v29, 0.0 }
0x3fdf   :  { %v26882_v16 = vsub.f32 %v26834_v31, %v17851_v26  ;;  %v17881_v43 = vsel %vm703_vm5, %v17865_v25, 0.0 }
0x3fe0   :  { %17891 = vadd.xlane.f32.xlu1 %v17890_v0  ;;  %17882 = vadd.xlane.f32.xlu0 %v17881_v43 }
0x3fe1   :  { %v17867_v30 = vmul.f32 %v26882_v16, %v26882_v16 }
0x3fe3   :  { %v17887_v4 = vsel %vm703_vm5, %v17867_v30, 0.0 }
0x3fe4   :  { %17888 = vadd.xlane.f32.xlu0 %v17887_v4 }
0x4060   :  { %v17874_v48 = vpop.xlane.xlu1 %17873 }
0x4061   :  { %v17894_v2 = vmul.f32 0.03125, %v17874_v48  ;;  %v17871_v63 = vpop.xlane.xlu0 %17870 }
0x4062   :  { %v17893_v15 = vmul.f32 0.03125, %v17871_v63 }
0x4063   :  { %v17902_v9 = vadd.f32 1e-12, %v17894_v2 }
0x4064   :  { %v17901_v13 = vadd.f32 1e-12, %v17893_v15  ;;  %v19273_v15 = vld [vmem:[%s23360_s17 + $0x48] sm:$0xff] }
0x4065   :  { %22744 = vrsqrt.f32 %v17902_v9  ;;  %v17880_v44 = vpop.xlane.xlu1 %17879 }
0x4066   :  { %22746 = vrsqrt.f32 %v17901_v13  ;;  %v17896_v6 = vmul.f32 0.03125, %v17880_v44  ;;  %v19274_v13 = vld [vmem:[%s23360_s17 + $0x50] sm:$0xff]  ;;  %v19275_v44 = vld [vmem:[%s23360_s17 + $0x58] sm:$0xff] }
0x4068   :  { %v17904_v27 = vadd.f32 1e-12, %v17896_v6  ;;  %v21812_v6 = vpack.c.bf16 %v19275_v44, %v19274_v13 }
0x4069   :  { %v17886_v46 = vpop.xlane.xlu1 %17885  ;;  %v17877_v47 = vpop.xlane.xlu0 %17876 }
0x406a   :  { %22748 = vrsqrt.f32 %v17904_v27  ;;  %v17898_v35 = vmul.f32 0.03125, %v17886_v46  ;;  %v17895_v42 = vmul.f32 0.03125, %v17877_v47  ;;  %v19276_v27 = vld [vmem:[%s23360_s17 + $0x60] sm:$0xff]  ;;  %v19277_v46 = vld [vmem:[%s23360_s17 + $0x68] sm:$0xff] }
0x406b   :  { %v21816_v47 = vpack.c.bf16 %v19277_v46, %v19276_v27 }
0x406c   :  { %v17906_v18 = vadd.f32 1e-12, %v17898_v35  ;;  %v17903_v37 = vadd.f32 1e-12, %v17895_v42  ;;  %v19278_v35 = vld [vmem:[%s23360_s17 + $0x70] sm:$0xff]  ;;  %v19279_v42 = vld [vmem:[%s23360_s17 + $0x78] sm:$0xff] }
0x406d   :  { %v17892_v17 = vpop.xlane.xlu1 %17891  ;;  %v17883_v32 = vpop.xlane.xlu0 %17882 }
0x406e   :  { %22750 = vrsqrt.f32 %v17906_v18  ;;  %v17900_v41 = vmul.f32 0.03125, %v17892_v17  ;;  %v17897_v19 = vmul.f32 0.03125, %v17883_v32  ;;  %v21820_v18 = vpack.c.bf16 %v19279_v42, %v19278_v35 }
0x406f   :  { %v22745_v3 = vpop.eup %22744  ;;  %22752 = vrsqrt.f32 %v17903_v37  ;;  %v19263_v37 = vld [vmem:[#allocation20 + $0x1] ss:$0 sm:$0xff] }
0x4070   :  { %v22747_v59 = vpop.eup %22746  ;;  %v17918_v1 = vmul.f32 %v22745_v3, %v26841_v33  ;;  %v17908_v40 = vadd.f32 1e-12, %v17900_v41  ;;  %v17905_v52 = vadd.f32 1e-12, %v17897_v19 }
0x4071   :  { %v17889_v54 = vpop.xlane.xlu0 %17888  ;;  %v17917_v12 = vmul.f32 %v22747_v59, %v26844_v60 }
0x4072   :  { %v17932_v11 = vmul.f32 %v19257_v57, %v17918_v1  ;;  %22754 = vrsqrt.f32 %v17908_v40  ;;  %v17899_v10 = vmul.f32 0.03125, %v17889_v54 }
0x4073   :  { %22756 = vrsqrt.f32 %v17905_v52  ;;  %v17931_v55 = vmul.f32 %v19257_v57, %v17917_v12 }
0x4074   :  { %v22749_v8 = vpop.eup %22748  ;;  %v17907_v58 = vadd.f32 1e-12, %v17899_v10  ;;  %v17946_v22 = vadd.f32 %v19258_v34, %v17932_v11 }
0x4075   :  { %v17945_v5 = vadd.f32 %v19258_v34, %v17931_v55  ;;  %v17920_v33 = vmul.f32 %v22749_v8, %v26852_v21 }
0x4076   :  { %22758 = vrsqrt.f32 %v17907_v58 }
0x4077   :  { %21328 = vmatprep.mubr.msk.f32.mxu0 %vm703_vm5, %v17945_v5  ;;  %v17934_v25 = vmul.f32 %v19257_v57, %v17920_v33 }
0x4078   :  { %v22751_v29 = vpop.eup %22750  ;;  %21329 = vmatmul.mubr.msk.f32.vlgmr.msra.gmra.mrb[188].mxu0 %vm703_vm5, %v17946_v22 }
0x4079   :  { %v22753_v26 = vpop.eup %22752  ;;  %v17922_v0 = vmul.f32 %v22751_v29, %v26858_v38  ;;  %v17948_v7 = vadd.f32 %v19258_v34, %v17934_v25 }
0x407a   :  { %v17919_v60 = vmul.f32 %v22753_v26, %v26861_v50 }
0x407b   :  { %v17936_v39 = vmul.f32 %v19257_v57, %v17922_v0 }
0x407c   :  { %v22755_v43 = vpop.eup %22754  ;;  %v17933_v30 = vmul.f32 %v19257_v57, %v17919_v60 }
0x407d   :  { %v22757_v4 = vpop.eup %22756  ;;  %v17924_v14 = vmul.f32 %v22755_v43, %v26869_v61  ;;  %v17950_v48 = vadd.f32 %v19258_v34, %v17936_v39 }
0x407e   :  { %v17947_v20 = vadd.f32 %v19258_v34, %v17933_v30  ;;  %v17921_v28 = vmul.f32 %v22757_v4, %v26873_v24 }
0x407f   :  { %v17938_v24 = vmul.f32 %v19257_v57, %v17924_v14 }
0x4080   :  { %v22759_v21 = vpop.eup %22758  ;;  %21331 = vmatprep.mubr.msk.f32.mxu0 %vm703_vm5, %v17947_v20  ;;  %v17935_v36 = vmul.f32 %v19257_v57, %v17921_v28 }
0x4081   :  { %21332 = vmatmul.mubr.msk.f32.gmra.mrb[190].mxu0 %vm703_vm5, %v17948_v7  ;;  %v17923_v38 = vmul.f32 %v22759_v21, %v26882_v16  ;;  %v17952_v63 = vadd.f32 %v19258_v34, %v17938_v24  ;;  %v19272_v16 = vld [vmem:[%s23360_s17 + $0x40] sm:$0xff]  ;;  %s27119_s17 = sld [smem:[#allocation35_spill]] }
0x4082   :  { %v17949_v50 = vadd.f32 %v19258_v34, %v17935_v36  ;;  %v21808_v9 = vpack.c.bf16 %v19273_v15, %v19272_v16 }
0x4083   :  { %v17937_v2 = vmul.f32 %v19257_v57, %v17923_v38 }
0x4084   :  { %21334 = vmatprep.mubr.msk.f32.mxu0 %vm703_vm5, %v17949_v50  ;;  %21809 = vmatprep.subr.bf16.mxu1 %v21808_v9 }
0x4085   :  { %21335 = vmatmul.mubr.msk.f32.gmra.mrb[192].mxu0 %vm703_vm5, %v17950_v48  ;;  %v17951_v61 = vadd.f32 %v19258_v34, %v17937_v2  ;;  %21811 = vmatpush3.bf16.msra.mxu1 %v21808_v9 }
0x4086   :  { %21813 = vmatprep.subr.bf16.mxu1 %v21812_v6 }
0x4087   :  { %21337 = vmatprep.mubr.msk.f32.mxu0 %vm703_vm5, %v17951_v61 }
0x4089   :  { %21338 = vmatmul.mubr.msk.f32.gmra.mrb[194].mxu0 %vm703_vm5, %v17952_v63  ;;  %21815 = vmatpush3.bf16.msra.mxu1 %v21812_v6 }
0x408a   :  { %21817 = vmatprep.subr.bf16.mxu1 %v21816_v47 }
0x408d   :  { %21819 = vmatpush3.bf16.msra.mxu1 %v21816_v47 }
0x408e   :  { %21821 = vmatprep.subr.bf16.mxu1 %v21820_v18 }
0x4091   :  { %21823 = vmatpush3.bf16.msra.mxu1 %v21820_v18 }
0x414b   :  { %v21330_v17 = vpop.f32.mrb[188].mxu0 }
0x414c   :  { %v18062_v32 = vadd.f32 %v21330_v17, %v19263_v37  ;;  %v18056_v41 = vpop.f32.mrb[189].mxu0 }
0x414d   :  { %v18057_v19 = vadd.f32 %v19263_v37, %v18056_v41 }
0x414e   :  { %v18104_v3 = vmul.f32 0.044715, %v18062_v32  ;;  %v18096_v41 = vmul.f32 0.5, %v18062_v32 }
0x414f   :  { %v18103_v57 = vmul.f32 0.044715, %v18057_v19  ;;  %v18095_v18 = vmul.f32 0.5, %v18057_v19 }
0x4150   :  { %v18112_v59 = vmul.f32 %v18104_v3, %v18062_v32 }
0x4151   :  { %v18111_v1 = vmul.f32 %v18103_v57, %v18057_v19 }
0x4152   :  { %v18120_v40 = vmul.f32 %v18112_v59, %v18062_v32 }
0x4153   :  { %v18119_v52 = vmul.f32 %v18111_v1, %v18057_v19 }
0x4154   :  { %v18128_v54 = vadd.f32 %v18120_v40, %v18062_v32  ;;  %v21333_v12 = vpop.f32.mrb[190].mxu0 }
0x4155   :  { %v18127_v34 = vadd.f32 %v18119_v52, %v18057_v19  ;;  %v26916_v11 = vadd.f32 %v21333_v12, %v19263_v37  ;;  %v18066_v10 = vpop.f32.mrb[191].mxu0 }
0x4156   :  { %v18136_v55 = vmul.f32 0.7978846, %v18128_v54  ;;  %v18067_v8 = vadd.f32 %v19263_v37, %v18066_v10 }
0x4157   :  { %v18106_v58 = vmul.f32 0.044715, %v26916_v11  ;;  %v18135_v5 = vmul.f32 0.7978846, %v18127_v34  ;;  %v18098_v10 = vmul.f32 0.5, %v26916_v11 }
0x4158   :  { %22760 = vtanh.f32 %v18136_v55  ;;  %v18105_v22 = vmul.f32 0.044715, %v18067_v8  ;;  %v21336_v33 = vpop.f32.mrb[192].mxu0  ;;  %v18097_v34 = vmul.f32 0.5, %v18067_v8 }
0x4159   :  { %v18114_v29 = vmul.f32 %v18106_v58, %v26916_v11  ;;  %v26920_v26 = vadd.f32 %v21336_v33, %v19263_v37  ;;  %v18076_v60 = vpop.f32.mrb[193].mxu0  ;;  %22762 = vtanh.f32 %v18135_v5 }
0x415a   :  { %v18113_v25 = vmul.f32 %v18105_v22, %v18067_v8  ;;  %v18077_v0 = vadd.f32 %v19263_v37, %v18076_v60 }
0x415b   :  { %v18122_v43 = vmul.f32 %v18114_v29, %v26916_v11  ;;  %v18108_v30 = vmul.f32 0.044715, %v26920_v26 }
0x415c   :  { %v18121_v4 = vmul.f32 %v18113_v25, %v18067_v8  ;;  %v18107_v20 = vmul.f32 0.044715, %v18077_v0  ;;  %v21339_v28 = vpop.f32.mrb[194].mxu0  ;;  %v18099_v29 = vmul.f32 0.5, %v18077_v0  ;;  %v18100_v25 = vmul.f32 0.5, %v26920_v26 }
0x415d   :  { %v18130_v7 = vadd.f32 %v18122_v43, %v26916_v11  ;;  %v18116_v39 = vmul.f32 %v18108_v30, %v26920_v26  ;;  %v26926_v14 = vadd.f32 %v21339_v28, %v19263_v37  ;;  %v18086_v21 = vpop.f32.mrb[195].mxu0 }
0x415e   :  { %v18129_v36 = vadd.f32 %v18121_v4, %v18067_v8  ;;  %v18115_v38 = vmul.f32 %v18107_v20, %v18077_v0  ;;  %v18087_v50 = vadd.f32 %v19263_v37, %v18086_v21  ;;  %v19288_v21 = vld [vmem:[#allocation22 + $0x1] ss:$0 sm:$0xff] }
0x415f   :  { %v18124_v48 = vmul.f32 %v18116_v39, %v26920_v26  ;;  %v18110_v2 = vmul.f32 0.044715, %v26926_v14  ;;  %v18138_v24 = vmul.f32 0.7978846, %v18130_v7  ;;  %v18102_v7 = vmul.f32 0.5, %v26926_v14 }
0x4160   :  { %v18123_v61 = vmul.f32 %v18115_v38, %v18077_v0  ;;  %v18109_v63 = vmul.f32 0.044715, %v18087_v50  ;;  %v18137_v16 = vmul.f32 0.7978846, %v18129_v36  ;;  %v18101_v11 = vmul.f32 0.5, %v18087_v50 }
0x4161   :  { %v18132_v15 = vadd.f32 %v18124_v48, %v26920_v26  ;;  %v18118_v9 = vmul.f32 %v18110_v2, %v26926_v14  ;;  %22764 = vtanh.f32 %v18138_v24 }
0x4162   :  { %v22761_v13 = vpop.eup %22760  ;;  %v18131_v44 = vadd.f32 %v18123_v61, %v18077_v0  ;;  %v18117_v6 = vmul.f32 %v18109_v63, %v18087_v50  ;;  %22766 = vtanh.f32 %v18137_v16 }
0x4163   :  { %v22763_v27 = vpop.eup %22762  ;;  %v18152_v46 = vadd.f32 1.0, %v22761_v13  ;;  %v18126_v47 = vmul.f32 %v18118_v9, %v26926_v14  ;;  %v18140_v35 = vmul.f32 0.7978846, %v18132_v15 }
0x4164   :  { %v18125_v42 = vmul.f32 %v18117_v6, %v18087_v50  ;;  %v18151_v37 = vadd.f32 1.0, %v22763_v27  ;;  %v18139_v17 = vmul.f32 0.7978846, %v18131_v44 }
0x4165   :  { %v18134_v3 = vadd.f32 %v18126_v47, %v26926_v14  ;;  %22768 = vtanh.f32 %v18140_v35  ;;  %v18160_v1 = vmul.f32 %v18152_v46, %v18096_v41 }
0x4166   :  { %v18133_v57 = vadd.f32 %v18125_v42, %v18087_v50  ;;  %v18159_v59 = vmul.f32 %v18151_v37, %v18095_v18  ;;  %22770 = vtanh.f32 %v18139_v17 }
0x4167   :  { %v18142_v40 = vmul.f32 0.7978846, %v18134_v3 }
0x4168   :  { %21356 = vmatprep.mubr.msk.f32.mxu1 %vm9424_vm8, %v18159_v59  ;;  %v18141_v52 = vmul.f32 0.7978846, %v18133_v57 }
0x4169   :  { %21357 = vmatmul.mubr.msk.f32.vlgmr.msra.gmra.mrb[194].mxu1 %vm9424_vm8, %v18160_v1  ;;  %22772 = vtanh.f32 %v18142_v40 }
0x416a   :  { %22774 = vtanh.f32 %v18141_v52 }
0x416b   :  { %v22765_v54 = vpop.eup %22764 }
0x416c   :  { %v22767_v19 = vpop.eup %22766  ;;  %v18154_v12 = vadd.f32 1.0, %v22765_v54 }
0x416d   :  { %v18153_v32 = vadd.f32 1.0, %v22767_v19 }
0x416e   :  { %v18162_v22 = vmul.f32 %v18154_v12, %v18098_v10 }
0x416f   :  { %v22769_v55 = vpop.eup %22768  ;;  %v18161_v58 = vmul.f32 %v18153_v32, %v18097_v34 }
0x4170   :  { %v22771_v5 = vpop.eup %22770  ;;  %v18156_v33 = vadd.f32 1.0, %v22769_v55 }
0x4171   :  { %21359 = vmatprep.mubr.msk.f32.mxu1 %vm9424_vm8, %v18161_v58  ;;  %v18155_v60 = vadd.f32 1.0, %v22771_v5 }
0x4172   :  { %21360 = vmatmul.mubr.msk.f32.gmra.mrb[196].mxu1 %vm9424_vm8, %v18162_v22  ;;  %v18164_v8 = vmul.f32 %v18156_v33, %v18100_v25 }
0x4173   :  { %v22773_v43 = vpop.eup %22772  ;;  %v18163_v30 = vmul.f32 %v18155_v60, %v18099_v29 }
0x4174   :  { %v22775_v4 = vpop.eup %22774  ;;  %v18158_v20 = vadd.f32 1.0, %v22773_v43 }
0x4175   :  { %21362 = vmatprep.mubr.msk.f32.mxu1 %vm9424_vm8, %v18163_v30  ;;  %v18157_v28 = vadd.f32 1.0, %v22775_v4 }
0x4176   :  { %21363 = vmatmul.mubr.msk.f32.gmra.mrb[198].mxu1 %vm9424_vm8, %v18164_v8  ;;  %v18166_v0 = vmul.f32 %v18158_v20, %v18102_v7 }
0x4177   :  { %v18165_v39 = vmul.f32 %v18157_v28, %v18101_v11 }
0x4179   :  { %21365 = vmatprep.mubr.msk.f32.mxu1 %vm9424_vm8, %v18165_v39 }
0x417a   :  { %21366 = vmatmul.mubr.msk.f32.gmra.mrb[200].mxu1 %vm9424_vm8, %v18166_v0 }
0x423c   :  { %v21358_v26 = vpop.f32.mrb[194].mxu1 }
0x423d   :  { %v18306_v36 = vadd.f32 %v21358_v26, %v26801_v49  ;;  %v18266_v38 = vpop.f32.mrb[195].mxu1 }
0x423e   :  { %v18305_v48 = vadd.f32 %v18266_v38, %v26804_v62 }
0x423f   :  { %v18322_v2 = vadd.f32 %v19288_v21, %v18306_v36 }
0x4240   :  { %v18321_v50 = vadd.f32 %v19288_v21, %v18305_v48 }
0x4241   :  { %v18334_v24 = vsel %vm703_vm5, %v18322_v2, 0.0 }
0x4242   :  { %18335 = vadd.xlane.f32.xlu1 %v18334_v24  ;;  %v18331_v14 = vsel %vm703_vm5, %v18321_v50, 0.0 }
0x4243   :  { %18332 = vadd.xlane.f32.xlu0 %v18331_v14 }
0x4245   :  { %v21361_v61 = vpop.f32.mrb[196].mxu1 }
0x4246   :  { %v18308_v63 = vadd.f32 %v21361_v61, %v26811_v56  ;;  %v18276_v16 = vpop.f32.mrb[197].mxu1  ;;  %v18535_v61 = vld [vmem:[%s27119_s17] sm:$0xff] }
0x4247   :  { %v18307_v15 = vadd.f32 %v18276_v16, %v26816_v23  ;;  %v18537_v16 = vld [vmem:[%s27119_s17 + $0x10] sm:$0xff] }
0x4248   :  { %v18324_v9 = vadd.f32 %v19288_v21, %v18308_v63  ;;  %v18536_v63 = vld [vmem:[%s27119_s17 + $0x8] sm:$0xff] }
0x4249   :  { %v18323_v13 = vadd.f32 %v19288_v21, %v18307_v15  ;;  %v21364_v49 = vpop.f32.mrb[198].mxu1  ;;  %v21824_v15 = vpack.c.bf16 %v18536_v63, %v18535_v61 }
0x424a   :  { %v18310_v44 = vadd.f32 %v21364_v49, %v26819_v51  ;;  %v18286_v62 = vpop.f32.mrb[199].mxu1  ;;  %v18340_v6 = vsel %vm703_vm5, %v18324_v9, 0.0 }
0x424b   :  { %v18309_v27 = vadd.f32 %v18286_v62, %v26824_v53  ;;  %18341 = vadd.xlane.f32.xlu1 %v18340_v6  ;;  %v18337_v46 = vsel %vm703_vm5, %v18323_v13, 0.0  ;;  %21825 = vmatprep.subr.bf16.mxu0 %v21824_v15 }
0x424c   :  { %v18326_v47 = vadd.f32 %v19288_v21, %v18310_v44  ;;  %18338 = vadd.xlane.f32.xlu0 %v18337_v46  ;;  %21827 = vmatpush3.bf16.msra.mxu0 %v21824_v15 }
0x424d   :  { %v18325_v35 = vadd.f32 %v19288_v21, %v18309_v27  ;;  %v21367_v56 = vpop.f32.mrb[200].mxu1 }
0x424e   :  { %v18312_v42 = vadd.f32 %v21367_v56, %v26829_v45  ;;  %v18296_v23 = vpop.f32.mrb[201].mxu1  ;;  %v18346_v18 = vsel %vm703_vm5, %v18326_v47, 0.0 }
0x424f   :  { %v18311_v37 = vadd.f32 %v18296_v23, %v26834_v31  ;;  %18347 = vadd.xlane.f32.xlu1 %v18346_v18  ;;  %v18343_v51 = vsel %vm703_vm5, %v18325_v35, 0.0 }
0x4250   :  { %v18328_v17 = vadd.f32 %v19288_v21, %v18312_v42  ;;  %18344 = vadd.xlane.f32.xlu0 %v18343_v51 }
0x4251   :  { %v18327_v53 = vadd.f32 %v19288_v21, %v18311_v37 }
0x4252   :  { %v18352_v41 = vsel %vm703_vm5, %v18328_v17, 0.0 }
0x4253   :  { %18353 = vadd.xlane.f32.xlu1 %v18352_v41  ;;  %v18349_v3 = vsel %vm703_vm5, %v18327_v53, 0.0  ;;  %v19289_v41 = vld [vmem:[#allocation8] ss:$0 sm:$0xff] }
0x4254   :  { %18350 = vadd.xlane.f32.xlu0 %v18349_v3 }
0x42cf   :  { %v18336_v57 = vpop.xlane.xlu1 %18335 }
0x42d0   :  { %v18356_v59 = vmul.f32 0.03125, %v18336_v57  ;;  %v18333_v45 = vpop.xlane.xlu0 %18332 }
0x42d1   :  { %v18355_v1 = vmul.f32 0.03125, %v18333_v45 }
0x42d2   :  { %v26961_v40 = vsub.f32 %v18322_v2, %v18356_v59 }
0x42d3   :  { %v26963_v52 = vsub.f32 %v18321_v50, %v18355_v1  ;;  %v19290_v1 = vld [vmem:[#allocation10] ss:$0 sm:$0xff] }
0x42d4   :  { %v18372_v31 = vmul.f32 %v26961_v40, %v26961_v40 }
0x42d5   :  { %v18371_v54 = vmul.f32 %v26963_v52, %v26963_v52 }
0x42d6   :  { %v18382_v19 = vsel %vm703_vm5, %v18372_v31, 0.0 }
0x42d7   :  { %18383 = vadd.xlane.f32.xlu1 %v18382_v19  ;;  %v18379_v12 = vsel %vm703_vm5, %v18371_v54, 0.0 }
0x42d8   :  { %v18342_v34 = vpop.xlane.xlu1 %18341  ;;  %18380 = vadd.xlane.f32.xlu0 %v18379_v12 }
0x42d9   :  { %v18358_v32 = vmul.f32 0.03125, %v18342_v34  ;;  %v18339_v10 = vpop.xlane.xlu0 %18338 }
0x42da   :  { %v18357_v55 = vmul.f32 0.03125, %v18339_v10 }
0x42db   :  { %v26971_v58 = vsub.f32 %v18324_v9, %v18358_v32  ;;  %v18538_v9 = vld [vmem:[%s27119_s17 + $0x18] sm:$0xff] }
0x42dc   :  { %v26973_v5 = vsub.f32 %v18323_v13, %v18357_v55  ;;  %v18348_v22 = vpop.xlane.xlu1 %18347  ;;  %v21828_v13 = vpack.c.bf16 %v18538_v9, %v18537_v16 }
0x42dd   :  { %v18360_v33 = vmul.f32 0.03125, %v18348_v22  ;;  %v18345_v29 = vpop.xlane.xlu0 %18344  ;;  %v18374_v60 = vmul.f32 %v26971_v58, %v26971_v58 }
0x42de   :  { %v18359_v25 = vmul.f32 0.03125, %v18345_v29  ;;  %v18373_v43 = vmul.f32 %v26973_v5, %v26973_v5  ;;  %21829 = vmatprep.subr.bf16.mxu0 %v21828_v13 }
0x42df   :  { %v26979_v30 = vsub.f32 %v18326_v47, %v18360_v33  ;;  %v18388_v4 = vsel %vm703_vm5, %v18374_v60, 0.0  ;;  %21831 = vmatpush3.bf16.msra.mxu0 %v21828_v13 }
0x42e0   :  { %v26982_v8 = vsub.f32 %v18325_v35, %v18359_v25  ;;  %18389 = vadd.xlane.f32.xlu1 %v18388_v4  ;;  %v18354_v20 = vpop.xlane.xlu1 %18353  ;;  %v18385_v11 = vsel %vm703_vm5, %v18373_v43, 0.0 }
0x42e1   :  { %v18362_v28 = vmul.f32 0.03125, %v18354_v20  ;;  %18386 = vadd.xlane.f32.xlu0 %v18385_v11  ;;  %v18351_v7 = vpop.xlane.xlu0 %18350  ;;  %v18376_v39 = vmul.f32 %v26979_v30, %v26979_v30 }
0x42e2   :  { %v18361_v0 = vmul.f32 0.03125, %v18351_v7  ;;  %v18375_v26 = vmul.f32 %v26982_v8, %v26982_v8 }
0x42e3   :  { %v26989_v21 = vsub.f32 %v18328_v17, %v18362_v28  ;;  %v18394_v36 = vsel %vm703_vm5, %v18376_v39, 0.0 }
0x42e4   :  { %v26992_v38 = vsub.f32 %v18327_v53, %v18361_v0  ;;  %18395 = vadd.xlane.f32.xlu1 %v18394_v36  ;;  %v18391_v48 = vsel %vm703_vm5, %v18375_v26, 0.0 }
0x42e5   :  { %18392 = vadd.xlane.f32.xlu0 %v18391_v48  ;;  %v18378_v2 = vmul.f32 %v26989_v21, %v26989_v21 }
0x42e6   :  { %v18377_v50 = vmul.f32 %v26992_v38, %v26992_v38 }
0x42e7   :  { %v18400_v24 = vsel %vm703_vm5, %v18378_v2, 0.0 }
0x42e8   :  { %18401 = vadd.xlane.f32.xlu1 %v18400_v24  ;;  %v18397_v14 = vsel %vm703_vm5, %v18377_v50, 0.0 }
0x42e9   :  { %18398 = vadd.xlane.f32.xlu0 %v18397_v14 }
0x4364   :  { %v18384_v49 = vpop.xlane.xlu1 %18383 }
0x4365   :  { %v18404_v44 = vmul.f32 0.03125, %v18384_v49  ;;  %v18381_v62 = vpop.xlane.xlu0 %18380 }
0x4366   :  { %v18403_v6 = vmul.f32 0.03125, %v18381_v62 }
0x4367   :  { %v18412_v27 = vadd.f32 1e-05, %v18404_v44 }
0x4368   :  { %v18411_v46 = vadd.f32 1e-05, %v18403_v6 }
0x4369   :  { %22776 = vrsqrt.f32 %v18412_v27 }
0x436a   :  { %22778 = vrsqrt.f32 %v18411_v46 }
0x436d   :  { %v18390_v47 = vpop.xlane.xlu1 %18389 }
0x436e   :  { %v18406_v35 = vmul.f32 0.03125, %v18390_v47  ;;  %v18387_v56 = vpop.xlane.xlu0 %18386 }
0x436f   :  { %v18405_v42 = vmul.f32 0.03125, %v18387_v56 }
0x4370   :  { %v18414_v23 = vadd.f32 1e-05, %v18406_v35 }
0x4371   :  { %v18413_v18 = vadd.f32 1e-05, %v18405_v42  ;;  %v18396_v37 = vpop.xlane.xlu1 %18395 }
0x4372   :  { %22780 = vrsqrt.f32 %v18414_v23  ;;  %v18408_v51 = vmul.f32 0.03125, %v18396_v37  ;;  %v18393_v17 = vpop.xlane.xlu0 %18392 }
0x4373   :  { %v22777_v53 = vpop.eup %22776  ;;  %22782 = vrsqrt.f32 %v18413_v18  ;;  %v18407_v3 = vmul.f32 0.03125, %v18393_v17 }
0x4374   :  { %v22779_v57 = vpop.eup %22778  ;;  %v18428_v59 = vmul.f32 %v22777_v53, %v26961_v40  ;;  %v18416_v45 = vadd.f32 1e-05, %v18408_v51 }
0x4375   :  { %v18427_v31 = vmul.f32 %v22779_v57, %v26963_v52  ;;  %v18415_v54 = vadd.f32 1e-05, %v18407_v3  ;;  %v18402_v19 = vpop.xlane.xlu1 %18401 }
0x4376   :  { %v18442_v12 = vmul.f32 %v19289_v41, %v18428_v59  ;;  %22784 = vrsqrt.f32 %v18416_v45  ;;  %v18410_v34 = vmul.f32 0.03125, %v18402_v19  ;;  %v18399_v32 = vpop.xlane.xlu0 %18398 }
0x4377   :  { %v18441_v10 = vmul.f32 %v19289_v41, %v18427_v31  ;;  %22786 = vrsqrt.f32 %v18415_v54  ;;  %v18409_v55 = vmul.f32 0.03125, %v18399_v32 }
0x4378   :  { %v27007_v22 = vadd.f32 %v19290_v1, %v18442_v12  ;;  %v18418_v33 = vadd.f32 1e-05, %v18410_v34 }
0x4379   :  { %v27009_v29 = vadd.f32 %v19290_v1, %v18441_v10  ;;  %v18417_v60 = vadd.f32 1e-05, %v18409_v55 }
0x437a   :  { %v18472_v40 = vmul.f32 0.044715, %v27007_v22  ;;  %22788 = vrsqrt.f32 %v18418_v33 }
0x437b   :  { %22790 = vrsqrt.f32 %v18417_v60  ;;  %v18471_v52 = vmul.f32 0.044715, %v27009_v29  ;;  %v18463_v60 = vmul.f32 0.5, %v27009_v29 }
0x437c   :  { %v22781_v25 = vpop.eup %22780  ;;  %v18480_v43 = vmul.f32 %v18472_v40, %v27007_v22 }
0x437d   :  { %v22783_v4 = vpop.eup %22782  ;;  %v18430_v20 = vmul.f32 %v22781_v25, %v26971_v58  ;;  %v18479_v11 = vmul.f32 %v18471_v52, %v27009_v29 }
0x437e   :  { %v18429_v28 = vmul.f32 %v22783_v4, %v26973_v5  ;;  %v18488_v7 = vmul.f32 %v18480_v43, %v27007_v22  ;;  %v18464_v43 = vmul.f32 0.5, %v27007_v22 }
0x437f   :  { %v18444_v39 = vmul.f32 %v19289_v41, %v18430_v20  ;;  %v18487_v0 = vmul.f32 %v18479_v11, %v27009_v29 }
0x4380   :  { %v22785_v26 = vpop.eup %22784  ;;  %v18443_v36 = vmul.f32 %v19289_v41, %v18429_v28  ;;  %v18496_v48 = vadd.f32 %v18488_v7, %v27007_v22 }
0x4381   :  { %v22787_v2 = vpop.eup %22786  ;;  %v27020_v50 = vadd.f32 %v19290_v1, %v18444_v39  ;;  %v18432_v24 = vmul.f32 %v22785_v26, %v26979_v30  ;;  %v18495_v58 = vadd.f32 %v18487_v0, %v27009_v29 }
0x4382   :  { %v27024_v14 = vadd.f32 %v19290_v1, %v18443_v36  ;;  %v18431_v5 = vmul.f32 %v22787_v2, %v26982_v8  ;;  %v18504_v61 = vmul.f32 0.7978846, %v18496_v48 }
0x4383   :  { %v18446_v63 = vmul.f32 %v19289_v41, %v18432_v24  ;;  %v18503_v16 = vmul.f32 0.7978846, %v18495_v58  ;;  %v18474_v15 = vmul.f32 0.044715, %v27020_v50  ;;  %v18466_v48 = vmul.f32 0.5, %v27020_v50 }
0x4384   :  { %v22789_v9 = vpop.eup %22788  ;;  %v18445_v13 = vmul.f32 %v19289_v41, %v18431_v5  ;;  %22792 = vtanh.f32 %v18504_v61  ;;  %v18473_v49 = vmul.f32 0.044715, %v27024_v14  ;;  %v18465_v22 = vmul.f32 0.5, %v27024_v14 }
0x4385   :  { %v22791_v44 = vpop.eup %22790  ;;  %v27029_v62 = vadd.f32 %v19290_v1, %v18446_v63  ;;  %v18434_v30 = vmul.f32 %v22789_v9, %v26989_v21  ;;  %22794 = vtanh.f32 %v18503_v16  ;;  %v18482_v6 = vmul.f32 %v18474_v15, %v27020_v50 }
0x4386   :  { %v18459_v27 = vadd.f32 %v19290_v1, %v18445_v13  ;;  %v18433_v8 = vmul.f32 %v22791_v44, %v26992_v38  ;;  %v18481_v46 = vmul.f32 %v18473_v49, %v27024_v14 }
0x4387   :  { %v18448_v47 = vmul.f32 %v19289_v41, %v18434_v30  ;;  %v18490_v35 = vmul.f32 %v18482_v6, %v27020_v50  ;;  %v18476_v56 = vmul.f32 0.044715, %v27029_v62  ;;  %v18468_v15 = vmul.f32 0.5, %v27029_v62 }
0x4388   :  { %v18447_v42 = vmul.f32 %v19289_v41, %v18433_v8  ;;  %v18489_v23 = vmul.f32 %v18481_v46, %v27024_v14  ;;  %v18475_v18 = vmul.f32 0.044715, %v18459_v27  ;;  %v18467_v63 = vmul.f32 0.5, %v18459_v27 }
0x4389   :  { %v27038_v37 = vadd.f32 %v19290_v1, %v18448_v47  ;;  %v18498_v21 = vadd.f32 %v18490_v35, %v27020_v50  ;;  %v18484_v51 = vmul.f32 %v18476_v56, %v27029_v62 }
0x438a   :  { %v18461_v17 = vadd.f32 %v19290_v1, %v18447_v42  ;;  %v18497_v38 = vadd.f32 %v18489_v23, %v27024_v14  ;;  %v18483_v53 = vmul.f32 %v18475_v18, %v18459_v27 }
0x438b   :  { %v18506_v3 = vmul.f32 0.7978846, %v18498_v21  ;;  %v18492_v57 = vmul.f32 %v18484_v51, %v27029_v62  ;;  %v18478_v59 = vmul.f32 0.044715, %v27038_v37  ;;  %v18470_v6 = vmul.f32 0.5, %v27038_v37 }
0x438c   :  { %v18505_v45 = vmul.f32 0.7978846, %v18497_v38  ;;  %v18491_v41 = vmul.f32 %v18483_v53, %v18459_v27  ;;  %v18477_v31 = vmul.f32 0.044715, %v18461_v17  ;;  %v18469_v50 = vmul.f32 0.5, %v18461_v17 }
0x438d   :  { %22796 = vtanh.f32 %v18506_v3  ;;  %v18500_v54 = vadd.f32 %v18492_v57, %v27029_v62  ;;  %v18486_v19 = vmul.f32 %v18478_v59, %v27038_v37  ;;  %v19291_v62 = vld [vmem:[%s27120_s22] ss:$0 sm:$0xff] }
0x438e   :  { %v22793_v12 = vpop.eup %22792  ;;  %22798 = vtanh.f32 %v18505_v45  ;;  %v18499_v34 = vadd.f32 %v18491_v41, %v18459_v27  ;;  %v18485_v1 = vmul.f32 %v18477_v31, %v18461_v17 }
0x438f   :  { %v22795_v32 = vpop.eup %22794  ;;  %v18520_v10 = vadd.f32 1.0, %v22793_v12  ;;  %v18508_v55 = vmul.f32 0.7978846, %v18500_v54  ;;  %v18494_v33 = vmul.f32 %v18486_v19, %v27038_v37 }
0x4390   :  { %v18519_v40 = vadd.f32 1.0, %v22795_v32  ;;  %v18507_v52 = vmul.f32 0.7978846, %v18499_v34  ;;  %v18493_v25 = vmul.f32 %v18485_v1, %v18461_v17 }
0x4391   :  { %22800 = vtanh.f32 %v18508_v55  ;;  %v18502_v4 = vadd.f32 %v18494_v33, %v27038_v37  ;;  %v18528_v28 = vmul.f32 %v18520_v10, %v18464_v43 }
0x4392   :  { %v18527_v20 = vmul.f32 %v18519_v40, %v18463_v60  ;;  %22802 = vtanh.f32 %v18507_v52  ;;  %v18501_v11 = vadd.f32 %v18493_v25, %v18461_v17 }
0x4393   :  { %v18510_v7 = vmul.f32 0.7978846, %v18502_v4 }
0x4394   :  { %21376 = vmatprep.mubr.msk.f32.mxu0 %vm703_vm5, %v18527_v20  ;;  %v18509_v39 = vmul.f32 0.7978846, %v18501_v11 }
0x4395   :  { %21377 = vmatmul.mubr.msk.f32.vlgmr.msra.gmra.mrb[196].mxu0 %vm703_vm5, %v18528_v28  ;;  %22804 = vtanh.f32 %v18510_v7 }
0x4396   :  { %22806 = vtanh.f32 %v18509_v39 }
0x4397   :  { %v22797_v29 = vpop.eup %22796 }
0x4398   :  { %v22799_v0 = vpop.eup %22798  ;;  %v18522_v26 = vadd.f32 1.0, %v22797_v29 }
0x4399   :  { %v18521_v36 = vadd.f32 1.0, %v22799_v0 }
0x439a   :  { %v18530_v5 = vmul.f32 %v18522_v26, %v18466_v48 }
0x439b   :  { %v22801_v2 = vpop.eup %22800  ;;  %v18529_v24 = vmul.f32 %v18521_v36, %v18465_v22 }
0x439c   :  { %v22803_v58 = vpop.eup %22802  ;;  %v18524_v61 = vadd.f32 1.0, %v22801_v2 }
0x439d   :  { %21379 = vmatprep.mubr.msk.f32.mxu0 %vm703_vm5, %v18529_v24  ;;  %v18523_v16 = vadd.f32 1.0, %v22803_v58 }
0x439e   :  { %21380 = vmatmul.mubr.msk.f32.gmra.mrb[198].mxu0 %vm703_vm5, %v18530_v5  ;;  %v18532_v49 = vmul.f32 %v18524_v61, %v18468_v15 }
0x439f   :  { %v22805_v9 = vpop.eup %22804  ;;  %v18531_v13 = vmul.f32 %v18523_v16, %v18467_v63 }
0x43a0   :  { %v22807_v14 = vpop.eup %22806  ;;  %v18526_v44 = vadd.f32 1.0, %v22805_v9 }
0x43a1   :  { %21382 = vmatprep.mubr.msk.f32.mxu0 %vm703_vm5, %v18531_v13  ;;  %v18525_v30 = vadd.f32 1.0, %v22807_v14 }
0x43a2   :  { %21383 = vmatmul.mubr.msk.f32.gmra.mrb[200].mxu0 %vm703_vm5, %v18532_v49  ;;  %v18534_v8 = vmul.f32 %v18526_v44, %v18470_v6 }
0x43a3   :  { %v18533_v27 = vmul.f32 %v18525_v30, %v18469_v50 }
0x43a5   :  { %21385 = vmatprep.mubr.msk.f32.mxu0 %vm703_vm5, %v18533_v27 }
0x43a6   :  { %21386 = vmatmul.mubr.msk.f32.gmra.mrb[202].mxu0 %vm703_vm5, %v18534_v8 }
0x4468   :  { %v21378_v46 = vpop.f32.mrb[196].mxu0 }
0x4469   :  { %v18642_v47 = vadd.f32 %v21378_v46, %v19291_v62  ;;  %v18636_v35 = vpop.f32.mrb[197].mxu0 }
0x446a   :  { %v18637_v56 = vadd.f32 %v19291_v62, %v18636_v35 }
0x446b   :  { %18676 = vst.msk [vmem:[#allocation23 + $0x8] sm:$0xff] %vm6208_vm6, %v18642_v47 }
0x446c   :  { %18675 = vst.msk [vmem:[#allocation23] sm:$0xff] %vm6208_vm6, %v18637_v56 }
0x4471   :  { %v21381_v42 = vpop.f32.mrb[198].mxu0 }
0x4472   :  { %v18652_v23 = vadd.f32 %v21381_v42, %v19291_v62  ;;  %v18646_v18 = vpop.f32.mrb[199].mxu0 }
0x4473   :  { %v18647_v21 = vadd.f32 %v19291_v62, %v18646_v18 }
0x4474   :  { %18678 = vst.msk [vmem:[#allocation23 + $0x18] sm:$0xff] %vm6208_vm6, %v18652_v23 }
0x4475   :  { %18677 = vst.msk [vmem:[#allocation23 + $0x10] sm:$0xff] %vm6208_vm6, %v18647_v21  ;;  %v21384_v37 = vpop.f32.mrb[200].mxu0 }
0x4476   :  { %v18662_v51 = vadd.f32 %v21384_v37, %v19291_v62  ;;  %v18656_v17 = vpop.f32.mrb[201].mxu0 }
0x4477   :  { %v18657_v38 = vadd.f32 %v19291_v62, %v18656_v17 }
0x4478   :  { %18680 = vst.msk [vmem:[#allocation23 + $0x28] sm:$0xff] %vm6208_vm6, %v18662_v51 }
0x4479   :  { %18679 = vst.msk [vmem:[#allocation23 + $0x20] sm:$0xff] %vm6208_vm6, %v18657_v38  ;;  %v21387_v53 = vpop.f32.mrb[202].mxu0 }
0x447a   :  { %v18672_v3 = vadd.f32 %v21387_v53, %v19291_v62  ;;  %v18666_v57 = vpop.f32.mrb[203].mxu0 }
0x447b   :  { %v18667_v59 = vadd.f32 %v19291_v62, %v18666_v57 }
0x447c   :  { %18682 = vst.msk [vmem:[#allocation23 + $0x38] sm:$0xff] %vm6208_vm6, %v18672_v3 }
0x447d   :  { %18681 = vst.msk [vmem:[#allocation23 + $0x30] sm:$0xff] %vm6208_vm6, %v18667_v59 }
0x447e   :  { %23117 = shalt.err (!%p23114_p10)
}
0x447f   :  { %s23118_s5 = scalar_lea.hbm %s23370_s27, 1024 }
0x4480   :  { %p23119_p11 = scmp.ne.s32.totalorder %s23370_s27, %s23118_s5  ;;  %p23122_p12 = scmp.lt.u32.totalorder %s23118_s5, %s23370_s27 }
0x4482   :  { %p23124_p13 = pnand %p23122_p12, %p23119_p11 }
0x4484   :  { %23127 = shalt.err (!%p23124_p13)
}
0x4485   :  { %s23206_s6 = smov 128  }
0x4486   :  { %18694 = dma.vmem_to_hbm [thread:$0]  %s18689_s12, 1024, %s23370_s27, [#allocation4], %s23206_s6, %s23206_s6, %s23203_s16  }
0x4487   :  { %23142 = dma.done.wait [#allocation4], 1024  }
0x4488   :  { %23143 = vsyncadd [#allocation4], 4294966272 }
0x4489   :  { %18698 = vsyncpa [#allocation3], 1 }
0x448a   :  { %18699 = vsyncpa [#allocation6], 1 }
0x448b   :  { %18700 = vsyncpa [#allocation9], 1 }
0x448c   :  { %18701 = vsyncpa [#allocation12], 1 }
0x448d   :  { %18702 = vsyncpa [#allocation15], 1 }
0x448e   :  { %18703 = vsyncpa [#allocation18], 1 }
0x448f   :  { %18704 = vsyncpa [#allocation21], 1 }
0x4490   :  { %18705 = vsyncpa [#allocation4], 1 }

</bundles_post_ra>
